<compile_context>
chip_gen: v7x
topology: tpu7x:2x2x1
jax: 0.10.0
libtpu: 0.0.40
codegen_flags: <defaults>
</compile_context>

<pallas_src>
import functools

import jax
import jax.numpy as jnp
from jax.experimental import pallas as pl
from jax.experimental.pallas import tpu as pltpu


# -----------------------------------------------------------------------------
# Small helpers
# -----------------------------------------------------------------------------
def _round_up(x, m):
    return (x + m - 1) // m * m


def _cdiv(a, b):
    return -(-a // b)


def _choose_m_tiling(m, max_tm=256):
    tm = min(max_tm, _round_up(m, 8))          # sublane-aligned (mult of 8)
    mp = _round_up(m, tm)
    return mp, tm, mp // tm


def _choose_k_tiling(k, max_tk=1024):
    kp = _round_up(k, 128)                     # lane-aligned
    n_k = _cdiv(kp, max_tk)
    tk = _round_up(_cdiv(kp, n_k), 128)
    kp = tk * n_k
    return kp, tk, n_k


def _lrn_transform(x, local_size, alpha, beta):
    # x: (rows, C) f32.  Across-channel LRN with AvgPool3d
    # count_include_pad=True semantics (divisor is always local_size and the
    # channel edges are zero-padded).
    _, c = x.shape
    half = (local_size - 1) // 2
    x2 = x * x
    # Banded 0/1 matrix on the MXU: win[:, j] = sum_{|d|<=half} x2[:, j+d].
    ci = jax.lax.broadcasted_iota(jnp.int32, (c, c), 0)
    cj = jax.lax.broadcasted_iota(jnp.int32, (c, c), 1)
    band = (jnp.abs(ci - cj) <= half).astype(jnp.float32)
    win = jnp.dot(x2, band, preferred_element_type=jnp.float32)
    base = win * (alpha / local_size) + 1.0
    if beta == 0.75:
        r = jax.lax.rsqrt(base)                # base ** -0.5
        inv = r * jnp.sqrt(r)                  # base ** -0.75 (no exp/log)
    else:
        inv = jnp.exp(-beta * jnp.log(base))
    return x * inv


# -----------------------------------------------------------------------------
# Pallas kernels
# -----------------------------------------------------------------------------
def _gemm_bias_relu_kernel(a_ref, w_ref, b_ref, o_ref, acc_ref, *,
                           fuse_lrn, lrn_size, lrn_alpha, lrn_beta):
    # a: (1, tm, tk) bf16, w: (1, tk, Np) bf16, b: (1, 1, Np) f32
    # o: (1, tm, Np) f32, acc scratch: (tm, Np) f32.
    # grid = (groups, m_tiles, k_tiles); K is the innermost (reduction) axis.
    @pl.when(pl.program_id(2) == 0)
    def _init():
        acc_ref[...] = jnp.zeros_like(acc_ref)

    acc_ref[...] += jnp.dot(a_ref[0], w_ref[0],
                            preferred_element_type=jnp.float32)

    @pl.when(pl.program_id(2) == pl.num_programs(2) - 1)
    def _finalize():
        y = jnp.maximum(acc_ref[...] + b_ref[0], 0.0)
        if fuse_lrn:
            y = _lrn_transform(y, lrn_size, lrn_alpha, lrn_beta)
        o_ref[0] = y.astype(o_ref.dtype)


def _lrn_kernel(x_ref, o_ref, *, local_size, alpha, beta):
    # x/o: (tm, C) f32 tiles; channel dim is fully resident per tile.
    o_ref[...] = _lrn_transform(x_ref[...], local_size, alpha, beta
                                ).astype(o_ref.dtype)


def _maxpool_3x3_s2_kernel(x_ref, o_ref, *, OH, OW):
    # x: (1, H, W, C), o: (1, OH, OW, C).  One batch element per grid step;
    # the activation is read once from HBM, all 3x3 taps come from VMEM.
    for oh in range(OH):
        row = jnp.maximum(
            jnp.maximum(x_ref[0, 2 * oh, :, :], x_ref[0, 2 * oh + 1, :, :]),
            x_ref[0, 2 * oh + 2, :, :])                        # (W, C)
        cols = [jnp.max(row[2 * ow:2 * ow + 3, :], axis=0, keepdims=True)
                for ow in range(OW)]                           # OW x (1, C)
        o_ref[0, oh, :, :] = jnp.concatenate(cols, axis=0)     # (OW, C)


# -----------------------------------------------------------------------------
# Wrappers around pallas_call
# -----------------------------------------------------------------------------
def im2col(x_nhwc, kh, kw, stride, padding):
    # (N, H, W, C) -> (N*OH*OW, kh*kw*C), patch index order (i, j, c) matching
    # PyTorch weights (Cout, Cin, KH, KW) transposed to (KH, KW, Cin, Cout).
    n, _, _, c = x_nhwc.shape
    if padding:
        x_nhwc = jnp.pad(
            x_nhwc, ((0, 0), (padding, padding), (padding, padding), (0, 0)))
    hp, wp = x_nhwc.shape[1], x_nhwc.shape[2]
    oh = (hp - kh) // stride + 1
    ow = (wp - kw) // stride + 1
    cols = []
    for i in range(kh):
        for j in range(kw):
            cols.append(
                x_nhwc[:, i:i + stride * (oh - 1) + 1:stride,
                          j:j + stride * (ow - 1) + 1:stride, :])
    patches = jnp.stack(cols, axis=3)          # (N, OH, OW, kh*kw, C)
    return patches.reshape(n * oh * ow, kh * kw * c), oh, ow


def conv2d_relu(x_nhwc, w_oihw, b, *, stride=1, padding=0, groups=1,
                fuse_lrn=False, lrn_size=5, lrn_alpha=1e-4, lrn_beta=0.75,
                max_tm=256, max_tk=1024):
    """Grouped conv as im2col + a single tiled Pallas GEMM (bias/ReLU/LRN fused)."""
    assert not (fuse_lrn and groups != 1), "LRN window crosses group boundary"
    cout, cin_g, kh, kw = w_oihw.shape
    cout_g = cout // groups
    ngp = _round_up(cout_g, 128)               # lane-dense output width

    patches_list, w_list, b_list = [], [], []
    oh = ow = None
    for g in range(groups):
        xg = x_nhwc[..., g * cin_g:(g + 1) * cin_g]
        pg, oh, ow = im2col(xg, kh, kw, stride, padding)
        patches_list.append(pg)
        wg = jnp.transpose(w_oihw[g * cout_g:(g + 1) * cout_g],
                           (2, 3, 1, 0)).reshape(kh * kw * cin_g, cout_g)
        w_list.append(wg)
        b_list.append(b[g * cout_g:(g + 1) * cout_g])

    m, kg = patches_list[0].shape
    kp, tk, n_k = _choose_k_tiling(kg, max_tk)
    mp, tm, n_m = _choose_m_tiling(m, max_tm)

    # Zero padding is numerically inert: padded K rows have zero weights,
    # padded output channels get zero weight + zero bias (-> 0 after ReLU/LRN),
    # padded M rows are sliced off below.
    a = jnp.stack([jnp.pad(p, ((0, mp - m), (0, kp - kg)))
                   for p in patches_list], axis=0).astype(jnp.bfloat16)
    w = jnp.stack([jnp.pad(wg, ((0, kp - kg), (0, ngp - cout_g)))
                   for wg in w_list], axis=0).astype(jnp.bfloat16)
    bias = jnp.stack([jnp.pad(bg, (0, ngp - cout_g)).reshape(1, ngp)
                      for bg in b_list], axis=0).astype(jnp.float32)

    kernel = functools.partial(
        _gemm_bias_relu_kernel, fuse_lrn=fuse_lrn, lrn_size=lrn_size,
        lrn_alpha=lrn_alpha, lrn_beta=lrn_beta)

    out = pl.pallas_call(
        kernel,
        out_shape=jax.ShapeDtypeStruct((groups, mp, ngp), jnp.float32),
        grid=(groups, n_m, n_k),
        in_specs=[
            pl.BlockSpec((1, tm, tk), lambda g, i, k: (g, i, k)),
            pl.BlockSpec((1, tk, ngp), lambda g, i, k: (g, k, 0)),
            pl.BlockSpec((1, 1, ngp), lambda g, i, k: (g, 0, 0)),
        ],
        out_specs=pl.BlockSpec((1, tm, ngp), lambda g, i, k: (g, i, 0)),
        scratch_shapes=[pltpu.VMEM((tm, ngp), jnp.float32)],
        compiler_params=pltpu.CompilerParams(
            dimension_semantics=("parallel", "parallel", "arbitrary")),
    )(a, w, bias)

    if groups == 1:
        y = out[0, :m, :cout_g]
    else:
        y = jnp.concatenate([out[g, :m, :cout_g] for g in range(groups)],
                            axis=1)
    return y, oh, ow


def lrn(y_flat, local_size=5, alpha=1e-4, beta=0.75, max_tm=512):
    m, c = y_flat.shape
    mp, tm, n_m = _choose_m_tiling(m, max_tm)
    xp = jnp.pad(y_flat, ((0, mp - m), (0, 0))) if mp != m else y_flat
    out = pl.pallas_call(
        functools.partial(_lrn_kernel, local_size=local_size, alpha=alpha,
                          beta=beta),
        out_shape=jax.ShapeDtypeStruct((mp, c), jnp.float32),
        grid=(n_m,),
        in_specs=[pl.BlockSpec((tm, c), lambda i: (i, 0))],
        out_specs=pl.BlockSpec((tm, c), lambda i: (i, 0)),
        compiler_params=pltpu.CompilerParams(
            dimension_semantics=("parallel",)),
    )(xp)
    return out[:m]


def maxpool_3x3_s2(x_nhwc):
    n, h, w, c = x_nhwc.shape
    oh = (h - 3) // 2 + 1
    ow = (w - 3) // 2 + 1
    return pl.pallas_call(
        functools.partial(_maxpool_3x3_s2_kernel, OH=oh, OW=ow),
        out_shape=jax.ShapeDtypeStruct((n, oh, ow, c), x_nhwc.dtype),
        grid=(n,),
        in_specs=[pl.BlockSpec((1, h, w, c), lambda i: (i, 0, 0, 0))],
        out_specs=pl.BlockSpec((1, oh, ow, c), lambda i: (i, 0, 0, 0)),
        compiler_params=pltpu.CompilerParams(
            dimension_semantics=("parallel",)),
    )(x_nhwc)


# -----------------------------------------------------------------------------
# AlexNet features
# -----------------------------------------------------------------------------
def init_params(key):
    shapes = {
        "w1": (96, 3, 11, 11),
        "w2": (256, 48, 5, 5),    # groups=2
        "w3": (384, 256, 3, 3),
        "w4": (384, 192, 3, 3),   # groups=2
        "w5": (256, 192, 3, 3),   # groups=2
    }
    params = {}
    keys = jax.random.split(key, 2 * len(shapes))
    for idx, (name, shape) in enumerate(shapes.items()):
        wk, bk = keys[2 * idx], keys[2 * idx + 1]
        params[name] = jax.random.normal(wk, shape, jnp.float32) * 0.02
        params["b" + name[1:]] = (
            jax.random.normal(bk, (shape[0],), jnp.float32) * 0.01)
    return params


def alexnet_forward(x_nchw, params):
    x = jnp.transpose(x_nchw, (0, 2, 3, 1)).astype(jnp.float32)  # -> NHWC
    n = x.shape[0]

    # conv1 (11x11 s4) + ReLU + LRN (fused into the GEMM epilogue) + maxpool
    y, oh, ow = conv2d_relu(x, params["w1"], params["b1"], stride=4, padding=0,
                            fuse_lrn=True)
    y = maxpool_3x3_s2(y.reshape(n, oh, ow, -1))

    # conv2 (5x5 p2, groups=2) + ReLU, LRN, maxpool
    y, oh, ow = conv2d_relu(y, params["w2"], params["b2"], stride=1, padding=2,
                            groups=2)
    y = lrn(y, local_size=5, alpha=1e-4, beta=0.75)
    y = maxpool_3x3_s2(y.reshape(n, oh, ow, -1))

    # conv3 (3x3 p1) + ReLU
    y, oh, ow = conv2d_relu(y, params["w3"], params["b3"], stride=1, padding=1)
    y = y.reshape(n, oh, ow, -1)

    # conv4 (3x3 p1, groups=2) + ReLU
    y, oh, ow = conv2d_relu(y, params["w4"], params["b4"], stride=1, padding=1,
                            groups=2)
    y = y.reshape(n, oh, ow, -1)

    # conv5 (3x3 p1, groups=2) + ReLU + maxpool
    y, oh, ow = conv2d_relu(y, params["w5"], params["b5"], stride=1, padding=1,
                            groups=2)
    y = maxpool_3x3_s2(y.reshape(n, oh, ow, -1))

    return jnp.transpose(y, (0, 3, 1, 2))  # -> NCHW


if __name__ == "__main__":
    key = jax.random.PRNGKey(0)
    pkey, xkey = jax.random.split(key)
    params = init_params(pkey)

    # Smallest spatial size for which all AlexNet stages stay valid:
    # 67 -> conv1: 15 -> pool: 7 -> conv2: 7 -> pool: 3 -> conv3-5: 3 -> pool: 1
    x = jax.random.normal(xkey, (2, 3, 67, 67), jnp.float32)

    out = jax.jit(lambda inp: alexnet_forward(inp, params))(x)
    jax.block_until_ready(out)
    assert out.shape == (2, 256, 1, 1), out.shape
    assert out.dtype == jnp.float32
    print("KERNEL_OK")
</pallas_src>

<mosaic_0001>
module attributes {stable_mosaic.version = 11 : i64} {
  func.func @_gemm_bias_relu_kernel(%arg0: i32, %arg1: i32, %arg2: i32, %arg3: memref<1x256x384xbf16, #tpu.memory_space<vmem>>, %arg4: memref<1x384x128xbf16, #tpu.memory_space<vmem>>, %arg5: memref<1x1x128xf32, #tpu.memory_space<vmem>>, %arg6: memref<1x256x128xf32, #tpu.memory_space<vmem>>, %arg7: memref<256x128xf32, #tpu.memory_space<vmem>>) attributes {dimension_semantics = [#tpu.dimension_semantics<parallel>, #tpu.dimension_semantics<parallel>, #tpu.dimension_semantics<arbitrary>], iteration_bounds = array<i64: 1, 2, 1>, scalar_prefetch = 0 : i64, scratch_operands = 1 : i64, tpu.core_type = #tpu.core_type<tc>, window_params = [{transform_indices = @transform_0, window_bounds = array<i64: 1, 256, 384>}, {transform_indices = @transform_1, window_bounds = array<i64: 1, 384, 128>}, {transform_indices = @transform_2, window_bounds = array<i64: 1, 1, 128>}, {transform_indices = @transform_3, window_bounds = array<i64: 1, 256, 128>}]} {
    %c0_i32 = arith.constant 0 : i32
    %0 = arith.cmpi eq, %arg2, %c0_i32 : i32
    %1 = arith.extui %0 : i1 to i32
    %c0_i32_0 = arith.constant 0 : i32
    %2 = arith.cmpi ne, %1, %c0_i32_0 : i32
    scf.if %2 {
      %cst_12 = arith.constant 0.000000e+00 : f32
      %14 = vector.broadcast %cst_12 : f32 to vector<256x128xf32>
      %c0_13 = arith.constant 0 : index
      %c0_14 = arith.constant 0 : index
      %15 = vector.load %arg7[%c0_13, %c0_14] : memref<256x128xf32, #tpu.memory_space<vmem>>, vector<256x128xf32>
      tpu.vector_store %arg7[%c0_13, %c0_14], %14 {strides = array<i32>} : memref<256x128xf32, #tpu.memory_space<vmem>>, vector<256x128xf32>,
    } else {
    }
    %c0 = arith.constant 0 : index
    %c0_1 = arith.constant 0 : index
    %3 = vector.load %arg7[%c0, %c0_1] : memref<256x128xf32, #tpu.memory_space<vmem>>, vector<256x128xf32>
    %c0_2 = arith.constant 0 : index
    %c0_3 = arith.constant 0 : index
    %c0_4 = arith.constant 0 : index
    %4 = vector.load %arg3[%c0_2, %c0_3, %c0_4] : memref<1x256x384xbf16, #tpu.memory_space<vmem>>, vector<1x256x384xbf16>
    %5 = vector.shape_cast %4 : vector<1x256x384xbf16> to vector<256x384xbf16>
    %c0_5 = arith.constant 0 : index
    %c0_6 = arith.constant 0 : index
    %c0_7 = arith.constant 0 : index
    %6 = vector.load %arg4[%c0_5, %c0_6, %c0_7] : memref<1x384x128xbf16, #tpu.memory_space<vmem>>, vector<1x384x128xbf16>
    %7 = vector.shape_cast %6 : vector<1x384x128xbf16> to vector<384x128xbf16>
    %cst = arith.constant dense<0.000000e+00> : vector<256x128xf32>
    %8 = tpu.matmul %5, %7, %cst {dimension_numbers = #tpu.dot_dimension_numbers<[1], [0], [0], [1], [0, 0, 1, 1], [], []>} : vector<256x384xbf16>, vector<384x128xbf16>, vector<256x128xf32> -> vector<256x128xf32>
    %9 = arith.addf %3, %8 : vector<256x128xf32>
    %c0_8 = arith.constant 0 : index
    %c0_9 = arith.constant 0 : index
    %10 = vector.load %arg7[%c0_8, %c0_9] : memref<256x128xf32, #tpu.memory_space<vmem>>, vector<256x128xf32>
    tpu.vector_store %arg7[%c0_8, %c0_9], %9 {strides = array<i32>} : memref<256x128xf32, #tpu.memory_space<vmem>>, vector<256x128xf32>,
    %c0_i32_10 = arith.constant 0 : i32
    %11 = arith.cmpi eq, %arg2, %c0_i32_10 : i32
    %12 = arith.extui %11 : i1 to i32
    %c0_i32_11 = arith.constant 0 : i32
    %13 = arith.cmpi ne, %12, %c0_i32_11 : i32
    scf.if %13 {
      %c0_12 = arith.constant 0 : index
      %c0_13 = arith.constant 0 : index
      %14 = vector.load %arg7[%c0_12, %c0_13] : memref<256x128xf32, #tpu.memory_space<vmem>>, vector<256x128xf32>
      %c0_14 = arith.constant 0 : index
      %c0_15 = arith.constant 0 : index
      %c0_16 = arith.constant 0 : index
      %15 = vector.load %arg5[%c0_14, %c0_15, %c0_16] : memref<1x1x128xf32, #tpu.memory_space<vmem>>, vector<1x1x128xf32>
      %16 = vector.shape_cast %15 : vector<1x1x128xf32> to vector<1x128xf32>
      %17 = vector.broadcast %16 : vector<1x128xf32> to vector<256x128xf32>
      %18 = arith.addf %14, %17 : vector<256x128xf32>
      %cst_17 = arith.constant 0.000000e+00 : f32
      %19 = vector.broadcast %cst_17 : f32 to vector<256x128xf32>
      %20 = arith.maximumf %18, %19 : vector<256x128xf32>
      %21 = arith.mulf %20, %20 : vector<256x128xf32>
      %22 = tpu.iota {dimensions = array<i32: 0>} : vector<128x128xi32>
      %23 = tpu.iota {dimensions = array<i32: 1>} : vector<128x128xi32>
      %24 = arith.subi %22, %23 : vector<128x128xi32>
      %25 = math.absi %24 : vector<128x128xi32>
      %c2_i32 = arith.constant 2 : i32
      %26 = vector.broadcast %c2_i32 : i32 to vector<128x128xi32>
      %27 = arith.cmpi sle, %25, %26 : vector<128x128xi32>
      %28 = arith.extui %27 : vector<128x128xi1> to vector<128x128xi32>
      %29 = arith.sitofp %28 : vector<128x128xi32> to vector<128x128xf32>
      %cst_18 = arith.constant dense<0.000000e+00> : vector<256x128xf32>
      %30 = tpu.matmul %21, %29, %cst_18 {dimension_numbers = #tpu.dot_dimension_numbers<[1], [0], [0], [1], [0, 0, 1, 1], [], []>} : vector<256x128xf32>, vector<128x128xf32>, vector<256x128xf32> -> vector<256x128xf32>
      %cst_19 = arith.constant 2.000000e-05 : f32
      %31 = vector.broadcast %cst_19 : f32 to vector<256x128xf32>
      %32 = arith.mulf %30, %31 : vector<256x128xf32>
      %cst_20 = arith.constant 1.000000e+00 : f32
      %33 = vector.broadcast %cst_20 : f32 to vector<256x128xf32>
      %34 = arith.addf %32, %33 : vector<256x128xf32>
      %35 = math.rsqrt %34 : vector<256x128xf32>
      %36 = math.sqrt %35 : vector<256x128xf32>
      %37 = arith.mulf %35, %36 : vector<256x128xf32>
      %38 = arith.mulf %20, %37 : vector<256x128xf32>
      %c0_21 = arith.constant 0 : index
      %c0_22 = arith.constant 0 : index
      %c0_23 = arith.constant 0 : index
      %39 = vector.load %arg6[%c0_21, %c0_22, %c0_23] : memref<1x256x128xf32, #tpu.memory_space<vmem>>, vector<1x256x128xf32>
      %40 = vector.shape_cast %39 : vector<1x256x128xf32> to vector<256x128xf32>
      %41 = vector.shape_cast %38 : vector<256x128xf32> to vector<1x256x128xf32>
      tpu.vector_store %arg6[%c0_21, %c0_22, %c0_23], %41 {strides = array<i32>} : memref<1x256x128xf32, #tpu.memory_space<vmem>>, vector<1x256x128xf32>,
    } else {
    }
    return
  }
  func.func @transform_0(%arg0: i32, %arg1: i32, %arg2: i32) -> (i32, i32, i32) {
    %c0_i32 = arith.constant 0 : i32
    return %arg0, %arg1, %arg2 : i32, i32, i32
  }
  func.func @transform_1(%arg0: i32, %arg1: i32, %arg2: i32) -> (i32, i32, i32) {
    %c0_i32 = arith.constant 0 : i32
    %c0_i32_0 = arith.constant 0 : i32
    return %arg0, %arg2, %c0_i32 : i32, i32, i32
  }
  func.func @transform_2(%arg0: i32, %arg1: i32, %arg2: i32) -> (i32, i32, i32) {
    %c0_i32 = arith.constant 0 : i32
    %c0_i32_0 = arith.constant 0 : i32
    %c0_i32_1 = arith.constant 0 : i32
    return %arg0, %c0_i32, %c0_i32_0 : i32, i32, i32
  }
  func.func @transform_3(%arg0: i32, %arg1: i32, %arg2: i32) -> (i32, i32, i32) {
    %c0_i32 = arith.constant 0 : i32
    %c0_i32_0 = arith.constant 0 : i32
    return %arg0, %arg1, %c0_i32 : i32, i32, i32
  }
}

module attributes {stable_mosaic.version = 11 : i64} {
  func.func @_maxpool_3x3_s2_kernel(%arg0: i32, %arg1: memref<1x15x15x96xf32, #tpu.memory_space<vmem>>, %arg2: memref<1x7x7x96xf32, #tpu.memory_space<vmem>>) attributes {dimension_semantics = [#tpu.dimension_semantics<parallel>], iteration_bounds = array<i64: 2>, scalar_prefetch = 0 : i64, scratch_operands = 0 : i64, tpu.core_type = #tpu.core_type<tc>, window_params = [{transform_indices = @transform_0, window_bounds = array<i64: 1, 15, 15, 96>}, {transform_indices = @transform_1, window_bounds = array<i64: 1, 7, 7, 96>}]} {
    %c0 = arith.constant 0 : index
    %c0_0 = arith.constant 0 : index
    %c0_1 = arith.constant 0 : index
    %c0_2 = arith.constant 0 : index
    %0 = vector.load %arg1[%c0, %c0_0, %c0_1, %c0_2] : memref<1x15x15x96xf32, #tpu.memory_space<vmem>>, vector<1x1x15x96xf32>
    %1 = vector.shape_cast %0 : vector<1x1x15x96xf32> to vector<15x96xf32>
    %c0_3 = arith.constant 0 : index
    %c1 = arith.constant 1 : index
    %c0_4 = arith.constant 0 : index
    %c0_5 = arith.constant 0 : index
    %2 = vector.load %arg1[%c0_3, %c1, %c0_4, %c0_5] : memref<1x15x15x96xf32, #tpu.memory_space<vmem>>, vector<1x1x15x96xf32>
    %3 = vector.shape_cast %2 : vector<1x1x15x96xf32> to vector<15x96xf32>
    %4 = arith.maximumf %1, %3 : vector<15x96xf32>
    %c0_6 = arith.constant 0 : index
    %c2 = arith.constant 2 : index
    %c0_7 = arith.constant 0 : index
    %c0_8 = arith.constant 0 : index
    %5 = vector.load %arg1[%c0_6, %c2, %c0_7, %c0_8] : memref<1x15x15x96xf32, #tpu.memory_space<vmem>>, vector<1x1x15x96xf32>
    %6 = vector.shape_cast %5 : vector<1x1x15x96xf32> to vector<15x96xf32>
    %7 = arith.maximumf %4, %6 : vector<15x96xf32>
    %8 = vector.extract_strided_slice %7 {offsets = [0, 0], sizes = [3, 96], strides = [1, 1]} : vector<15x96xf32> to vector<3x96xf32>
    %cst = arith.constant dense<0xFF800000> : vector<96xf32>
    %9 = vector.multi_reduction <maximumf>, %8, %cst [0] : vector<3x96xf32> to vector<96xf32>
    %10 = vector.shape_cast %9 : vector<96xf32> to vector<1x96xf32>
    %11 = vector.extract_strided_slice %7 {offsets = [2, 0], sizes = [3, 96], strides = [1, 1]} : vector<15x96xf32> to vector<3x96xf32>
    %cst_9 = arith.constant dense<0xFF800000> : vector<96xf32>
    %12 = vector.multi_reduction <maximumf>, %11, %cst_9 [0] : vector<3x96xf32> to vector<96xf32>
    %13 = vector.shape_cast %12 : vector<96xf32> to vector<1x96xf32>
    %14 = vector.extract_strided_slice %7 {offsets = [4, 0], sizes = [3, 96], strides = [1, 1]} : vector<15x96xf32> to vector<3x96xf32>
    %cst_10 = arith.constant dense<0xFF800000> : vector<96xf32>
    %15 = vector.multi_reduction <maximumf>, %14, %cst_10 [0] : vector<3x96xf32> to vector<96xf32>
    %16 = vector.shape_cast %15 : vector<96xf32> to vector<1x96xf32>
    %17 = vector.extract_strided_slice %7 {offsets = [6, 0], sizes = [3, 96], strides = [1, 1]} : vector<15x96xf32> to vector<3x96xf32>
    %cst_11 = arith.constant dense<0xFF800000> : vector<96xf32>
    %18 = vector.multi_reduction <maximumf>, %17, %cst_11 [0] : vector<3x96xf32> to vector<96xf32>
    %19 = vector.shape_cast %18 : vector<96xf32> to vector<1x96xf32>
    %20 = vector.extract_strided_slice %7 {offsets = [8, 0], sizes = [3, 96], strides = [1, 1]} : vector<15x96xf32> to vector<3x96xf32>
    %cst_12 = arith.constant dense<0xFF800000> : vector<96xf32>
    %21 = vector.multi_reduction <maximumf>, %20, %cst_12 [0] : vector<3x96xf32> to vector<96xf32>
    %22 = vector.shape_cast %21 : vector<96xf32> to vector<1x96xf32>
    %23 = vector.extract_strided_slice %7 {offsets = [10, 0], sizes = [3, 96], strides = [1, 1]} : vector<15x96xf32> to vector<3x96xf32>
    %cst_13 = arith.constant dense<0xFF800000> : vector<96xf32>
    %24 = vector.multi_reduction <maximumf>, %23, %cst_13 [0] : vector<3x96xf32> to vector<96xf32>
    %25 = vector.shape_cast %24 : vector<96xf32> to vector<1x96xf32>
    %26 = vector.extract_strided_slice %7 {offsets = [12, 0], sizes = [3, 96], strides = [1, 1]} : vector<15x96xf32> to vector<3x96xf32>
    %cst_14 = arith.constant dense<0xFF800000> : vector<96xf32>
    %27 = vector.multi_reduction <maximumf>, %26, %cst_14 [0] : vector<3x96xf32> to vector<96xf32>
    %28 = vector.shape_cast %27 : vector<96xf32> to vector<1x96xf32>
    %29 = tpu.concatenate %10, %13, %16, %19, %22, %25, %28 in 0 : vector<1x96xf32>, vector<1x96xf32>, vector<1x96xf32>, vector<1x96xf32>, vector<1x96xf32>, vector<1x96xf32>, vector<1x96xf32> -> vector<7x96xf32>
    %c0_15 = arith.constant 0 : index
    %c0_16 = arith.constant 0 : index
    %c0_17 = arith.constant 0 : index
    %c0_18 = arith.constant 0 : index
    %30 = vector.load %arg2[%c0_15, %c0_16, %c0_17, %c0_18] : memref<1x7x7x96xf32, #tpu.memory_space<vmem>>, vector<1x1x7x96xf32>
    %31 = vector.shape_cast %30 : vector<1x1x7x96xf32> to vector<7x96xf32>
    %32 = vector.shape_cast %29 : vector<7x96xf32> to vector<1x1x7x96xf32>
    tpu.vector_store %arg2[%c0_15, %c0_16, %c0_17, %c0_18], %32 {strides = array<i32>} : memref<1x7x7x96xf32, #tpu.memory_space<vmem>>, vector<1x1x7x96xf32>,
    %c0_19 = arith.constant 0 : index
    %c2_20 = arith.constant 2 : index
    %c0_21 = arith.constant 0 : index
    %c0_22 = arith.constant 0 : index
    %33 = vector.load %arg1[%c0_19, %c2_20, %c0_21, %c0_22] : memref<1x15x15x96xf32, #tpu.memory_space<vmem>>, vector<1x1x15x96xf32>
    %34 = vector.shape_cast %33 : vector<1x1x15x96xf32> to vector<15x96xf32>
    %c0_23 = arith.constant 0 : index
    %c3 = arith.constant 3 : index
    %c0_24 = arith.constant 0 : index
    %c0_25 = arith.constant 0 : index
    %35 = vector.load %arg1[%c0_23, %c3, %c0_24, %c0_25] : memref<1x15x15x96xf32, #tpu.memory_space<vmem>>, vector<1x1x15x96xf32>
    %36 = vector.shape_cast %35 : vector<1x1x15x96xf32> to vector<15x96xf32>
    %37 = arith.maximumf %34, %36 : vector<15x96xf32>
    %c0_26 = arith.constant 0 : index
    %c4 = arith.constant 4 : index
    %c0_27 = arith.constant 0 : index
    %c0_28 = arith.constant 0 : index
    %38 = vector.load %arg1[%c0_26, %c4, %c0_27, %c0_28] : memref<1x15x15x96xf32, #tpu.memory_space<vmem>>, vector<1x1x15x96xf32>
    %39 = vector.shape_cast %38 : vector<1x1x15x96xf32> to vector<15x96xf32>
    %40 = arith.maximumf %37, %39 : vector<15x96xf32>
    %41 = vector.extract_strided_slice %40 {offsets = [0, 0], sizes = [3, 96], strides = [1, 1]} : vector<15x96xf32> to vector<3x96xf32>
    %cst_29 = arith.constant dense<0xFF800000> : vector<96xf32>
    %42 = vector.multi_reduction <maximumf>, %41, %cst_29 [0] : vector<3x96xf32> to vector<96xf32>
    %43 = vector.shape_cast %42 : vector<96xf32> to vector<1x96xf32>
    %44 = vector.extract_strided_slice %40 {offsets = [2, 0], sizes = [3, 96], strides = [1, 1]} : vector<15x96xf32> to vector<3x96xf32>
    %cst_30 = arith.constant dense<0xFF800000> : vector<96xf32>
    %45 = vector.multi_reduction <maximumf>, %44, %cst_30 [0] : vector<3x96xf32> to vector<96xf32>
    %46 = vector.shape_cast %45 : vector<96xf32> to vector<1x96xf32>
    %47 = vector.extract_strided_slice %40 {offsets = [4, 0], sizes = [3, 96], strides = [1, 1]} : vector<15x96xf32> to vector<3x96xf32>
    %cst_31 = arith.constant dense<0xFF800000> : vector<96xf32>
    %48 = vector.multi_reduction <maximumf>, %47, %cst_31 [0] : vector<3x96xf32> to vector<96xf32>
    %49 = vector.shape_cast %48 : vector<96xf32> to vector<1x96xf32>
    %50 = vector.extract_strided_slice %40 {offsets = [6, 0], sizes = [3, 96], strides = [1, 1]} : vector<15x96xf32> to vector<3x96xf32>
    %cst_32 = arith.constant dense<0xFF800000> : vector<96xf32>
    %51 = vector.multi_reduction <maximumf>, %50, %cst_32 [0] : vector<3x96xf32> to vector<96xf32>
    %52 = vector.shape_cast %51 : vector<96xf32> to vector<1x96xf32>
    %53 = vector.extract_strided_slice %40 {offsets = [8, 0], sizes = [3, 96], strides = [1, 1]} : vector<15x96xf32> to vector<3x96xf32>
    %cst_33 = arith.constant dense<0xFF800000> : vector<96xf32>
    %54 = vector.multi_reduction <maximumf>, %53, %cst_33 [0] : vector<3x96xf32> to vector<96xf32>
    %55 = vector.shape_cast %54 : vector<96xf32> to vector<1x96xf32>
    %56 = vector.extract_strided_slice %40 {offsets = [10, 0], sizes = [3, 96], strides = [1, 1]} : vector<15x96xf32> to vector<3x96xf32>
    %cst_34 = arith.constant dense<0xFF800000> : vector<96xf32>
    %57 = vector.multi_reduction <maximumf>, %56, %cst_34 [0] : vector<3x96xf32> to vector<96xf32>
    %58 = vector.shape_cast %57 : vector<96xf32> to vector<1x96xf32>
    %59 = vector.extract_strided_slice %40 {offsets = [12, 0], sizes = [3, 96], strides = [1, 1]} : vector<15x96xf32> to vector<3x96xf32>
    %cst_35 = arith.constant dense<0xFF800000> : vector<96xf32>
    %60 = vector.multi_reduction <maximumf>, %59, %cst_35 [0] : vector<3x96xf32> to vector<96xf32>
    %61 = vector.shape_cast %60 : vector<96xf32> to vector<1x96xf32>
    %62 = tpu.concatenate %43, %46, %49, %52, %55, %58, %61 in 0 : vector<1x96xf32>, vector<1x96xf32>, vector<1x96xf32>, vector<1x96xf32>, vector<1x96xf32>, vector<1x96xf32>, vector<1x96xf32> -> vector<7x96xf32>
    %c0_36 = arith.constant 0 : index
    %c1_37 = arith.constant 1 : index
    %c0_38 = arith.constant 0 : index
    %c0_39 = arith.constant 0 : index
    %63 = vector.load %arg2[%c0_36, %c1_37, %c0_38, %c0_39] : memref<1x7x7x96xf32, #tpu.memory_space<vmem>>, vector<1x1x7x96xf32>
    %64 = vector.shape_cast %63 : vector<1x1x7x96xf32> to vector<7x96xf32>
    %65 = vector.shape_cast %62 : vector<7x96xf32> to vector<1x1x7x96xf32>
    tpu.vector_store %arg2[%c0_36, %c1_37, %c0_38, %c0_39], %65 {strides = array<i32>} : memref<1x7x7x96xf32, #tpu.memory_space<vmem>>, vector<1x1x7x96xf32>,
    %c0_40 = arith.constant 0 : index
    %c4_41 = arith.constant 4 : index
    %c0_42 = arith.constant 0 : index
    %c0_43 = arith.constant 0 : index
    %66 = vector.load %arg1[%c0_40, %c4_41, %c0_42, %c0_43] : memref<1x15x15x96xf32, #tpu.memory_space<vmem>>, vector<1x1x15x96xf32>
    %67 = vector.shape_cast %66 : vector<1x1x15x96xf32> to vector<15x96xf32>
    %c0_44 = arith.constant 0 : index
    %c5 = arith.constant 5 : index
    %c0_45 = arith.constant 0 : index
    %c0_46 = arith.constant 0 : index
    %68 = vector.load %arg1[%c0_44, %c5, %c0_45, %c0_46] : memref<1x15x15x96xf32, #tpu.memory_space<vmem>>, vector<1x1x15x96xf32>
    %69 = vector.shape_cast %68 : vector<1x1x15x96xf32> to vector<15x96xf32>
    %70 = arith.maximumf %67, %69 : vector<15x96xf32>
    %c0_47 = arith.constant 0 : index
    %c6 = arith.constant 6 : index
    %c0_48 = arith.constant 0 : index
    %c0_49 = arith.constant 0 : index
    %71 = vector.load %arg1[%c0_47, %c6, %c0_48, %c0_49] : memref<1x15x15x96xf32, #tpu.memory_space<vmem>>, vector<1x1x15x96xf32>
    %72 = vector.shape_cast %71 : vector<1x1x15x96xf32> to vector<15x96xf32>
    %73 = arith.maximumf %70, %72 : vector<15x96xf32>
    %74 = vector.extract_strided_slice %73 {offsets = [0, 0], sizes = [3, 96], strides = [1, 1]} : vector<15x96xf32> to vector<3x96xf32>
    %cst_50 = arith.constant dense<0xFF800000> : vector<96xf32>
    %75 = vector.multi_reduction <maximumf>, %74, %cst_50 [0] : vector<3x96xf32> to vector<96xf32>
    %76 = vector.shape_cast %75 : vector<96xf32> to vector<1x96xf32>
    %77 = vector.extract_strided_slice %73 {offsets = [2, 0], sizes = [3, 96], strides = [1, 1]} : vector<15x96xf32> to vector<3x96xf32>
    %cst_51 = arith.constant dense<0xFF800000> : vector<96xf32>
    %78 = vector.multi_reduction <maximumf>, %77, %cst_51 [0] : vector<3x96xf32> to vector<96xf32>
    %79 = vector.shape_cast %78 : vector<96xf32> to vector<1x96xf32>
    %80 = vector.extract_strided_slice %73 {offsets = [4, 0], sizes = [3, 96], strides = [1, 1]} : vector<15x96xf32> to vector<3x96xf32>
    %cst_52 = arith.constant dense<0xFF800000> : vector<96xf32>
    %81 = vector.multi_reduction <maximumf>, %80, %cst_52 [0] : vector<3x96xf32> to vector<96xf32>
    %82 = vector.shape_cast %81 : vector<96xf32> to vector<1x96xf32>
    %83 = vector.extract_strided_slice %73 {offsets = [6, 0], sizes = [3, 96], strides = [1, 1]} : vector<15x96xf32> to vector<3x96xf32>
    %cst_53 = arith.constant dense<0xFF800000> : vector<96xf32>
    %84 = vector.multi_reduction <maximumf>, %83, %cst_53 [0] : vector<3x96xf32> to vector<96xf32>
    %85 = vector.shape_cast %84 : vector<96xf32> to vector<1x96xf32>
    %86 = vector.extract_strided_slice %73 {offsets = [8, 0], sizes = [3, 96], strides = [1, 1]} : vector<15x96xf32> to vector<3x96xf32>
    %cst_54 = arith.constant dense<0xFF800000> : vector<96xf32>
    %87 = vector.multi_reduction <maximumf>, %86, %cst_54 [0] : vector<3x96xf32> to vector<96xf32>
    %88 = vector.shape_cast %87 : vector<96xf32> to vector<1x96xf32>
    %89 = vector.extract_strided_slice %73 {offsets = [10, 0], sizes = [3, 96], strides = [1, 1]} : vector<15x96xf32> to vector<3x96xf32>
    %cst_55 = arith.constant dense<0xFF800000> : vector<96xf32>
    %90 = vector.multi_reduction <maximumf>, %89, %cst_55 [0] : vector<3x96xf32> to vector<96xf32>
    %91 = vector.shape_cast %90 : vector<96xf32> to vector<1x96xf32>
    %92 = vector.extract_strided_slice %73 {offsets = [12, 0], sizes = [3, 96], strides = [1, 1]} : vector<15x96xf32> to vector<3x96xf32>
    %cst_56 = arith.constant dense<0xFF800000> : vector<96xf32>
    %93 = vector.multi_reduction <maximumf>, %92, %cst_56 [0] : vector<3x96xf32> to vector<96xf32>
    %94 = vector.shape_cast %93 : vector<96xf32> to vector<1x96xf32>
    %95 = tpu.concatenate %76, %79, %82, %85, %88, %91, %94 in 0 : vector<1x96xf32>, vector<1x96xf32>, vector<1x96xf32>, vector<1x96xf32>, vector<1x96xf32>, vector<1x96xf32>, vector<1x96xf32> -> vector<7x96xf32>
    %c0_57 = arith.constant 0 : index
    %c2_58 = arith.constant 2 : index
    %c0_59 = arith.constant 0 : index
    %c0_60 = arith.constant 0 : index
    %96 = vector.load %arg2[%c0_57, %c2_58, %c0_59, %c0_60] : memref<1x7x7x96xf32, #tpu.memory_space<vmem>>, vector<1x1x7x96xf32>
    %97 = vector.shape_cast %96 : vector<1x1x7x96xf32> to vector<7x96xf32>
    %98 = vector.shape_cast %95 : vector<7x96xf32> to vector<1x1x7x96xf32>
    tpu.vector_store %arg2[%c0_57, %c2_58, %c0_59, %c0_60], %98 {strides = array<i32>} : memref<1x7x7x96xf32, #tpu.memory_space<vmem>>, vector<1x1x7x96xf32>,
    %c0_61 = arith.constant 0 : index
    %c6_62 = arith.constant 6 : index
    %c0_63 = arith.constant 0 : index
    %c0_64 = arith.constant 0 : index
    %99 = vector.load %arg1[%c0_61, %c6_62, %c0_63, %c0_64] : memref<1x15x15x96xf32, #tpu.memory_space<vmem>>, vector<1x1x15x96xf32>
    %100 = vector.shape_cast %99 : vector<1x1x15x96xf32> to vector<15x96xf32>
    %c0_65 = arith.constant 0 : index
    %c7 = arith.constant 7 : index
    %c0_66 = arith.constant 0 : index
    %c0_67 = arith.constant 0 : index
    %101 = vector.load %arg1[%c0_65, %c7, %c0_66, %c0_67] : memref<1x15x15x96xf32, #tpu.memory_space<vmem>>, vector<1x1x15x96xf32>
    %102 = vector.shape_cast %101 : vector<1x1x15x96xf32> to vector<15x96xf32>
    %103 = arith.maximumf %100, %102 : vector<15x96xf32>
    %c0_68 = arith.constant 0 : index
    %c8 = arith.constant 8 : index
    %c0_69 = arith.constant 0 : index
    %c0_70 = arith.constant 0 : index
    %104 = vector.load %arg1[%c0_68, %c8, %c0_69, %c0_70] : memref<1x15x15x96xf32, #tpu.memory_space<vmem>>, vector<1x1x15x96xf32>
    %105 = vector.shape_cast %104 : vector<1x1x15x96xf32> to vector<15x96xf32>
    %106 = arith.maximumf %103, %105 : vector<15x96xf32>
    %107 = vector.extract_strided_slice %106 {offsets = [0, 0], sizes = [3, 96], strides = [1, 1]} : vector<15x96xf32> to vector<3x96xf32>
    %cst_71 = arith.constant dense<0xFF800000> : vector<96xf32>
    %108 = vector.multi_reduction <maximumf>, %107, %cst_71 [0] : vector<3x96xf32> to vector<96xf32>
    %109 = vector.shape_cast %108 : vector<96xf32> to vector<1x96xf32>
    %110 = vector.extract_strided_slice %106 {offsets = [2, 0], sizes = [3, 96], strides = [1, 1]} : vector<15x96xf32> to vector<3x96xf32>
    %cst_72 = arith.constant dense<0xFF800000> : vector<96xf32>
    %111 = vector.multi_reduction <maximumf>, %110, %cst_72 [0] : vector<3x96xf32> to vector<96xf32>
    %112 = vector.shape_cast %111 : vector<96xf32> to vector<1x96xf32>
    %113 = vector.extract_strided_slice %106 {offsets = [4, 0], sizes = [3, 96], strides = [1, 1]} : vector<15x96xf32> to vector<3x96xf32>
    %cst_73 = arith.constant dense<0xFF800000> : vector<96xf32>
    %114 = vector.multi_reduction <maximumf>, %113, %cst_73 [0] : vector<3x96xf32> to vector<96xf32>
    %115 = vector.shape_cast %114 : vector<96xf32> to vector<1x96xf32>
    %116 = vector.extract_strided_slice %106 {offsets = [6, 0], sizes = [3, 96], strides = [1, 1]} : vector<15x96xf32> to vector<3x96xf32>
    %cst_74 = arith.constant dense<0xFF800000> : vector<96xf32>
    %117 = vector.multi_reduction <maximumf>, %116, %cst_74 [0] : vector<3x96xf32> to vector<96xf32>
    %118 = vector.shape_cast %117 : vector<96xf32> to vector<1x96xf32>
    %119 = vector.extract_strided_slice %106 {offsets = [8, 0], sizes = [3, 96], strides = [1, 1]} : vector<15x96xf32> to vector<3x96xf32>
    %cst_75 = arith.constant dense<0xFF800000> : vector<96xf32>
    %120 = vector.multi_reduction <maximumf>, %119, %cst_75 [0] : vector<3x96xf32> to vector<96xf32>
    %121 = vector.shape_cast %120 : vector<96xf32> to vector<1x96xf32>
    %122 = vector.extract_strided_slice %106 {offsets = [10, 0], sizes = [3, 96], strides = [1, 1]} : vector<15x96xf32> to vector<3x96xf32>
    %cst_76 = arith.constant dense<0xFF800000> : vector<96xf32>
    %123 = vector.multi_reduction <maximumf>, %122, %cst_76 [0] : vector<3x96xf32> to vector<96xf32>
    %124 = vector.shape_cast %123 : vector<96xf32> to vector<1x96xf32>
    %125 = vector.extract_strided_slice %106 {offsets = [12, 0], sizes = [3, 96], strides = [1, 1]} : vector<15x96xf32> to vector<3x96xf32>
    %cst_77 = arith.constant dense<0xFF800000> : vector<96xf32>
    %126 = vector.multi_reduction <maximumf>, %125, %cst_77 [0] : vector<3x96xf32> to vector<96xf32>
    %127 = vector.shape_cast %126 : vector<96xf32> to vector<1x96xf32>
    %128 = tpu.concatenate %109, %112, %115, %118, %121, %124, %127 in 0 : vector<1x96xf32>, vector<1x96xf32>, vector<1x96xf32>, vector<1x96xf32>, vector<1x96xf32>, vector<1x96xf32>, vector<1x96xf32> -> vector<7x96xf32>
    %c0_78 = arith.constant 0 : index
    %c3_79 = arith.constant 3 : index
    %c0_80 = arith.constant 0 : index
    %c0_81 = arith.constant 0 : index
    %129 = vector.load %arg2[%c0_78, %c3_79, %c0_80, %c0_81] : memref<1x7x7x96xf32, #tpu.memory_space<vmem>>, vector<1x1x7x96xf32>
    %130 = vector.shape_cast %129 : vector<1x1x7x96xf32> to vector<7x96xf32>
    %131 = vector.shape_cast %128 : vector<7x96xf32> to vector<1x1x7x96xf32>
    tpu.vector_store %arg2[%c0_78, %c3_79, %c0_80, %c0_81], %131 {strides = array<i32>} : memref<1x7x7x96xf32, #tpu.memory_space<vmem>>, vector<1x1x7x96xf32>,
    %c0_82 = arith.constant 0 : index
    %c8_83 = arith.constant 8 : index
    %c0_84 = arith.constant 0 : index
    %c0_85 = arith.constant 0 : index
    %132 = vector.load %arg1[%c0_82, %c8_83, %c0_84, %c0_85] : memref<1x15x15x96xf32, #tpu.memory_space<vmem>>, vector<1x1x15x96xf32>
    %133 = vector.shape_cast %132 : vector<1x1x15x96xf32> to vector<15x96xf32>
    %c0_86 = arith.constant 0 : index
    %c9 = arith.constant 9 : index
    %c0_87 = arith.constant 0 : index
    %c0_88 = arith.constant 0 : index
    %134 = vector.load %arg1[%c0_86, %c9, %c0_87, %c0_88] : memref<1x15x15x96xf32, #tpu.memory_space<vmem>>, vector<1x1x15x96xf32>
    %135 = vector.shape_cast %134 : vector<1x1x15x96xf32> to vector<15x96xf32>
    %136 = arith.maximumf %133, %135 : vector<15x96xf32>
    %c0_89 = arith.constant 0 : index
    %c10 = arith.constant 10 : index
    %c0_90 = arith.constant 0 : index
    %c0_91 = arith.constant 0 : index
    %137 = vector.load %arg1[%c0_89, %c10, %c0_90, %c0_91] : memref<1x15x15x96xf32, #tpu.memory_space<vmem>>, vector<1x1x15x96xf32>
    %138 = vector.shape_cast %137 : vector<1x1x15x96xf32> to vector<15x96xf32>
    %139 = arith.maximumf %136, %138 : vector<15x96xf32>
    %140 = vector.extract_strided_slice %139 {offsets = [0, 0], sizes = [3, 96], strides = [1, 1]} : vector<15x96xf32> to vector<3x96xf32>
    %cst_92 = arith.constant dense<0xFF800000> : vector<96xf32>
    %141 = vector.multi_reduction <maximumf>, %140, %cst_92 [0] : vector<3x96xf32> to vector<96xf32>
    %142 = vector.shape_cast %141 : vector<96xf32> to vector<1x96xf32>
    %143 = vector.extract_strided_slice %139 {offsets = [2, 0], sizes = [3, 96], strides = [1, 1]} : vector<15x96xf32> to vector<3x96xf32>
    %cst_93 = arith.constant dense<0xFF800000> : vector<96xf32>
    %144 = vector.multi_reduction <maximumf>, %143, %cst_93 [0] : vector<3x96xf32> to vector<96xf32>
    %145 = vector.shape_cast %144 : vector<96xf32> to vector<1x96xf32>
    %146 = vector.extract_strided_slice %139 {offsets = [4, 0], sizes = [3, 96], strides = [1, 1]} : vector<15x96xf32> to vector<3x96xf32>
    %cst_94 = arith.constant dense<0xFF800000> : vector<96xf32>
    %147 = vector.multi_reduction <maximumf>, %146, %cst_94 [0] : vector<3x96xf32> to vector<96xf32>
    %148 = vector.shape_cast %147 : vector<96xf32> to vector<1x96xf32>
    %149 = vector.extract_strided_slice %139 {offsets = [6, 0], sizes = [3, 96], strides = [1, 1]} : vector<15x96xf32> to vector<3x96xf32>
    %cst_95 = arith.constant dense<0xFF800000> : vector<96xf32>
    %150 = vector.multi_reduction <maximumf>, %149, %cst_95 [0] : vector<3x96xf32> to vector<96xf32>
    %151 = vector.shape_cast %150 : vector<96xf32> to vector<1x96xf32>
    %152 = vector.extract_strided_slice %139 {offsets = [8, 0], sizes = [3, 96], strides = [1, 1]} : vector<15x96xf32> to vector<3x96xf32>
    %cst_96 = arith.constant dense<0xFF800000> : vector<96xf32>
    %153 = vector.multi_reduction <maximumf>, %152, %cst_96 [0] : vector<3x96xf32> to vector<96xf32>
    %154 = vector.shape_cast %153 : vector<96xf32> to vector<1x96xf32>
    %155 = vector.extract_strided_slice %139 {offsets = [10, 0], sizes = [3, 96], strides = [1, 1]} : vector<15x96xf32> to vector<3x96xf32>
    %cst_97 = arith.constant dense<0xFF800000> : vector<96xf32>
    %156 = vector.multi_reduction <maximumf>, %155, %cst_97 [0] : vector<3x96xf32> to vector<96xf32>
    %157 = vector.shape_cast %156 : vector<96xf32> to vector<1x96xf32>
    %158 = vector.extract_strided_slice %139 {offsets = [12, 0], sizes = [3, 96], strides = [1, 1]} : vector<15x96xf32> to vector<3x96xf32>
    %cst_98 = arith.constant dense<0xFF800000> : vector<96xf32>
    %159 = vector.multi_reduction <maximumf>, %158, %cst_98 [0] : vector<3x96xf32> to vector<96xf32>
    %160 = vector.shape_cast %159 : vector<96xf32> to vector<1x96xf32>
    %161 = tpu.concatenate %142, %145, %148, %151, %154, %157, %160 in 0 : vector<1x96xf32>, vector<1x96xf32>, vector<1x96xf32>, vector<1x96xf32>, vector<1x96xf32>, vector<1x96xf32>, vector<1x96xf32> -> vector<7x96xf32>
    %c0_99 = arith.constant 0 : index
    %c4_100 = arith.constant 4 : index
    %c0_101 = arith.constant 0 : index
    %c0_102 = arith.constant 0 : index
    %162 = vector.load %arg2[%c0_99, %c4_100, %c0_101, %c0_102] : memref<1x7x7x96xf32, #tpu.memory_space<vmem>>, vector<1x1x7x96xf32>
    %163 = vector.shape_cast %162 : vector<1x1x7x96xf32> to vector<7x96xf32>
    %164 = vector.shape_cast %161 : vector<7x96xf32> to vector<1x1x7x96xf32>
    tpu.vector_store %arg2[%c0_99, %c4_100, %c0_101, %c0_102], %164 {strides = array<i32>} : memref<1x7x7x96xf32, #tpu.memory_space<vmem>>, vector<1x1x7x96xf32>,
    %c0_103 = arith.constant 0 : index
    %c10_104 = arith.constant 10 : index
    %c0_105 = arith.constant 0 : index
    %c0_106 = arith.constant 0 : index
    %165 = vector.load %arg1[%c0_103, %c10_104, %c0_105, %c0_106] : memref<1x15x15x96xf32, #tpu.memory_space<vmem>>, vector<1x1x15x96xf32>
    %166 = vector.shape_cast %165 : vector<1x1x15x96xf32> to vector<15x96xf32>
    %c0_107 = arith.constant 0 : index
    %c11 = arith.constant 11 : index
    %c0_108 = arith.constant 0 : index
    %c0_109 = arith.constant 0 : index
    %167 = vector.load %arg1[%c0_107, %c11, %c0_108, %c0_109] : memref<1x15x15x96xf32, #tpu.memory_space<vmem>>, vector<1x1x15x96xf32>
    %168 = vector.shape_cast %167 : vector<1x1x15x96xf32> to vector<15x96xf32>
    %169 = arith.maximumf %166, %168 : vector<15x96xf32>
    %c0_110 = arith.constant 0 : index
    %c12 = arith.constant 12 : index
    %c0_111 = arith.constant 0 : index
    %c0_112 = arith.constant 0 : index
    %170 = vector.load %arg1[%c0_110, %c12, %c0_111, %c0_112] : memref<1x15x15x96xf32, #tpu.memory_space<vmem>>, vector<1x1x15x96xf32>
    %171 = vector.shape_cast %170 : vector<1x1x15x96xf32> to vector<15x96xf32>
    %172 = arith.maximumf %169, %171 : vector<15x96xf32>
    %173 = vector.extract_strided_slice %172 {offsets = [0, 0], sizes = [3, 96], strides = [1, 1]} : vector<15x96xf32> to vector<3x96xf32>
    %cst_113 = arith.constant dense<0xFF800000> : vector<96xf32>
    %174 = vector.multi_reduction <maximumf>, %173, %cst_113 [0] : vector<3x96xf32> to vector<96xf32>
    %175 = vector.shape_cast %174 : vector<96xf32> to vector<1x96xf32>
    %176 = vector.extract_strided_slice %172 {offsets = [2, 0], sizes = [3, 96], strides = [1, 1]} : vector<15x96xf32> to vector<3x96xf32>
    %cst_114 = arith.constant dense<0xFF800000> : vector<96xf32>
    %177 = vector.multi_reduction <maximumf>, %176, %cst_114 [0] : vector<3x96xf32> to vector<96xf32>
    %178 = vector.shape_cast %177 : vector<96xf32> to vector<1x96xf32>
    %179 = vector.extract_strided_slice %172 {offsets = [4, 0], sizes = [3, 96], strides = [1, 1]} : vector<15x96xf32> to vector<3x96xf32>
    %cst_115 = arith.constant dense<0xFF800000> : vector<96xf32>
    %180 = vector.multi_reduction <maximumf>, %179, %cst_115 [0] : vector<3x96xf32> to vector<96xf32>
    %181 = vector.shape_cast %180 : vector<96xf32> to vector<1x96xf32>
    %182 = vector.extract_strided_slice %172 {offsets = [6, 0], sizes = [3, 96], strides = [1, 1]} : vector<15x96xf32> to vector<3x96xf32>
    %cst_116 = arith.constant dense<0xFF800000> : vector<96xf32>
    %183 = vector.multi_reduction <maximumf>, %182, %cst_116 [0] : vector<3x96xf32> to vector<96xf32>
    %184 = vector.shape_cast %183 : vector<96xf32> to vector<1x96xf32>
    %185 = vector.extract_strided_slice %172 {offsets = [8, 0], sizes = [3, 96], strides = [1, 1]} : vector<15x96xf32> to vector<3x96xf32>
    %cst_117 = arith.constant dense<0xFF800000> : vector<96xf32>
    %186 = vector.multi_reduction <maximumf>, %185, %cst_117 [0] : vector<3x96xf32> to vector<96xf32>
    %187 = vector.shape_cast %186 : vector<96xf32> to vector<1x96xf32>
    %188 = vector.extract_strided_slice %172 {offsets = [10, 0], sizes = [3, 96], strides = [1, 1]} : vector<15x96xf32> to vector<3x96xf32>
    %cst_118 = arith.constant dense<0xFF800000> : vector<96xf32>
    %189 = vector.multi_reduction <maximumf>, %188, %cst_118 [0] : vector<3x96xf32> to vector<96xf32>
    %190 = vector.shape_cast %189 : vector<96xf32> to vector<1x96xf32>
    %191 = vector.extract_strided_slice %172 {offsets = [12, 0], sizes = [3, 96], strides = [1, 1]} : vector<15x96xf32> to vector<3x96xf32>
    %cst_119 = arith.constant dense<0xFF800000> : vector<96xf32>
    %192 = vector.multi_reduction <maximumf>, %191, %cst_119 [0] : vector<3x96xf32> to vector<96xf32>
    %193 = vector.shape_cast %192 : vector<96xf32> to vector<1x96xf32>
    %194 = tpu.concatenate %175, %178, %181, %184, %187, %190, %193 in 0 : vector<1x96xf32>, vector<1x96xf32>, vector<1x96xf32>, vector<1x96xf32>, vector<1x96xf32>, vector<1x96xf32>, vector<1x96xf32> -> vector<7x96xf32>
    %c0_120 = arith.constant 0 : index
    %c5_121 = arith.constant 5 : index
    %c0_122 = arith.constant 0 : index
    %c0_123 = arith.constant 0 : index
    %195 = vector.load %arg2[%c0_120, %c5_121, %c0_122, %c0_123] : memref<1x7x7x96xf32, #tpu.memory_space<vmem>>, vector<1x1x7x96xf32>
    %196 = vector.shape_cast %195 : vector<1x1x7x96xf32> to vector<7x96xf32>
    %197 = vector.shape_cast %194 : vector<7x96xf32> to vector<1x1x7x96xf32>
    tpu.vector_store %arg2[%c0_120, %c5_121, %c0_122, %c0_123], %197 {strides = array<i32>} : memref<1x7x7x96xf32, #tpu.memory_space<vmem>>, vector<1x1x7x96xf32>,
    %c0_124 = arith.constant 0 : index
    %c12_125 = arith.constant 12 : index
    %c0_126 = arith.constant 0 : index
    %c0_127 = arith.constant 0 : index
    %198 = vector.load %arg1[%c0_124, %c12_125, %c0_126, %c0_127] : memref<1x15x15x96xf32, #tpu.memory_space<vmem>>, vector<1x1x15x96xf32>
    %199 = vector.shape_cast %198 : vector<1x1x15x96xf32> to vector<15x96xf32>
    %c0_128 = arith.constant 0 : index
    %c13 = arith.constant 13 : index
    %c0_129 = arith.constant 0 : index
    %c0_130 = arith.constant 0 : index
    %200 = vector.load %arg1[%c0_128, %c13, %c0_129, %c0_130] : memref<1x15x15x96xf32, #tpu.memory_space<vmem>>, vector<1x1x15x96xf32>
    %201 = vector.shape_cast %200 : vector<1x1x15x96xf32> to vector<15x96xf32>
    %202 = arith.maximumf %199, %201 : vector<15x96xf32>
    %c0_131 = arith.constant 0 : index
    %c14 = arith.constant 14 : index
    %c0_132 = arith.constant 0 : index
    %c0_133 = arith.constant 0 : index
    %203 = vector.load %arg1[%c0_131, %c14, %c0_132, %c0_133] : memref<1x15x15x96xf32, #tpu.memory_space<vmem>>, vector<1x1x15x96xf32>
    %204 = vector.shape_cast %203 : vector<1x1x15x96xf32> to vector<15x96xf32>
    %205 = arith.maximumf %202, %204 : vector<15x96xf32>
    %206 = vector.extract_strided_slice %205 {offsets = [0, 0], sizes = [3, 96], strides = [1, 1]} : vector<15x96xf32> to vector<3x96xf32>
    %cst_134 = arith.constant dense<0xFF800000> : vector<96xf32>
    %207 = vector.multi_reduction <maximumf>, %206, %cst_134 [0] : vector<3x96xf32> to vector<96xf32>
    %208 = vector.shape_cast %207 : vector<96xf32> to vector<1x96xf32>
    %209 = vector.extract_strided_slice %205 {offsets = [2, 0], sizes = [3, 96], strides = [1, 1]} : vector<15x96xf32> to vector<3x96xf32>
    %cst_135 = arith.constant dense<0xFF800000> : vector<96xf32>
    %210 = vector.multi_reduction <maximumf>, %209, %cst_135 [0] : vector<3x96xf32> to vector<96xf32>
    %211 = vector.shape_cast %210 : vector<96xf32> to vector<1x96xf32>
    %212 = vector.extract_strided_slice %205 {offsets = [4, 0], sizes = [3, 96], strides = [1, 1]} : vector<15x96xf32> to vector<3x96xf32>
    %cst_136 = arith.constant dense<0xFF800000> : vector<96xf32>
    %213 = vector.multi_reduction <maximumf>, %212, %cst_136 [0] : vector<3x96xf32> to vector<96xf32>
    %214 = vector.shape_cast %213 : vector<96xf32> to vector<1x96xf32>
    %215 = vector.extract_strided_slice %205 {offsets = [6, 0], sizes = [3, 96], strides = [1, 1]} : vector<15x96xf32> to vector<3x96xf32>
    %cst_137 = arith.constant dense<0xFF800000> : vector<96xf32>
    %216 = vector.multi_reduction <maximumf>, %215, %cst_137 [0] : vector<3x96xf32> to vector<96xf32>
    %217 = vector.shape_cast %216 : vector<96xf32> to vector<1x96xf32>
    %218 = vector.extract_strided_slice %205 {offsets = [8, 0], sizes = [3, 96], strides = [1, 1]} : vector<15x96xf32> to vector<3x96xf32>
    %cst_138 = arith.constant dense<0xFF800000> : vector<96xf32>
    %219 = vector.multi_reduction <maximumf>, %218, %cst_138 [0] : vector<3x96xf32> to vector<96xf32>
    %220 = vector.shape_cast %219 : vector<96xf32> to vector<1x96xf32>
    %221 = vector.extract_strided_slice %205 {offsets = [10, 0], sizes = [3, 96], strides = [1, 1]} : vector<15x96xf32> to vector<3x96xf32>
    %cst_139 = arith.constant dense<0xFF800000> : vector<96xf32>
    %222 = vector.multi_reduction <maximumf>, %221, %cst_139 [0] : vector<3x96xf32> to vector<96xf32>
    %223 = vector.shape_cast %222 : vector<96xf32> to vector<1x96xf32>
    %224 = vector.extract_strided_slice %205 {offsets = [12, 0], sizes = [3, 96], strides = [1, 1]} : vector<15x96xf32> to vector<3x96xf32>
    %cst_140 = arith.constant dense<0xFF800000> : vector<96xf32>
    %225 = vector.multi_reduction <maximumf>, %224, %cst_140 [0] : vector<3x96xf32> to vector<96xf32>
    %226 = vector.shape_cast %225 : vector<96xf32> to vector<1x96xf32>
    %227 = tpu.concatenate %208, %211, %214, %217, %220, %223, %226 in 0 : vector<1x96xf32>, vector<1x96xf32>, vector<1x96xf32>, vector<1x96xf32>, vector<1x96xf32>, vector<1x96xf32>, vector<1x96xf32> -> vector<7x96xf32>
    %c0_141 = arith.constant 0 : index
    %c6_142 = arith.constant 6 : index
    %c0_143 = arith.constant 0 : index
    %c0_144 = arith.constant 0 : index
    %228 = vector.load %arg2[%c0_141, %c6_142, %c0_143, %c0_144] : memref<1x7x7x96xf32, #tpu.memory_space<vmem>>, vector<1x1x7x96xf32>
    %229 = vector.shape_cast %228 : vector<1x1x7x96xf32> to vector<7x96xf32>
    %230 = vector.shape_cast %227 : vector<7x96xf32> to vector<1x1x7x96xf32>
    tpu.vector_store %arg2[%c0_141, %c6_142, %c0_143, %c0_144], %230 {strides = array<i32>} : memref<1x7x7x96xf32, #tpu.memory_space<vmem>>, vector<1x1x7x96xf32>,
    return
  }
  func.func @transform_0(%arg0: i32) -> (i32, i32, i32, i32) {
    %c0_i32 = arith.constant 0 : i32
    %c0_i32_0 = arith.constant 0 : i32
    %c0_i32_1 = arith.constant 0 : i32
    %c0_i32_2 = arith.constant 0 : i32
    return %arg0, %c0_i32, %c0_i32_0, %c0_i32_1 : i32, i32, i32, i32
  }
  func.func @transform_1(%arg0: i32) -> (i32, i32, i32, i32) {
    %c0_i32 = arith.constant 0 : i32
    %c0_i32_0 = arith.constant 0 : i32
    %c0_i32_1 = arith.constant 0 : i32
    %c0_i32_2 = arith.constant 0 : i32
    return %arg0, %c0_i32, %c0_i32_0, %c0_i32_1 : i32, i32, i32, i32
  }
}

module attributes {stable_mosaic.version = 11 : i64} {
  func.func @_gemm_bias_relu_kernel(%arg0: i32, %arg1: i32, %arg2: i32, %arg3: memref<1x104x640xbf16, #tpu.memory_space<vmem>>, %arg4: memref<1x640x128xbf16, #tpu.memory_space<vmem>>, %arg5: memref<1x1x128xf32, #tpu.memory_space<vmem>>, %arg6: memref<1x104x128xf32, #tpu.memory_space<vmem>>, %arg7: memref<104x128xf32, #tpu.memory_space<vmem>>) attributes {dimension_semantics = [#tpu.dimension_semantics<parallel>, #tpu.dimension_semantics<parallel>, #tpu.dimension_semantics<arbitrary>], iteration_bounds = array<i64: 2, 1, 2>, scalar_prefetch = 0 : i64, scratch_operands = 1 : i64, tpu.core_type = #tpu.core_type<tc>, window_params = [{transform_indices = @transform_0, window_bounds = array<i64: 1, 104, 640>}, {transform_indices = @transform_1, window_bounds = array<i64: 1, 640, 128>}, {transform_indices = @transform_2, window_bounds = array<i64: 1, 1, 128>}, {transform_indices = @transform_3, window_bounds = array<i64: 1, 104, 128>}]} {
    %c0_i32 = arith.constant 0 : i32
    %0 = arith.cmpi eq, %arg2, %c0_i32 : i32
    %1 = arith.extui %0 : i1 to i32
    %c0_i32_0 = arith.constant 0 : i32
    %2 = arith.cmpi ne, %1, %c0_i32_0 : i32
    scf.if %2 {
      %cst_11 = arith.constant 0.000000e+00 : f32
      %14 = vector.broadcast %cst_11 : f32 to vector<104x128xf32>
      %c0_12 = arith.constant 0 : index
      %c0_13 = arith.constant 0 : index
      %15 = vector.load %arg7[%c0_12, %c0_13] : memref<104x128xf32, #tpu.memory_space<vmem>>, vector<104x128xf32>
      tpu.vector_store %arg7[%c0_12, %c0_13], %14 {strides = array<i32>} : memref<104x128xf32, #tpu.memory_space<vmem>>, vector<104x128xf32>,
    } else {
    }
    %c0 = arith.constant 0 : index
    %c0_1 = arith.constant 0 : index
    %3 = vector.load %arg7[%c0, %c0_1] : memref<104x128xf32, #tpu.memory_space<vmem>>, vector<104x128xf32>
    %c0_2 = arith.constant 0 : index
    %c0_3 = arith.constant 0 : index
    %c0_4 = arith.constant 0 : index
    %4 = vector.load %arg3[%c0_2, %c0_3, %c0_4] : memref<1x104x640xbf16, #tpu.memory_space<vmem>>, vector<1x104x640xbf16>
    %5 = vector.shape_cast %4 : vector<1x104x640xbf16> to vector<104x640xbf16>
    %c0_5 = arith.constant 0 : index
    %c0_6 = arith.constant 0 : index
    %c0_7 = arith.constant 0 : index
    %6 = vector.load %arg4[%c0_5, %c0_6, %c0_7] : memref<1x640x128xbf16, #tpu.memory_space<vmem>>, vector<1x640x128xbf16>
    %7 = vector.shape_cast %6 : vector<1x640x128xbf16> to vector<640x128xbf16>
    %cst = arith.constant dense<0.000000e+00> : vector<104x128xf32>
    %8 = tpu.matmul %5, %7, %cst {dimension_numbers = #tpu.dot_dimension_numbers<[1], [0], [0], [1], [0, 0, 1, 1], [], []>} : vector<104x640xbf16>, vector<640x128xbf16>, vector<104x128xf32> -> vector<104x128xf32>
    %9 = arith.addf %3, %8 : vector<104x128xf32>
    %c0_8 = arith.constant 0 : index
    %c0_9 = arith.constant 0 : index
    %10 = vector.load %arg7[%c0_8, %c0_9] : memref<104x128xf32, #tpu.memory_space<vmem>>, vector<104x128xf32>
    tpu.vector_store %arg7[%c0_8, %c0_9], %9 {strides = array<i32>} : memref<104x128xf32, #tpu.memory_space<vmem>>, vector<104x128xf32>,
    %c1_i32 = arith.constant 1 : i32
    %11 = arith.cmpi eq, %arg2, %c1_i32 : i32
    %12 = arith.extui %11 : i1 to i32
    %c0_i32_10 = arith.constant 0 : i32
    %13 = arith.cmpi ne, %12, %c0_i32_10 : i32
    scf.if %13 {
      %c0_11 = arith.constant 0 : index
      %c0_12 = arith.constant 0 : index
      %14 = vector.load %arg7[%c0_11, %c0_12] : memref<104x128xf32, #tpu.memory_space<vmem>>, vector<104x128xf32>
      %c0_13 = arith.constant 0 : index
      %c0_14 = arith.constant 0 : index
      %c0_15 = arith.constant 0 : index
      %15 = vector.load %arg5[%c0_13, %c0_14, %c0_15] : memref<1x1x128xf32, #tpu.memory_space<vmem>>, vector<1x1x128xf32>
      %16 = vector.shape_cast %15 : vector<1x1x128xf32> to vector<1x128xf32>
      %17 = vector.broadcast %16 : vector<1x128xf32> to vector<104x128xf32>
      %18 = arith.addf %14, %17 : vector<104x128xf32>
      %cst_16 = arith.constant 0.000000e+00 : f32
      %19 = vector.broadcast %cst_16 : f32 to vector<104x128xf32>
      %20 = arith.maximumf %18, %19 : vector<104x128xf32>
      %c0_17 = arith.constant 0 : index
      %c0_18 = arith.constant 0 : index
      %c0_19 = arith.constant 0 : index
      %21 = vector.load %arg6[%c0_17, %c0_18, %c0_19] : memref<1x104x128xf32, #tpu.memory_space<vmem>>, vector<1x104x128xf32>
      %22 = vector.shape_cast %21 : vector<1x104x128xf32> to vector<104x128xf32>
      %23 = vector.shape_cast %20 : vector<104x128xf32> to vector<1x104x128xf32>
      tpu.vector_store %arg6[%c0_17, %c0_18, %c0_19], %23 {strides = array<i32>} : memref<1x104x128xf32, #tpu.memory_space<vmem>>, vector<1x104x128xf32>,
    } else {
    }
    return
  }
  func.func @transform_0(%arg0: i32, %arg1: i32, %arg2: i32) -> (i32, i32, i32) {
    %c0_i32 = arith.constant 0 : i32
    return %arg0, %arg1, %arg2 : i32, i32, i32
  }
  func.func @transform_1(%arg0: i32, %arg1: i32, %arg2: i32) -> (i32, i32, i32) {
    %c0_i32 = arith.constant 0 : i32
    %c0_i32_0 = arith.constant 0 : i32
    return %arg0, %arg2, %c0_i32 : i32, i32, i32
  }
  func.func @transform_2(%arg0: i32, %arg1: i32, %arg2: i32) -> (i32, i32, i32) {
    %c0_i32 = arith.constant 0 : i32
    %c0_i32_0 = arith.constant 0 : i32
    %c0_i32_1 = arith.constant 0 : i32
    return %arg0, %c0_i32, %c0_i32_0 : i32, i32, i32
  }
  func.func @transform_3(%arg0: i32, %arg1: i32, %arg2: i32) -> (i32, i32, i32) {
    %c0_i32 = arith.constant 0 : i32
    %c0_i32_0 = arith.constant 0 : i32
    return %arg0, %arg1, %c0_i32 : i32, i32, i32
  }
}

module attributes {stable_mosaic.version = 11 : i64} {
  func.func @_lrn_kernel(%arg0: i32, %arg1: memref<104x256xf32, #tpu.memory_space<vmem>>, %arg2: memref<104x256xf32, #tpu.memory_space<vmem>>) attributes {dimension_semantics = [#tpu.dimension_semantics<parallel>], iteration_bounds = array<i64: 1>, scalar_prefetch = 0 : i64, scratch_operands = 0 : i64, tpu.core_type = #tpu.core_type<tc>, window_params = [{transform_indices = @transform_0, window_bounds = array<i64: 104, 256>}, {transform_indices = @transform_1, window_bounds = array<i64: 104, 256>}]} {
    %c0 = arith.constant 0 : index
    %c0_0 = arith.constant 0 : index
    %0 = vector.load %arg1[%c0, %c0_0] : memref<104x256xf32, #tpu.memory_space<vmem>>, vector<104x256xf32>
    %1 = arith.mulf %0, %0 : vector<104x256xf32>
    %2 = tpu.iota {dimensions = array<i32: 0>} : vector<256x256xi32>
    %3 = tpu.iota {dimensions = array<i32: 1>} : vector<256x256xi32>
    %4 = arith.subi %2, %3 : vector<256x256xi32>
    %5 = math.absi %4 : vector<256x256xi32>
    %c2_i32 = arith.constant 2 : i32
    %6 = vector.broadcast %c2_i32 : i32 to vector<256x256xi32>
    %7 = arith.cmpi sle, %5, %6 : vector<256x256xi32>
    %8 = arith.extui %7 : vector<256x256xi1> to vector<256x256xi32>
    %9 = arith.sitofp %8 : vector<256x256xi32> to vector<256x256xf32>
    %cst = arith.constant dense<0.000000e+00> : vector<104x256xf32>
    %10 = tpu.matmul %1, %9, %cst {dimension_numbers = #tpu.dot_dimension_numbers<[1], [0], [0], [1], [0, 0, 1, 1], [], []>} : vector<104x256xf32>, vector<256x256xf32>, vector<104x256xf32> -> vector<104x256xf32>
    %cst_1 = arith.constant 2.000000e-05 : f32
    %11 = vector.broadcast %cst_1 : f32 to vector<104x256xf32>
    %12 = arith.mulf %10, %11 : vector<104x256xf32>
    %cst_2 = arith.constant 1.000000e+00 : f32
    %13 = vector.broadcast %cst_2 : f32 to vector<104x256xf32>
    %14 = arith.addf %12, %13 : vector<104x256xf32>
    %15 = math.rsqrt %14 : vector<104x256xf32>
    %16 = math.sqrt %15 : vector<104x256xf32>
    %17 = arith.mulf %15, %16 : vector<104x256xf32>
    %18 = arith.mulf %0, %17 : vector<104x256xf32>
    %c0_3 = arith.constant 0 : index
    %c0_4 = arith.constant 0 : index
    %19 = vector.load %arg2[%c0_3, %c0_4] : memref<104x256xf32, #tpu.memory_space<vmem>>, vector<104x256xf32>
    tpu.vector_store %arg2[%c0_3, %c0_4], %18 {strides = array<i32>} : memref<104x256xf32, #tpu.memory_space<vmem>>, vector<104x256xf32>,
    return
  }
  func.func @transform_0(%arg0: i32) -> (i32, i32) {
    %c0_i32 = arith.constant 0 : i32
    %c0_i32_0 = arith.constant 0 : i32
    return %arg0, %c0_i32 : i32, i32
  }
  func.func @transform_1(%arg0: i32) -> (i32, i32) {
    %c0_i32 = arith.constant 0 : i32
    %c0_i32_0 = arith.constant 0 : i32
    return %arg0, %c0_i32 : i32, i32
  }
}

module attributes {stable_mosaic.version = 11 : i64} {
  func.func @_maxpool_3x3_s2_kernel(%arg0: i32, %arg1: memref<1x7x7x256xf32, #tpu.memory_space<vmem>>, %arg2: memref<1x3x3x256xf32, #tpu.memory_space<vmem>>) attributes {dimension_semantics = [#tpu.dimension_semantics<parallel>], iteration_bounds = array<i64: 2>, scalar_prefetch = 0 : i64, scratch_operands = 0 : i64, tpu.core_type = #tpu.core_type<tc>, window_params = [{transform_indices = @transform_0, window_bounds = array<i64: 1, 7, 7, 256>}, {transform_indices = @transform_1, window_bounds = array<i64: 1, 3, 3, 256>}]} {
    %c0 = arith.constant 0 : index
    %c0_0 = arith.constant 0 : index
    %c0_1 = arith.constant 0 : index
    %c0_2 = arith.constant 0 : index
    %0 = vector.load %arg1[%c0, %c0_0, %c0_1, %c0_2] : memref<1x7x7x256xf32, #tpu.memory_space<vmem>>, vector<1x1x7x256xf32>
    %1 = vector.shape_cast %0 : vector<1x1x7x256xf32> to vector<7x256xf32>
    %c0_3 = arith.constant 0 : index
    %c1 = arith.constant 1 : index
    %c0_4 = arith.constant 0 : index
    %c0_5 = arith.constant 0 : index
    %2 = vector.load %arg1[%c0_3, %c1, %c0_4, %c0_5] : memref<1x7x7x256xf32, #tpu.memory_space<vmem>>, vector<1x1x7x256xf32>
    %3 = vector.shape_cast %2 : vector<1x1x7x256xf32> to vector<7x256xf32>
    %4 = arith.maximumf %1, %3 : vector<7x256xf32>
    %c0_6 = arith.constant 0 : index
    %c2 = arith.constant 2 : index
    %c0_7 = arith.constant 0 : index
    %c0_8 = arith.constant 0 : index
    %5 = vector.load %arg1[%c0_6, %c2, %c0_7, %c0_8] : memref<1x7x7x256xf32, #tpu.memory_space<vmem>>, vector<1x1x7x256xf32>
    %6 = vector.shape_cast %5 : vector<1x1x7x256xf32> to vector<7x256xf32>
    %7 = arith.maximumf %4, %6 : vector<7x256xf32>
    %8 = vector.extract_strided_slice %7 {offsets = [0, 0], sizes = [3, 256], strides = [1, 1]} : vector<7x256xf32> to vector<3x256xf32>
    %cst = arith.constant dense<0xFF800000> : vector<256xf32>
    %9 = vector.multi_reduction <maximumf>, %8, %cst [0] : vector<3x256xf32> to vector<256xf32>
    %10 = vector.shape_cast %9 : vector<256xf32> to vector<1x256xf32>
    %11 = vector.extract_strided_slice %7 {offsets = [2, 0], sizes = [3, 256], strides = [1, 1]} : vector<7x256xf32> to vector<3x256xf32>
    %cst_9 = arith.constant dense<0xFF800000> : vector<256xf32>
    %12 = vector.multi_reduction <maximumf>, %11, %cst_9 [0] : vector<3x256xf32> to vector<256xf32>
    %13 = vector.shape_cast %12 : vector<256xf32> to vector<1x256xf32>
    %14 = vector.extract_strided_slice %7 {offsets = [4, 0], sizes = [3, 256], strides = [1, 1]} : vector<7x256xf32> to vector<3x256xf32>
    %cst_10 = arith.constant dense<0xFF800000> : vector<256xf32>
    %15 = vector.multi_reduction <maximumf>, %14, %cst_10 [0] : vector<3x256xf32> to vector<256xf32>
    %16 = vector.shape_cast %15 : vector<256xf32> to vector<1x256xf32>
    %17 = tpu.concatenate %10, %13, %16 in 0 : vector<1x256xf32>, vector<1x256xf32>, vector<1x256xf32> -> vector<3x256xf32>
    %c0_11 = arith.constant 0 : index
    %c0_12 = arith.constant 0 : index
    %c0_13 = arith.constant 0 : index
    %c0_14 = arith.constant 0 : index
    %18 = vector.load %arg2[%c0_11, %c0_12, %c0_13, %c0_14] : memref<1x3x3x256xf32, #tpu.memory_space<vmem>>, vector<1x1x3x256xf32>
    %19 = vector.shape_cast %18 : vector<1x1x3x256xf32> to vector<3x256xf32>
    %20 = vector.shape_cast %17 : vector<3x256xf32> to vector<1x1x3x256xf32>
    tpu.vector_store %arg2[%c0_11, %c0_12, %c0_13, %c0_14], %20 {strides = array<i32>} : memref<1x3x3x256xf32, #tpu.memory_space<vmem>>, vector<1x1x3x256xf32>,
    %c0_15 = arith.constant 0 : index
    %c2_16 = arith.constant 2 : index
    %c0_17 = arith.constant 0 : index
    %c0_18 = arith.constant 0 : index
    %21 = vector.load %arg1[%c0_15, %c2_16, %c0_17, %c0_18] : memref<1x7x7x256xf32, #tpu.memory_space<vmem>>, vector<1x1x7x256xf32>
    %22 = vector.shape_cast %21 : vector<1x1x7x256xf32> to vector<7x256xf32>
    %c0_19 = arith.constant 0 : index
    %c3 = arith.constant 3 : index
    %c0_20 = arith.constant 0 : index
    %c0_21 = arith.constant 0 : index
    %23 = vector.load %arg1[%c0_19, %c3, %c0_20, %c0_21] : memref<1x7x7x256xf32, #tpu.memory_space<vmem>>, vector<1x1x7x256xf32>
    %24 = vector.shape_cast %23 : vector<1x1x7x256xf32> to vector<7x256xf32>
    %25 = arith.maximumf %22, %24 : vector<7x256xf32>
    %c0_22 = arith.constant 0 : index
    %c4 = arith.constant 4 : index
    %c0_23 = arith.constant 0 : index
    %c0_24 = arith.constant 0 : index
    %26 = vector.load %arg1[%c0_22, %c4, %c0_23, %c0_24] : memref<1x7x7x256xf32, #tpu.memory_space<vmem>>, vector<1x1x7x256xf32>
    %27 = vector.shape_cast %26 : vector<1x1x7x256xf32> to vector<7x256xf32>
    %28 = arith.maximumf %25, %27 : vector<7x256xf32>
    %29 = vector.extract_strided_slice %28 {offsets = [0, 0], sizes = [3, 256], strides = [1, 1]} : vector<7x256xf32> to vector<3x256xf32>
    %cst_25 = arith.constant dense<0xFF800000> : vector<256xf32>
    %30 = vector.multi_reduction <maximumf>, %29, %cst_25 [0] : vector<3x256xf32> to vector<256xf32>
    %31 = vector.shape_cast %30 : vector<256xf32> to vector<1x256xf32>
    %32 = vector.extract_strided_slice %28 {offsets = [2, 0], sizes = [3, 256], strides = [1, 1]} : vector<7x256xf32> to vector<3x256xf32>
    %cst_26 = arith.constant dense<0xFF800000> : vector<256xf32>
    %33 = vector.multi_reduction <maximumf>, %32, %cst_26 [0] : vector<3x256xf32> to vector<256xf32>
    %34 = vector.shape_cast %33 : vector<256xf32> to vector<1x256xf32>
    %35 = vector.extract_strided_slice %28 {offsets = [4, 0], sizes = [3, 256], strides = [1, 1]} : vector<7x256xf32> to vector<3x256xf32>
    %cst_27 = arith.constant dense<0xFF800000> : vector<256xf32>
    %36 = vector.multi_reduction <maximumf>, %35, %cst_27 [0] : vector<3x256xf32> to vector<256xf32>
    %37 = vector.shape_cast %36 : vector<256xf32> to vector<1x256xf32>
    %38 = tpu.concatenate %31, %34, %37 in 0 : vector<1x256xf32>, vector<1x256xf32>, vector<1x256xf32> -> vector<3x256xf32>
    %c0_28 = arith.constant 0 : index
    %c1_29 = arith.constant 1 : index
    %c0_30 = arith.constant 0 : index
    %c0_31 = arith.constant 0 : index
    %39 = vector.load %arg2[%c0_28, %c1_29, %c0_30, %c0_31] : memref<1x3x3x256xf32, #tpu.memory_space<vmem>>, vector<1x1x3x256xf32>
    %40 = vector.shape_cast %39 : vector<1x1x3x256xf32> to vector<3x256xf32>
    %41 = vector.shape_cast %38 : vector<3x256xf32> to vector<1x1x3x256xf32>
    tpu.vector_store %arg2[%c0_28, %c1_29, %c0_30, %c0_31], %41 {strides = array<i32>} : memref<1x3x3x256xf32, #tpu.memory_space<vmem>>, vector<1x1x3x256xf32>,
    %c0_32 = arith.constant 0 : index
    %c4_33 = arith.constant 4 : index
    %c0_34 = arith.constant 0 : index
    %c0_35 = arith.constant 0 : index
    %42 = vector.load %arg1[%c0_32, %c4_33, %c0_34, %c0_35] : memref<1x7x7x256xf32, #tpu.memory_space<vmem>>, vector<1x1x7x256xf32>
    %43 = vector.shape_cast %42 : vector<1x1x7x256xf32> to vector<7x256xf32>
    %c0_36 = arith.constant 0 : index
    %c5 = arith.constant 5 : index
    %c0_37 = arith.constant 0 : index
    %c0_38 = arith.constant 0 : index
    %44 = vector.load %arg1[%c0_36, %c5, %c0_37, %c0_38] : memref<1x7x7x256xf32, #tpu.memory_space<vmem>>, vector<1x1x7x256xf32>
    %45 = vector.shape_cast %44 : vector<1x1x7x256xf32> to vector<7x256xf32>
    %46 = arith.maximumf %43, %45 : vector<7x256xf32>
    %c0_39 = arith.constant 0 : index
    %c6 = arith.constant 6 : index
    %c0_40 = arith.constant 0 : index
    %c0_41 = arith.constant 0 : index
    %47 = vector.load %arg1[%c0_39, %c6, %c0_40, %c0_41] : memref<1x7x7x256xf32, #tpu.memory_space<vmem>>, vector<1x1x7x256xf32>
    %48 = vector.shape_cast %47 : vector<1x1x7x256xf32> to vector<7x256xf32>
    %49 = arith.maximumf %46, %48 : vector<7x256xf32>
    %50 = vector.extract_strided_slice %49 {offsets = [0, 0], sizes = [3, 256], strides = [1, 1]} : vector<7x256xf32> to vector<3x256xf32>
    %cst_42 = arith.constant dense<0xFF800000> : vector<256xf32>
    %51 = vector.multi_reduction <maximumf>, %50, %cst_42 [0] : vector<3x256xf32> to vector<256xf32>
    %52 = vector.shape_cast %51 : vector<256xf32> to vector<1x256xf32>
    %53 = vector.extract_strided_slice %49 {offsets = [2, 0], sizes = [3, 256], strides = [1, 1]} : vector<7x256xf32> to vector<3x256xf32>
    %cst_43 = arith.constant dense<0xFF800000> : vector<256xf32>
    %54 = vector.multi_reduction <maximumf>, %53, %cst_43 [0] : vector<3x256xf32> to vector<256xf32>
    %55 = vector.shape_cast %54 : vector<256xf32> to vector<1x256xf32>
    %56 = vector.extract_strided_slice %49 {offsets = [4, 0], sizes = [3, 256], strides = [1, 1]} : vector<7x256xf32> to vector<3x256xf32>
    %cst_44 = arith.constant dense<0xFF800000> : vector<256xf32>
    %57 = vector.multi_reduction <maximumf>, %56, %cst_44 [0] : vector<3x256xf32> to vector<256xf32>
    %58 = vector.shape_cast %57 : vector<256xf32> to vector<1x256xf32>
    %59 = tpu.concatenate %52, %55, %58 in 0 : vector<1x256xf32>, vector<1x256xf32>, vector<1x256xf32> -> vector<3x256xf32>
    %c0_45 = arith.constant 0 : index
    %c2_46 = arith.constant 2 : index
    %c0_47 = arith.constant 0 : index
    %c0_48 = arith.constant 0 : index
    %60 = vector.load %arg2[%c0_45, %c2_46, %c0_47, %c0_48] : memref<1x3x3x256xf32, #tpu.memory_space<vmem>>, vector<1x1x3x256xf32>
    %61 = vector.shape_cast %60 : vector<1x1x3x256xf32> to vector<3x256xf32>
    %62 = vector.shape_cast %59 : vector<3x256xf32> to vector<1x1x3x256xf32>
    tpu.vector_store %arg2[%c0_45, %c2_46, %c0_47, %c0_48], %62 {strides = array<i32>} : memref<1x3x3x256xf32, #tpu.memory_space<vmem>>, vector<1x1x3x256xf32>,
    return
  }
  func.func @transform_0(%arg0: i32) -> (i32, i32, i32, i32) {
    %c0_i32 = arith.constant 0 : i32
    %c0_i32_0 = arith.constant 0 : i32
    %c0_i32_1 = arith.constant 0 : i32
    %c0_i32_2 = arith.constant 0 : i32
    return %arg0, %c0_i32, %c0_i32_0, %c0_i32_1 : i32, i32, i32, i32
  }
  func.func @transform_1(%arg0: i32) -> (i32, i32, i32, i32) {
    %c0_i32 = arith.constant 0 : i32
    %c0_i32_0 = arith.constant 0 : i32
    %c0_i32_1 = arith.constant 0 : i32
    %c0_i32_2 = arith.constant 0 : i32
    return %arg0, %c0_i32, %c0_i32_0, %c0_i32_1 : i32, i32, i32, i32
  }
}

module attributes {stable_mosaic.version = 11 : i64} {
  func.func @_gemm_bias_relu_kernel(%arg0: i32, %arg1: i32, %arg2: i32, %arg3: memref<1x24x768xbf16, #tpu.memory_space<vmem>>, %arg4: memref<1x768x384xbf16, #tpu.memory_space<vmem>>, %arg5: memref<1x1x384xf32, #tpu.memory_space<vmem>>, %arg6: memref<1x24x384xf32, #tpu.memory_space<vmem>>, %arg7: memref<24x384xf32, #tpu.memory_space<vmem>>) attributes {dimension_semantics = [#tpu.dimension_semantics<parallel>, #tpu.dimension_semantics<parallel>, #tpu.dimension_semantics<arbitrary>], iteration_bounds = array<i64: 1, 1, 3>, scalar_prefetch = 0 : i64, scratch_operands = 1 : i64, tpu.core_type = #tpu.core_type<tc>, window_params = [{transform_indices = @transform_0, window_bounds = array<i64: 1, 24, 768>}, {transform_indices = @transform_1, window_bounds = array<i64: 1, 768, 384>}, {transform_indices = @transform_2, window_bounds = array<i64: 1, 1, 384>}, {transform_indices = @transform_3, window_bounds = array<i64: 1, 24, 384>}]} {
    %c0_i32 = arith.constant 0 : i32
    %0 = arith.cmpi eq, %arg2, %c0_i32 : i32
    %1 = arith.extui %0 : i1 to i32
    %c0_i32_0 = arith.constant 0 : i32
    %2 = arith.cmpi ne, %1, %c0_i32_0 : i32
    scf.if %2 {
      %cst_11 = arith.constant 0.000000e+00 : f32
      %14 = vector.broadcast %cst_11 : f32 to vector<24x384xf32>
      %c0_12 = arith.constant 0 : index
      %c0_13 = arith.constant 0 : index
      %15 = vector.load %arg7[%c0_12, %c0_13] : memref<24x384xf32, #tpu.memory_space<vmem>>, vector<24x384xf32>
      tpu.vector_store %arg7[%c0_12, %c0_13], %14 {strides = array<i32>} : memref<24x384xf32, #tpu.memory_space<vmem>>, vector<24x384xf32>,
    } else {
    }
    %c0 = arith.constant 0 : index
    %c0_1 = arith.constant 0 : index
    %3 = vector.load %arg7[%c0, %c0_1] : memref<24x384xf32, #tpu.memory_space<vmem>>, vector<24x384xf32>
    %c0_2 = arith.constant 0 : index
    %c0_3 = arith.constant 0 : index
    %c0_4 = arith.constant 0 : index
    %4 = vector.load %arg3[%c0_2, %c0_3, %c0_4] : memref<1x24x768xbf16, #tpu.memory_space<vmem>>, vector<1x24x768xbf16>
    %5 = vector.shape_cast %4 : vector<1x24x768xbf16> to vector<24x768xbf16>
    %c0_5 = arith.constant 0 : index
    %c0_6 = arith.constant 0 : index
    %c0_7 = arith.constant 0 : index
    %6 = vector.load %arg4[%c0_5, %c0_6, %c0_7] : memref<1x768x384xbf16, #tpu.memory_space<vmem>>, vector<1x768x384xbf16>
    %7 = vector.shape_cast %6 : vector<1x768x384xbf16> to vector<768x384xbf16>
    %cst = arith.constant dense<0.000000e+00> : vector<24x384xf32>
    %8 = tpu.matmul %5, %7, %cst {dimension_numbers = #tpu.dot_dimension_numbers<[1], [0], [0], [1], [0, 0, 1, 1], [], []>} : vector<24x768xbf16>, vector<768x384xbf16>, vector<24x384xf32> -> vector<24x384xf32>
    %9 = arith.addf %3, %8 : vector<24x384xf32>
    %c0_8 = arith.constant 0 : index
    %c0_9 = arith.constant 0 : index
    %10 = vector.load %arg7[%c0_8, %c0_9] : memref<24x384xf32, #tpu.memory_space<vmem>>, vector<24x384xf32>
    tpu.vector_store %arg7[%c0_8, %c0_9], %9 {strides = array<i32>} : memref<24x384xf32, #tpu.memory_space<vmem>>, vector<24x384xf32>,
    %c2_i32 = arith.constant 2 : i32
    %11 = arith.cmpi eq, %arg2, %c2_i32 : i32
    %12 = arith.extui %11 : i1 to i32
    %c0_i32_10 = arith.constant 0 : i32
    %13 = arith.cmpi ne, %12, %c0_i32_10 : i32
    scf.if %13 {
      %c0_11 = arith.constant 0 : index
      %c0_12 = arith.constant 0 : index
      %14 = vector.load %arg7[%c0_11, %c0_12] : memref<24x384xf32, #tpu.memory_space<vmem>>, vector<24x384xf32>
      %c0_13 = arith.constant 0 : index
      %c0_14 = arith.constant 0 : index
      %c0_15 = arith.constant 0 : index
      %15 = vector.load %arg5[%c0_13, %c0_14, %c0_15] : memref<1x1x384xf32, #tpu.memory_space<vmem>>, vector<1x1x384xf32>
      %16 = vector.shape_cast %15 : vector<1x1x384xf32> to vector<1x384xf32>
      %17 = vector.broadcast %16 : vector<1x384xf32> to vector<24x384xf32>
      %18 = arith.addf %14, %17 : vector<24x384xf32>
      %cst_16 = arith.constant 0.000000e+00 : f32
      %19 = vector.broadcast %cst_16 : f32 to vector<24x384xf32>
      %20 = arith.maximumf %18, %19 : vector<24x384xf32>
      %c0_17 = arith.constant 0 : index
      %c0_18 = arith.constant 0 : index
      %c0_19 = arith.constant 0 : index
      %21 = vector.load %arg6[%c0_17, %c0_18, %c0_19] : memref<1x24x384xf32, #tpu.memory_space<vmem>>, vector<1x24x384xf32>
      %22 = vector.shape_cast %21 : vector<1x24x384xf32> to vector<24x384xf32>
      %23 = vector.shape_cast %20 : vector<24x384xf32> to vector<1x24x384xf32>
      tpu.vector_store %arg6[%c0_17, %c0_18, %c0_19], %23 {strides = array<i32>} : memref<1x24x384xf32, #tpu.memory_space<vmem>>, vector<1x24x384xf32>,
    } else {
    }
    return
  }
  func.func @transform_0(%arg0: i32, %arg1: i32, %arg2: i32) -> (i32, i32, i32) {
    %c0_i32 = arith.constant 0 : i32
    return %arg0, %arg1, %arg2 : i32, i32, i32
  }
  func.func @transform_1(%arg0: i32, %arg1: i32, %arg2: i32) -> (i32, i32, i32) {
    %c0_i32 = arith.constant 0 : i32
    %c0_i32_0 = arith.constant 0 : i32
    return %arg0, %arg2, %c0_i32 : i32, i32, i32
  }
  func.func @transform_2(%arg0: i32, %arg1: i32, %arg2: i32) -> (i32, i32, i32) {
    %c0_i32 = arith.constant 0 : i32
    %c0_i32_0 = arith.constant 0 : i32
    %c0_i32_1 = arith.constant 0 : i32
    return %arg0, %c0_i32, %c0_i32_0 : i32, i32, i32
  }
  func.func @transform_3(%arg0: i32, %arg1: i32, %arg2: i32) -> (i32, i32, i32) {
    %c0_i32 = arith.constant 0 : i32
    %c0_i32_0 = arith.constant 0 : i32
    return %arg0, %arg1, %c0_i32 : i32, i32, i32
  }
}

module attributes {stable_mosaic.version = 11 : i64} {
  func.func @_gemm_bias_relu_kernel(%arg0: i32, %arg1: i32, %arg2: i32, %arg3: memref<1x24x896xbf16, #tpu.memory_space<vmem>>, %arg4: memref<1x896x256xbf16, #tpu.memory_space<vmem>>, %arg5: memref<1x1x256xf32, #tpu.memory_space<vmem>>, %arg6: memref<1x24x256xf32, #tpu.memory_space<vmem>>, %arg7: memref<24x256xf32, #tpu.memory_space<vmem>>) attributes {dimension_semantics = [#tpu.dimension_semantics<parallel>, #tpu.dimension_semantics<parallel>, #tpu.dimension_semantics<arbitrary>], iteration_bounds = array<i64: 2, 1, 2>, scalar_prefetch = 0 : i64, scratch_operands = 1 : i64, tpu.core_type = #tpu.core_type<tc>, window_params = [{transform_indices = @transform_0, window_bounds = array<i64: 1, 24, 896>}, {transform_indices = @transform_1, window_bounds = array<i64: 1, 896, 256>}, {transform_indices = @transform_2, window_bounds = array<i64: 1, 1, 256>}, {transform_indices = @transform_3, window_bounds = array<i64: 1, 24, 256>}]} {
    %c0_i32 = arith.constant 0 : i32
    %0 = arith.cmpi eq, %arg2, %c0_i32 : i32
    %1 = arith.extui %0 : i1 to i32
    %c0_i32_0 = arith.constant 0 : i32
    %2 = arith.cmpi ne, %1, %c0_i32_0 : i32
    scf.if %2 {
      %cst_11 = arith.constant 0.000000e+00 : f32
      %14 = vector.broadcast %cst_11 : f32 to vector<24x256xf32>
      %c0_12 = arith.constant 0 : index
      %c0_13 = arith.constant 0 : index
      %15 = vector.load %arg7[%c0_12, %c0_13] : memref<24x256xf32, #tpu.memory_space<vmem>>, vector<24x256xf32>
      tpu.vector_store %arg7[%c0_12, %c0_13], %14 {strides = array<i32>} : memref<24x256xf32, #tpu.memory_space<vmem>>, vector<24x256xf32>,
    } else {
    }
    %c0 = arith.constant 0 : index
    %c0_1 = arith.constant 0 : index
    %3 = vector.load %arg7[%c0, %c0_1] : memref<24x256xf32, #tpu.memory_space<vmem>>, vector<24x256xf32>
    %c0_2 = arith.constant 0 : index
    %c0_3 = arith.constant 0 : index
    %c0_4 = arith.constant 0 : index
    %4 = vector.load %arg3[%c0_2, %c0_3, %c0_4] : memref<1x24x896xbf16, #tpu.memory_space<vmem>>, vector<1x24x896xbf16>
    %5 = vector.shape_cast %4 : vector<1x24x896xbf16> to vector<24x896xbf16>
    %c0_5 = arith.constant 0 : index
    %c0_6 = arith.constant 0 : index
    %c0_7 = arith.constant 0 : index
    %6 = vector.load %arg4[%c0_5, %c0_6, %c0_7] : memref<1x896x256xbf16, #tpu.memory_space<vmem>>, vector<1x896x256xbf16>
    %7 = vector.shape_cast %6 : vector<1x896x256xbf16> to vector<896x256xbf16>
    %cst = arith.constant dense<0.000000e+00> : vector<24x256xf32>
    %8 = tpu.matmul %5, %7, %cst {dimension_numbers = #tpu.dot_dimension_numbers<[1], [0], [0], [1], [0, 0, 1, 1], [], []>} : vector<24x896xbf16>, vector<896x256xbf16>, vector<24x256xf32> -> vector<24x256xf32>
    %9 = arith.addf %3, %8 : vector<24x256xf32>
    %c0_8 = arith.constant 0 : index
    %c0_9 = arith.constant 0 : index
    %10 = vector.load %arg7[%c0_8, %c0_9] : memref<24x256xf32, #tpu.memory_space<vmem>>, vector<24x256xf32>
    tpu.vector_store %arg7[%c0_8, %c0_9], %9 {strides = array<i32>} : memref<24x256xf32, #tpu.memory_space<vmem>>, vector<24x256xf32>,
    %c1_i32 = arith.constant 1 : i32
    %11 = arith.cmpi eq, %arg2, %c1_i32 : i32
    %12 = arith.extui %11 : i1 to i32
    %c0_i32_10 = arith.constant 0 : i32
    %13 = arith.cmpi ne, %12, %c0_i32_10 : i32
    scf.if %13 {
      %c0_11 = arith.constant 0 : index
      %c0_12 = arith.constant 0 : index
      %14 = vector.load %arg7[%c0_11, %c0_12] : memref<24x256xf32, #tpu.memory_space<vmem>>, vector<24x256xf32>
      %c0_13 = arith.constant 0 : index
      %c0_14 = arith.constant 0 : index
      %c0_15 = arith.constant 0 : index
      %15 = vector.load %arg5[%c0_13, %c0_14, %c0_15] : memref<1x1x256xf32, #tpu.memory_space<vmem>>, vector<1x1x256xf32>
      %16 = vector.shape_cast %15 : vector<1x1x256xf32> to vector<1x256xf32>
      %17 = vector.broadcast %16 : vector<1x256xf32> to vector<24x256xf32>
      %18 = arith.addf %14, %17 : vector<24x256xf32>
      %cst_16 = arith.constant 0.000000e+00 : f32
      %19 = vector.broadcast %cst_16 : f32 to vector<24x256xf32>
      %20 = arith.maximumf %18, %19 : vector<24x256xf32>
      %c0_17 = arith.constant 0 : index
      %c0_18 = arith.constant 0 : index
      %c0_19 = arith.constant 0 : index
      %21 = vector.load %arg6[%c0_17, %c0_18, %c0_19] : memref<1x24x256xf32, #tpu.memory_space<vmem>>, vector<1x24x256xf32>
      %22 = vector.shape_cast %21 : vector<1x24x256xf32> to vector<24x256xf32>
      %23 = vector.shape_cast %20 : vector<24x256xf32> to vector<1x24x256xf32>
      tpu.vector_store %arg6[%c0_17, %c0_18, %c0_19], %23 {strides = array<i32>} : memref<1x24x256xf32, #tpu.memory_space<vmem>>, vector<1x24x256xf32>,
    } else {
    }
    return
  }
  func.func @transform_0(%arg0: i32, %arg1: i32, %arg2: i32) -> (i32, i32, i32) {
    %c0_i32 = arith.constant 0 : i32
    return %arg0, %arg1, %arg2 : i32, i32, i32
  }
  func.func @transform_1(%arg0: i32, %arg1: i32, %arg2: i32) -> (i32, i32, i32) {
    %c0_i32 = arith.constant 0 : i32
    %c0_i32_0 = arith.constant 0 : i32
    return %arg0, %arg2, %c0_i32 : i32, i32, i32
  }
  func.func @transform_2(%arg0: i32, %arg1: i32, %arg2: i32) -> (i32, i32, i32) {
    %c0_i32 = arith.constant 0 : i32
    %c0_i32_0 = arith.constant 0 : i32
    %c0_i32_1 = arith.constant 0 : i32
    return %arg0, %c0_i32, %c0_i32_0 : i32, i32, i32
  }
  func.func @transform_3(%arg0: i32, %arg1: i32, %arg2: i32) -> (i32, i32, i32) {
    %c0_i32 = arith.constant 0 : i32
    %c0_i32_0 = arith.constant 0 : i32
    return %arg0, %arg1, %c0_i32 : i32, i32, i32
  }
}

module attributes {stable_mosaic.version = 11 : i64} {
  func.func @_gemm_bias_relu_kernel(%arg0: i32, %arg1: i32, %arg2: i32, %arg3: memref<1x24x896xbf16, #tpu.memory_space<vmem>>, %arg4: memref<1x896x128xbf16, #tpu.memory_space<vmem>>, %arg5: memref<1x1x128xf32, #tpu.memory_space<vmem>>, %arg6: memref<1x24x128xf32, #tpu.memory_space<vmem>>, %arg7: memref<24x128xf32, #tpu.memory_space<vmem>>) attributes {dimension_semantics = [#tpu.dimension_semantics<parallel>, #tpu.dimension_semantics<parallel>, #tpu.dimension_semantics<arbitrary>], iteration_bounds = array<i64: 2, 1, 2>, scalar_prefetch = 0 : i64, scratch_operands = 1 : i64, tpu.core_type = #tpu.core_type<tc>, window_params = [{transform_indices = @transform_0, window_bounds = array<i64: 1, 24, 896>}, {transform_indices = @transform_1, window_bounds = array<i64: 1, 896, 128>}, {transform_indices = @transform_2, window_bounds = array<i64: 1, 1, 128>}, {transform_indices = @transform_3, window_bounds = array<i64: 1, 24, 128>}]} {
    %c0_i32 = arith.constant 0 : i32
    %0 = arith.cmpi eq, %arg2, %c0_i32 : i32
    %1 = arith.extui %0 : i1 to i32
    %c0_i32_0 = arith.constant 0 : i32
    %2 = arith.cmpi ne, %1, %c0_i32_0 : i32
    scf.if %2 {
      %cst_11 = arith.constant 0.000000e+00 : f32
      %14 = vector.broadcast %cst_11 : f32 to vector<24x128xf32>
      %c0_12 = arith.constant 0 : index
      %c0_13 = arith.constant 0 : index
      %15 = vector.load %arg7[%c0_12, %c0_13] : memref<24x128xf32, #tpu.memory_space<vmem>>, vector<24x128xf32>
      tpu.vector_store %arg7[%c0_12, %c0_13], %14 {strides = array<i32>} : memref<24x128xf32, #tpu.memory_space<vmem>>, vector<24x128xf32>,
    } else {
    }
    %c0 = arith.constant 0 : index
    %c0_1 = arith.constant 0 : index
    %3 = vector.load %arg7[%c0, %c0_1] : memref<24x128xf32, #tpu.memory_space<vmem>>, vector<24x128xf32>
    %c0_2 = arith.constant 0 : index
    %c0_3 = arith.constant 0 : index
    %c0_4 = arith.constant 0 : index
    %4 = vector.load %arg3[%c0_2, %c0_3, %c0_4] : memref<1x24x896xbf16, #tpu.memory_space<vmem>>, vector<1x24x896xbf16>
    %5 = vector.shape_cast %4 : vector<1x24x896xbf16> to vector<24x896xbf16>
    %c0_5 = arith.constant 0 : index
    %c0_6 = arith.constant 0 : index
    %c0_7 = arith.constant 0 : index
    %6 = vector.load %arg4[%c0_5, %c0_6, %c0_7] : memref<1x896x128xbf16, #tpu.memory_space<vmem>>, vector<1x896x128xbf16>
    %7 = vector.shape_cast %6 : vector<1x896x128xbf16> to vector<896x128xbf16>
    %cst = arith.constant dense<0.000000e+00> : vector<24x128xf32>
    %8 = tpu.matmul %5, %7, %cst {dimension_numbers = #tpu.dot_dimension_numbers<[1], [0], [0], [1], [0, 0, 1, 1], [], []>} : vector<24x896xbf16>, vector<896x128xbf16>, vector<24x128xf32> -> vector<24x128xf32>
    %9 = arith.addf %3, %8 : vector<24x128xf32>
    %c0_8 = arith.constant 0 : index
    %c0_9 = arith.constant 0 : index
    %10 = vector.load %arg7[%c0_8, %c0_9] : memref<24x128xf32, #tpu.memory_space<vmem>>, vector<24x128xf32>
    tpu.vector_store %arg7[%c0_8, %c0_9], %9 {strides = array<i32>} : memref<24x128xf32, #tpu.memory_space<vmem>>, vector<24x128xf32>,
    %c1_i32 = arith.constant 1 : i32
    %11 = arith.cmpi eq, %arg2, %c1_i32 : i32
    %12 = arith.extui %11 : i1 to i32
    %c0_i32_10 = arith.constant 0 : i32
    %13 = arith.cmpi ne, %12, %c0_i32_10 : i32
    scf.if %13 {
      %c0_11 = arith.constant 0 : index
      %c0_12 = arith.constant 0 : index
      %14 = vector.load %arg7[%c0_11, %c0_12] : memref<24x128xf32, #tpu.memory_space<vmem>>, vector<24x128xf32>
      %c0_13 = arith.constant 0 : index
      %c0_14 = arith.constant 0 : index
      %c0_15 = arith.constant 0 : index
      %15 = vector.load %arg5[%c0_13, %c0_14, %c0_15] : memref<1x1x128xf32, #tpu.memory_space<vmem>>, vector<1x1x128xf32>
      %16 = vector.shape_cast %15 : vector<1x1x128xf32> to vector<1x128xf32>
      %17 = vector.broadcast %16 : vector<1x128xf32> to vector<24x128xf32>
      %18 = arith.addf %14, %17 : vector<24x128xf32>
      %cst_16 = arith.constant 0.000000e+00 : f32
      %19 = vector.broadcast %cst_16 : f32 to vector<24x128xf32>
      %20 = arith.maximumf %18, %19 : vector<24x128xf32>
      %c0_17 = arith.constant 0 : index
      %c0_18 = arith.constant 0 : index
      %c0_19 = arith.constant 0 : index
      %21 = vector.load %arg6[%c0_17, %c0_18, %c0_19] : memref<1x24x128xf32, #tpu.memory_space<vmem>>, vector<1x24x128xf32>
      %22 = vector.shape_cast %21 : vector<1x24x128xf32> to vector<24x128xf32>
      %23 = vector.shape_cast %20 : vector<24x128xf32> to vector<1x24x128xf32>
      tpu.vector_store %arg6[%c0_17, %c0_18, %c0_19], %23 {strides = array<i32>} : memref<1x24x128xf32, #tpu.memory_space<vmem>>, vector<1x24x128xf32>,
    } else {
    }
    return
  }
  func.func @transform_0(%arg0: i32, %arg1: i32, %arg2: i32) -> (i32, i32, i32) {
    %c0_i32 = arith.constant 0 : i32
    return %arg0, %arg1, %arg2 : i32, i32, i32
  }
  func.func @transform_1(%arg0: i32, %arg1: i32, %arg2: i32) -> (i32, i32, i32) {
    %c0_i32 = arith.constant 0 : i32
    %c0_i32_0 = arith.constant 0 : i32
    return %arg0, %arg2, %c0_i32 : i32, i32, i32
  }
  func.func @transform_2(%arg0: i32, %arg1: i32, %arg2: i32) -> (i32, i32, i32) {
    %c0_i32 = arith.constant 0 : i32
    %c0_i32_0 = arith.constant 0 : i32
    %c0_i32_1 = arith.constant 0 : i32
    return %arg0, %c0_i32, %c0_i32_0 : i32, i32, i32
  }
  func.func @transform_3(%arg0: i32, %arg1: i32, %arg2: i32) -> (i32, i32, i32) {
    %c0_i32 = arith.constant 0 : i32
    %c0_i32_0 = arith.constant 0 : i32
    return %arg0, %arg1, %c0_i32 : i32, i32, i32
  }
}

module attributes {stable_mosaic.version = 11 : i64} {
  func.func @_maxpool_3x3_s2_kernel(%arg0: i32, %arg1: memref<1x3x3x256xf32, #tpu.memory_space<vmem>>, %arg2: memref<1x1x1x256xf32, #tpu.memory_space<vmem>>) attributes {dimension_semantics = [#tpu.dimension_semantics<parallel>], iteration_bounds = array<i64: 2>, scalar_prefetch = 0 : i64, scratch_operands = 0 : i64, tpu.core_type = #tpu.core_type<tc>, window_params = [{transform_indices = @transform_0, window_bounds = array<i64: 1, 3, 3, 256>}, {transform_indices = @transform_1, window_bounds = array<i64: 1, 1, 1, 256>}]} {
    %c0 = arith.constant 0 : index
    %c0_0 = arith.constant 0 : index
    %c0_1 = arith.constant 0 : index
    %c0_2 = arith.constant 0 : index
    %0 = vector.load %arg1[%c0, %c0_0, %c0_1, %c0_2] : memref<1x3x3x256xf32, #tpu.memory_space<vmem>>, vector<1x1x3x256xf32>
    %1 = vector.shape_cast %0 : vector<1x1x3x256xf32> to vector<3x256xf32>
    %c0_3 = arith.constant 0 : index
    %c1 = arith.constant 1 : index
    %c0_4 = arith.constant 0 : index
    %c0_5 = arith.constant 0 : index
    %2 = vector.load %arg1[%c0_3, %c1, %c0_4, %c0_5] : memref<1x3x3x256xf32, #tpu.memory_space<vmem>>, vector<1x1x3x256xf32>
    %3 = vector.shape_cast %2 : vector<1x1x3x256xf32> to vector<3x256xf32>
    %4 = arith.maximumf %1, %3 : vector<3x256xf32>
    %c0_6 = arith.constant 0 : index
    %c2 = arith.constant 2 : index
    %c0_7 = arith.constant 0 : index
    %c0_8 = arith.constant 0 : index
    %5 = vector.load %arg1[%c0_6, %c2, %c0_7, %c0_8] : memref<1x3x3x256xf32, #tpu.memory_space<vmem>>, vector<1x1x3x256xf32>
    %6 = vector.shape_cast %5 : vector<1x1x3x256xf32> to vector<3x256xf32>
    %7 = arith.maximumf %4, %6 : vector<3x256xf32>
    %cst = arith.constant dense<0xFF800000> : vector<256xf32>
    %8 = vector.multi_reduction <maximumf>, %7, %cst [0] : vector<3x256xf32> to vector<256xf32>
    %9 = vector.shape_cast %8 : vector<256xf32> to vector<1x256xf32>
    %c0_9 = arith.constant 0 : index
    %c0_10 = arith.constant 0 : index
    %c0_11 = arith.constant 0 : index
    %c0_12 = arith.constant 0 : index
    %10 = vector.load %arg2[%c0_9, %c0_10, %c0_11, %c0_12] : memref<1x1x1x256xf32, #tpu.memory_space<vmem>>, vector<1x1x1x256xf32>
    %11 = vector.shape_cast %10 : vector<1x1x1x256xf32> to vector<1x256xf32>
    %12 = vector.shape_cast %9 : vector<1x256xf32> to vector<1x1x1x256xf32>
    tpu.vector_store %arg2[%c0_9, %c0_10, %c0_11, %c0_12], %12 {strides = array<i32>} : memref<1x1x1x256xf32, #tpu.memory_space<vmem>>, vector<1x1x1x256xf32>,
    return
  }
  func.func @transform_0(%arg0: i32) -> (i32, i32, i32, i32) {
    %c0_i32 = arith.constant 0 : i32
    %c0_i32_0 = arith.constant 0 : i32
    %c0_i32_1 = arith.constant 0 : i32
    %c0_i32_2 = arith.constant 0 : i32
    return %arg0, %c0_i32, %c0_i32_0, %c0_i32_1 : i32, i32, i32, i32
  }
  func.func @transform_1(%arg0: i32) -> (i32, i32, i32, i32) {
    %c0_i32 = arith.constant 0 : i32
    %c0_i32_0 = arith.constant 0 : i32
    %c0_i32_1 = arith.constant 0 : i32
    %c0_i32_2 = arith.constant 0 : i32
    return %arg0, %c0_i32, %c0_i32_0, %c0_i32_1 : i32, i32, i32, i32
  }
}

</mosaic_0001>

<bundles_post_ra>
// kernel: squeeze.8
= control target key start
LH: loop header
LB: loop body
LE: loop exit
PB: predicated region body
PF: predicated region fallthrough
CT: control target
= control target key end

     0   :  { %vm3_vm0 = vcmask 785408   ;;  %s988_s0 = inlined_call_operand.vmem [shape: f32[1,450,96], index: 0, kind: input, shape index: {}]   ;;  %s989_s1 = inlined_call_operand.vmem [shape: f32[2,15,15,96], index: 1, kind: output, shape index: {}]  }
   0x1   :  { %v2_v0 = vld [vmem:[%s988_s0] sm:$0xff]   ;;  %v337_v1 = vld [vmem:[%s988_s0 + $0x8] sm:$0xff]   ;;  %v340_v2 = vld [vmem:[%s988_s0 + $0x10] sm:$0xff]  }
   0x2   :  { %4 = vst.msk [vmem:[%s989_s1] sm:$0xff] %vm3_vm0, %v2_v0   ;;  %338 = vst.msk [vmem:[%s989_s1 + $0x8] sm:$0x7f] %vm3_vm0, %v337_v1   ;;  %v342_v3 = vld [vmem:[%s988_s0 + $0x18] sm:$0xff]   ;;  %v345_v4 = vld [vmem:[%s988_s0 + $0x20] sm:$0xff]  }
   0x3   :  { %339 = vst.msk [vmem:[%s989_s1 + $0x9] sm:$0x80] %vm3_vm0, %v337_v1   ;;  %341 = vst.msk [vmem:[%s989_s1 + $0x11] sm:$0xff] %vm3_vm0, %v340_v2   ;;  %v347_v5 = vld [vmem:[%s988_s0 + $0x28] sm:$0xff]   ;;  %v350_v6 = vld [vmem:[%s988_s0 + $0x30] sm:$0xff]  }
   0x4   :  { %343 = vst.msk [vmem:[%s989_s1 + $0x19] sm:$0x3f] %vm3_vm0, %v342_v3   ;;  %344 = vst.msk [vmem:[%s989_s1 + $0x1a] sm:$0xc0] %vm3_vm0, %v342_v3   ;;  %v352_v7 = vld [vmem:[%s988_s0 + $0x38] sm:$0xff]   ;;  %v355_v8 = vld [vmem:[%s988_s0 + $0x40] sm:$0xff]  }
   0x5   :  { %346 = vst.msk [vmem:[%s989_s1 + $0x22] sm:$0xff] %vm3_vm0, %v345_v4   ;;  %348 = vst.msk [vmem:[%s989_s1 + $0x2a] sm:$0x1f] %vm3_vm0, %v347_v5   ;;  %v357_v9 = vld [vmem:[%s988_s0 + $0x48] sm:$0xff]   ;;  %v360_v10 = vld [vmem:[%s988_s0 + $0x50] sm:$0xff]  }
   0x6   :  { %349 = vst.msk [vmem:[%s989_s1 + $0x2b] sm:$0xe0] %vm3_vm0, %v347_v5   ;;  %351 = vst.msk [vmem:[%s989_s1 + $0x33] sm:$0xff] %vm3_vm0, %v350_v6   ;;  %v362_v11 = vld [vmem:[%s988_s0 + $0x58] sm:$0xff]   ;;  %v365_v12 = vld [vmem:[%s988_s0 + $0x60] sm:$0xff]  }
   0x7   :  { %353 = vst.msk [vmem:[%s989_s1 + $0x3b] sm:$0xf] %vm3_vm0, %v352_v7   ;;  %354 = vst.msk [vmem:[%s989_s1 + $0x3c] sm:$0xf0] %vm3_vm0, %v352_v7   ;;  %v367_v13 = vld [vmem:[%s988_s0 + $0x68] sm:$0xff]   ;;  %v370_v14 = vld [vmem:[%s988_s0 + $0x70] sm:$0xff]  }
   0x8   :  { %356 = vst.msk [vmem:[%s989_s1 + $0x44] sm:$0xff] %vm3_vm0, %v355_v8   ;;  %358 = vst.msk [vmem:[%s989_s1 + $0x4c] sm:$0x7] %vm3_vm0, %v357_v9   ;;  %v372_v15 = vld [vmem:[%s988_s0 + $0x78] sm:$0xff]   ;;  %v374_v16 = vld [vmem:[%s988_s0 + $0x80] sm:$0xff]  }
   0x9   :  { %359 = vst.msk [vmem:[%s989_s1 + $0x4d] sm:$0xf8] %vm3_vm0, %v357_v9   ;;  %361 = vst.msk [vmem:[%s989_s1 + $0x55] sm:$0xff] %vm3_vm0, %v360_v10   ;;  %v377_v17 = vld [vmem:[%s988_s0 + $0x88] sm:$0xff]   ;;  %v379_v18 = vld [vmem:[%s988_s0 + $0x90] sm:$0xff]  }
   0xa   :  { %363 = vst.msk [vmem:[%s989_s1 + $0x5d] sm:$0x3] %vm3_vm0, %v362_v11   ;;  %364 = vst.msk [vmem:[%s989_s1 + $0x5e] sm:$0xfc] %vm3_vm0, %v362_v11   ;;  %v382_v19 = vld [vmem:[%s988_s0 + $0x98] sm:$0xff]   ;;  %v384_v20 = vld [vmem:[%s988_s0 + $0xa0] sm:$0xff]  }
   0xb   :  { %366 = vst.msk [vmem:[%s989_s1 + $0x66] sm:$0xff] %vm3_vm0, %v365_v12   ;;  %368 = vst.msk [vmem:[%s989_s1 + $0x6e] ss:$2 sm:$0x3] %vm3_vm0, %v367_v13   ;;  %v387_v21 = vld [vmem:[%s988_s0 + $0xa8] sm:$0xff]   ;;  %v389_v22 = vld [vmem:[%s988_s0 + $0xb0] sm:$0xff]  }
   0xc   :  { %369 = vst.msk [vmem:[%s989_s1 + $0x6f] sm:$0xfc] %vm3_vm0, %v367_v13   ;;  %371 = vst.msk [vmem:[%s989_s1 + $0x77] sm:$0xff] %vm3_vm0, %v370_v14   ;;  %v392_v23 = vld [vmem:[%s988_s0 + $0xb8] sm:$0xff]   ;;  %v394_v24 = vld [vmem:[%s988_s0 + $0xc0] sm:$0xff]  }
   0xd   :  { %373 = vst.msk [vmem:[%s989_s1 + $0x80] sm:$0xff] %vm3_vm0, %v372_v15   ;;  %375 = vst.msk [vmem:[%s989_s1 + $0x88] sm:$0x7f] %vm3_vm0, %v374_v16   ;;  %v397_v25 = vld [vmem:[%s988_s0 + $0xc8] sm:$0xff]   ;;  %v399_v26 = vld [vmem:[%s988_s0 + $0xd0] sm:$0xff]  }
   0xe   :  { %376 = vst.msk [vmem:[%s989_s1 + $0x89] sm:$0x80] %vm3_vm0, %v374_v16   ;;  %378 = vst.msk [vmem:[%s989_s1 + $0x91] sm:$0xff] %vm3_vm0, %v377_v17   ;;  %v402_v27 = vld [vmem:[%s988_s0 + $0xd8] sm:$0xff]   ;;  %v404_v28 = vld [vmem:[%s988_s0 + $0xe0] sm:$0xff]  }
   0xf   :  { %380 = vst.msk [vmem:[%s989_s1 + $0x99] sm:$0x3f] %vm3_vm0, %v379_v18   ;;  %381 = vst.msk [vmem:[%s989_s1 + $0x9a] sm:$0xc0] %vm3_vm0, %v379_v18   ;;  %v407_v29 = vld [vmem:[%s988_s0 + $0xe8] sm:$0xff]   ;;  %v409_v30 = vld [vmem:[%s988_s0 + $0xf0] sm:$0xff]  }
  0x10   :  { %383 = vst.msk [vmem:[%s989_s1 + $0xa2] sm:$0xff] %vm3_vm0, %v382_v19   ;;  %385 = vst.msk [vmem:[%s989_s1 + $0xaa] sm:$0x1f] %vm3_vm0, %v384_v20   ;;  %v411_v31 = vld [vmem:[%s988_s0 + $0xf8] sm:$0xff]   ;;  %v414_v32 = vld [vmem:[%s988_s0 + $0x100] sm:$0xff]  }
  0x11   :  { %386 = vst.msk [vmem:[%s989_s1 + $0xab] sm:$0xe0] %vm3_vm0, %v384_v20   ;;  %388 = vst.msk [vmem:[%s989_s1 + $0xb3] sm:$0xff] %vm3_vm0, %v387_v21   ;;  %v416_v33 = vld [vmem:[%s988_s0 + $0x108] sm:$0xff]   ;;  %v419_v34 = vld [vmem:[%s988_s0 + $0x110] sm:$0xff]  }
  0x12   :  { %390 = vst.msk [vmem:[%s989_s1 + $0xbb] sm:$0xf] %vm3_vm0, %v389_v22   ;;  %391 = vst.msk [vmem:[%s989_s1 + $0xbc] sm:$0xf0] %vm3_vm0, %v389_v22   ;;  %v421_v35 = vld [vmem:[%s988_s0 + $0x118] sm:$0xff]   ;;  %v424_v36 = vld [vmem:[%s988_s0 + $0x120] sm:$0xff]  }
  0x13   :  { %393 = vst.msk [vmem:[%s989_s1 + $0xc4] sm:$0xff] %vm3_vm0, %v392_v23   ;;  %395 = vst.msk [vmem:[%s989_s1 + $0xcc] sm:$0x7] %vm3_vm0, %v394_v24   ;;  %v426_v37 = vld [vmem:[%s988_s0 + $0x128] sm:$0xff]   ;;  %v429_v38 = vld [vmem:[%s988_s0 + $0x130] sm:$0xff]  }
  0x14   :  { %396 = vst.msk [vmem:[%s989_s1 + $0xcd] sm:$0xf8] %vm3_vm0, %v394_v24   ;;  %398 = vst.msk [vmem:[%s989_s1 + $0xd5] sm:$0xff] %vm3_vm0, %v397_v25   ;;  %v431_v39 = vld [vmem:[%s988_s0 + $0x138] sm:$0xff]   ;;  %v434_v40 = vld [vmem:[%s988_s0 + $0x140] sm:$0xff]  }
  0x15   :  { %400 = vst.msk [vmem:[%s989_s1 + $0xdd] sm:$0x3] %vm3_vm0, %v399_v26   ;;  %401 = vst.msk [vmem:[%s989_s1 + $0xde] sm:$0xfc] %vm3_vm0, %v399_v26   ;;  %v436_v41 = vld [vmem:[%s988_s0 + $0x148] sm:$0xff]   ;;  %v439_v42 = vld [vmem:[%s988_s0 + $0x150] sm:$0xff]  }
  0x16   :  { %403 = vst.msk [vmem:[%s989_s1 + $0xe6] sm:$0xff] %vm3_vm0, %v402_v27   ;;  %405 = vst.msk [vmem:[%s989_s1 + $0xee] ss:$2 sm:$0x3] %vm3_vm0, %v404_v28   ;;  %v441_v43 = vld [vmem:[%s988_s0 + $0x158] sm:$0xff]   ;;  %v444_v44 = vld [vmem:[%s988_s0 + $0x160] sm:$0xff]  }
  0x17   :  { %406 = vst.msk [vmem:[%s989_s1 + $0xef] sm:$0xfc] %vm3_vm0, %v404_v28   ;;  %408 = vst.msk [vmem:[%s989_s1 + $0xf7] sm:$0xff] %vm3_vm0, %v407_v29   ;;  %v446_v45 = vld [vmem:[%s988_s0 + $0x168] sm:$0xff]   ;;  %v448_v46 = vld [vmem:[%s988_s0 + $0x170] sm:$0xff]  }
  0x18   :  { %410 = vst.msk [vmem:[%s989_s1 + $0x100] sm:$0xff] %vm3_vm0, %v409_v30   ;;  %412 = vst.msk [vmem:[%s989_s1 + $0x108] sm:$0x7f] %vm3_vm0, %v411_v31   ;;  %v451_v47 = vld [vmem:[%s988_s0 + $0x178] sm:$0xff]   ;;  %v453_v48 = vld [vmem:[%s988_s0 + $0x180] sm:$0xff]  }
  0x19   :  { %413 = vst.msk [vmem:[%s989_s1 + $0x109] sm:$0x80] %vm3_vm0, %v411_v31   ;;  %415 = vst.msk [vmem:[%s989_s1 + $0x111] sm:$0xff] %vm3_vm0, %v414_v32   ;;  %v456_v49 = vld [vmem:[%s988_s0 + $0x188] sm:$0xff]   ;;  %v458_v50 = vld [vmem:[%s988_s0 + $0x190] sm:$0xff]  }
  0x1a   :  { %417 = vst.msk [vmem:[%s989_s1 + $0x119] sm:$0x3f] %vm3_vm0, %v416_v33   ;;  %418 = vst.msk [vmem:[%s989_s1 + $0x11a] sm:$0xc0] %vm3_vm0, %v416_v33   ;;  %v461_v51 = vld [vmem:[%s988_s0 + $0x198] sm:$0xff]   ;;  %v463_v52 = vld [vmem:[%s988_s0 + $0x1a0] sm:$0xff]  }
  0x1b   :  { %420 = vst.msk [vmem:[%s989_s1 + $0x122] sm:$0xff] %vm3_vm0, %v419_v34   ;;  %422 = vst.msk [vmem:[%s989_s1 + $0x12a] sm:$0x1f] %vm3_vm0, %v421_v35   ;;  %v466_v53 = vld [vmem:[%s988_s0 + $0x1a8] sm:$0xff]   ;;  %v468_v54 = vld [vmem:[%s988_s0 + $0x1b0] sm:$0xff]  }
  0x1c   :  { %423 = vst.msk [vmem:[%s989_s1 + $0x12b] sm:$0xe0] %vm3_vm0, %v421_v35   ;;  %425 = vst.msk [vmem:[%s989_s1 + $0x133] sm:$0xff] %vm3_vm0, %v424_v36   ;;  %v471_v55 = vld [vmem:[%s988_s0 + $0x1b8] sm:$0xff]   ;;  %v473_v56 = vld [vmem:[%s988_s0 + $0x1c0] sm:$0x3]  }
  0x1d   :  { %427 = vst.msk [vmem:[%s989_s1 + $0x13b] sm:$0xf] %vm3_vm0, %v426_v37   ;;  %428 = vst.msk [vmem:[%s989_s1 + $0x13c] sm:$0xf0] %vm3_vm0, %v426_v37  }
  0x1e   :  { %430 = vst.msk [vmem:[%s989_s1 + $0x144] sm:$0xff] %vm3_vm0, %v429_v38   ;;  %432 = vst.msk [vmem:[%s989_s1 + $0x14c] sm:$0x7] %vm3_vm0, %v431_v39  }
  0x1f   :  { %433 = vst.msk [vmem:[%s989_s1 + $0x14d] sm:$0xf8] %vm3_vm0, %v431_v39   ;;  %435 = vst.msk [vmem:[%s989_s1 + $0x155] sm:$0xff] %vm3_vm0, %v434_v40  }
  0x20   :  { %437 = vst.msk [vmem:[%s989_s1 + $0x15d] sm:$0x3] %vm3_vm0, %v436_v41   ;;  %438 = vst.msk [vmem:[%s989_s1 + $0x15e] sm:$0xfc] %vm3_vm0, %v436_v41  }
  0x21   :  { %440 = vst.msk [vmem:[%s989_s1 + $0x166] sm:$0xff] %vm3_vm0, %v439_v42   ;;  %442 = vst.msk [vmem:[%s989_s1 + $0x16e] ss:$2 sm:$0x3] %vm3_vm0, %v441_v43  }
  0x22   :  { %443 = vst.msk [vmem:[%s989_s1 + $0x16f] sm:$0xfc] %vm3_vm0, %v441_v43   ;;  %445 = vst.msk [vmem:[%s989_s1 + $0x177] sm:$0xff] %vm3_vm0, %v444_v44  }
  0x23   :  { %447 = vst.msk [vmem:[%s989_s1 + $0x180] sm:$0xff] %vm3_vm0, %v446_v45   ;;  %449 = vst.msk [vmem:[%s989_s1 + $0x188] sm:$0x7f] %vm3_vm0, %v448_v46  }
  0x24   :  { %450 = vst.msk [vmem:[%s989_s1 + $0x189] sm:$0x80] %vm3_vm0, %v448_v46   ;;  %452 = vst.msk [vmem:[%s989_s1 + $0x191] sm:$0xff] %vm3_vm0, %v451_v47  }
  0x25   :  { %454 = vst.msk [vmem:[%s989_s1 + $0x199] sm:$0x3f] %vm3_vm0, %v453_v48   ;;  %455 = vst.msk [vmem:[%s989_s1 + $0x19a] sm:$0xc0] %vm3_vm0, %v453_v48  }
  0x26   :  { %457 = vst.msk [vmem:[%s989_s1 + $0x1a2] sm:$0xff] %vm3_vm0, %v456_v49   ;;  %459 = vst.msk [vmem:[%s989_s1 + $0x1aa] sm:$0x1f] %vm3_vm0, %v458_v50  }
  0x27   :  { %460 = vst.msk [vmem:[%s989_s1 + $0x1ab] sm:$0xe0] %vm3_vm0, %v458_v50   ;;  %462 = vst.msk [vmem:[%s989_s1 + $0x1b3] sm:$0xff] %vm3_vm0, %v461_v51  }
  0x28   :  { %464 = vst.msk [vmem:[%s989_s1 + $0x1bb] sm:$0xf] %vm3_vm0, %v463_v52   ;;  %465 = vst.msk [vmem:[%s989_s1 + $0x1bc] sm:$0xf0] %vm3_vm0, %v463_v52  }
  0x29   :  { %467 = vst.msk [vmem:[%s989_s1 + $0x1c4] sm:$0xff] %vm3_vm0, %v466_v53   ;;  %469 = vst.msk [vmem:[%s989_s1 + $0x1cc] sm:$0x7] %vm3_vm0, %v468_v54  }
  0x2a   :  { %470 = vst.msk [vmem:[%s989_s1 + $0x1cd] sm:$0xf8] %vm3_vm0, %v468_v54   ;;  %472 = vst.msk [vmem:[%s989_s1 + $0x1d5] sm:$0xff] %vm3_vm0, %v471_v55  }
  0x2b   :  { %474 = vst.msk [vmem:[%s989_s1 + $0x1dd] sm:$0x3] %vm3_vm0, %v473_v56  }

// kernel: _lambda_.10
= control target key start
LH: loop header
LB: loop body
LE: loop exit
PB: predicated region body
PF: predicated region fallthrough
CT: control target
= control target key end

     0   :  { %s763_s6 = smov 0   ;;  %s962_s0 = inlined_call_operand.vmem [shape: f32[2,15,15,96], index: 0, kind: input, shape index: {}]   ;;  %s963_s1 = inlined_call_operand.vmem [shape: f32[2,7,7,96], index: 1, kind: output, shape index: {}]  }
   0x1 LB: > { %s680_s7 = sadd.s32 4294967295, %s751_s6   ;;  %p684_p0 = scmp.ge.s32.totalorder %s751_s6, 1  ;;  %s751_s6 = sphi %s763_s6, %s11_s6  }
   0x2   : > { %p87_p1 = scmp.lt.s32.totalorder %s751_s6, 3 }
   0x4   : > { %p88_p2 = pnand %p684_p0, %p87_p1 }
   0x5   : > { %p107_p3 = scmp.lt.s32.totalorder (!%p88_p2), %s680_s7, 1  ;;  %vm129_vm0 = vcmask (!%p88_p2), 780288   ;;  %vm137_vm1 = vcmask (!%p88_p2), 782338   ;;  %vm145_vm2 = vcmask (!%p88_p2), 784388   ;;  %vm153_vm3 = vcmask (!%p88_p2), 785414  }
   0x6   : > { %91 = sbr.rel (%p88_p2) target bundleno = 135 (0x87), region = 24  ;;  %vm155_vm4 = vcmask (!%p88_p2), 778240   ;;  %vm185_vm5 = vcmask (!%p88_p2), 1040384   ;;  %vm187_vm6 = vcmask (!%p88_p2), 1041408   ;;  %vm189_vm7 = vcmask (!%p88_p2), 1042432  }
   0x7   : > { %vm191_vm8 = vcmask (!%p88_p2), 1043456   ;;  %vm193_vm9 = vcmask (!%p88_p2), 1044480   ;;  %vm195_vm10 = vcmask (!%p88_p2), 1045504   ;;  %vm197_vm11 = vcmask (!%p88_p2), 784384  }
   0xd   : > { %s965_s7 = smov (!%p107_p3, %s680_s7), 1 }
   0xe   : > { %s735_s8 = smul.u32 240, %s965_s7 }
   0xf   : > { %s736_s12 = smul.u32 56, %s965_s7 }
  0x10   : > { %s777_s11 = scalar_lea.vmem %s962_s0, %s735_s8 }
  0x11   : > { %v117_v0 = vld [vmem:[%s777_s11] sm:$0xff]  ;;  %v118_v1 = vld [vmem:[%s777_s11 + $0x8] sm:$0x7f]  ;;  %v687_v2 = vld [vmem:[%s777_s11 + $0x10] sm:$0xff]  ;;  %s820_s15 = scalar_lea.vmem %s963_s1, %s736_s12 }
  0x12   : > { %v688_v3 = vld [vmem:[%s777_s11 + $0x18] sm:$0x7f]  ;;  %v122_v4 = vmax.f32 %v117_v0, %v687_v2  ;;  %v689_v5 = vld [vmem:[%s777_s11 + $0x20] sm:$0xff]  ;;  %v690_v6 = vld [vmem:[%s777_s11 + $0x28] sm:$0x7f] }
  0x13   : > { %v123_v7 = vmax.f32 %v118_v1, %v688_v3  ;;  %v692_v8 = vld [vmem:[%s777_s11 + $0x28] sm:$0x7f]  ;;  %v693_v9 = vld [vmem:[%s777_s11 + $0x30] sm:$0xff]  ;;  %v694_v10 = vld [vmem:[%s777_s11 + $0x38] sm:$0x7f] }
  0x14   : > { %v127_v11 = vmax.f32 %v122_v4, %v689_v5  ;;  %v204_v13 = vmax.f32 %v689_v5, %v693_v9  ;;  %v205_v14 = vmax.f32 %v692_v8, %v694_v10  ;;  %v797_v31 = vld [vmem:[%s777_s11 + $0x40] sm:$0xff]  ;;  %v696_v32 = vld [vmem:[%s777_s11 + $0x48] sm:$0x7f] }
  0x15   : > { %v128_v12 = vmax.f32 %v123_v7, %v690_v6 }
  0x16   : > { %v130_v15 = vsel %vm129_vm0, %v127_v11, -inf  ;;  %v138_v16 = vsel %vm137_vm1, %v127_v11, -inf  ;;  %v146_v17 = vsel %vm145_vm2, %v127_v11, -inf  ;;  %v154_v18 = vsel %vm153_vm3, %v127_v11, -inf }
  0x17   : > { %v131_v19 = vrot.slane %v130_v15, 4  ;;  %v139_v20 = vrot.slane %v138_v16, 4  ;;  %v147_v21 = vrot.slane %v146_v17, 4  ;;  %v156_v22 = vsel %vm155_vm4, %v128_v12, -inf }
  0x18   : > { %v157_v23 = vmax.f32 %v154_v18, %v156_v22  ;;  %v164_v24 = vsel %vm129_vm0, %v128_v12, -inf  ;;  %v171_v25 = vsel %vm137_vm1, %v128_v12, -inf  ;;  %v178_v26 = vsel %vm145_vm2, %v128_v12, -inf }
  0x19   : > { %v132_v27 = vmax.f32 %v130_v15, %v131_v19  ;;  %v140_v28 = vmax.f32 %v138_v16, %v139_v20  ;;  %v148_v29 = vmax.f32 %v146_v17, %v147_v21  ;;  %v165_v30 = vrot.slane %v164_v24, 4 }
  0x1a   : > { %v158_v33 = vrot.slane %v157_v23, 4  ;;  %v172_v34 = vrot.slane %v171_v25, 4  ;;  %v179_v35 = vrot.slane %v178_v26, 4  ;;  %v209_v36 = vmax.f32 %v204_v13, %v797_v31 }
  0x1b   : > { %v133_v37 = vrot.slane %v132_v27, 2  ;;  %v141_v38 = vrot.slane %v140_v28, 2  ;;  %v149_v39 = vrot.slane %v148_v29, 2  ;;  %v166_v40 = vmax.f32 %v164_v24, %v165_v30 }
  0x1c   : > { %v159_v41 = vmax.f32 %v157_v23, %v158_v33  ;;  %v173_v42 = vmax.f32 %v171_v25, %v172_v34  ;;  %v180_v43 = vmax.f32 %v178_v26, %v179_v35  ;;  %v801_v44 = vmax.f32 %v205_v14, %v696_v32  ;;  %v700_v34 = vld [vmem:[%s777_s11 + $0x50] sm:$0xff] }
  0x1d   : > { %v134_v45 = vmax.f32 %v132_v27, %v133_v37  ;;  %v142_v46 = vmax.f32 %v140_v28, %v141_v38  ;;  %v150_v47 = vmax.f32 %v148_v29, %v149_v39  ;;  %v167_v48 = vrot.slane %v166_v40, 2  ;;  %v699_v39 = vld [vmem:[%s777_s11 + $0x48] sm:$0x7f] }
  0x1e   : > { %v160_v49 = vrot.slane %v159_v41, 2  ;;  %v174_v50 = vrot.slane %v173_v42, 2  ;;  %v181_v51 = vrot.slane %v180_v43, 2  ;;  %v211_v52 = vsel %vm129_vm0, %v209_v36, -inf }
  0x1f   : > { %v135_v53 = vrot.slane %v134_v45, 1  ;;  %v143_v54 = vrot.slane %v142_v46, 1  ;;  %v151_v55 = vrot.slane %v150_v47, 1  ;;  %v168_v56 = vmax.f32 %v166_v40, %v167_v48  ;;  %v701_v40 = vld [vmem:[%s777_s11 + $0x58] sm:$0x7f] }
  0x20   : > { %v161_v57 = vmax.f32 %v159_v41, %v160_v49  ;;  %v175_v58 = vmax.f32 %v173_v42, %v174_v50  ;;  %v182_v59 = vmax.f32 %v180_v43, %v181_v51  ;;  %v212_v60 = vrot.slane %v211_v52, 4  ;;  %v703_v50 = vld [vmem:[%s777_s11 + $0x68] sm:$0x7f] }
  0x21   : > { %v136_v61 = vmax.f32 %v134_v45, %v135_v53  ;;  %v144_v62 = vmax.f32 %v142_v46, %v143_v54  ;;  %v152_v63 = vmax.f32 %v150_v47, %v151_v55  ;;  %v169_v0 = vrot.slane %v168_v56, 1  ;;  %v835_v55 = vld [vmem:[%s777_s11 + $0x60] sm:$0xff] }
  0x22   : > { %v162_v1 = vrot.slane %v161_v57, 1  ;;  %v176_v2 = vrot.slane %v175_v58, 1  ;;  %v183_v3 = vrot.slane %v182_v59, 1  ;;  %v213_v4 = vmax.f32 %v211_v52, %v212_v60 }
  0x23   : > { %v170_v5 = vmax.f32 %v168_v56, %v169_v0  ;;  %v186_v6 = vsel %vm185_vm5, %v136_v61, %v144_v62  ;;  %v218_v7 = vsel %vm137_vm1, %v209_v36, -inf  ;;  %v225_v8 = vsel %vm145_vm2, %v209_v36, -inf }
  0x24   : > { %v163_v9 = vmax.f32 %v161_v57, %v162_v1  ;;  %v177_v10 = vmax.f32 %v175_v58, %v176_v2  ;;  %v184_v11 = vmax.f32 %v182_v59, %v183_v3  ;;  %v188_v12 = vsel %vm187_vm6, %v186_v6, %v152_v63 }
  0x25   : > { %v214_v13 = vrot.slane %v213_v4, 2  ;;  %v219_v14 = vrot.slane %v218_v7, 4  ;;  %v226_v15 = vrot.slane %v225_v8, 4  ;;  %v232_v16 = vsel %vm153_vm3, %v209_v36, -inf }
  0x26   : > { %v190_v17 = vsel %vm189_vm7, %v188_v12, %v163_v9  ;;  %v233_v18 = vsel %vm155_vm4, %v801_v44, -inf  ;;  %v241_v19 = vsel %vm129_vm0, %v801_v44, -inf  ;;  %v248_v20 = vsel %vm137_vm1, %v801_v44, -inf }
  0x27   : > { %v192_v21 = vsel %vm191_vm8, %v190_v17, %v170_v5  ;;  %v215_v22 = vmax.f32 %v213_v4, %v214_v13  ;;  %v220_v23 = vmax.f32 %v218_v7, %v219_v14  ;;  %v227_v24 = vmax.f32 %v225_v8, %v226_v15 }
  0x28   : > { %v194_v25 = vsel %vm193_vm9, %v192_v21, %v177_v10  ;;  %v234_v26 = vmax.f32 %v232_v16, %v233_v18  ;;  %v242_v27 = vrot.slane %v241_v19, 4  ;;  %v249_v28 = vrot.slane %v248_v20, 4 }
  0x29   : > { %v196_v29 = vsel %vm195_vm10, %v194_v25, %v184_v11  ;;  %v216_v30 = vrot.slane %v215_v22, 1  ;;  %v221_v32 = vrot.slane %v220_v23, 2  ;;  %v228_v33 = vrot.slane %v227_v24, 2 }
  0x2a   : > { %198 = vst.msk [vmem:[%s820_s15] sm:$0x7f] %vm197_vm11, %v196_v29  ;;  %v235_v35 = vrot.slane %v234_v26, 4  ;;  %v243_v36 = vmax.f32 %v241_v19, %v242_v27  ;;  %v250_v37 = vmax.f32 %v248_v20, %v249_v28  ;;  %v255_v38 = vsel %vm145_vm2, %v801_v44, -inf }
  0x2b   : > { %v217_v41 = vmax.f32 %v215_v22, %v216_v30  ;;  %v222_v42 = vmax.f32 %v220_v23, %v221_v32  ;;  %v229_v43 = vmax.f32 %v227_v24, %v228_v33  ;;  %v256_v45 = vrot.slane %v255_v38, 4 }
  0x2c   : > { %v236_v46 = vmax.f32 %v234_v26, %v235_v35  ;;  %v244_v47 = vrot.slane %v243_v36, 2  ;;  %v251_v48 = vrot.slane %v250_v37, 2  ;;  %v275_v49 = vmax.f32 %v797_v31, %v700_v34 }
  0x2d   : > { %v223_v51 = vrot.slane %v222_v42, 1  ;;  %v230_v52 = vrot.slane %v229_v43, 1  ;;  %v257_v53 = vmax.f32 %v255_v38, %v256_v45  ;;  %v276_v54 = vmax.f32 %v699_v39, %v701_v40  ;;  %v707_v39 = vld [vmem:[%s777_s11 + $0x70] sm:$0xff]  ;;  %v706_v45 = vld [vmem:[%s777_s11 + $0x68] sm:$0x7f] }
  0x2e   : > { %v237_v44 = vrot.slane %v236_v46, 2  ;;  %v245_v56 = vmax.f32 %v243_v36, %v244_v47  ;;  %v252_v57 = vmax.f32 %v250_v37, %v251_v48  ;;  %v280_v58 = vmax.f32 %v275_v49, %v835_v55 }
  0x2f   : > { %v224_v59 = vmax.f32 %v222_v42, %v223_v51  ;;  %v231_v60 = vmax.f32 %v229_v43, %v230_v52  ;;  %v258_v61 = vrot.slane %v257_v53, 2  ;;  %v281_v62 = vmax.f32 %v276_v54, %v703_v50 }
  0x30   : > { %v238_v63 = vmax.f32 %v236_v46, %v237_v44  ;;  %v246_v0 = vrot.slane %v245_v56, 1  ;;  %v253_v1 = vrot.slane %v252_v57, 1  ;;  %v282_v31 = vsel %vm129_vm0, %v280_v58, -inf  ;;  %v708_v46 = vld [vmem:[%s777_s11 + $0x78] sm:$0x7f] }
  0x31   : > { %v259_v2 = vmax.f32 %v257_v53, %v258_v61  ;;  %v262_v3 = vsel %vm185_vm5, %v217_v41, %v224_v59  ;;  %v283_v4 = vrot.slane %v282_v31, 4  ;;  %v289_v5 = vsel %vm137_vm1, %v280_v58, -inf  ;;  %v710_v44 = vld [vmem:[%s777_s11 + $0x88] sm:$0x7f] }
  0x32   : > { %v239_v6 = vrot.slane %v238_v63, 1  ;;  %v247_v7 = vmax.f32 %v245_v56, %v246_v0  ;;  %v254_v8 = vmax.f32 %v252_v57, %v253_v1  ;;  %v263_v9 = vsel %vm187_vm6, %v262_v3, %v231_v60  ;;  %v860_v60 = vld [vmem:[%s777_s11 + $0x80] sm:$0xff] }
  0x33   : > { %v260_v10 = vrot.slane %v259_v2, 1  ;;  %v284_v11 = vmax.f32 %v282_v31, %v283_v4  ;;  %v290_v12 = vrot.slane %v289_v5, 4  ;;  %v296_v13 = vsel %vm145_vm2, %v280_v58, -inf }
  0x34   : > { %v240_v14 = vmax.f32 %v238_v63, %v239_v6  ;;  %v297_v15 = vrot.slane %v296_v13, 4  ;;  %v303_v16 = vsel %vm153_vm3, %v280_v58, -inf  ;;  %v304_v17 = vsel %vm155_vm4, %v281_v62, -inf }
  0x35   : > { %v261_v18 = vmax.f32 %v259_v2, %v260_v10  ;;  %v285_v19 = vrot.slane %v284_v11, 2  ;;  %v291_v20 = vmax.f32 %v289_v5, %v290_v12  ;;  %v305_v21 = vmax.f32 %v303_v16, %v304_v17 }
  0x36   : > { %v264_v22 = vsel %vm189_vm7, %v263_v9, %v240_v14  ;;  %v298_v23 = vmax.f32 %v296_v13, %v297_v15  ;;  %v312_v24 = vsel %vm129_vm0, %v281_v62, -inf  ;;  %v319_v25 = vsel %vm137_vm1, %v281_v62, -inf }
  0x37   : > { %v265_v26 = vsel %vm191_vm8, %v264_v22, %v247_v7  ;;  %v286_v27 = vmax.f32 %v284_v11, %v285_v19  ;;  %v292_v28 = vrot.slane %v291_v20, 2  ;;  %v306_v29 = vrot.slane %v305_v21, 4 }
  0x38   : > { %v266_v30 = vsel %vm193_vm9, %v265_v26, %v254_v8  ;;  %v299_v32 = vrot.slane %v298_v23, 2  ;;  %v313_v33 = vrot.slane %v312_v24, 4  ;;  %v320_v34 = vrot.slane %v319_v25, 4 }
  0x39   : > { %v267_v35 = vsel %vm195_vm10, %v266_v30, %v261_v18  ;;  %v287_v36 = vrot.slane %v286_v27, 1  ;;  %v293_v37 = vmax.f32 %v291_v20, %v292_v28  ;;  %v307_v38 = vmax.f32 %v305_v21, %v306_v29 }
  0x3a   : > { %697 = vst.msk [vmem:[%s820_s15 + $0x8] sm:$0x7f] %vm197_vm11, %v267_v35  ;;  %v300_v40 = vmax.f32 %v298_v23, %v299_v32  ;;  %v314_v41 = vmax.f32 %v312_v24, %v313_v33  ;;  %v321_v42 = vmax.f32 %v319_v25, %v320_v34  ;;  %v326_v43 = vsel %vm145_vm2, %v281_v62, -inf }
  0x3b   : > { %v288_v47 = vmax.f32 %v286_v27, %v287_v36  ;;  %v294_v48 = vrot.slane %v293_v37, 1  ;;  %v308_v49 = vrot.slane %v307_v38, 2  ;;  %v327_v50 = vrot.slane %v326_v43, 4  ;;  %v714_v36 = vld [vmem:[%s777_s11 + $0x90] sm:$0xff] }
  0x3c   : > { %v301_v51 = vrot.slane %v300_v40, 1  ;;  %v315_v52 = vrot.slane %v314_v41, 2  ;;  %v322_v53 = vrot.slane %v321_v42, 2  ;;  %v346_v54 = vmax.f32 %v835_v55, %v707_v39 }
  0x3d   : > { %v295_v56 = vmax.f32 %v293_v37, %v294_v48  ;;  %v309_v57 = vmax.f32 %v307_v38, %v308_v49  ;;  %v328_v58 = vmax.f32 %v326_v43, %v327_v50  ;;  %v347_v59 = vmax.f32 %v706_v45, %v708_v46  ;;  %v713_v46 = vld [vmem:[%s777_s11 + $0x88] sm:$0x7f] }
  0x3e   : > { %v302_v61 = vmax.f32 %v300_v40, %v301_v51  ;;  %v316_v62 = vmax.f32 %v314_v41, %v315_v52  ;;  %v323_v63 = vmax.f32 %v321_v42, %v322_v53  ;;  %v351_v0 = vmax.f32 %v346_v54, %v860_v60 }
  0x3f   : > { %v310_v1 = vrot.slane %v309_v57, 1  ;;  %v329_v31 = vrot.slane %v328_v58, 2  ;;  %v333_v2 = vsel %vm185_vm5, %v288_v47, %v295_v56  ;;  %v352_v3 = vmax.f32 %v347_v59, %v710_v44  ;;  %v715_v47 = vld [vmem:[%s777_s11 + $0x98] sm:$0x7f]  ;;  %v717_v56 = vld [vmem:[%s777_s11 + $0xa8] sm:$0x7f] }
  0x40   : > { %v317_v4 = vrot.slane %v316_v62, 1  ;;  %v324_v5 = vrot.slane %v323_v63, 1  ;;  %v334_v55 = vsel %vm187_vm6, %v333_v2, %v302_v61  ;;  %v353_v6 = vsel %vm129_vm0, %v351_v0, -inf }
  0x41   : > { %v311_v7 = vmax.f32 %v309_v57, %v310_v1  ;;  %v330_v8 = vmax.f32 %v328_v58, %v329_v31  ;;  %v354_v9 = vrot.slane %v353_v6, 4  ;;  %v360_v10 = vsel %vm137_vm1, %v351_v0, -inf }
  0x42   : > { %v318_v11 = vmax.f32 %v316_v62, %v317_v4  ;;  %v325_v12 = vmax.f32 %v323_v63, %v324_v5  ;;  %v361_v13 = vrot.slane %v360_v10, 4  ;;  %v367_v14 = vsel %vm145_vm2, %v351_v0, -inf  ;;  %v885_v62 = vld [vmem:[%s777_s11 + $0xa0] sm:$0xff] }
  0x43   : > { %v331_v15 = vrot.slane %v330_v8, 1  ;;  %v335_v16 = vsel %vm189_vm7, %v334_v55, %v311_v7  ;;  %v355_v17 = vmax.f32 %v353_v6, %v354_v9  ;;  %v368_v18 = vrot.slane %v367_v14, 4 }
  0x44   : > { %v336_v19 = vsel %vm191_vm8, %v335_v16, %v318_v11  ;;  %v362_v20 = vmax.f32 %v360_v10, %v361_v13  ;;  %v374_v21 = vsel %vm153_vm3, %v351_v0, -inf  ;;  %v375_v22 = vsel %vm155_vm4, %v352_v3, -inf }
  0x45   : > { %v332_v23 = vmax.f32 %v330_v8, %v331_v15  ;;  %v337_v24 = vsel %vm193_vm9, %v336_v19, %v325_v12  ;;  %v356_v25 = vrot.slane %v355_v17, 2  ;;  %v369_v26 = vmax.f32 %v367_v14, %v368_v18 }
  0x46   : > { %v363_v27 = vrot.slane %v362_v20, 2  ;;  %v376_v28 = vmax.f32 %v374_v21, %v375_v22  ;;  %v383_v29 = vsel %vm129_vm0, %v352_v3, -inf  ;;  %v390_v30 = vsel %vm137_vm1, %v352_v3, -inf }
  0x47   : > { %v338_v32 = vsel %vm195_vm10, %v337_v24, %v332_v23  ;;  %v357_v33 = vmax.f32 %v355_v17, %v356_v25  ;;  %v370_v34 = vrot.slane %v369_v26, 2  ;;  %v384_v35 = vrot.slane %v383_v29, 4 }
  0x48   : > { %704 = vst.msk [vmem:[%s820_s15 + $0x10] sm:$0x7f] %vm197_vm11, %v338_v32  ;;  %v364_v37 = vmax.f32 %v362_v20, %v363_v27  ;;  %v377_v38 = vrot.slane %v376_v28, 4  ;;  %v391_v39 = vrot.slane %v390_v30, 4  ;;  %v397_v40 = vsel %vm145_vm2, %v352_v3, -inf }
  0x49   : > { %v358_v41 = vrot.slane %v357_v33, 1  ;;  %v371_v42 = vmax.f32 %v369_v26, %v370_v34  ;;  %v385_v43 = vmax.f32 %v383_v29, %v384_v35  ;;  %v398_v45 = vrot.slane %v397_v40, 4 }
  0x4a   : > { %v365_v48 = vrot.slane %v364_v37, 1  ;;  %v378_v49 = vmax.f32 %v376_v28, %v377_v38  ;;  %v392_v50 = vmax.f32 %v390_v30, %v391_v39  ;;  %v417_v51 = vmax.f32 %v860_v60, %v714_v36 }
  0x4b   : > { %v359_v52 = vmax.f32 %v357_v33, %v358_v41  ;;  %v372_v53 = vrot.slane %v371_v42, 1  ;;  %v386_v54 = vrot.slane %v385_v43, 2  ;;  %v399_v44 = vmax.f32 %v397_v40, %v398_v45  ;;  %v721_v41 = vld [vmem:[%s777_s11 + $0xb0] sm:$0xff] }
  0x4c   : > { %v366_v57 = vmax.f32 %v364_v37, %v365_v48  ;;  %v379_v58 = vrot.slane %v378_v49, 2  ;;  %v393_v59 = vrot.slane %v392_v50, 2  ;;  %v418_v61 = vmax.f32 %v713_v46, %v715_v47 }
  0x4d   : > { %v373_v63 = vmax.f32 %v371_v42, %v372_v53  ;;  %v387_v0 = vmax.f32 %v385_v43, %v386_v54  ;;  %v400_v1 = vrot.slane %v399_v44, 2  ;;  %v422_v31 = vmax.f32 %v417_v51, %v885_v62  ;;  %v720_v51 = vld [vmem:[%s777_s11 + $0xa8] sm:$0x7f] }
  0x4e   : > { %v380_v2 = vmax.f32 %v378_v49, %v379_v58  ;;  %v394_v3 = vmax.f32 %v392_v50, %v393_v59  ;;  %v404_v60 = vsel %vm185_vm5, %v359_v52, %v366_v57  ;;  %v423_v4 = vmax.f32 %v418_v61, %v717_v56  ;;  %v722_v52 = vld [vmem:[%s777_s11 + $0xb8] sm:$0x7f] }
  0x4f   : > { %v388_v5 = vrot.slane %v387_v0, 1  ;;  %v401_v55 = vmax.f32 %v399_v44, %v400_v1  ;;  %v405_v6 = vsel %vm187_vm6, %v404_v60, %v373_v63  ;;  %v424_v7 = vsel %vm129_vm0, %v422_v31, -inf  ;;  %v909_v63 = vld [vmem:[%s777_s11 + $0xc0] sm:$0xff] }
  0x50   : > { %v381_v8 = vrot.slane %v380_v2, 1  ;;  %v395_v9 = vrot.slane %v394_v3, 1  ;;  %v425_v10 = vrot.slane %v424_v7, 4  ;;  %v431_v11 = vsel %vm137_vm1, %v422_v31, -inf }
  0x51   : > { %v389_v12 = vmax.f32 %v387_v0, %v388_v5  ;;  %v402_v13 = vrot.slane %v401_v55, 1  ;;  %v432_v14 = vrot.slane %v431_v11, 4  ;;  %v438_v15 = vsel %vm145_vm2, %v422_v31, -inf  ;;  %v724_v0 = vld [vmem:[%s777_s11 + $0xc8] sm:$0x7f] }
  0x52   : > { %v382_v16 = vmax.f32 %v380_v2, %v381_v8  ;;  %v396_v17 = vmax.f32 %v394_v3, %v395_v9  ;;  %v426_v18 = vmax.f32 %v424_v7, %v425_v10  ;;  %v439_v19 = vrot.slane %v438_v15, 4 }
  0x53   : > { %v403_v20 = vmax.f32 %v401_v55, %v402_v13  ;;  %v433_v21 = vmax.f32 %v431_v11, %v432_v14  ;;  %v445_v22 = vsel %vm153_vm3, %v422_v31, -inf  ;;  %v446_v23 = vsel %vm155_vm4, %v423_v4, -inf }
  0x54   : > { %v406_v24 = vsel %vm189_vm7, %v405_v6, %v382_v16  ;;  %v427_v25 = vrot.slane %v426_v18, 2  ;;  %v440_v26 = vmax.f32 %v438_v15, %v439_v19  ;;  %v447_v27 = vmax.f32 %v445_v22, %v446_v23 }
  0x55   : > { %v407_v28 = vsel %vm191_vm8, %v406_v24, %v389_v12  ;;  %v434_v29 = vrot.slane %v433_v21, 2  ;;  %v454_v30 = vsel %vm129_vm0, %v423_v4, -inf  ;;  %v461_v32 = vsel %vm137_vm1, %v423_v4, -inf }
  0x56   : > { %v408_v33 = vsel %vm193_vm9, %v407_v28, %v396_v17  ;;  %v428_v34 = vmax.f32 %v426_v18, %v427_v25  ;;  %v441_v35 = vrot.slane %v440_v26, 2  ;;  %v448_v36 = vrot.slane %v447_v27, 4 }
  0x57   : > { %v409_v37 = vsel %vm195_vm10, %v408_v33, %v403_v20  ;;  %v435_v38 = vmax.f32 %v433_v21, %v434_v29  ;;  %v455_v39 = vrot.slane %v454_v30, 4  ;;  %v462_v40 = vrot.slane %v461_v32, 4 }
  0x58   : > { %711 = vst.msk [vmem:[%s820_s15 + $0x18] sm:$0x7f] %vm197_vm11, %v409_v37  ;;  %v429_v42 = vrot.slane %v428_v34, 1  ;;  %v442_v43 = vmax.f32 %v440_v26, %v441_v35  ;;  %v449_v45 = vmax.f32 %v447_v27, %v448_v36  ;;  %v468_v46 = vsel %vm145_vm2, %v423_v4, -inf }
  0x59   : > { %v436_v47 = vrot.slane %v435_v38, 1  ;;  %v456_v48 = vmax.f32 %v454_v30, %v455_v39  ;;  %v463_v49 = vmax.f32 %v461_v32, %v462_v40  ;;  %v469_v50 = vrot.slane %v468_v46, 4 }
  0x5a   : > { %v430_v53 = vmax.f32 %v428_v34, %v429_v42  ;;  %v443_v54 = vrot.slane %v442_v43, 1  ;;  %v450_v44 = vrot.slane %v449_v45, 2  ;;  %v488_v56 = vmax.f32 %v885_v62, %v721_v41 }
  0x5b   : > { %v437_v57 = vmax.f32 %v435_v38, %v436_v47  ;;  %v457_v58 = vrot.slane %v456_v48, 2  ;;  %v464_v59 = vrot.slane %v463_v49, 2  ;;  %v470_v61 = vmax.f32 %v468_v46, %v469_v50  ;;  %v728_v38 = vld [vmem:[%s777_s11 + $0xd0] sm:$0xff] }
  0x5c   : > { %v444_v1 = vmax.f32 %v442_v43, %v443_v54  ;;  %v451_v31 = vmax.f32 %v449_v45, %v450_v44  ;;  %v489_v2 = vmax.f32 %v720_v51, %v722_v52  ;;  %v493_v3 = vmax.f32 %v488_v56, %v909_v63  ;;  %v730_v54 = vld [vmem:[%s777_s11 + $0xe0] sm:$0xff] }
  0x5d   : > { %v458_v60 = vmax.f32 %v456_v48, %v457_v58  ;;  %v465_v4 = vmax.f32 %v463_v49, %v464_v59  ;;  %v471_v5 = vrot.slane %v470_v61, 2  ;;  %v475_v55 = vsel %vm185_vm5, %v430_v53, %v437_v57  ;;  %v727_v48 = vld [vmem:[%s777_s11 + $0xc8] sm:$0x7f]  ;;  %v729_v49 = vld [vmem:[%s777_s11 + $0xd8] sm:$0x7f] }
  0x5e   : > { %v452_v6 = vrot.slane %v451_v31, 1  ;;  %v476_v62 = vsel %vm187_vm6, %v475_v55, %v444_v1  ;;  %v494_v7 = vmax.f32 %v489_v2, %v724_v0  ;;  %v495_v8 = vsel %vm129_vm0, %v493_v3, -inf  ;;  %v731_v59 = vld [vmem:[%s777_s11 + $0xe8] sm:$0x7f] }
  0x5f   : > { %v459_v9 = vrot.slane %v458_v60, 1  ;;  %v466_v10 = vrot.slane %v465_v4, 1  ;;  %v472_v11 = vmax.f32 %v470_v61, %v471_v5  ;;  %v496_v12 = vrot.slane %v495_v8, 4 }
  0x60   : > { %v453_v13 = vmax.f32 %v451_v31, %v452_v6  ;;  %v502_v14 = vsel %vm137_vm1, %v493_v3, -inf  ;;  %v509_v15 = vsel %vm145_vm2, %v493_v3, -inf  ;;  %v516_v16 = vsel %vm153_vm3, %v493_v3, -inf }
  0x61   : > { %v460_v17 = vmax.f32 %v458_v60, %v459_v9  ;;  %v467_v18 = vmax.f32 %v465_v4, %v466_v10  ;;  %v473_v19 = vrot.slane %v472_v11, 1  ;;  %v497_v20 = vmax.f32 %v495_v8, %v496_v12 }
  0x62   : > { %v477_v21 = vsel %vm189_vm7, %v476_v62, %v453_v13  ;;  %v503_v22 = vrot.slane %v502_v14, 4  ;;  %v510_v23 = vrot.slane %v509_v15, 4  ;;  %v517_v24 = vsel %vm155_vm4, %v494_v7, -inf }
  0x63   : > { %v474_v25 = vmax.f32 %v472_v11, %v473_v19  ;;  %v478_v26 = vsel %vm191_vm8, %v477_v21, %v460_v17  ;;  %v498_v27 = vrot.slane %v497_v20, 2  ;;  %v518_v28 = vmax.f32 %v516_v16, %v517_v24 }
  0x64   : > { %v479_v29 = vsel %vm193_vm9, %v478_v26, %v467_v18  ;;  %v504_v30 = vmax.f32 %v502_v14, %v503_v22  ;;  %v511_v32 = vmax.f32 %v509_v15, %v510_v23  ;;  %v525_v33 = vsel %vm129_vm0, %v494_v7, -inf }
  0x65   : > { %v480_v34 = vsel %vm195_vm10, %v479_v29, %v474_v25  ;;  %v499_v35 = vmax.f32 %v497_v20, %v498_v27  ;;  %v519_v36 = vrot.slane %v518_v28, 4  ;;  %v526_v37 = vrot.slane %v525_v33, 4 }
  0x66   : > { %718 = vst.msk [vmem:[%s820_s15 + $0x20] sm:$0x7f] %vm197_vm11, %v480_v34  ;;  %v505_v39 = vrot.slane %v504_v30, 2  ;;  %v512_v40 = vrot.slane %v511_v32, 2  ;;  %v532_v41 = vsel %vm137_vm1, %v494_v7, -inf  ;;  %v539_v42 = vsel %vm145_vm2, %v494_v7, -inf }
  0x67   : > { %v500_v43 = vrot.slane %v499_v35, 1  ;;  %v520_v45 = vmax.f32 %v518_v28, %v519_v36  ;;  %v527_v46 = vmax.f32 %v525_v33, %v526_v37  ;;  %v533_v47 = vrot.slane %v532_v41, 4 }
  0x68   : > { %v506_v50 = vmax.f32 %v504_v30, %v505_v39  ;;  %v513_v51 = vmax.f32 %v511_v32, %v512_v40  ;;  %v540_v52 = vrot.slane %v539_v42, 4  ;;  %v559_v53 = vmax.f32 %v909_v63, %v728_v38 }
  0x69   : > { %v501_v44 = vmax.f32 %v499_v35, %v500_v43  ;;  %v521_v56 = vrot.slane %v520_v45, 2  ;;  %v528_v57 = vrot.slane %v527_v46, 2  ;;  %v534_v58 = vmax.f32 %v532_v41, %v533_v47 }
  0x6a   : > { %v507_v61 = vrot.slane %v506_v50, 1  ;;  %v514_v0 = vrot.slane %v513_v51, 1  ;;  %v541_v1 = vmax.f32 %v539_v42, %v540_v52  ;;  %v560_v31 = vmax.f32 %v727_v48, %v729_v49 }
  0x6b   : > { %v522_v2 = vmax.f32 %v520_v45, %v521_v56  ;;  %v529_v3 = vmax.f32 %v527_v46, %v528_v57  ;;  %v535_v60 = vrot.slane %v534_v58, 2  ;;  %v564_v4 = vmax.f32 %v559_v53, %v730_v54 }
  0x6c   : > { %v508_v5 = vmax.f32 %v506_v50, %v507_v61  ;;  %v515_v55 = vmax.f32 %v513_v51, %v514_v0  ;;  %v542_v6 = vrot.slane %v541_v1, 2  ;;  %v565_v62 = vmax.f32 %v560_v31, %v731_v59 }
  0x6d   : > { %v523_v7 = vrot.slane %v522_v2, 1  ;;  %v530_v63 = vrot.slane %v529_v3, 1  ;;  %v536_v8 = vmax.f32 %v534_v58, %v535_v60  ;;  %v566_v9 = vsel %vm129_vm0, %v564_v4, -inf }
  0x6e   : > { %v543_v10 = vmax.f32 %v541_v1, %v542_v6  ;;  %v546_v11 = vsel %vm185_vm5, %v501_v44, %v508_v5  ;;  %v567_v12 = vrot.slane %v566_v9, 4  ;;  %v573_v13 = vsel %vm137_vm1, %v564_v4, -inf }
  0x6f   : > { %v524_v14 = vmax.f32 %v522_v2, %v523_v7  ;;  %v531_v15 = vmax.f32 %v529_v3, %v530_v63  ;;  %v537_v16 = vrot.slane %v536_v8, 1  ;;  %v547_v17 = vsel %vm187_vm6, %v546_v11, %v515_v55 }
  0x70   : > { %v544_v18 = vrot.slane %v543_v10, 1  ;;  %v568_v19 = vmax.f32 %v566_v9, %v567_v12  ;;  %v574_v20 = vrot.slane %v573_v13, 4  ;;  %v580_v21 = vsel %vm145_vm2, %v564_v4, -inf }
  0x71   : > { %v538_v22 = vmax.f32 %v536_v8, %v537_v16  ;;  %v548_v23 = vsel %vm189_vm7, %v547_v17, %v524_v14  ;;  %v581_v24 = vrot.slane %v580_v21, 4  ;;  %v587_v25 = vsel %vm153_vm3, %v564_v4, -inf }
  0x72   : > { %v545_v26 = vmax.f32 %v543_v10, %v544_v18  ;;  %v549_v27 = vsel %vm191_vm8, %v548_v23, %v531_v15  ;;  %v569_v28 = vrot.slane %v568_v19, 2  ;;  %v575_v29 = vmax.f32 %v573_v13, %v574_v20 }
  0x73   : > { %v550_v30 = vsel %vm193_vm9, %v549_v27, %v538_v22  ;;  %v582_v32 = vmax.f32 %v580_v21, %v581_v24  ;;  %v588_v33 = vsel %vm155_vm4, %v565_v62, -inf  ;;  %v596_v34 = vsel %vm129_vm0, %v565_v62, -inf }
  0x74   : > { %v551_v35 = vsel %vm195_vm10, %v550_v30, %v545_v26  ;;  %v570_v36 = vmax.f32 %v568_v19, %v569_v28  ;;  %v576_v37 = vrot.slane %v575_v29, 2  ;;  %v589_v38 = vmax.f32 %v587_v25, %v588_v33 }
  0x75   : > { %725 = vst.msk [vmem:[%s820_s15 + $0x28] sm:$0x7f] %vm197_vm11, %v551_v35  ;;  %v583_v39 = vrot.slane %v582_v32, 2  ;;  %v597_v40 = vrot.slane %v596_v34, 4  ;;  %v603_v41 = vsel %vm137_vm1, %v565_v62, -inf  ;;  %v610_v42 = vsel %vm145_vm2, %v565_v62, -inf }
  0x76   : > { %v571_v43 = vrot.slane %v570_v36, 1  ;;  %v577_v45 = vmax.f32 %v575_v29, %v576_v37  ;;  %v590_v46 = vrot.slane %v589_v38, 4  ;;  %v604_v47 = vrot.slane %v603_v41, 4 }
  0x77   : > { %v584_v48 = vmax.f32 %v582_v32, %v583_v39  ;;  %v598_v49 = vmax.f32 %v596_v34, %v597_v40  ;;  %v611_v50 = vrot.slane %v610_v42, 4 }
  0x78   : > { %v572_v51 = vmax.f32 %v570_v36, %v571_v43  ;;  %v578_v52 = vrot.slane %v577_v45, 1  ;;  %v591_v53 = vmax.f32 %v589_v38, %v590_v46  ;;  %v605_v54 = vmax.f32 %v603_v41, %v604_v47 }
  0x79   : > { %v585_v44 = vrot.slane %v584_v48, 1  ;;  %v599_v56 = vrot.slane %v598_v49, 2  ;;  %v612_v57 = vmax.f32 %v610_v42, %v611_v50 }
  0x7a   : > { %v579_v58 = vmax.f32 %v577_v45, %v578_v52  ;;  %v592_v59 = vrot.slane %v591_v53, 2  ;;  %v606_v61 = vrot.slane %v605_v54, 2 }
  0x7b   : > { %v586_v0 = vmax.f32 %v584_v48, %v585_v44  ;;  %v600_v1 = vmax.f32 %v598_v49, %v599_v56  ;;  %v613_v31 = vrot.slane %v612_v57, 2 }
  0x7c   : > { %v593_v2 = vmax.f32 %v591_v53, %v592_v59  ;;  %v607_v3 = vmax.f32 %v605_v54, %v606_v61  ;;  %v617_v60 = vsel %vm185_vm5, %v572_v51, %v579_v58 }
  0x7d   : > { %v601_v4 = vrot.slane %v600_v1, 1  ;;  %v614_v5 = vmax.f32 %v612_v57, %v613_v31  ;;  %v618_v63 = vsel %vm187_vm6, %v617_v60, %v586_v0 }
  0x7e   : > { %v594_v55 = vrot.slane %v593_v2, 1  ;;  %v608_v6 = vrot.slane %v607_v3, 1 }
  0x7f   : > { %v602_v62 = vmax.f32 %v600_v1, %v601_v4  ;;  %v615_v7 = vrot.slane %v614_v5, 1 }
  0x80   : > { %v595_v8 = vmax.f32 %v593_v2, %v594_v55  ;;  %v609_v9 = vmax.f32 %v607_v3, %v608_v6 }
  0x81   : > { %v616_v10 = vmax.f32 %v614_v5, %v615_v7 }
  0x82   : > { %v619_v11 = vsel %vm189_vm7, %v618_v63, %v595_v8 }
  0x83   : > { %v620_v12 = vsel %vm191_vm8, %v619_v11, %v602_v62 }
  0x84   : > { %v621_v13 = vsel %vm193_vm9, %v620_v12, %v609_v9 }
  0x85   : > { %v622_v14 = vsel %vm195_vm10, %v621_v13, %v616_v10 }
  0x86   : > { %732 = vst.msk [vmem:[%s820_s15 + $0x30] sm:$0x7f] %vm197_vm11, %v622_v14 }
  0x87 PF: > { %s11_s6 = sadd.s32 1, %s751_s6  }
  0x88   : > { %p8_p4 = scmp.ge.s32.totalorder %s11_s6, 4  }
  0x8a   :  { %10 = sbr.rel (!%p8_p4) target bundleno = 1 (0x1), region = 74 }

// kernel: _lambda_.9
= control target key start
LH: loop header
LB: loop body
LE: loop exit
PB: predicated region body
PF: predicated region fallthrough
CT: control target
= control target key end

     0   :  { %s3057_s12 = smov 0   ;;  %s3059_s13 = smov 0   ;;  %s3732_s0 = inlined_call_operand.vmem [shape: bf16[1,512,384], index: 0, kind: input, shape index: {}]   ;;  %s3733_s1 = inlined_call_operand.vmem [shape: bf16[1,384,128], index: 1, kind: input, shape index: {}]   ;;  %s3734_s2 = inlined_call_operand.vmem [shape: f32[1,1,128], index: 2, kind: input, shape index: {}]   ;;  %s3735_s3 = inlined_call_operand.vmem [shape: f32[1,512,128], index: 3, kind: output, shape index: {}]  }
   0x1   :  { %s3061_s14 = smov 0  }
   0x2 LB: > { %s28_s15 = sadd.s32 1, %s3030_s13  ;;  %p2298_p0 = scmp.ge.s32.totalorder %s3034_s14, 1  ;;  %s3034_s14 = sphi %s3061_s14, %s13_s14   ;;  %s3030_s13 = sphi %s3059_s13, %s3741_s13   ;;  %s3026_s12 = sphi %s3057_s12, %s3740_s12  }
   0x3   : > { %p30_p1 = scmp.ge.s32.totalorder %s28_s15, 2  ;;  %p198_p2 = scmp.lt.s32.totalorder %s3034_s14, 3 }
   0x5   : > { %s3743_s15 = smov (%p30_p1, %s28_s15), 0  ;;  %p199_p3 = pnand %p2298_p0, %p198_p2 }
   0x6   : > { %v2796_v0 = vld [vmem:[%s3733_s1 + $0x40] sm:$0xff] (!%p199_p3)   ;;  %v2799_v3 = vld [vmem:[%s3733_s1 + $0x48] sm:$0xff] (!%p199_p3)   ;;  %v2802_v6 = vld [vmem:[%s3733_s1 + $0x50] sm:$0xff] (!%p199_p3)   ;;  %s2299_s5 = sshll.u32 (!%p199_p3), %s3026_s12, 5  ;;  %v1391_v30 = vlaneseq (!%p199_p3) }
   0x7   : > { %202 = sbr.rel (%p199_p3) target bundleno = 635 (0x27b), region = 32  ;;  %v2797_v1 = vld [vmem:[%s3733_s1] sm:$0xff] (!%p199_p3)   ;;  %2426 = vmatprep.subr.bf16.mxu0 (!%p199_p3), %v2796_v0  ;;  %v2800_v4 = vld [vmem:[%s3733_s1 + $0x8] sm:$0xff] (!%p199_p3)   ;;  %v2803_v7 = vld [vmem:[%s3733_s1 + $0x10] sm:$0xff] (!%p199_p3)   ;;  %p251_p4 = scmp.lt.s32.totalorder (!%p199_p3), %s2299_s5, 63 }
   0x8   : > { %v2798_v2 = vld [vmem:[%s3733_s1 + $0x80] sm:$0xff] (!%p199_p3)   ;;  %2427 = vmatpush3.bf16.msra.mxu0 (!%p199_p3), %v2797_v1  ;;  %v2801_v5 = vld [vmem:[%s3733_s1 + $0x88] sm:$0xff] (!%p199_p3)   ;;  %v2804_v8 = vld [vmem:[%s3733_s1 + $0x90] sm:$0xff] (!%p199_p3)   ;;  %v3165_v32 = vshrl.u32 (!%p199_p3), %v1391_v30, 7  ;;  %v3170_v36 = vand.u32 (!%p199_p3), 127, %v1391_v30 }
   0x9   : > { %2610 = vmatprep.subr.bf16.mxu1 (!%p199_p3), %v2798_v2  ;;  %2428 = vmatprep.subr.bf16.mxu0 (!%p199_p3), %v2799_v3  ;;  %v2805_v9 = vld [vmem:[%s3733_s1 + $0x58] sm:$0xff] (!%p199_p3)   ;;  %v2808_v12 = vld [vmem:[%s3733_s1 + $0x60] sm:$0xff] (!%p199_p3)   ;;  %v2811_v15 = vld [vmem:[%s3733_s1 + $0x68] sm:$0xff] (!%p199_p3)  }
   0xa   : > { %2611 = vmatpush3.bf16.msra.mxu1 (!%p199_p3), %v2798_v2  ;;  %v2806_v10 = vld [vmem:[%s3733_s1 + $0x18] sm:$0xff] (!%p199_p3)   ;;  %v2810_v13 = vld [vmem:[%s3733_s1 + $0xa0] sm:$0xff] (!%p199_p3)   ;;  %v2813_v16 = vld [vmem:[%s3733_s1 + $0xa8] sm:$0xff] (!%p199_p3)   ;;  %v1393_v37 = vadd.s32 (!%p199_p3), 8, %v3165_v32  ;;  %v1394_v38 = vadd.s32 (!%p199_p3), 16, %v3165_v32  ;;  %v1395_v39 = vadd.s32 (!%p199_p3), 24, %v3165_v32  ;;  %v1410_v40 = vsub.s32 (!%p199_p3), %v3165_v32, %v3170_v36 }
   0xb   : > { %2612 = vmatprep.subr.bf16.mxu1 (!%p199_p3), %v2801_v5  ;;  %v2807_v11 = vld [vmem:[%s3733_s1 + $0x98] sm:$0xff] (!%p199_p3)   ;;  %v2809_v14 = vld [vmem:[%s3733_s1 + $0x20] sm:$0xff] (!%p199_p3)   ;;  %v2812_v17 = vld [vmem:[%s3733_s1 + $0x28] sm:$0xff] (!%p199_p3)   ;;  %v1396_v41 = vadd.s32 (!%p199_p3), 32, %v3165_v32  ;;  %v1397_v44 = vadd.s32 (!%p199_p3), 40, %v3165_v32  ;;  %v1398_v52 = vadd.s32 (!%p199_p3), 48, %v3165_v32 }
   0xc   : > { %2429 = vmatpush3.bf16.msra.mxu0 (!%p199_p3), %v2800_v4  ;;  %v2814_v18 = vld [vmem:[%s3733_s1 + $0x70] sm:$0xff] (!%p199_p3)   ;;  %v2817_v21 = vld [vmem:[%s3733_s1 + $0x78] sm:$0xff] (!%p199_p3)   ;;  %v1411_v43 = vsub.s32 (!%p199_p3), %v1393_v37, %v3170_v36  ;;  %v1412_v46 = vsub.s32 (!%p199_p3), %v1394_v38, %v3170_v36  ;;  %v1413_v47 = vsub.s32 (!%p199_p3), %v1395_v39, %v3170_v36  ;;  %v1427_v50 = vsub.s32 (!%p199_p3), 0, %v1410_v40 }
   0xd   : > { %2430 = vmatprep.subr.bf16.mxu0 (!%p199_p3), %v2802_v6  ;;  %v2815_v19 = vld [vmem:[%s3733_s1 + $0x30] sm:$0xff] (!%p199_p3)   ;;  %v2819_v22 = vld [vmem:[%s3733_s1 + $0xb8] sm:$0xff] (!%p199_p3)   ;;  %v1414_v51 = vsub.s32 (!%p199_p3), %v1396_v41, %v3170_v36  ;;  %v1415_v54 = vsub.s32 (!%p199_p3), %v1397_v44, %v3170_v36  ;;  %v1399_v55 = vadd.s32 (!%p199_p3), 56, %v3165_v32  ;;  %v1416_v61 = vsub.s32 (!%p199_p3), %v1398_v52, %v3170_v36 }
   0xe   : > { %2613 = vmatpush3.bf16.msra.mxu1 %v2801_v5  ;;  %s3745_s5 = smov (!%p251_p4, %s2299_s5), 63  ;;  %v2816_v20 = vld [vmem:[%s3733_s1 + $0xb0] sm:$0xff]   ;;  %v2818_v25 = vld [vmem:[%s3733_s1 + $0x38] sm:$0xff]   ;;  %v1430_v53 = vsub.s32 0, %v1411_v43  ;;  %v1433_v56 = vsub.s32 0, %v1412_v46  ;;  %v1436_v57 = vsub.s32 0, %v1413_v47  ;;  %v2376_v59 = vmin.u32 %v1427_v50, %v1410_v40 }
   0xf   : > { %2614 = vmatprep.subr.bf16.mxu1 %v2804_v8  ;;  %s2770_s27 = smul.u32 12, %s3745_s5  ;;  %v1439_v60 = vsub.s32 0, %v1414_v51  ;;  %v1442_v63 = vsub.s32 0, %v1415_v54  ;;  %v1417_v0 = vsub.s32 %v1399_v55, %v3170_v36  ;;  %v1400_v4 = vadd.s32 64, %v3165_v32  ;;  %s2302_s24 = sshll.u32 %s3745_s5, 3 }
  0x10   : > { %2431 = vmatpush3.bf16.msra.mxu0 %v2803_v7  ;;  %v2377_v62 = vmin.u32 %v1430_v53, %v1411_v43  ;;  %v2378_v2 = vmin.u32 %v1433_v56, %v1412_v46  ;;  %v2379_v3 = vmin.u32 %v1436_v57, %v1413_v47  ;;  %vm1474_vm0 = vcmp.le.s32.totalorder %v2376_v59, 2 }
  0x11   : > { %2432 = vmatprep.subr.bf16.mxu0 %v2805_v9  ;;  %s3147_s16 = scalar_lea.vmem %s3732_s0, %s2770_s27  ;;  %v2380_v7 = vmin.u32 %v1439_v60, %v1414_v51  ;;  %v2381_v9 = vmin.u32 %v1442_v63, %v1415_v54  ;;  %v1402_v44 = vadd.s32 80, %v3165_v32  ;;  %v1404_v52 = vadd.s32 96, %v3165_v32  ;;  %s3504_s27 = scalar_lea.vmem %s3735_s3, %s2302_s24 }
  0x12   : > { %2615 = vmatpush3.bf16.msra.mxu1 %v2804_v8  ;;  %v2822_v23 = vld [vmem:[%s3147_s16 + $0x4] ss:$12 sps:$4 sm:$0xff]   ;;  %v2823_v24 = vld [vmem:[%s3147_s16 + $0x8] ss:$12 sps:$4 sm:$0xff]   ;;  %v2820_v26 = vld [vmem:[%s3147_s16] ss:$12 sps:$4 sm:$0xff]  }
  0x13   : > { %2616 = vmatprep.subr.bf16.mxu1 %v2807_v11  ;;  %899 = vmatprep.mubr.bf16.mxu0 %v2822_v23  ;;  %v2825_v27 = vld [vmem:[%s3147_s16 + $0x1c] ss:$12 sps:$4 sm:$0xff]   ;;  %v2824_v28 = vld [vmem:[%s3147_s16 + $0x20] ss:$12 sps:$4 sm:$0xff]   ;;  %v2831_v29 = vld [vmem:[%s3147_s16 + $0x38] ss:$12 sps:$4 sm:$0xff]   ;;  %v1422_v56 = vsub.s32 %v1404_v52, %v3170_v36 }
  0x14   : > { %2433 = vmatpush3.bf16.msra.mxu0 %v2806_v10  ;;  %2626 = vmatprep.mubr.bf16.mxu1 %v2823_v24  ;;  %v2827_v31 = vld [vmem:[%s3147_s16 + $0x18] ss:$12 sps:$4 sm:$0xff]   ;;  %v2828_v33 = vld [vmem:[%s3147_s16 + $0x34] ss:$12 sps:$4 sm:$0xff]   ;;  %v2832_v34 = vld [vmem:[%s3147_s16 + $0x50] ss:$12 sps:$4 sm:$0xff]  }
  0x15   : > { %2434 = vmatprep.subr.bf16.mxu0 %v2808_v12  ;;  %v2839_v35 = vld [vmem:[%s3147_s16 + $0x68] ss:$12 sps:$4 sm:$0xff]   ;;  %v2830_v42 = vld [vmem:[%s3147_s16 + $0x30] ss:$12 sps:$4 sm:$0xff]   ;;  %v2833_v45 = vld [vmem:[%s3147_s16 + $0x4c] ss:$12 sps:$4 sm:$0xff]  }
  0x16   : > { %2617 = vmatpush3.bf16.msra.mxu1 %v2807_v11  ;;  %v2840_v48 = vld [vmem:[%s3147_s16 + $0x80] ss:$12 sps:$4 sm:$0xff]   ;;  %v2847_v49 = vld [vmem:[%s3147_s16 + $0x98] ss:$12 sps:$4 sm:$0xff]   ;;  %v2835_v58 = vld [vmem:[%s3147_s16 + $0x48] ss:$12 sps:$4 sm:$0xff]   ;;  %v1418_v11 = vsub.s32 %v1400_v4, %v3170_v36 }
  0x17   : > { %2618 = vmatprep.subr.bf16.mxu1 %v2810_v13  ;;  %v2836_v1 = vld [vmem:[%s3147_s16 + $0x64] ss:$12 sps:$4 sm:$0xff]   ;;  %v2855_v6 = vld [vmem:[%s3147_s16 + $0xc8] ss:$12 sps:$4 sm:$0xff]   ;;  %v1445_v8 = vsub.s32 0, %v1416_v61  ;;  %vm1475_vm1 = vcmp.le.s32.totalorder %v2377_v62, 2 }
  0x18   : > { %2435 = vmatpush3.bf16.msra.mxu0 %v2809_v14  ;;  %v2848_v5 = vld [vmem:[%s3147_s16 + $0xb0] ss:$12 sps:$4 sm:$0xff]   ;;  %v1448_v10 = vsub.s32 0, %v1417_v0  ;;  %vm1476_vm2 = vcmp.le.s32.totalorder %v2378_v2, 2  ;;  %vm1477_vm3 = vcmp.le.s32.totalorder %v2379_v3, 2  ;;  %v1401_v12 = vadd.s32 72, %v3165_v32  ;;  %vm2738_vm4 = vmpackc.low %vm1475_vm1, %vm1474_vm0 }
  0x19   : > { %2436 = vmatprep.subr.bf16.mxu0 %v2811_v15  ;;  %vm1478_vm5 = vcmp.le.s32.totalorder %v2380_v7, 2  ;;  %v2838_v14 = vld [vmem:[%s3147_s16 + $0x60] ss:$12 sps:$4 sm:$0xff]   ;;  %v3036_v15 = vmov 1.0|1.0   ;;  %vm3201_vm6 = vmpackc.low %vm1477_vm3, %vm1476_vm2  ;;  %vm1479_vm7 = vcmp.le.s32.totalorder %v2381_v9, 2 }
  0x1a   : > { %2619 = vmatpush3.bf16.msra.mxu1 %v2810_v13  ;;  %v2382_v13 = vmin.u32 %v1445_v8, %v1416_v61  ;;  %v2863_v23 = vld [vmem:[%s3147_s16 + $0xf8] ss:$12 sps:$4 sm:$0xff]   ;;  %vm3214_vm8 = vmpackc.low %vm1479_vm7, %vm1478_vm5  ;;  %v2871_v30 = vld [vmem:[%s3147_s16 + $0x128] ss:$12 sps:$4 sm:$0xff]   ;;  %v1405_v53 = vadd.s32 104, %v3165_v32  ;;  %v1406_v61 = vadd.s32 112, %v3165_v32 }
  0x1b   : > { %2620 = vmatprep.subr.bf16.mxu1 %v2813_v16  ;;  %v2851_v37 = vld [vmem:[%s3147_s16 + $0xa8] ss:$12 sps:$4 sm:$0xff]   ;;  %v2852_v38 = vld [vmem:[%s3147_s16 + $0xc4] ss:$12 sps:$4 sm:$0xff]   ;;  %v2854_v40 = vld [vmem:[%s3147_s16 + $0xc0] ss:$12 sps:$4 sm:$0xff]  }
  0x1c   : > { %2437 = vmatpush3.bf16.msra.mxu0 %v2812_v17  ;;  %v2383_v17 = vmin.u32 %v1448_v10, %v1417_v0  ;;  %vm1480_vm9 = vcmp.le.s32.totalorder %v2382_v13, 2  ;;  %v2880_v39 = vld [vmem:[%s3147_s16 + $0x170] ss:$12 sps:$4 sm:$0xff]   ;;  %v2860_v43 = vld [vmem:[%s3147_s16 + $0xf4] ss:$12 sps:$4 sm:$0xff]   ;;  %v1423_v57 = vsub.s32 %v1405_v53, %v3170_v36  ;;  %v1407_v62 = vadd.s32 120, %v3165_v32 }
  0x1d   : > { %2438 = vmatprep.subr.bf16.mxu0 %v2814_v18  ;;  %v1419_v18 = vsub.s32 %v1401_v12, %v3170_v36  ;;  %v2857_v41 = vld [vmem:[%s3147_s16 + $0xdc] ss:$12 sps:$4 sm:$0xff]   ;;  %v2865_v47 = vld [vmem:[%s3147_s16 + $0x10c] ss:$12 sps:$4 sm:$0xff]   ;;  %v2868_v63 = vld [vmem:[%s3147_s16 + $0x124] ss:$12 sps:$4 sm:$0xff]   ;;  %v1424_v2 = vsub.s32 %v1406_v61, %v3170_v36 }
  0x1e   : > { %2621 = vmatpush3.bf16.msra.mxu1 %v2813_v16  ;;  %vm1481_vm10 = vcmp.le.s32.totalorder %v2383_v17, 2  ;;  %v2862_v46 = vld [vmem:[%s3147_s16 + $0xf0] ss:$12 sps:$4 sm:$0xff]   ;;  %v1466_v59 = vsub.s32 0, %v1423_v57  ;;  %v2867_v60 = vld [vmem:[%s3147_s16 + $0x108] ss:$12 sps:$4 sm:$0xff]   ;;  %v1425_v3 = vsub.s32 %v1407_v62, %v3170_v36 }
  0x1f   : > { %2622 = vmatprep.subr.bf16.mxu1 %v2816_v20  ;;  %vm2750_vm11 = vmpackc.low %vm1481_vm10, %vm1480_vm9  ;;  %v1469_v4 = vsub.s32 0, %v1424_v2  ;;  %v2870_v7 = vld [vmem:[%s3147_s16 + $0x120] ss:$12 sps:$4 sm:$0xff]   ;;  %v2875_v8 = vld [vmem:[%s3147_s16 + $0x138] ss:$12 sps:$4 sm:$0xff]  }
  0x20   : > { %2439 = vmatpush3.bf16.msra.mxu0 %v2815_v19  ;;  %v1451_v19 = vsub.s32 0, %v1418_v11  ;;  %v2876_v9 = vld [vmem:[%s3147_s16 + $0x154] ss:$12 sps:$4 sm:$0xff]   ;;  %v2878_v10 = vld [vmem:[%s3147_s16 + $0x150] ss:$12 sps:$4 sm:$0xff]  }
  0x21   : > { %2440 = vmatprep.subr.bf16.mxu0 %v2817_v21  ;;  %v2856_v21 = vld [vmem:[%s3147_s16 + $0xe0] ss:$12 sps:$4 sm:$0xff]   ;;  %v2883_v12 = vld [vmem:[%s3147_s16 + $0x168] ss:$12 sps:$4 sm:$0xff]  }
  0x22   : > { %2623 = vmatpush3.bf16.msra.mxu1 %v2816_v20  ;;  %v2841_v20 = vld [vmem:[%s3147_s16 + $0x7c] ss:$12 sps:$4 sm:$0xff]  }
  0x23   : > { %2624 = vmatprep.subr.bf16.mxu1 %v2819_v22 }
  0x24   : > { %2441 = vmatpush3.bf16.msra.mxu0 %v2818_v25  ;;  %v2384_v25 = vmin.u32 %v1451_v19, %v1418_v11  ;;  %v2881_v11 = vld [vmem:[%s3147_s16 + $0x16c] ss:$12 sps:$4 sm:$0xff]  }
  0x26   : > { %2625 = vmatpush3.bf16.msra.mxu1 %v2819_v22  ;;  %v1454_v22 = vsub.s32 0, %v1419_v18  ;;  %vm1482_vm12 = vcmp.le.s32.totalorder %v2384_v25, 2 }
  0x27   : > { %900 = vmatmul.mubr.bf16.vlgmr.msra.gmra.mrb[0].mxu0 %v2820_v26  ;;  %2739 = vmatprep.subr.msk.bf16.mxu1 %vm2738_vm4, %v3036_v15 }
  0x28   : > { %907 = vmatprep.mubr.bf16.mxu0 %v2825_v27  ;;  %v2385_v26 = vmin.u32 %v1454_v22, %v1419_v18  ;;  %v2843_v27 = vld [vmem:[%s3147_s16 + $0x78] ss:$12 sps:$4 sm:$0xff]  }
  0x29   : > { %2627 = vmatmul.mubr.bf16.vlgmr.msra.gmra.mrb[0].mxu1 %v2824_v28  ;;  %v2844_v28 = vld [vmem:[%s3147_s16 + $0x94] ss:$12 sps:$4 sm:$0xff]  }
  0x2a   : > { %2630 = vmatprep.mubr.bf16.mxu1 %v2831_v29  ;;  %2741 = vmatpush3.bf16.msk.msra.mxu1 %vm2738_vm4, %v3036_v15  ;;  %vm1483_vm13 = vcmp.le.s32.totalorder %v2385_v26, 2  ;;  %v2864_v29 = vld [vmem:[%s3147_s16 + $0x110] ss:$12 sps:$4 sm:$0xff]  }
  0x2b   : > { %2743 = vmatprep.subr.msk.bf16.mxu1 %vm3201_vm6, %v3036_v15  ;;  %vm2754_vm14 = vmpackc.low %vm1483_vm13, %vm1482_vm12 }
  0x2e   : > { %2745 = vmatpush3.bf16.msk.msra.mxu1 %vm3201_vm6, %v3036_v15 }
  0x2f   : > { %908 = vmatmul.mubr.bf16.gmra.mrb[4].mxu0 %v2827_v31  ;;  %2747 = vmatprep.subr.msk.bf16.mxu1 %vm3214_vm8, %v3036_v15  ;;  %v2846_v31 = vld [vmem:[%s3147_s16 + $0x90] ss:$12 sps:$4 sm:$0xff]  }
  0x30   : > { %915 = vmatprep.mubr.bf16.mxu0 %v2828_v33  ;;  %v2849_v33 = vld [vmem:[%s3147_s16 + $0xac] ss:$12 sps:$4 sm:$0xff]  }
  0x31   : > { %2631 = vmatmul.mubr.bf16.gmra.mrb[4].mxu1 %v2832_v34  ;;  %v2872_v34 = vld [vmem:[%s3147_s16 + $0x140] ss:$12 sps:$4 sm:$0xff]  }
  0x32   : > { %2634 = vmatprep.mubr.bf16.mxu1 %v2839_v35  ;;  %2749 = vmatpush3.bf16.msk.msra.mxu1 %vm3214_vm8, %v3036_v15  ;;  %v2879_v35 = vld [vmem:[%s3147_s16 + $0x158] ss:$12 sps:$4 sm:$0xff]  }
  0x33   : > { %2751 = vmatprep.subr.msk.bf16.mxu1 %vm2750_vm11, %v3036_v15 }
  0x36   : > { %2753 = vmatpush3.bf16.msk.msra.mxu1 %vm2750_vm11, %v3036_v15 }
  0x37   : > { %916 = vmatmul.mubr.bf16.gmra.mrb[8].mxu0 %v2830_v42  ;;  %2755 = vmatprep.subr.msk.bf16.mxu1 %vm2754_vm14, %v3036_v15  ;;  %v2859_v42 = vld [vmem:[%s3147_s16 + $0xd8] ss:$12 sps:$4 sm:$0xff]  }
  0x38   : > { %923 = vmatprep.mubr.bf16.mxu0 %v2833_v45  ;;  %v1403_v45 = vadd.s32 88, %v3165_v32  ;;  %v1472_v32 = vsub.s32 0, %v1425_v3 }
  0x39   : > { %2635 = vmatmul.mubr.bf16.gmra.mrb[8].mxu1 %v2840_v48  ;;  %v1420_v48 = vsub.s32 %v1402_v44, %v3170_v36 }
  0x3a   : > { %2638 = vmatprep.mubr.bf16.mxu1 %v2847_v49  ;;  %2757 = vmatpush3.bf16.msk.msra.mxu1 %vm2754_vm14, %v3036_v15  ;;  %v1421_v49 = vsub.s32 %v1403_v45, %v3170_v36  ;;  %v2873_v36 = vld [vmem:[%s3147_s16 + $0x13c] ss:$12 sps:$4 sm:$0xff]  }
  0x3b   : > { %v1457_v50 = vsub.s32 0, %v1420_v48 }
  0x3c   : > { %v1460_v51 = vsub.s32 0, %v1421_v49 }
  0x3d   : > { %v2386_v54 = vmin.u32 %v1457_v50, %v1420_v48 }
  0x3e   : > { %v2387_v55 = vmin.u32 %v1460_v51, %v1421_v49 }
  0x3f   : > { %924 = vmatmul.mubr.bf16.gmra.mrb[12].mxu0 %v2835_v58  ;;  %vm1484_vm15 = vcmp.le.s32.totalorder %v2386_v54, 2  ;;  %v1463_v58 = vsub.s32 0, %v1422_v56 }
  0x40   : > { %931 = vmatprep.mubr.bf16.mxu0 %v2836_v1  ;;  %vm1485_vm0 = vcmp.le.s32.totalorder %v2387_v55, 2  ;;  %v2389_v1 = vmin.u32 %v1466_v59, %v1423_v57 }
  0x41   : > { %2639 = vmatmul.mubr.bf16.gmra.mrb[12].mxu1 %v2848_v5  ;;  %vm2758_vm1 = vmpackc.low %vm1485_vm0, %vm1484_vm15  ;;  %v2388_v0 = vmin.u32 %v1463_v58, %v1422_v56  ;;  %v2390_v5 = vmin.u32 %v1469_v4, %v1424_v2 }
  0x42   : > { %2642 = vmatprep.mubr.bf16.mxu1 %v2855_v6  ;;  %2759 = vmatprep.subr.msk.bf16.mxu1 %vm2758_vm1, %v3036_v15  ;;  %vm1487_vm3 = vcmp.le.s32.totalorder %v2389_v1, 2  ;;  %v2391_v6 = vmin.u32 %v1472_v32, %v1425_v3 }
  0x43   : > { %2761 = vmatpush3.bf16.msk.msra.mxu1 %vm2758_vm1, %v3036_v15  ;;  %vm1486_vm2 = vcmp.le.s32.totalorder %v2388_v0, 2  ;;  %vm1488_vm5 = vcmp.le.s32.totalorder %v2390_v5, 2 }
  0x44   : > { %vm2762_vm4 = vmpackc.low %vm1487_vm3, %vm1486_vm2  ;;  %vm1489_vm6 = vcmp.le.s32.totalorder %v2391_v6, 2 }
  0x45   : > { %2763 = vmatprep.subr.msk.bf16.mxu1 %vm2762_vm4, %v3036_v15  ;;  %vm2766_vm7 = vmpackc.low %vm1489_vm6, %vm1488_vm5 }
  0x47   : > { %932 = vmatmul.mubr.bf16.gmra.mrb[16].mxu0 %v2838_v14  ;;  %2765 = vmatpush3.bf16.msk.msra.mxu1 %vm2762_vm4, %v3036_v15 }
  0x48   : > { %939 = vmatprep.mubr.bf16.mxu0 %v2841_v20  ;;  %2767 = vmatprep.subr.msk.bf16.mxu1 %vm2766_vm7, %v3036_v15 }
  0x49   : > { %2643 = vmatmul.mubr.bf16.gmra.mrb[16].mxu1 %v2856_v21 }
  0x4a   : > { %2646 = vmatprep.mubr.bf16.mxu1 %v2863_v23 }
  0x4b   : > { %2769 = vmatpush3.bf16.msk.msra.mxu1 %vm2766_vm7, %v3036_v15  ;;  %v3278_v15 = vld [vmem:[%s3734_s2] ss:$0 sm:$0xff] }
  0x4f   : > { %940 = vmatmul.mubr.bf16.gmra.mrb[20].mxu0 %v2843_v27 }
  0x50   : > { %947 = vmatprep.mubr.bf16.mxu0 %v2844_v28 }
  0x51   : > { %2647 = vmatmul.mubr.bf16.gmra.mrb[20].mxu1 %v2864_v29 }
  0x52   : > { %2650 = vmatprep.mubr.bf16.mxu1 %v2871_v30 }
  0x57   : > { %948 = vmatmul.mubr.bf16.gmra.mrb[24].mxu0 %v2846_v31 }
  0x58   : > { %955 = vmatprep.mubr.bf16.mxu0 %v2849_v33 }
  0x59   : > { %2651 = vmatmul.mubr.bf16.gmra.mrb[24].mxu1 %v2872_v34 }
  0x5a   : > { %2654 = vmatprep.mubr.bf16.mxu1 %v2879_v35 }
  0x5f   : > { %956 = vmatmul.mubr.bf16.gmra.mrb[28].mxu0 %v2851_v37 }
  0x60   : > { %963 = vmatprep.mubr.bf16.mxu0 %v2852_v38 }
  0x61   : > { %2655 = vmatmul.mubr.bf16.gmra.mrb[28].mxu1 %v2880_v39 }
  0x67   : > { %964 = vmatmul.mubr.bf16.gmra.mrb[32].mxu0 %v2854_v40 }
  0x68   : > { %971 = vmatprep.mubr.bf16.mxu0 %v2857_v41 }
  0x6f   : > { %972 = vmatmul.mubr.bf16.gmra.mrb[36].mxu0 %v2859_v42 }
  0x70   : > { %979 = vmatprep.mubr.bf16.mxu0 %v2860_v43 }
  0x77   : > { %980 = vmatmul.mubr.bf16.gmra.mrb[40].mxu0 %v2862_v46 }
  0x78   : > { %987 = vmatprep.mubr.bf16.mxu0 %v2865_v47 }
  0x7f   : > { %988 = vmatmul.mubr.bf16.gmra.mrb[44].mxu0 %v2867_v60 }
  0x80   : > { %995 = vmatprep.mubr.bf16.mxu0 %v2868_v63 }
  0x87   : > { %996 = vmatmul.mubr.bf16.gmra.mrb[48].mxu0 %v2870_v7 }
  0x88   : > { %1003 = vmatprep.mubr.bf16.mxu0 %v2873_v36 }
  0x8f   : > { %1004 = vmatmul.mubr.bf16.gmra.mrb[52].mxu0 %v2875_v8 }
  0x90   : > { %1011 = vmatprep.mubr.bf16.mxu0 %v2876_v9 }
  0x97   : > { %1012 = vmatmul.mubr.bf16.gmra.mrb[56].mxu0 %v2878_v10 }
  0x98   : > { %1019 = vmatprep.mubr.bf16.mxu0 %v2881_v11 }
  0x9f   : > { %1020 = vmatmul.mubr.bf16.gmra.mrb[60].mxu0 %v2883_v12 }
  0xfa   : > { %v2442_v13 = vpop.f32.mrb[0].mxu0 }
  0xfb   : > { %v2443_v14 = vpop.f32.mrb[1].mxu0 }
  0xfc   : > { %v2444_v16 = vadd.f32 %v2443_v14, %v2442_v13  ;;  %v2445_v17 = vpop.f32.mrb[2].mxu0  ;;  %v2628_v18 = vpop.f32.mrb[0].mxu1 }
  0xfd   : > { %v2446_v19 = vpop.f32.mrb[3].mxu0  ;;  %v1062_v20 = vpop.f32.mrb[1].mxu1 }
  0xfe   : > { %v2447_v21 = vadd.f32 %v2446_v19, %v2445_v17  ;;  %v1063_v22 = vadd.f32 %v2444_v16, %v1062_v20  ;;  %v2629_v23 = vpop.f32.mrb[2].mxu1 }
  0xff   : > { %v1065_v24 = vpop.f32.mrb[3].mxu1 }
 0x100   : > { %v1295_v25 = vadd.f32 %v3278_v15, %v1063_v22  ;;  %v1066_v26 = vadd.f32 %v2447_v21, %v1065_v24 }
 0x102   : > { %v3281_v27 = vmax.f32 %v1295_v25, 0.0  ;;  %v1296_v28 = vadd.f32 %v3278_v15, %v1066_v26  ;;  %v2448_v29 = vpop.f32.mrb[4].mxu0 }
 0x103   : > { %v2449_v30 = vpop.f32.mrb[5].mxu0 }
 0x104   : > { %v3284_v31 = vmax.f32 %v1296_v28, 0.0  ;;  %v2450_v33 = vadd.f32 %v2449_v30, %v2448_v29  ;;  %v2451_v34 = vpop.f32.mrb[6].mxu0  ;;  %v1359_v35 = vmul.f32 %v3281_v27, %v3281_v27  ;;  %v2632_v37 = vpop.f32.mrb[4].mxu1 }
 0x105   : > { %v2452_v38 = vpop.f32.mrb[7].mxu0  ;;  %v1078_v39 = vpop.f32.mrb[5].mxu1 }
 0x106   : > { %v1360_v40 = vmul.f32 %v3284_v31, %v3284_v31  ;;  %v1071_v41 = vadd.f32 %v2628_v18, %v2450_v33  ;;  %v2453_v42 = vadd.f32 %v2452_v38, %v2451_v34  ;;  %2690 = vmatprep.mubr.f32.mxu1 %v1359_v35  ;;  %v2633_v43 = vpop.f32.mrb[6].mxu1 }
 0x107   : > { %v1081_v44 = vpop.f32.mrb[7].mxu1 }
 0x108   : > { %v1297_v45 = vadd.f32 %v3278_v15, %v1071_v41  ;;  %v1074_v46 = vadd.f32 %v2629_v23, %v2453_v42  ;;  %2691 = vmatmul.mubr.f32.vlgmr.msra.gmra.mrb[32].mxu1 %v1360_v40 }
 0x10a   : > { %v3291_v47 = vmax.f32 %v1297_v45, 0.0  ;;  %v1298_v48 = vadd.f32 %v3278_v15, %v1074_v46  ;;  %v2454_v49 = vpop.f32.mrb[8].mxu0 }
 0x10b   : > { %v2455_v50 = vpop.f32.mrb[9].mxu0 }
 0x10c   : > { %v3294_v51 = vmax.f32 %v1298_v48, 0.0  ;;  %v2456_v52 = vadd.f32 %v2455_v50, %v2454_v49  ;;  %v2457_v53 = vpop.f32.mrb[10].mxu0  ;;  %v1361_v54 = vmul.f32 %v3291_v47, %v3291_v47  ;;  %v3298_v55 = vpop.f32.mrb[8].mxu1 }
 0x10d   : > { %v2458_v56 = vpop.f32.mrb[11].mxu0  ;;  %v1094_v57 = vpop.f32.mrb[9].mxu1 }
 0x10e   : > { %v2459_v58 = vadd.f32 %v2458_v56, %v2457_v53  ;;  %v1079_v59 = vadd.f32 %v2456_v52, %v1078_v39  ;;  %2693 = vmatprep.mubr.f32.mxu1 %v1361_v54  ;;  %v1362_v60 = vmul.f32 %v3294_v51, %v3294_v51  ;;  %v3302_v61 = vpop.f32.mrb[10].mxu1 }
 0x10f   : > { %v1097_v62 = vpop.f32.mrb[11].mxu1 }
 0x110   : > { %v1299_v63 = vadd.f32 %v3278_v15, %v1079_v59  ;;  %v1082_v0 = vadd.f32 %v2459_v58, %v1081_v44  ;;  %2694 = vmatmul.mubr.f32.gmra.mrb[34].mxu1 %v1362_v60 }
 0x112   : > { %v3305_v1 = vmax.f32 %v1299_v63, 0.0  ;;  %v1300_v2 = vadd.f32 %v3278_v15, %v1082_v0  ;;  %v2460_v3 = vpop.f32.mrb[12].mxu0 }
 0x113   : > { %v2461_v4 = vpop.f32.mrb[13].mxu0 }
 0x114   : > { %v3308_v32 = vmax.f32 %v1300_v2, 0.0  ;;  %v2462_v5 = vadd.f32 %v2461_v4, %v2460_v3  ;;  %v2463_v6 = vpop.f32.mrb[14].mxu0  ;;  %v1363_v7 = vmul.f32 %v3305_v1, %v3305_v1  ;;  %v3312_v36 = vpop.f32.mrb[12].mxu1 }
 0x115   : > { %v2464_v8 = vpop.f32.mrb[15].mxu0  ;;  %v1110_v9 = vpop.f32.mrb[13].mxu1 }
 0x116   : > { %v1087_v10 = vadd.f32 %v2632_v37, %v2462_v5  ;;  %v2465_v11 = vadd.f32 %v2464_v8, %v2463_v6  ;;  %2696 = vmatprep.mubr.f32.mxu1 %v1363_v7  ;;  %v1364_v12 = vmul.f32 %v3308_v32, %v3308_v32  ;;  %v3316_v13 = vpop.f32.mrb[14].mxu1 }
 0x117   : > { %v1113_v14 = vpop.f32.mrb[15].mxu1 }
 0x118   : > { %v1301_v16 = vadd.f32 %v3278_v15, %v1087_v10  ;;  %v1090_v17 = vadd.f32 %v2633_v43, %v2465_v11  ;;  %2697 = vmatmul.mubr.f32.gmra.mrb[36].mxu1 %v1364_v12 }
 0x11a   : > { %v3319_v18 = vmax.f32 %v1301_v16, 0.0  ;;  %v1302_v19 = vadd.f32 %v3278_v15, %v1090_v17  ;;  %v2466_v20 = vpop.f32.mrb[16].mxu0 }
 0x11b   : > { %v2467_v21 = vpop.f32.mrb[17].mxu0 }
 0x11c   : > { %v3322_v22 = vmax.f32 %v1302_v19, 0.0  ;;  %v2468_v23 = vadd.f32 %v2467_v21, %v2466_v20  ;;  %v2469_v24 = vpop.f32.mrb[18].mxu0  ;;  %v1365_v25 = vmul.f32 %v3319_v18, %v3319_v18  ;;  %v3326_v26 = vpop.f32.mrb[16].mxu1 }
 0x11d   : > { %v2470_v28 = vpop.f32.mrb[19].mxu0  ;;  %v3328_v29 = vpop.f32.mrb[17].mxu1 }
 0x11e   : > { %v2471_v30 = vadd.f32 %v2470_v28, %v2469_v24  ;;  %v1095_v33 = vadd.f32 %v2468_v23, %v1094_v57  ;;  %2699 = vmatprep.mubr.f32.mxu1 %v1365_v25  ;;  %v1366_v34 = vmul.f32 %v3322_v22, %v3322_v22  ;;  %v3332_v35 = vpop.f32.mrb[18].mxu1 }
 0x11f   : > { %v3334_v37 = vpop.f32.mrb[19].mxu1 }
 0x120   : > { %v1303_v38 = vadd.f32 %v3278_v15, %v1095_v33  ;;  %v1098_v39 = vadd.f32 %v2471_v30, %v1097_v62  ;;  %2700 = vmatmul.mubr.f32.gmra.mrb[38].mxu1 %v1366_v34 }
 0x122   : > { %v3337_v40 = vmax.f32 %v1303_v38, 0.0  ;;  %v1304_v41 = vadd.f32 %v3278_v15, %v1098_v39  ;;  %v2472_v42 = vpop.f32.mrb[20].mxu0 }
 0x123   : > { %v2473_v43 = vpop.f32.mrb[21].mxu0 }
 0x124   : > { %v3340_v44 = vmax.f32 %v1304_v41, 0.0  ;;  %v2474_v45 = vadd.f32 %v2473_v43, %v2472_v42  ;;  %v2475_v46 = vpop.f32.mrb[22].mxu0  ;;  %v1367_v48 = vmul.f32 %v3337_v40, %v3337_v40  ;;  %v3344_v49 = vpop.f32.mrb[20].mxu1 }
 0x125   : > { %v2476_v50 = vpop.f32.mrb[23].mxu0  ;;  %v3346_v52 = vpop.f32.mrb[21].mxu1 }
 0x126   : > { %v1103_v53 = vadd.f32 %v3298_v55, %v2474_v45  ;;  %v2477_v54 = vadd.f32 %v2476_v50, %v2475_v46  ;;  %2702 = vmatprep.mubr.f32.mxu1 %v1367_v48  ;;  %v1368_v56 = vmul.f32 %v3340_v44, %v3340_v44  ;;  %v3351_v57 = vpop.f32.mrb[22].mxu1 }
 0x127   : > { %v3353_v58 = vpop.f32.mrb[23].mxu1 }
 0x128   : > { %v1305_v59 = vadd.f32 %v3278_v15, %v1103_v53  ;;  %v1106_v60 = vadd.f32 %v3302_v61, %v2477_v54  ;;  %2703 = vmatmul.mubr.f32.gmra.mrb[40].mxu1 %v1368_v56 }
 0x12a   : > { %v3357_v62 = vmax.f32 %v1305_v59, 0.0  ;;  %v1306_v63 = vadd.f32 %v3278_v15, %v1106_v60  ;;  %v2478_v0 = vpop.f32.mrb[24].mxu0 }
 0x12b   : > { %v2479_v55 = vpop.f32.mrb[25].mxu0 }
 0x12c   : > { %v3360_v2 = vmax.f32 %v1306_v63, 0.0  ;;  %v2480_v3 = vadd.f32 %v2479_v55, %v2478_v0  ;;  %v2481_v4 = vpop.f32.mrb[26].mxu0  ;;  %v1369_v5 = vmul.f32 %v3357_v62, %v3357_v62  ;;  %v3364_v6 = vpop.f32.mrb[24].mxu1 }
 0x12d   : > { %v2482_v7 = vpop.f32.mrb[27].mxu0  ;;  %v3366_v8 = vpop.f32.mrb[25].mxu1 }
 0x12e   : > { %v2483_v61 = vadd.f32 %v2482_v7, %v2481_v4  ;;  %v1111_v10 = vadd.f32 %v2480_v3, %v1110_v9  ;;  %2705 = vmatprep.mubr.f32.mxu1 %v1369_v5  ;;  %v1370_v11 = vmul.f32 %v3360_v2, %v3360_v2  ;;  %v3370_v12 = vpop.f32.mrb[26].mxu1 }
 0x12f   : > { %v3372_v16 = vpop.f32.mrb[27].mxu1 }
 0x130   : > { %v1307_v17 = vadd.f32 %v3278_v15, %v1111_v10  ;;  %v1114_v19 = vadd.f32 %v2483_v61, %v1113_v14  ;;  %2706 = vmatmul.mubr.f32.gmra.mrb[42].mxu1 %v1370_v11 }
 0x132   : > { %v3375_v20 = vmax.f32 %v1307_v17, 0.0  ;;  %v1308_v21 = vadd.f32 %v3278_v15, %v1114_v19  ;;  %v2484_v23 = vpop.f32.mrb[28].mxu0 }
 0x133   : > { %v2485_v24 = vpop.f32.mrb[29].mxu0 }
 0x134   : > { %v3378_v25 = vmax.f32 %v1308_v21, 0.0  ;;  %v2486_v9 = vadd.f32 %v2485_v24, %v2484_v23  ;;  %v2487_v28 = vpop.f32.mrb[30].mxu0  ;;  %v1371_v30 = vmul.f32 %v3375_v20, %v3375_v20  ;;  %v3382_v33 = vpop.f32.mrb[28].mxu1 }
 0x135   : > { %v2488_v34 = vpop.f32.mrb[31].mxu0  ;;  %v3384_v38 = vpop.f32.mrb[29].mxu1 }
 0x136   : > { %v1119_v14 = vadd.f32 %v3312_v36, %v2486_v9  ;;  %v2489_v39 = vadd.f32 %v2488_v34, %v2487_v28  ;;  %2708 = vmatprep.mubr.f32.mxu1 %v1371_v30  ;;  %v1372_v41 = vmul.f32 %v3378_v25, %v3378_v25  ;;  %v3389_v42 = vpop.f32.mrb[30].mxu1 }
 0x137   : > { %v3391_v43 = vpop.f32.mrb[31].mxu1 }
 0x138   : > { %v1309_v45 = vadd.f32 %v3278_v15, %v1119_v14  ;;  %v1122_v46 = vadd.f32 %v3316_v13, %v2489_v39  ;;  %2709 = vmatmul.mubr.f32.gmra.mrb[44].mxu1 %v1372_v41 }
 0x13a   : > { %v3395_v48 = vmax.f32 %v1309_v45, 0.0  ;;  %v1310_v50 = vadd.f32 %v3278_v15, %v1122_v46  ;;  %v2490_v53 = vpop.f32.mrb[32].mxu0 }
 0x13b   : > { %v2491_v36 = vpop.f32.mrb[33].mxu0 }
 0x13c   : > { %v3398_v54 = vmax.f32 %v1310_v50, 0.0  ;;  %v2492_v56 = vadd.f32 %v2491_v36, %v2490_v53  ;;  %v2493_v59 = vpop.f32.mrb[34].mxu0  ;;  %v1373_v60 = vmul.f32 %v3395_v48, %v3395_v48 }
 0x13d   : > { %v2494_v63 = vpop.f32.mrb[35].mxu0 }
 0x13e   : > { %v2495_v0 = vadd.f32 %v2494_v63, %v2493_v59  ;;  %v1127_v55 = vadd.f32 %v2492_v56, %v3328_v29  ;;  %2711 = vmatprep.mubr.f32.mxu1 %v1373_v60  ;;  %v1374_v13 = vmul.f32 %v3398_v54, %v3398_v54 }
 0x140   : > { %v1311_v3 = vadd.f32 %v3278_v15, %v1127_v55  ;;  %v1130_v4 = vadd.f32 %v2495_v0, %v3334_v37  ;;  %2712 = vmatmul.mubr.f32.gmra.mrb[46].mxu1 %v1374_v13 }
 0x142   : > { %v3407_v5 = vmax.f32 %v1311_v3, 0.0  ;;  %v1312_v7 = vadd.f32 %v3278_v15, %v1130_v4  ;;  %v2496_v61 = vpop.f32.mrb[36].mxu0 }
 0x143   : > { %v2497_v10 = vpop.f32.mrb[37].mxu0 }
 0x144   : > { %v3410_v11 = vmax.f32 %v1312_v7, 0.0  ;;  %v2498_v17 = vadd.f32 %v2497_v10, %v2496_v61  ;;  %v2499_v19 = vpop.f32.mrb[38].mxu0  ;;  %v1375_v29 = vmul.f32 %v3407_v5, %v3407_v5 }
 0x145   : > { %v2500_v21 = vpop.f32.mrb[39].mxu0 }
 0x146   : > { %v1135_v23 = vadd.f32 %v3326_v26, %v2498_v17  ;;  %v2501_v24 = vadd.f32 %v2500_v21, %v2499_v19  ;;  %2714 = vmatprep.mubr.f32.mxu1 %v1375_v29  ;;  %v1376_v37 = vmul.f32 %v3410_v11, %v3410_v11 }
 0x148   : > { %v1313_v9 = vadd.f32 %v3278_v15, %v1135_v23  ;;  %v1138_v28 = vadd.f32 %v3332_v35, %v2501_v24  ;;  %2715 = vmatmul.mubr.f32.gmra.mrb[48].mxu1 %v1376_v37 }
 0x14a   : > { %v3419_v30 = vmax.f32 %v1313_v9, 0.0  ;;  %v1314_v34 = vadd.f32 %v3278_v15, %v1138_v28  ;;  %v2502_v14 = vpop.f32.mrb[40].mxu0 }
 0x14b   : > { %v2503_v39 = vpop.f32.mrb[41].mxu0 }
 0x14c   : > { %v3422_v41 = vmax.f32 %v1314_v34, 0.0  ;;  %v2504_v45 = vadd.f32 %v2503_v39, %v2502_v14  ;;  %v2505_v26 = vpop.f32.mrb[42].mxu0  ;;  %v1377_v46 = vmul.f32 %v3419_v30, %v3419_v30 }
 0x14d   : > { %v2506_v50 = vpop.f32.mrb[43].mxu0 }
 0x14e   : > { %v2507_v53 = vadd.f32 %v2506_v50, %v2505_v26  ;;  %v1143_v36 = vadd.f32 %v2504_v45, %v3346_v52  ;;  %2717 = vmatprep.mubr.f32.mxu1 %v1377_v46  ;;  %v1378_v35 = vmul.f32 %v3422_v41, %v3422_v41 }
 0x150   : > { %v1315_v56 = vadd.f32 %v3278_v15, %v1143_v36  ;;  %v1146_v59 = vadd.f32 %v2507_v53, %v3353_v58  ;;  %2718 = vmatmul.mubr.f32.gmra.mrb[50].mxu1 %v1378_v35 }
 0x152   : > { %v3431_v60 = vmax.f32 %v1315_v56, 0.0  ;;  %v1316_v63 = vadd.f32 %v3278_v15, %v1146_v59  ;;  %v2508_v0 = vpop.f32.mrb[44].mxu0 }
 0x153   : > { %v2509_v55 = vpop.f32.mrb[45].mxu0 }
 0x154   : > { %v3434_v13 = vmax.f32 %v1316_v63, 0.0  ;;  %v2510_v3 = vadd.f32 %v2509_v55, %v2508_v0  ;;  %v2511_v4 = vpop.f32.mrb[46].mxu0  ;;  %v1379_v52 = vmul.f32 %v3431_v60, %v3431_v60 }
 0x155   : > { %v2512_v7 = vpop.f32.mrb[47].mxu0 }
 0x156   : > { %v1151_v61 = vadd.f32 %v3344_v49, %v2510_v3  ;;  %v2513_v10 = vadd.f32 %v2512_v7, %v2511_v4  ;;  %2720 = vmatprep.mubr.f32.mxu1 %v1379_v52  ;;  %v1380_v58 = vmul.f32 %v3434_v13, %v3434_v13 }
 0x158   : > { %v1317_v17 = vadd.f32 %v3278_v15, %v1151_v61  ;;  %v1154_v19 = vadd.f32 %v3351_v57, %v2513_v10  ;;  %2721 = vmatmul.mubr.f32.gmra.mrb[52].mxu1 %v1380_v58 }
 0x15a   : > { %v3443_v29 = vmax.f32 %v1317_v17, 0.0  ;;  %v1318_v21 = vadd.f32 %v3278_v15, %v1154_v19  ;;  %v2514_v23 = vpop.f32.mrb[48].mxu0 }
 0x15b   : > { %v2515_v24 = vpop.f32.mrb[49].mxu0 }
 0x15c   : > { %v3446_v37 = vmax.f32 %v1318_v21, 0.0  ;;  %v2516_v9 = vadd.f32 %v2515_v24, %v2514_v23  ;;  %v2517_v49 = vpop.f32.mrb[50].mxu0  ;;  %v1381_v28 = vmul.f32 %v3443_v29, %v3443_v29 }
 0x15d   : > { %v2518_v34 = vpop.f32.mrb[51].mxu0 }
 0x15e   : > { %v2519_v14 = vadd.f32 %v2518_v34, %v2517_v49  ;;  %v1159_v39 = vadd.f32 %v2516_v9, %v3366_v8  ;;  %2723 = vmatprep.mubr.f32.mxu1 %v1381_v28  ;;  %v1382_v57 = vmul.f32 %v3446_v37, %v3446_v37 }
 0x160   : > { %v1319_v45 = vadd.f32 %v3278_v15, %v1159_v39  ;;  %v1162_v26 = vadd.f32 %v2519_v14, %v3372_v16  ;;  %2724 = vmatmul.mubr.f32.gmra.mrb[54].mxu1 %v1382_v57 }
 0x162   : > { %v3455_v46 = vmax.f32 %v1319_v45, 0.0  ;;  %v1320_v50 = vadd.f32 %v3278_v15, %v1162_v26  ;;  %v2520_v53 = vpop.f32.mrb[52].mxu0 }
 0x163   : > { %v2521_v36 = vpop.f32.mrb[53].mxu0 }
 0x164   : > { %v3458_v35 = vmax.f32 %v1320_v50, 0.0  ;;  %v2522_v56 = vadd.f32 %v2521_v36, %v2520_v53  ;;  %v2523_v59 = vpop.f32.mrb[54].mxu0  ;;  %v1383_v8 = vmul.f32 %v3455_v46, %v3455_v46 }
 0x165   : > { %v2524_v63 = vpop.f32.mrb[55].mxu0 }
 0x166   : > { %v1167_v0 = vadd.f32 %v3364_v6, %v2522_v56  ;;  %v2525_v55 = vadd.f32 %v2524_v63, %v2523_v59  ;;  %2726 = vmatprep.mubr.f32.mxu1 %v1383_v8  ;;  %v1384_v16 = vmul.f32 %v3458_v35, %v3458_v35 }
 0x168   : > { %v1321_v3 = vadd.f32 %v3278_v15, %v1167_v0  ;;  %v1170_v4 = vadd.f32 %v3370_v12, %v2525_v55  ;;  %2727 = vmatmul.mubr.f32.gmra.mrb[56].mxu1 %v1384_v16 }
 0x16a   : > { %v3467_v52 = vmax.f32 %v1321_v3, 0.0  ;;  %v1322_v7 = vadd.f32 %v3278_v15, %v1170_v4  ;;  %v2526_v61 = vpop.f32.mrb[56].mxu0 }
 0x16b   : > { %v2527_v10 = vpop.f32.mrb[57].mxu0 }
 0x16c   : > { %v3470_v58 = vmax.f32 %v1322_v7, 0.0  ;;  %v2528_v17 = vadd.f32 %v2527_v10, %v2526_v61  ;;  %v2529_v6 = vpop.f32.mrb[58].mxu0  ;;  %v1385_v19 = vmul.f32 %v3467_v52, %v3467_v52 }
 0x16d   : > { %v2530_v21 = vpop.f32.mrb[59].mxu0 }
 0x16e   : > { %v2531_v23 = vadd.f32 %v2530_v21, %v2529_v6  ;;  %v1175_v24 = vadd.f32 %v2528_v17, %v3384_v38  ;;  %2729 = vmatprep.mubr.f32.mxu1 %v1385_v19  ;;  %v1386_v12 = vmul.f32 %v3470_v58, %v3470_v58 }
 0x170   : > { %v1323_v9 = vadd.f32 %v3278_v15, %v1175_v24  ;;  %v1178_v49 = vadd.f32 %v2531_v23, %v3391_v43  ;;  %2730 = vmatmul.mubr.f32.gmra.mrb[58].mxu1 %v1386_v12 }
 0x172   : > { %v3479_v28 = vmax.f32 %v1323_v9, 0.0  ;;  %v1324_v34 = vadd.f32 %v3278_v15, %v1178_v49  ;;  %v2532_v14 = vpop.f32.mrb[60].mxu0 }
 0x173   : > { %v2533_v39 = vpop.f32.mrb[61].mxu0 }
 0x174   : > { %v3482_v57 = vmax.f32 %v1324_v34, 0.0  ;;  %v2534_v45 = vadd.f32 %v2533_v39, %v2532_v14  ;;  %v2535_v26 = vpop.f32.mrb[62].mxu0  ;;  %v1387_v38 = vmul.f32 %v3479_v28, %v3479_v28 }
 0x175   : > { %v2536_v50 = vpop.f32.mrb[63].mxu0 }
 0x176   : > { %v1183_v53 = vadd.f32 %v3382_v33, %v2534_v45  ;;  %v2537_v36 = vadd.f32 %v2536_v50, %v2535_v26  ;;  %2732 = vmatprep.mubr.f32.mxu1 %v1387_v38  ;;  %v1388_v43 = vmul.f32 %v3482_v57, %v3482_v57 }
 0x178   : > { %v1325_v56 = vadd.f32 %v3278_v15, %v1183_v53  ;;  %v1186_v59 = vadd.f32 %v3389_v42, %v2537_v36  ;;  %2733 = vmatmul.mubr.f32.gmra.mrb[60].mxu1 %v1388_v43 }
 0x17a   : > { %v3491_v8 = vmax.f32 %v1325_v56, 0.0  ;;  %v1326_v63 = vadd.f32 %v3278_v15, %v1186_v59 }
 0x17c   : > { %v3494_v0 = vmax.f32 %v1326_v63, 0.0  ;;  %v1389_v55 = vmul.f32 %v3491_v8, %v3491_v8 }
 0x17e   : > { %2735 = vmatprep.mubr.f32.mxu1 %v1389_v55  ;;  %v1390_v33 = vmul.f32 %v3494_v0, %v3494_v0 }
 0x180   : > { %2736 = vmatmul.mubr.f32.gmra.mrb[62].mxu1 %v1390_v33 }
 0x1db   : > { %v2692_v16 = vpop.f32.mrb[32].mxu1 }
 0x1dc   : > { %v1748_v3 = vmul.f32 2e-05, %v2692_v16  ;;  %v1588_v4 = vpop.f32.mrb[33].mxu1 }
 0x1dd   : > { %v1747_v7 = vmul.f32 2e-05, %v1588_v4 }
 0x1de   : > { %v1780_v42 = vadd.f32 1.0, %v1748_v3 }
 0x1df   : > { %v1779_v61 = vadd.f32 1.0, %v1747_v7 }
 0x1e0   : > { %2884 = vrsqrt.f32 %v1780_v42 }
 0x1e1   : > { %2886 = vrsqrt.f32 %v1779_v61 }
 0x1e3   : > { %v2695_v10 = vpop.f32.mrb[34].mxu1 }
 0x1e4   : > { %v1750_v15 = vmul.f32 2e-05, %v2695_v10  ;;  %v1598_v17 = vpop.f32.mrb[35].mxu1 }
 0x1e5   : > { %v1749_v6 = vmul.f32 2e-05, %v1598_v17 }
 0x1e6   : > { %v1782_v19 = vadd.f32 1.0, %v1750_v15 }
 0x1e7   : > { %v1781_v21 = vadd.f32 1.0, %v1749_v6 }
 0x1e8   : > { %2888 = vrsqrt.f32 %v1782_v19 }
 0x1e9   : > { %2890 = vrsqrt.f32 %v1781_v21 }
 0x1ea   : > { %v2885_v23 = vpop.eup %2884 }
 0x1eb   : > { %v2887_v24 = vpop.eup %2886  ;;  %2892 = vrsqrt.f32 %v2885_v23  ;;  %v2698_v12 = vpop.f32.mrb[36].mxu1  ;;  %vm1852_vm8 = vcmp.eq.f32.partialorder %v2885_v23, inf  ;;  %v1855_v63 = vand.u32 2147483648, %v2885_v23  ;;  %vm1854_vm9 = vcmp.eq.f32.partialorder %v2885_v23, 0.0 }
 0x1ec   : > { %2894 = vrsqrt.f32 %v2887_v24  ;;  %v1608_v9 = vpop.f32.mrb[37].mxu1  ;;  %v1752_v49 = vmul.f32 2e-05, %v2698_v12  ;;  %vm1845_vm10 = vcmp.eq.f32.partialorder %v2887_v24, inf  ;;  %v1848_v4 = vand.u32 2147483648, %v2887_v24 }
 0x1ed   : > { %v1751_v34 = vmul.f32 2e-05, %v1608_v9  ;;  %vm1847_vm11 = vcmp.eq.f32.partialorder %v2887_v24, 0.0 }
 0x1ee   : > { %v1784_v14 = vadd.f32 1.0, %v1752_v49 }
 0x1ef   : > { %v1783_v39 = vadd.f32 1.0, %v1751_v34 }
 0x1f0   : > { %2896 = vrsqrt.f32 %v1784_v14 }
 0x1f1   : > { %2898 = vrsqrt.f32 %v1783_v39 }
 0x1f2   : > { %v2889_v45 = vpop.eup %2888 }
 0x1f3   : > { %v2891_v26 = vpop.eup %2890  ;;  %2900 = vrsqrt.f32 %v2889_v45  ;;  %v2701_v38 = vpop.f32.mrb[38].mxu1  ;;  %vm1866_vm12 = vcmp.eq.f32.partialorder %v2889_v45, inf  ;;  %vm1868_vm13 = vcmp.eq.f32.partialorder %v2889_v45, 0.0 }
 0x1f4   : > { %2902 = vrsqrt.f32 %v2891_v26  ;;  %v1618_v50 = vpop.f32.mrb[39].mxu1  ;;  %v1754_v36 = vmul.f32 2e-05, %v2701_v38  ;;  %vm1859_vm14 = vcmp.eq.f32.partialorder %v2891_v26, inf  ;;  %vm1861_vm15 = vcmp.eq.f32.partialorder %v2891_v26, 0.0 }
 0x1f5   : > { %v2893_v53 = vpop.eup %2892  ;;  %v1753_v43 = vmul.f32 2e-05, %v1618_v50 }
 0x1f6   : > { %v2895_v56 = vpop.eup %2894  ;;  %v1851_v59 = vmul.f32 %v2893_v53, %v2885_v23  ;;  %v1786_v33 = vadd.f32 1.0, %v1754_v36 }
 0x1f7   : > { %v1844_v55 = vmul.f32 %v2895_v56, %v2887_v24  ;;  %v1785_v16 = vadd.f32 1.0, %v1753_v43 }
 0x1f8   : > { %v1853_v3 = vsel %vm1852_vm8, %v2885_v23, %v1851_v59  ;;  %2904 = vrsqrt.f32 %v1786_v33 }
 0x1f9   : > { %v1856_v7 = vsel %vm1854_vm9, %v1855_v63, %v1853_v3  ;;  %v1846_v42 = vsel %vm1845_vm10, %v2887_v24, %v1844_v55  ;;  %2906 = vrsqrt.f32 %v1785_v16 }
 0x1fa   : > { %v2068_v61 = vmul.f32 %v2885_v23, %v1856_v7  ;;  %v1849_v10 = vsel %vm1847_vm11, %v1848_v4, %v1846_v42  ;;  %v2897_v15 = vpop.eup %2896 }
 0x1fb   : > { %v2067_v17 = vmul.f32 %v2887_v24, %v1849_v10  ;;  %v2704_v6 = vpop.f32.mrb[40].mxu1  ;;  %v3506_v19 = vpop.eup %2898  ;;  %2908 = vrsqrt.f32 %v2897_v15  ;;  %v1869_v24 = vand.u32 2147483648, %v2889_v45  ;;  %vm1880_vm0 = vcmp.eq.f32.partialorder %v2897_v15, inf }
 0x1fc   : > { %v2100_v21 = vmul.f32 %v2068_v61, %v3284_v31  ;;  %v1628_v12 = vpop.f32.mrb[41].mxu1  ;;  %2910 = vrsqrt.f32 %v3506_v19  ;;  %v1756_v14 = vmul.f32 2e-05, %v2704_v6  ;;  %v1862_v31 = vand.u32 2147483648, %v2891_v26 }
 0x1fd   : > { %v2901_v9 = vpop.eup %2900  ;;  %v2099_v23 = vmul.f32 %v2067_v17, %v3281_v27  ;;  %v1755_v38 = vmul.f32 2e-05, %v1628_v12  ;;  %v1883_v6 = vand.u32 2147483648, %v2897_v15  ;;  %vm1882_vm1 = vcmp.eq.f32.partialorder %v2897_v15, 0.0 }
 0x1fe   : > { %v2903_v49 = vpop.eup %2902  ;;  %2132 = vst [vmem:[%s3504_s27 + $0x8] sm:$0xff] %v2100_v21  ;;  %v1865_v34 = vmul.f32 %v2901_v9, %v2889_v45  ;;  %v1788_v53 = vadd.f32 1.0, %v1756_v14  ;;  %vm1873_vm2 = vcmp.eq.f32.partialorder %v3506_v19, inf  ;;  %vm1875_vm3 = vcmp.eq.f32.partialorder %v3506_v19, 0.0 }
 0x1ff   : > { %2131 = vst [vmem:[%s3504_s27] sm:$0xff] %v2099_v23  ;;  %v1858_v39 = vmul.f32 %v2903_v49, %v2891_v26  ;;  %v1787_v27 = vadd.f32 1.0, %v1755_v38 }
 0x200   : > { %v1867_v50 = vsel %vm1866_vm12, %v2889_v45, %v1865_v34  ;;  %2912 = vrsqrt.f32 %v1788_v53 }
 0x201   : > { %v1870_v36 = vsel %vm1868_vm13, %v1869_v24, %v1867_v50  ;;  %v1860_v43 = vsel %vm1859_vm14, %v2891_v26, %v1858_v39  ;;  %2914 = vrsqrt.f32 %v1787_v27 }
 0x202   : > { %v2070_v56 = vmul.f32 %v2889_v45, %v1870_v36  ;;  %v1863_v59 = vsel %vm1861_vm15, %v1862_v31, %v1860_v43  ;;  %v2905_v63 = vpop.eup %2904 }
 0x203   : > { %v2069_v55 = vmul.f32 %v2891_v26, %v1863_v59  ;;  %v2707_v33 = vpop.f32.mrb[42].mxu1  ;;  %v2907_v16 = vpop.eup %2906  ;;  %2916 = vrsqrt.f32 %v2905_v63  ;;  %vm1894_vm4 = vcmp.eq.f32.partialorder %v2905_v63, inf  ;;  %vm1896_vm5 = vcmp.eq.f32.partialorder %v2905_v63, 0.0 }
 0x204   : > { %v2102_v3 = vmul.f32 %v2070_v56, %v3294_v51  ;;  %v1638_v4 = vpop.f32.mrb[43].mxu1  ;;  %2918 = vrsqrt.f32 %v2907_v16  ;;  %v1758_v61 = vmul.f32 2e-05, %v2707_v33  ;;  %vm1887_vm6 = vcmp.eq.f32.partialorder %v2907_v16, inf }
 0x205   : > { %v2101_v7 = vmul.f32 %v2069_v55, %v3291_v47  ;;  %v2909_v42 = vpop.eup %2908  ;;  %v1757_v10 = vmul.f32 2e-05, %v1638_v4  ;;  %v1876_v47 = vand.u32 2147483648, %v3506_v19  ;;  %vm1889_vm7 = vcmp.eq.f32.partialorder %v2907_v16, 0.0 }
 0x206   : > { %2134 = vst [vmem:[%s3504_s27 + $0x18] sm:$0xff] %v2102_v3  ;;  %v2911_v45 = vpop.eup %2910  ;;  %v1879_v17 = vmul.f32 %v2909_v42, %v2897_v15  ;;  %v1790_v21 = vadd.f32 1.0, %v1758_v61 }
 0x207   : > { %2133 = vst [vmem:[%s3504_s27 + $0x10] sm:$0xff] %v2101_v7  ;;  %v1872_v26 = vmul.f32 %v2911_v45, %v3506_v19  ;;  %v1789_v12 = vadd.f32 1.0, %v1757_v10 }
 0x208   : > { %v1881_v9 = vsel %vm1880_vm0, %v2897_v15, %v1879_v17  ;;  %2920 = vrsqrt.f32 %v1790_v21 }
 0x209   : > { %v1884_v51 = vsel %vm1882_vm1, %v1883_v6, %v1881_v9  ;;  %v1874_v23 = vsel %vm1873_vm2, %v3506_v19, %v1872_v26  ;;  %2922 = vrsqrt.f32 %v1789_v12 }
 0x20a   : > { %v2072_v49 = vmul.f32 %v2897_v15, %v1884_v51  ;;  %v1877_v34 = vsel %vm1875_vm3, %v1876_v47, %v1874_v23  ;;  %v3522_v24 = vpop.eup %2912 }
 0x20b   : > { %v2710_v14 = vpop.f32.mrb[44].mxu1  ;;  %v2071_v39 = vmul.f32 %v3506_v19, %v1877_v34  ;;  %v3525_v31 = vpop.eup %2914  ;;  %2924 = vrsqrt.f32 %v3522_v24  ;;  %v1897_v19 = vand.u32 2147483648, %v2905_v63  ;;  %vm1908_vm8 = vcmp.eq.f32.partialorder %v3522_v24, inf }
 0x20c   : > { %v1760_v38 = vmul.f32 2e-05, %v2710_v14  ;;  %v1648_v50 = vpop.f32.mrb[45].mxu1  ;;  %v2104_v53 = vmul.f32 %v2072_v49, %v3308_v32  ;;  %2926 = vrsqrt.f32 %v3525_v31  ;;  %v1890_v32 = vand.u32 2147483648, %v2907_v16 }
 0x20d   : > { %v2917_v36 = vpop.eup %2916  ;;  %v2103_v43 = vmul.f32 %v2071_v39, %v3305_v1  ;;  %v1759_v55 = vmul.f32 2e-05, %v1648_v50  ;;  %v1911_v23 = vand.u32 2147483648, %v3522_v24  ;;  %vm1910_vm9 = vcmp.eq.f32.partialorder %v3522_v24, 0.0 }
 0x20e   : > { %v2919_v15 = vpop.eup %2918  ;;  %2136 = vst [vmem:[%s3504_s27 + $0x28] sm:$0xff] %v2104_v53  ;;  %v1893_v27 = vmul.f32 %v2917_v36, %v2905_v63  ;;  %v1792_v56 = vadd.f32 1.0, %v1760_v38  ;;  %vm1901_vm10 = vcmp.eq.f32.partialorder %v3525_v31, inf  ;;  %v1904_v34 = vand.u32 2147483648, %v3525_v31 }
 0x20f   : > { %2135 = vst [vmem:[%s3504_s27 + $0x20] sm:$0xff] %v2103_v43  ;;  %v1886_v59 = vmul.f32 %v2919_v15, %v2907_v16  ;;  %v1791_v1 = vadd.f32 1.0, %v1759_v55  ;;  %vm1903_vm11 = vcmp.eq.f32.partialorder %v3525_v31, 0.0 }
 0x210   : > { %v1895_v33 = vsel %vm1894_vm4, %v2905_v63, %v1893_v27  ;;  %2928 = vrsqrt.f32 %v1792_v56 }
 0x211   : > { %v1898_v3 = vsel %vm1896_vm5, %v1897_v19, %v1895_v33  ;;  %v1888_v4 = vsel %vm1887_vm6, %v2907_v16, %v1886_v59  ;;  %2930 = vrsqrt.f32 %v1791_v1 }
 0x212   : > { %v2074_v7 = vmul.f32 %v2905_v63, %v1898_v3  ;;  %v1891_v42 = vsel %vm1889_vm7, %v1890_v32, %v1888_v4  ;;  %v3533_v10 = vpop.eup %2920 }
 0x213   : > { %v2713_v61 = vpop.f32.mrb[46].mxu1  ;;  %v2073_v45 = vmul.f32 %v2907_v16, %v1891_v42  ;;  %v3535_v26 = vpop.eup %2922  ;;  %2932 = vrsqrt.f32 %v3533_v10  ;;  %vm1922_vm12 = vcmp.eq.f32.partialorder %v3533_v10, inf  ;;  %vm1924_vm13 = vcmp.eq.f32.partialorder %v3533_v10, 0.0 }
 0x214   : > { %v1762_v17 = vmul.f32 2e-05, %v2713_v61  ;;  %v1658_v6 = vpop.f32.mrb[47].mxu1  ;;  %v2106_v21 = vmul.f32 %v2074_v7, %v3322_v22  ;;  %2934 = vrsqrt.f32 %v3535_v26  ;;  %vm1915_vm14 = vcmp.eq.f32.partialorder %v3535_v26, inf }
 0x215   : > { %v2105_v12 = vmul.f32 %v2073_v45, %v3319_v18  ;;  %v2925_v63 = vpop.eup %2924  ;;  %v1761_v47 = vmul.f32 2e-05, %v1658_v6  ;;  %vm1917_vm15 = vcmp.eq.f32.partialorder %v3535_v26, 0.0 }
 0x216   : > { %2138 = vst [vmem:[%s3504_s27 + $0x38] sm:$0xff] %v2106_v21  ;;  %v1794_v9 = vadd.f32 1.0, %v1762_v17  ;;  %v2927_v51 = vpop.eup %2926  ;;  %v1907_v16 = vmul.f32 %v2925_v63, %v3522_v24 }
 0x217   : > { %2137 = vst [vmem:[%s3504_s27 + $0x30] sm:$0xff] %v2105_v12  ;;  %v1900_v22 = vmul.f32 %v2927_v51, %v3525_v31  ;;  %v1793_v49 = vadd.f32 1.0, %v1761_v47 }
 0x218   : > { %2936 = vrsqrt.f32 %v1794_v9  ;;  %v1909_v18 = vsel %vm1908_vm8, %v3522_v24, %v1907_v16 }
 0x219   : > { %v1912_v39 = vsel %vm1910_vm9, %v1911_v23, %v1909_v18  ;;  %v1902_v38 = vsel %vm1901_vm10, %v3525_v31, %v1900_v22  ;;  %2938 = vrsqrt.f32 %v1793_v49 }
 0x21a   : > { %v3551_v14 = vpop.eup %2928  ;;  %v2076_v53 = vmul.f32 %v3522_v24, %v1912_v39  ;;  %v1905_v36 = vsel %vm1903_vm11, %v1904_v34, %v1902_v38 }
 0x21b   : > { %v2716_v50 = vpop.f32.mrb[48].mxu1  ;;  %2940 = vrsqrt.f32 %v3551_v14  ;;  %v2075_v15 = vmul.f32 %v3525_v31, %v1905_v36  ;;  %v3558_v56 = vpop.eup %2930  ;;  %v1925_v31 = vand.u32 2147483648, %v3533_v10  ;;  %vm1936_vm0 = vcmp.eq.f32.partialorder %v3551_v14, inf }
 0x21c   : > { %v1668_v43 = vpop.f32.mrb[49].mxu1  ;;  %v1764_v27 = vmul.f32 2e-05, %v2716_v50  ;;  %v2108_v19 = vmul.f32 %v2076_v53, %v3340_v44  ;;  %2942 = vrsqrt.f32 %v3558_v56  ;;  %v1939_v22 = vand.u32 2147483648, %v3551_v14 }
 0x21d   : > { %v1763_v59 = vmul.f32 2e-05, %v1668_v43  ;;  %v2933_v55 = vpop.eup %2932  ;;  %v2107_v33 = vmul.f32 %v2075_v15, %v3337_v40  ;;  %v1918_v40 = vand.u32 2147483648, %v3535_v26  ;;  %vm1938_vm1 = vcmp.eq.f32.partialorder %v3551_v14, 0.0 }
 0x21e   : > { %v2935_v32 = vpop.eup %2934  ;;  %2140 = vst [vmem:[%s3504_s27 + $0x48] sm:$0xff] %v2108_v19  ;;  %v1921_v24 = vmul.f32 %v2933_v55, %v3533_v10  ;;  %v1796_v3 = vadd.f32 1.0, %v1764_v27  ;;  %vm1929_vm2 = vcmp.eq.f32.partialorder %v3558_v56, inf  ;;  %v1932_v38 = vand.u32 2147483648, %v3558_v56 }
 0x21f   : > { %v1795_v4 = vadd.f32 1.0, %v1763_v59  ;;  %2139 = vst [vmem:[%s3504_s27 + $0x40] sm:$0xff] %v2107_v33  ;;  %v1914_v44 = vmul.f32 %v2935_v32, %v3535_v26  ;;  %vm1931_vm3 = vcmp.eq.f32.partialorder %v3558_v56, 0.0 }
 0x220   : > { %v1923_v1 = vsel %vm1922_vm12, %v3533_v10, %v1921_v24  ;;  %2944 = vrsqrt.f32 %v1796_v3 }
 0x221   : > { %v1926_v42 = vsel %vm1924_vm13, %v1925_v31, %v1923_v1  ;;  %v1916_v61 = vsel %vm1915_vm14, %v3535_v26, %v1914_v44  ;;  %2946 = vrsqrt.f32 %v1795_v4 }
 0x222   : > { %v3573_v7 = vpop.eup %2936  ;;  %v2078_v17 = vmul.f32 %v3533_v10, %v1926_v42  ;;  %v1919_v6 = vsel %vm1917_vm15, %v1918_v40, %v1916_v61 }
 0x223   : > { %v2719_v45 = vpop.f32.mrb[50].mxu1  ;;  %2948 = vrsqrt.f32 %v3573_v7  ;;  %v3579_v12 = vpop.eup %2938  ;;  %v2077_v63 = vmul.f32 %v3535_v26, %v1919_v6  ;;  %vm1950_vm4 = vcmp.eq.f32.partialorder %v3573_v7, inf  ;;  %v1953_v3 = vand.u32 2147483648, %v3573_v7 }
 0x224   : > { %v1678_v21 = vpop.f32.mrb[51].mxu1  ;;  %v1766_v9 = vmul.f32 2e-05, %v2719_v45  ;;  %v2110_v51 = vmul.f32 %v2078_v17, %v3360_v2  ;;  %2950 = vrsqrt.f32 %v3579_v12  ;;  %vm1952_vm5 = vcmp.eq.f32.partialorder %v3573_v7, 0.0 }
 0x225   : > { %v2941_v47 = vpop.eup %2940  ;;  %v2109_v16 = vmul.f32 %v2077_v63, %v3357_v62  ;;  %v1765_v49 = vmul.f32 2e-05, %v1678_v21  ;;  %vm1943_vm6 = vcmp.eq.f32.partialorder %v3579_v12, inf  ;;  %v1946_v1 = vand.u32 2147483648, %v3579_v12 }
 0x226   : > { %v1935_v23 = vmul.f32 %v2941_v47, %v3551_v14  ;;  %v1798_v10 = vadd.f32 1.0, %v1766_v9  ;;  %2142 = vst [vmem:[%s3504_s27 + $0x58] sm:$0xff] %v2110_v51  ;;  %v2943_v18 = vpop.eup %2942  ;;  %vm1945_vm7 = vcmp.eq.f32.partialorder %v3579_v12, 0.0 }
 0x227   : > { %2141 = vst [vmem:[%s3504_s27 + $0x50] sm:$0xff] %v2109_v16  ;;  %v1928_v34 = vmul.f32 %v2943_v18, %v3558_v56  ;;  %v1797_v62 = vadd.f32 1.0, %v1765_v49 }
 0x228   : > { %v1937_v26 = vsel %vm1936_vm0, %v3551_v14, %v1935_v23  ;;  %2952 = vrsqrt.f32 %v1798_v10 }
 0x229   : > { %v1940_v2 = vsel %vm1938_vm1, %v1939_v22, %v1937_v26  ;;  %v1930_v36 = vsel %vm1929_vm2, %v3558_v56, %v1928_v34  ;;  %2954 = vrsqrt.f32 %v1797_v62 }
 0x22a   : > { %v2080_v39 = vmul.f32 %v3551_v14, %v1940_v2  ;;  %v3596_v53 = vpop.eup %2944  ;;  %v1933_v14 = vsel %vm1931_vm3, %v1932_v38, %v1930_v36 }
 0x22b   : > { %v2722_v50 = vpop.f32.mrb[52].mxu1  ;;  %v3600_v27 = vpop.eup %2946  ;;  %2956 = vrsqrt.f32 %v3596_v53  ;;  %v2079_v55 = vmul.f32 %v3558_v56, %v1933_v14  ;;  %vm1964_vm8 = vcmp.eq.f32.partialorder %v3596_v53, inf  ;;  %vm1966_vm9 = vcmp.eq.f32.partialorder %v3596_v53, 0.0 }
 0x22c   : > { %v1768_v43 = vmul.f32 2e-05, %v2722_v50  ;;  %v1688_v15 = vpop.f32.mrb[53].mxu1  ;;  %v2112_v19 = vmul.f32 %v2080_v39, %v3378_v25  ;;  %2958 = vrsqrt.f32 %v3600_v27  ;;  %vm1957_vm10 = vcmp.eq.f32.partialorder %v3600_v27, inf }
 0x22d   : > { %v2949_v59 = vpop.eup %2948  ;;  %v2111_v24 = vmul.f32 %v2079_v55, %v3375_v20  ;;  %v1767_v4 = vmul.f32 2e-05, %v1688_v15  ;;  %vm1959_vm11 = vcmp.eq.f32.partialorder %v3600_v27, 0.0 }
 0x22e   : > { %2144 = vst [vmem:[%s3504_s27 + $0x68] sm:$0xff] %v2112_v19  ;;  %v1949_v33 = vmul.f32 %v2949_v59, %v3573_v7  ;;  %v2951_v32 = vpop.eup %2950  ;;  %v1800_v25 = vadd.f32 1.0, %v1768_v43 }
 0x22f   : > { %v1942_v56 = vmul.f32 %v2951_v32, %v3579_v12  ;;  %2143 = vst [vmem:[%s3504_s27 + $0x60] sm:$0xff] %v2111_v24  ;;  %v1799_v40 = vadd.f32 1.0, %v1767_v4 }
 0x230   : > { %v1951_v31 = vsel %vm1950_vm4, %v3573_v7, %v1949_v33  ;;  %2960 = vrsqrt.f32 %v1800_v25 }
 0x231   : > { %v1954_v44 = vsel %vm1952_vm5, %v1953_v3, %v1951_v31  ;;  %v1944_v61 = vsel %vm1943_vm6, %v3579_v12, %v1942_v56 }
 0x232   : > { %v2953_v20 = vpop.eup %2952  ;;  %v2082_v42 = vmul.f32 %v3573_v7, %v1954_v44  ;;  %v1947_v17 = vsel %vm1945_vm7, %v1946_v1, %v1944_v61 }
 0x233   : > { %v2725_v45 = vpop.f32.mrb[54].mxu1  ;;  %2962 = vrsqrt.f32 %v2953_v20  ;;  %v2081_v63 = vmul.f32 %v3579_v12, %v1947_v17  ;;  %v3622_v9 = vpop.eup %2954  ;;  %vm1978_vm12 = vcmp.eq.f32.partialorder %v2953_v20, inf  ;;  %vm1980_vm13 = vcmp.eq.f32.partialorder %v2953_v20, 0.0 }
 0x234   : > { %v1698_v6 = vpop.f32.mrb[55].mxu1  ;;  %v2114_v21 = vmul.f32 %v2082_v42, %v3398_v54  ;;  %2964 = vrsqrt.f32 %v1799_v40  ;;  %v1770_v47 = vmul.f32 2e-05, %v2725_v45  ;;  %v1967_v54 = vand.u32 2147483648, %v3596_v53 }
 0x235   : > { %v1769_v51 = vmul.f32 2e-05, %v1698_v6  ;;  %v2957_v16 = vpop.eup %2956  ;;  %v2113_v7 = vmul.f32 %v2081_v63, %v3395_v48  ;;  %2966 = vrsqrt.f32 %v3622_v9  ;;  %v1960_v48 = vand.u32 2147483648, %v3600_v27 }
 0x236   : > { %2146 = vst [vmem:[%s3504_s27 + $0x78] sm:$0xff] %v2114_v21  ;;  %v2959_v23 = vpop.eup %2958  ;;  %v1963_v10 = vmul.f32 %v2957_v16, %v3596_v53  ;;  %v1802_v22 = vadd.f32 1.0, %v1770_v47  ;;  %vm1971_vm14 = vcmp.eq.f32.partialorder %v3622_v9, inf  ;;  %vm1973_vm15 = vcmp.eq.f32.partialorder %v3622_v9, 0.0 }
 0x237   : > { %v1801_v49 = vadd.f32 1.0, %v1769_v51  ;;  %2145 = vst [vmem:[%s3504_s27 + $0x70] sm:$0xff] %v2113_v7  ;;  %v1956_v12 = vmul.f32 %v2959_v23, %v3600_v27 }
 0x238   : > { %v1965_v18 = vsel %vm1964_vm8, %v3596_v53, %v1963_v10  ;;  %2968 = vrsqrt.f32 %v1802_v22 }
 0x239   : > { %v1968_v26 = vsel %vm1966_vm9, %v1967_v54, %v1965_v18  ;;  %v1958_v2 = vsel %vm1957_vm10, %v3600_v27, %v1956_v12  ;;  %2970 = vrsqrt.f32 %v1801_v49 }
 0x23a   : > { %v2961_v62 = vpop.eup %2960  ;;  %v2084_v39 = vmul.f32 %v3596_v53, %v1968_v26  ;;  %v1961_v38 = vsel %vm1959_vm11, %v1960_v48, %v1958_v2  ;;  %v1981_v53 = vand.u32 2147483648, %v2953_v20 }
 0x23b   : > { %v2728_v34 = vpop.f32.mrb[56].mxu1  ;;  %v2083_v43 = vmul.f32 %v3600_v27, %v1961_v38  ;;  %2972 = vrsqrt.f32 %v2961_v62  ;;  %vm1992_vm0 = vcmp.eq.f32.partialorder %v2961_v62, inf  ;;  %v1995_v51 = vand.u32 2147483648, %v2961_v62 }
 0x23c   : > { %v1772_v50 = vmul.f32 2e-05, %v2728_v34  ;;  %v1708_v36 = vpop.f32.mrb[57].mxu1  ;;  %v2116_v19 = vmul.f32 %v2084_v39, %v3410_v11  ;;  %vm1994_vm1 = vcmp.eq.f32.partialorder %v2961_v62, 0.0 }
 0x23d   : > { %v2963_v15 = vpop.eup %2962  ;;  %v1771_v59 = vmul.f32 2e-05, %v1708_v36  ;;  %v2115_v33 = vmul.f32 %v2083_v43, %v3407_v5  ;;  %v1974_v5 = vand.u32 2147483648, %v3622_v9 }
 0x23e   : > { %v1804_v14 = vadd.f32 1.0, %v1772_v50  ;;  %v3641_v55 = vpop.eup %2964  ;;  %v1977_v32 = vmul.f32 %v2963_v15, %v2953_v20  ;;  %2148 = vst [vmem:[%s3504_s27 + $0x88] sm:$0xff] %v2116_v19 }
 0x23f   : > { %2974 = vrsqrt.f32 %v3641_v55  ;;  %v2967_v24 = vpop.eup %2966  ;;  %2147 = vst [vmem:[%s3504_s27 + $0x80] sm:$0xff] %v2115_v33  ;;  %v1803_v27 = vadd.f32 1.0, %v1771_v59  ;;  %vm1985_vm2 = vcmp.eq.f32.partialorder %v3641_v55, inf  ;;  %vm1987_vm3 = vcmp.eq.f32.partialorder %v3641_v55, 0.0 }
 0x240   : > { %v1979_v3 = vsel %vm1978_vm12, %v2953_v20, %v1977_v32  ;;  %2976 = vrsqrt.f32 %v1804_v14  ;;  %v1970_v11 = vmul.f32 %v2967_v24, %v3622_v9 }
 0x241   : > { %v1982_v25 = vsel %vm1980_vm13, %v1981_v53, %v1979_v3  ;;  %2978 = vrsqrt.f32 %v1803_v27 }
 0x242   : > { %v2086_v4 = vmul.f32 %v2953_v20, %v1982_v25  ;;  %v3650_v56 = vpop.eup %2968  ;;  %v1972_v44 = vsel %vm1971_vm14, %v3622_v9, %v1970_v11 }
 0x243   : > { %v2731_v31 = vpop.f32.mrb[58].mxu1  ;;  %v3654_v42 = vpop.eup %2970  ;;  %v1975_v61 = vsel %vm1973_vm15, %v1974_v5, %v1972_v44  ;;  %2980 = vrsqrt.f32 %v3650_v56  ;;  %vm2006_vm4 = vcmp.eq.f32.partialorder %v3650_v56, inf  ;;  %vm2008_vm5 = vcmp.eq.f32.partialorder %v3650_v56, 0.0 }
 0x244   : > { %v1774_v1 = vmul.f32 2e-05, %v2731_v31  ;;  %v1718_v40 = vpop.f32.mrb[59].mxu1  ;;  %v2118_v20 = vmul.f32 %v2086_v4, %v3422_v41  ;;  %v2085_v45 = vmul.f32 %v3622_v9, %v1975_v61  ;;  %2982 = vrsqrt.f32 %v3654_v42 }
 0x245   : > { %v2973_v17 = vpop.eup %2972  ;;  %v1773_v47 = vmul.f32 2e-05, %v1718_v40  ;;  %vm1999_vm6 = vcmp.eq.f32.partialorder %v3654_v42, inf  ;;  %v2002_v14 = vand.u32 2147483648, %v3654_v42  ;;  %vm2001_vm7 = vcmp.eq.f32.partialorder %v3654_v42, 0.0 }
 0x246   : > { %2150 = vst [vmem:[%s3504_s27 + $0x98] sm:$0xff] %v2118_v20  ;;  %v1806_v6 = vadd.f32 1.0, %v1774_v1  ;;  %v2117_v21 = vmul.f32 %v2085_v45, %v3419_v30  ;;  %v1991_v63 = vmul.f32 %v2973_v17, %v2961_v62  ;;  %v1988_v30 = vand.u32 2147483648, %v3641_v55 }
 0x247   : > { %v1805_v7 = vadd.f32 1.0, %v1773_v47 }
 0x248   : > { %2984 = vrsqrt.f32 %v1806_v6  ;;  %2149 = vst [vmem:[%s3504_s27 + $0x90] sm:$0xff] %v2117_v21  ;;  %v1993_v41 = vsel %vm1992_vm0, %v2961_v62, %v1991_v63 }
 0x249   : > { %v2975_v16 = vpop.eup %2974  ;;  %v1996_v9 = vsel %vm1994_vm1, %v1995_v51, %v1993_v41 }
 0x24a   : > { %v3663_v23 = vpop.eup %2976  ;;  %v1984_v10 = vmul.f32 %v2975_v16, %v3641_v55  ;;  %v2088_v49 = vmul.f32 %v2961_v62, %v1996_v9 }
 0x24b   : > { %v2734_v22 = vpop.f32.mrb[60].mxu1  ;;  %2986 = vrsqrt.f32 %v3663_v23  ;;  %v3669_v12 = vpop.eup %2978  ;;  %vm2020_vm8 = vcmp.eq.f32.partialorder %v3663_v23, inf  ;;  %vm2022_vm9 = vcmp.eq.f32.partialorder %v3663_v23, 0.0 }
 0x24c   : > { %v1728_v54 = vpop.f32.mrb[61].mxu1  ;;  %v1986_v18 = vsel %vm1985_vm2, %v3641_v55, %v1984_v10  ;;  %2988 = vrsqrt.f32 %v1805_v7  ;;  %v1776_v48 = vmul.f32 2e-05, %v2734_v22  ;;  %v2120_v26 = vmul.f32 %v2088_v49, %v3434_v13 }
 0x24d   : > { %v1989_v2 = vsel %vm1987_vm3, %v1988_v30, %v1986_v18  ;;  %2990 = vrsqrt.f32 %v3669_v12  ;;  %v2981_v34 = vpop.eup %2980  ;;  %v1775_v36 = vmul.f32 2e-05, %v1728_v54  ;;  %v2009_v13 = vand.u32 2147483648, %v3650_v56 }
 0x24e   : > { %v2087_v62 = vmul.f32 %v3641_v55, %v1989_v2  ;;  %v1808_v39 = vadd.f32 1.0, %v1776_v48  ;;  %v2983_v38 = vpop.eup %2982  ;;  %2152 = vst [vmem:[%s3504_s27 + $0xa8] sm:$0xff] %v2120_v26  ;;  %v2005_v50 = vmul.f32 %v2981_v34, %v3650_v56  ;;  %vm2013_vm10 = vcmp.eq.f32.partialorder %v3669_v12, inf }
 0x24f   : > { %v1998_v15 = vmul.f32 %v2983_v38, %v3654_v42  ;;  %v1807_v59 = vadd.f32 1.0, %v1775_v36  ;;  %v2016_v45 = vand.u32 2147483648, %v3669_v12  ;;  %vm2015_vm11 = vcmp.eq.f32.partialorder %v3669_v12, 0.0 }
 0x250   : > { %v2119_v43 = vmul.f32 %v2087_v62, %v3431_v60  ;;  %2992 = vrsqrt.f32 %v1808_v39  ;;  %v2007_v19 = vsel %vm2006_vm4, %v3650_v56, %v2005_v50 }
 0x251   : > { %v2010_v33 = vsel %vm2008_vm5, %v2009_v13, %v2007_v19  ;;  %v2000_v32 = vsel %vm1999_vm6, %v3654_v42, %v1998_v15 }
 0x252   : > { %v2985_v55 = vpop.eup %2984  ;;  %2151 = vst [vmem:[%s3504_s27 + $0xa0] sm:$0xff] %v2119_v43  ;;  %v2090_v53 = vmul.f32 %v3650_v56, %v2010_v33  ;;  %v2003_v24 = vsel %vm2001_vm7, %v2002_v14, %v2000_v32  ;;  %v2023_v56 = vand.u32 2147483648, %v3663_v23 }
 0x253   : > { %v2737_v60 = vpop.f32.mrb[62].mxu1  ;;  %2994 = vrsqrt.f32 %v2985_v55  ;;  %v2089_v27 = vmul.f32 %v3654_v42, %v2003_v24  ;;  %vm2034_vm12 = vcmp.eq.f32.partialorder %v2985_v55, inf  ;;  %vm2036_vm13 = vcmp.eq.f32.partialorder %v2985_v55, 0.0 }
 0x254   : > { %v1738_v3 = vpop.f32.mrb[63].mxu1  ;;  %2996 = vrsqrt.f32 %v1807_v59  ;;  %v2122_v11 = vmul.f32 %v2090_v53, %v3446_v37  ;;  %v1778_v4 = vmul.f32 2e-05, %v2737_v60 }
 0x255   : > { %v2987_v25 = vpop.eup %2986  ;;  %v1777_v5 = vmul.f32 2e-05, %v1738_v3  ;;  %v2121_v44 = vmul.f32 %v2089_v27, %v3443_v29 }
 0x256   : > { %v2989_v31 = vpop.eup %2988  ;;  %v2019_v1 = vmul.f32 %v2987_v25, %v3663_v23  ;;  %2154 = vst [vmem:[%s3504_s27 + $0xb8] sm:$0xff] %v2122_v11  ;;  %v1810_v20 = vadd.f32 1.0, %v1778_v4 }
 0x257   : > { %v2991_v40 = vpop.eup %2990  ;;  %2998 = vrsqrt.f32 %v2989_v31  ;;  %2153 = vst [vmem:[%s3504_s27 + $0xb0] sm:$0xff] %v2121_v44  ;;  %v1809_v61 = vadd.f32 1.0, %v1777_v5  ;;  %vm2027_vm14 = vcmp.eq.f32.partialorder %v2989_v31, inf  ;;  %v2030_v54 = vand.u32 2147483648, %v2989_v31 }
 0x258   : > { %v2021_v42 = vsel %vm2020_vm8, %v3663_v23, %v2019_v1  ;;  %v2012_v37 = vmul.f32 %v2991_v40, %v3669_v12  ;;  %3000 = vrsqrt.f32 %v1810_v20  ;;  %vm2029_vm15 = vcmp.eq.f32.partialorder %v2989_v31, 0.0 }
 0x259   : > { %v2024_v29 = vsel %vm2022_vm9, %v2023_v56, %v2021_v42 }
 0x25a   : > { %v2993_v17 = vpop.eup %2992  ;;  %v2092_v6 = vmul.f32 %v3663_v23, %v2024_v29  ;;  %v2014_v21 = vsel %vm2013_vm10, %v3669_v12, %v2012_v37  ;;  %v2037_v23 = vand.u32 2147483648, %v2985_v55 }
 0x25b   : > { %v2017_v63 = vsel %vm2015_vm11, %v2016_v45, %v2014_v21  ;;  %3002 = vrsqrt.f32 %v2993_v17  ;;  %vm2048_vm0 = vcmp.eq.f32.partialorder %v2993_v17, inf  ;;  %v2051_v39 = vand.u32 2147483648, %v2993_v17 }
 0x25c   : > { %v2124_v47 = vmul.f32 %v2092_v6, %v3458_v35  ;;  %v2091_v51 = vmul.f32 %v3669_v12, %v2017_v63  ;;  %3004 = vrsqrt.f32 %v1809_v61  ;;  %vm2050_vm1 = vcmp.eq.f32.partialorder %v2993_v17, 0.0 }
 0x25d   : > { %v2995_v16 = vpop.eup %2994 }
 0x25e   : > { %v2997_v41 = vpop.eup %2996  ;;  %2156 = vst [vmem:[%s3504_s27 + $0xc8] sm:$0xff] %v2124_v47  ;;  %v2123_v7 = vmul.f32 %v2091_v51, %v3455_v46  ;;  %v2033_v9 = vmul.f32 %v2995_v16, %v2985_v55 }
 0x25f   : > { %3006 = vrsqrt.f32 %v2997_v41  ;;  %vm2041_vm2 = vcmp.eq.f32.partialorder %v2997_v41, inf  ;;  %v2044_v15 = vand.u32 2147483648, %v2997_v41  ;;  %vm2043_vm3 = vcmp.eq.f32.partialorder %v2997_v41, 0.0 }
 0x260   : > { %2155 = vst [vmem:[%s3504_s27 + $0xc0] sm:$0xff] %v2123_v7  ;;  %v2035_v10 = vsel %vm2034_vm12, %v2985_v55, %v2033_v9 }
 0x261   : > { %v2999_v22 = vpop.eup %2998  ;;  %v2038_v49 = vsel %vm2036_vm13, %v2037_v23, %v2035_v10 }
 0x262   : > { %v2094_v30 = vmul.f32 %v2985_v55, %v2038_v49  ;;  %v2026_v35 = vmul.f32 %v2999_v22, %v2989_v31  ;;  %v3001_v12 = vpop.eup %3000 }
 0x263   : > { %3008 = vrsqrt.f32 %v3001_v12  ;;  %vm2062_vm4 = vcmp.eq.f32.partialorder %v3001_v12, inf  ;;  %v2065_v53 = vand.u32 2147483648, %v3001_v12  ;;  %vm2064_vm5 = vcmp.eq.f32.partialorder %v3001_v12, 0.0 }
 0x264   : > { %v2126_v18 = vmul.f32 %v2094_v30, %v3470_v58  ;;  %v2028_v48 = vsel %vm2027_vm14, %v2989_v31, %v2026_v35 }
 0x265   : > { %v3003_v46 = vpop.eup %3002  ;;  %v2031_v26 = vsel %vm2029_vm15, %v2030_v54, %v2028_v48 }
 0x266   : > { %v3005_v2 = vpop.eup %3004  ;;  %2158 = vst [vmem:[%s3504_s27 + $0xd8] sm:$0xff] %v2126_v18  ;;  %v2093_v34 = vmul.f32 %v2989_v31, %v2031_v26  ;;  %v2047_v62 = vmul.f32 %v3003_v46, %v2993_v17 }
 0x267   : > { %3010 = vrsqrt.f32 %v3005_v2  ;;  %vm2055_vm6 = vcmp.eq.f32.partialorder %v3005_v2, inf  ;;  %vm2057_vm7 = vcmp.eq.f32.partialorder %v3005_v2, 0.0 }
 0x268   : > { %v2125_v38 = vmul.f32 %v2093_v34, %v3467_v52  ;;  %v2049_v50 = vsel %vm2048_vm0, %v2993_v17, %v2047_v62 }
 0x269   : > { %v3007_v36 = vpop.eup %3006  ;;  %v2052_v58 = vsel %vm2050_vm1, %v2051_v39, %v2049_v50 }
 0x26a   : > { %2157 = vst [vmem:[%s3504_s27 + $0xd0] sm:$0xff] %v2125_v38  ;;  %v2096_v43 = vmul.f32 %v2993_v17, %v2052_v58  ;;  %v2040_v13 = vmul.f32 %v3007_v36, %v2997_v41 }
 0x26c   : > { %v2128_v19 = vmul.f32 %v2096_v43, %v3482_v57  ;;  %v2042_v14 = vsel %vm2041_vm2, %v2997_v41, %v2040_v13  ;;  %v2058_v57 = vand.u32 2147483648, %v3005_v2 }
 0x26d   : > { %v2045_v59 = vsel %vm2043_vm3, %v2044_v15, %v2042_v14  ;;  %v3009_v33 = vpop.eup %3008 }
 0x26e   : > { %2160 = vst [vmem:[%s3504_s27 + $0xe8] sm:$0xff] %v2128_v19  ;;  %v2095_v55 = vmul.f32 %v2997_v41, %v2045_v59  ;;  %v2061_v32 = vmul.f32 %v3009_v33, %v3001_v12 }
 0x270   : > { %v2127_v52 = vmul.f32 %v2095_v55, %v3479_v28  ;;  %v2063_v24 = vsel %vm2062_vm4, %v3001_v12, %v2061_v32 }
 0x271   : > { %v3011_v60 = vpop.eup %3010  ;;  %v2066_v27 = vsel %vm2064_vm5, %v2065_v53, %v2063_v24 }
 0x272   : > { %2159 = vst [vmem:[%s3504_s27 + $0xe0] sm:$0xff] %v2127_v52  ;;  %v2054_v3 = vmul.f32 %v3011_v60, %v3005_v2  ;;  %v2098_v25 = vmul.f32 %v3001_v12, %v2066_v27 }
 0x274   : > { %v2056_v11 = vsel %vm2055_vm6, %v3005_v2, %v2054_v3  ;;  %v2130_v5 = vmul.f32 %v2098_v25, %v3494_v0 }
 0x275   : > { %v2059_v4 = vsel %vm2057_vm7, %v2058_v57, %v2056_v11 }
 0x276   : > { %v2097_v28 = vmul.f32 %v3005_v2, %v2059_v4  ;;  %2162 = vst [vmem:[%s3504_s27 + $0xf8] sm:$0xff] %v2130_v5 }
 0x278   : > { %v2129_v31 = vmul.f32 %v2097_v28, %v3491_v8 }
 0x27a   : > { %2161 = vst [vmem:[%s3504_s27 + $0xf0] sm:$0xff] %v2129_v31 }
 0x27b PF: > { %s13_s14 = sadd.s32 1, %s3034_s14   ;;  %s3740_s12 = smov %s3030_s13 }
 0x27c   : > { %p10_p5 = scmp.ge.s32.totalorder %s13_s14, 4   ;;  %s3741_s13 = smov %s3743_s15 }
 0x27e   :  { %12 = sbr.rel (!%p10_p5) target bundleno = 2 (0x2), region = 76 }

// kernel: _lambda_.11
= control target key start
LH: loop header
LB: loop body
LE: loop exit
PB: predicated region body
PF: predicated region fallthrough
CT: control target
= control target key end

     0   :  { %s1948_s12 = smov 0   ;;  %s1950_s13 = smov 0   ;;  %s2273_s0 = inlined_call_operand.vmem [shape: bf16[2,104,1280], index: 0, kind: input, shape index: {}]   ;;  %s2274_s1 = inlined_call_operand.vmem [shape: bf16[2,1280,128], index: 1, kind: input, shape index: {}]   ;;  %s2275_s2 = inlined_call_operand.vmem [shape: f32[2,1,128], index: 2, kind: input, shape index: {}]   ;;  %s2276_s3 = inlined_call_operand.vmem [shape: f32[2,104,128], index: 3, kind: output, shape index: {}]  }
   0x1   :  { %s1952_s14 = smov 0   ;;  %s1954_s15 = smov 0  }
   0x2   :  { %s1956_s16 = smov 0   ;;  %s1958_s17 = smov 0  }
   0x3   :  { %s1960_s18 = smov 0  }
   0x4 LB: > { %s25_s19 = sadd.s32 1, %s1915_s16  ;;  %s32_s20 = sadd.s32 1, %s1919_s17  ;;  %s1923_s18 = sphi %s1960_s18, %s13_s18   ;;  %s1919_s17 = sphi %s1958_s17, %s2282_s17   ;;  %s1915_s16 = sphi %s1956_s16, %s2281_s16   ;;  %s1911_s15 = sphi %s1954_s15, %s2280_s15   ;;  %s1907_s14 = sphi %s1952_s14, %s2279_s14   ;;  %s1903_s13 = sphi %s1950_s13, %s2278_s13   ;;  %s1899_s12 = sphi %s1948_s12, %s2277_s12  }
   0x5   : > { %p26_p0 = scmp.ge.s32.totalorder %s25_s19, 2  ;;  %p50_p1 = scmp.ne.s32.totalorder %s1903_s13, %s1899_s12 }
   0x6   : > { %p51_p2 = scmp.eq.s32.totalorder %s1923_s18, 0  ;;  %s43_s24 = sadd.s32 1, %s1903_s13 }
   0x7   : > { %s2284_s19 = smov (%p26_p0, %s25_s19), 0  ;;  %s2286_s20 = smov (!%p26_p0, %s32_s20), %s1919_s17 }
   0x8   : > { %p52_p3 = por %p51_p2, %p50_p1  ;;  %p34_p4 = scmp.ge.s32.totalorder %s2286_s20, 2 }
   0x9   : > { %s39_s21 = ssub.s32 %s1915_s16, %s2284_s19  ;;  %p1416_p6 = scmp.ge.s32.totalorder %s1923_s18, 4 }
   0xa   : > { %s2288_s20 = smov (%p34_p4, %s2286_s20), 0 }
   0xb   : > { %s36_s22 = ssub.s32 %s1919_s17, %s2288_s20  ;;  %158 = sbr.rel (%p1416_p6) target bundleno = 48 (0x30), region = 16 }
   0xc   : > { %s40_s23 = sor.u32 %s39_s21, %s36_s22 }
   0xd   : > { %p41_p5 = scmp.eq.s32.totalorder %s40_s23, 0 }
   0xf   : > { %s1999_s25 = scalar_select %p41_p5, %s1903_s13, %s43_s24  }
  0x12   : > { %161 = sbr.rel (!%p52_p3) target bundleno = 48 (0x30), region = 20  ;;  %s163_s26 = sand.u32 (%p52_p3), 1, %s1903_s13  }
  0x13   : > { %s167_s27 = smul.u32 (%p52_p3), 5, %s1915_s16 }
  0x14   : > { %s1718_s28 = smul.u32 (%p52_p3), 260, %s163_s26 }
  0x15   : > { %s1719_s29 = smul.u32 (%p52_p3), 130, %s1919_s17 }
  0x16   : > { %s2013_s8 = scalar_lea.vmem (%p52_p3), [#allocation3], %s1718_s28 }
  0x17   : > { %s171_s30 = sadd.s32 (%p52_p3), %s1719_s29, %s167_s27 }
  0x18   : > { %s1417_s4 = sshll.u32 (%p52_p3), %s171_s30, 2 }
  0x19   : > { %s2008_s7 = scalar_lea.vmem %s2273_s0, %s1417_s4 }
  0x1a   : > { %v188_v0 = vld [vmem:[%s2008_s7] sm:$0xff]  ;;  %v190_v1 = vld [vmem:[%s2008_s7 + $0x8] sm:$0xff]  ;;  %v194_v3 = vld [vmem:[%s2008_s7 + $0x30] sm:$0xff] }
  0x1b   : > { %v192_v2 = vld [vmem:[%s2008_s7 + $0x28] sm:$0xff]  ;;  %189 = vst [vmem:[%s2013_s8] sm:$0xff] %v188_v0  ;;  %191 = vst [vmem:[%s2013_s8 + $0x8] sm:$0xff] %v190_v1  ;;  %v196_v4 = vld [vmem:[%s2008_s7 + $0x50] sm:$0xff] }
  0x1c   : > { %193 = vst [vmem:[%s2013_s8 + $0x14] sm:$0xff] %v192_v2  ;;  %v198_v5 = vld [vmem:[%s2008_s7 + $0x58] sm:$0xff]  ;;  %195 = vst [vmem:[%s2013_s8 + $0x1c] sm:$0xff] %v194_v3  ;;  %v202_v7 = vld [vmem:[%s2008_s7 + $0x80] sm:$0xff] }
  0x1d   : > { %197 = vst [vmem:[%s2013_s8 + $0x28] sm:$0xff] %v196_v4  ;;  %199 = vst [vmem:[%s2013_s8 + $0x30] sm:$0xff] %v198_v5  ;;  %v200_v6 = vld [vmem:[%s2008_s7 + $0x78] sm:$0xff]  ;;  %v204_v8 = vld [vmem:[%s2008_s7 + $0xa0] sm:$0xff] }
  0x1e   : > { %201 = vst [vmem:[%s2013_s8 + $0x3c] sm:$0xff] %v200_v6  ;;  %203 = vst [vmem:[%s2013_s8 + $0x44] sm:$0xff] %v202_v7  ;;  %v206_v9 = vld [vmem:[%s2008_s7 + $0xa8] sm:$0xff]  ;;  %v210_v11 = vld [vmem:[%s2008_s7 + $0xd0] sm:$0xff] }
  0x1f   : > { %205 = vst [vmem:[%s2013_s8 + $0x50] sm:$0xff] %v204_v8  ;;  %v208_v10 = vld [vmem:[%s2008_s7 + $0xc8] sm:$0xff]  ;;  %207 = vst [vmem:[%s2013_s8 + $0x58] sm:$0xff] %v206_v9  ;;  %v212_v12 = vld [vmem:[%s2008_s7 + $0xf0] sm:$0xff] }
  0x20   : > { %209 = vst [vmem:[%s2013_s8 + $0x64] sm:$0xff] %v208_v10  ;;  %211 = vst [vmem:[%s2013_s8 + $0x6c] sm:$0xff] %v210_v11  ;;  %v214_v13 = vld [vmem:[%s2008_s7 + $0xf8] sm:$0xff]  ;;  %v218_v15 = vld [vmem:[%s2008_s7 + $0x120] sm:$0xff] }
  0x21   : > { %v216_v14 = vld [vmem:[%s2008_s7 + $0x118] sm:$0xff]  ;;  %213 = vst [vmem:[%s2013_s8 + $0x78] sm:$0xff] %v212_v12  ;;  %215 = vst [vmem:[%s2013_s8 + $0x80] sm:$0xff] %v214_v13  ;;  %v220_v16 = vld [vmem:[%s2008_s7 + $0x140] sm:$0xff] }
  0x22   : > { %217 = vst [vmem:[%s2013_s8 + $0x8c] sm:$0xff] %v216_v14  ;;  %v222_v17 = vld [vmem:[%s2008_s7 + $0x148] sm:$0xff]  ;;  %219 = vst [vmem:[%s2013_s8 + $0x94] sm:$0xff] %v218_v15  ;;  %v226_v19 = vld [vmem:[%s2008_s7 + $0x170] sm:$0xff] }
  0x23   : > { %221 = vst [vmem:[%s2013_s8 + $0xa0] sm:$0xff] %v220_v16  ;;  %223 = vst [vmem:[%s2013_s8 + $0xa8] sm:$0xff] %v222_v17  ;;  %v224_v18 = vld [vmem:[%s2008_s7 + $0x168] sm:$0xff]  ;;  %v228_v20 = vld [vmem:[%s2008_s7 + $0x190] sm:$0xff] }
  0x24   : > { %225 = vst [vmem:[%s2013_s8 + $0xb4] sm:$0xff] %v224_v18  ;;  %227 = vst [vmem:[%s2013_s8 + $0xbc] sm:$0xff] %v226_v19  ;;  %v230_v21 = vld [vmem:[%s2008_s7 + $0x198] sm:$0xff]  ;;  %v234_v23 = vld [vmem:[%s2008_s7 + $0x1c0] sm:$0xff] }
  0x25   : > { %229 = vst [vmem:[%s2013_s8 + $0xc8] sm:$0xff] %v228_v20  ;;  %v232_v22 = vld [vmem:[%s2008_s7 + $0x1b8] sm:$0xff]  ;;  %231 = vst [vmem:[%s2013_s8 + $0xd0] sm:$0xff] %v230_v21  ;;  %v236_v24 = vld [vmem:[%s2008_s7 + $0x1e0] sm:$0xff] }
  0x26   : > { %233 = vst [vmem:[%s2013_s8 + $0xdc] sm:$0xff] %v232_v22  ;;  %235 = vst [vmem:[%s2013_s8 + $0xe4] sm:$0xff] %v234_v23  ;;  %v238_v25 = vld [vmem:[%s2008_s7 + $0x1e8] sm:$0xff]  ;;  %v1418_v26 = vld [vmem:[%s2008_s7 + $0x10] sm:$0xf] }
  0x27   : > { %237 = vst [vmem:[%s2013_s8 + $0xf0] sm:$0xff] %v236_v24  ;;  %239 = vst [vmem:[%s2013_s8 + $0xf8] sm:$0xff] %v238_v25  ;;  %v1420_v27 = vld [vmem:[%s2008_s7 + $0x38] sm:$0xf]  ;;  %v1422_v28 = vld [vmem:[%s2008_s7 + $0x60] sm:$0xf] }
  0x28   : > { %1419 = vst [vmem:[%s2013_s8 + $0x10] sm:$0xf] %v1418_v26  ;;  %v1424_v29 = vld [vmem:[%s2008_s7 + $0x88] sm:$0xf]  ;;  %1421 = vst [vmem:[%s2013_s8 + $0x24] sm:$0xf] %v1420_v27 }
  0x29   : > { %1423 = vst [vmem:[%s2013_s8 + $0x38] sm:$0xf] %v1422_v28  ;;  %1425 = vst [vmem:[%s2013_s8 + $0x4c] sm:$0xf] %v1424_v29  ;;  %v1426_v30 = vld [vmem:[%s2008_s7 + $0xb0] sm:$0xf] }
  0x2a   : > { %v1428_v31 = vld [vmem:[%s2008_s7 + $0xd8] sm:$0xf]  ;;  %v1430_v32 = vld [vmem:[%s2008_s7 + $0x100] sm:$0xf]  ;;  %1427 = vst [vmem:[%s2013_s8 + $0x60] sm:$0xf] %v1426_v30 }
  0x2b   : > { %1429 = vst [vmem:[%s2013_s8 + $0x74] sm:$0xf] %v1428_v31  ;;  %1431 = vst [vmem:[%s2013_s8 + $0x88] sm:$0xf] %v1430_v32  ;;  %v1432_v33 = vld [vmem:[%s2008_s7 + $0x128] sm:$0xf] }
  0x2c   : > { %v1434_v34 = vld [vmem:[%s2008_s7 + $0x150] sm:$0xf]  ;;  %v1436_v35 = vld [vmem:[%s2008_s7 + $0x178] sm:$0xf]  ;;  %1433 = vst [vmem:[%s2013_s8 + $0x9c] sm:$0xf] %v1432_v33 }
  0x2d   : > { %1435 = vst [vmem:[%s2013_s8 + $0xb0] sm:$0xf] %v1434_v34  ;;  %1437 = vst [vmem:[%s2013_s8 + $0xc4] sm:$0xf] %v1436_v35  ;;  %v1438_v36 = vld [vmem:[%s2008_s7 + $0x1a0] sm:$0xf] }
  0x2e   : > { %v1440_v37 = vld [vmem:[%s2008_s7 + $0x1c8] sm:$0xf]  ;;  %v1442_v38 = vld [vmem:[%s2008_s7 + $0x1f0] sm:$0xf]  ;;  %1439 = vst [vmem:[%s2013_s8 + $0xd8] sm:$0xf] %v1438_v36 }
  0x2f   : > { %1441 = vst [vmem:[%s2013_s8 + $0xec] sm:$0xf] %v1440_v37  ;;  %1443 = vst [vmem:[%s2013_s8 + $0x100] sm:$0xf] %v1442_v38 }
  0x30 PF: > { %p1444_p7 = scmp.ge.s32.totalorder %s1923_s18, 1  ;;  %p296_p8 = scmp.lt.s32.totalorder %s1923_s18, 5 }
  0x32   : > { %p297_p9 = pnand %p1444_p7, %p296_p8 }
  0x33   : > { %s303_s9 = sand.u32 (!%p297_p9), 1, %s1899_s12   ;;  %s344_s10 = smul.u32 (!%p297_p9), 80, %s1907_s14 }
  0x34   : > { %300 = sbr.rel (%p297_p9) target bundleno = 416 (0x1a0), region = 54  ;;  %p345_p10 = scmp.lt.s32.totalorder (!%p297_p9), %s1911_s15, 1 }
  0x35   : > { %s1720_s11 = smul.u32 (!%p297_p9), 260, %s303_s9  ;;  %p347_p11 = scmp.lt.s32.totalorder (!%p297_p9), %s344_s10, 159 }
  0x36   : > { %p1447_p12 = scmp.ne.s32.totalorder (!%p297_p9), %s1907_s14, 0 }
  0x37   : > { %s2114_s7 = scalar_lea.vmem (!%p297_p9), [#allocation3], %s1720_s11 }
  0x3b   : > { %s2290_s15 = smov (!%p345_p10, %s1911_s15), 1  ;;  %s2292_s10 = smov (!%p347_p11, %s344_s10), 159 }
  0x3c   : > { %s1721_s21 = smul.u32 160, %s2290_s15  ;;  %s356_s24 = scalar_lea.vmem %s2275_s2, %s2290_s15  ;;  %v1925_v39 = vmov (!%p1447_p12), 0.0  }
  0x3d   : > { %s1722_s26 = smul.u32 104, %s2290_s15  ;;  %372 = vst [vmem:[#allocation2] sm:$0xff] (!%p1447_p12), %v1925_v39  ;;  %373 = vst [vmem:[#allocation2 + $0x8] sm:$0xff] (!%p1447_p12), %v1925_v39 }
  0x3e   : > { %s350_s27 = sadd.s32 %s1721_s21, %s2292_s10  ;;  %371 = sbr.rel (%p1447_p12) target bundleno = 69 (0x45), region = 62  ;;  %374 = vst [vmem:[#allocation2 + $0x10] sm:$0xff] (!%p1447_p12), %v1925_v39  ;;  %375 = vst [vmem:[#allocation2 + $0x18] sm:$0xff] (!%p1447_p12), %v1925_v39 }
  0x3f   : > { %s1445_s28 = sshll.u32 %s350_s27, 2  ;;  %s2107_s30 = scalar_lea.vmem %s2276_s3, %s1722_s26  ;;  %376 = vst [vmem:[#allocation2 + $0x20] sm:$0xff] (!%p1447_p12), %v1925_v39  ;;  %377 = vst [vmem:[#allocation2 + $0x28] sm:$0xff] (!%p1447_p12), %v1925_v39 }
  0x40   : > { %s2112_s6 = scalar_lea.vmem %s2274_s1, %s1445_s28  ;;  %378 = vst [vmem:[#allocation2 + $0x30] sm:$0xff] (!%p1447_p12), %v1925_v39  ;;  %379 = vst [vmem:[#allocation2 + $0x38] sm:$0xff] (!%p1447_p12), %v1925_v39 }
  0x41   : > { %380 = vst [vmem:[#allocation2 + $0x40] sm:$0xff] (!%p1447_p12), %v1925_v39  ;;  %381 = vst [vmem:[#allocation2 + $0x48] sm:$0xff] (!%p1447_p12), %v1925_v39 }
  0x42   : > { %382 = vst [vmem:[#allocation2 + $0x50] sm:$0xff] (!%p1447_p12), %v1925_v39  ;;  %383 = vst [vmem:[#allocation2 + $0x58] sm:$0xff] (!%p1447_p12), %v1925_v39 }
  0x43   : > { %384 = vst [vmem:[#allocation2 + $0x60] sm:$0xff] (!%p1447_p12), %v1925_v39 }
  0x45 PF: > { %v1782_v40 = vld [vmem:[%s2112_s6 + $0x40] sm:$0xff]   ;;  %v1784_v42 = vld [vmem:[%s2112_s6 + $0x48] sm:$0xff]   ;;  %v1786_v44 = vld [vmem:[%s2112_s6 + $0x50] sm:$0xff]   ;;  %v1926_v0 = vmov 0.0   ;;  %vm1927_vm0 = vmmov 0   ;;  %p1523_p13 = scmp.ne.s32.totalorder %s1907_s14, 1 }
  0x46   : > { %v1783_v41 = vld [vmem:[%s2112_s6] sm:$0xff]   ;;  %1702 = vmatprep.subr.bf16.mxu1 %v1782_v40  ;;  %1527 = vmatprep.subr.bf16.mxu0 %v1782_v40  ;;  %v1785_v43 = vld [vmem:[%s2112_s6 + $0x8] sm:$0xff]   ;;  %v1787_v45 = vld [vmem:[%s2112_s6 + $0x10] sm:$0xff]  }
  0x47   : > { %1710 = vmatpush3.bf16.msra.mxu1 %v1783_v41  ;;  %1528 = vmatpush3.bf16.msra.mxu0 %v1783_v41  ;;  %v1788_v46 = vld [vmem:[%s2112_s6 + $0x58] sm:$0xff]   ;;  %v1790_v48 = vld [vmem:[%s2112_s6 + $0x60] sm:$0xff]   ;;  %v1792_v50 = vld [vmem:[%s2112_s6 + $0x68] sm:$0xff]  }
  0x48   : > { %1703 = vmatprep.subr.bf16.mxu1 %v1784_v42  ;;  %1529 = vmatprep.subr.bf16.mxu0 %v1784_v42  ;;  %v1789_v47 = vld [vmem:[%s2112_s6 + $0x18] sm:$0xff]   ;;  %v1791_v49 = vld [vmem:[%s2112_s6 + $0x20] sm:$0xff]   ;;  %v1793_v52 = vld [vmem:[%s2112_s6 + $0x28] sm:$0xff]  }
  0x49   : > { %v1800_v51 = vld [vmem:[%s2114_s7 + $0xa4] ss:$20 sps:$4 sm:$0xff]   ;;  %v1796_v56 = vld [vmem:[%s2112_s6 + $0x78] sm:$0xff]   ;;  %v1814_v7 = vld [vmem:[%s2114_s7 + $0x28] ss:$20 sps:$4 sm:$0xff]  }
  0x4a   : > { %v1804_v53 = vld [vmem:[%s2114_s7 + $0x4] ss:$20 sps:$4 sm:$0xff]   ;;  %995 = vmatprep.mubr.bf16.mxu1 %v1800_v51  ;;  %v1797_v57 = vld [vmem:[%s2112_s6 + $0x38] sm:$0xff]   ;;  %v1819_v8 = vld [vmem:[%s2114_s7 + $0xc8] ss:$20 sps:$4 sm:$0xff]  }
  0x4b   : > { %1711 = vmatpush3.bf16.msra.mxu1 %v1785_v43  ;;  %1530 = vmatpush3.bf16.msra.mxu0 %v1785_v43  ;;  %v1794_v54 = vld [vmem:[%s2112_s6 + $0x70] sm:$0xff]   ;;  %v1801_v58 = vld [vmem:[%s2112_s6 + $0xc0] sm:$0xff]   ;;  %v1807_v63 = vld [vmem:[%s2112_s6 + $0xc8] sm:$0xff]  }
  0x4c   : > { %1704 = vmatprep.subr.bf16.mxu1 %v1786_v44  ;;  %1531 = vmatprep.subr.bf16.mxu0 %v1786_v44  ;;  %v1795_v55 = vld [vmem:[%s2112_s6 + $0x30] sm:$0xff]   ;;  %v1798_v59 = vld [vmem:[%s2114_s7 + $0xa0] ss:$20 sps:$4 sm:$0xff]   ;;  %v1834_v22 = vld [vmem:[%s2114_s7 + $0x7c] ss:$20 sps:$4 sm:$0xff]  }
  0x4d   : > { %963 = vmatprep.mubr.bf16.mxu0 %v1804_v53  ;;  %v1802_v60 = vld [vmem:[%s2114_s7] ss:$20 sps:$4 sm:$0xff]   ;;  %v1810_v5 = vld [vmem:[%s2112_s6 + $0xd0] sm:$0xff]   ;;  %v1850_v38 = vld [vmem:[%s2114_s7 + $0x5c] ss:$20 sps:$4 sm:$0xff]  }
  0x4e   : > { %v1805_v61 = vld [vmem:[%s2112_s6 + $0x80] sm:$0xff]   ;;  %v1811_v1 = vld [vmem:[%s2114_s7 + $0x2c] ss:$20 sps:$4 sm:$0xff]   ;;  %v1826_v18 = vld [vmem:[%s2114_s7 + $0x50] ss:$20 sps:$4 sm:$0xff]  }
  0x4f   : > { %1712 = vmatpush3.bf16.msra.mxu1 %v1787_v45  ;;  %1532 = vmatpush3.bf16.msra.mxu0 %v1787_v45  ;;  %v1806_v62 = vld [vmem:[%s2112_s6 + $0x100] sm:$0xff]   ;;  %v1816_v2 = vld [vmem:[%s2114_s7 + $0xcc] ss:$20 sps:$4 sm:$0xff]   ;;  %v1845_v34 = vld [vmem:[%s2114_s7 + $0x10] ss:$20 sps:$4 sm:$0xff]  }
  0x50   : > { %1705 = vmatprep.subr.bf16.mxu1 %v1788_v46  ;;  %1533 = vmatprep.subr.bf16.mxu0 %v1788_v46  ;;  %v1808_v3 = vld [vmem:[%s2112_s6 + $0x88] sm:$0xff]   ;;  %v1813_v6 = vld [vmem:[%s2112_s6 + $0x90] sm:$0xff]   ;;  %v434_v9 = vld [vmem:[%s2114_s7 + $0xf0] sm:$0xff] }
  0x51   : > { %v1809_v4 = vld [vmem:[%s2112_s6 + $0x108] sm:$0xff]   ;;  %v1815_v10 = vld [vmem:[%s2112_s6 + $0x110] sm:$0xff]   ;;  %v1818_v11 = vld [vmem:[%s2112_s6 + $0xd8] sm:$0xff]   ;;  %v1479_v13 = vcombine.high %v434_v9, %v434_v9  ;;  %v1478_v19 = vcombine.low %v434_v9, %v434_v9 }
  0x52   : > { %v1823_v12 = vld [vmem:[%s2114_s7 + $0x54] ss:$20 sps:$4 sm:$0xff]   ;;  %v1829_v21 = vld [vmem:[%s2112_s6 + $0xe8] sm:$0xff]   ;;  %v1837_v28 = vld [vmem:[%s2114_s7 + $0x78] ss:$20 sps:$4 sm:$0xff]  }
  0x53   : > { %1713 = vmatpush3.bf16.msra.mxu1 %v1789_v47  ;;  %1534 = vmatpush3.bf16.msra.mxu0 %v1789_v47  ;;  %v1820_v14 = vld [vmem:[%s2112_s6 + $0x98] sm:$0xff]   ;;  %v1822_v16 = vld [vmem:[%s2112_s6 + $0xe0] sm:$0xff]   ;;  %v1831_v24 = vld [vmem:[%s2112_s6 + $0xa8] sm:$0xff]  }
  0x54   : > { %1706 = vmatprep.subr.bf16.mxu1 %v1790_v48  ;;  %1535 = vmatprep.subr.bf16.mxu0 %v1790_v48  ;;  %v1821_v15 = vld [vmem:[%s2112_s6 + $0x118] sm:$0xff]   ;;  %v1825_v17 = vld [vmem:[%s2112_s6 + $0xa0] sm:$0xff]   ;;  %v1832_v25 = vld [vmem:[%s2112_s6 + $0x128] sm:$0xff]  }
  0x55   : > { %v1827_v20 = vld [vmem:[%s2112_s6 + $0x120] sm:$0xff]   ;;  %v1843_v23 = vld [vmem:[%s2114_s7 + $0xc] ss:$20 sps:$4 sm:$0xff]   ;;  %v1848_v36 = vld [vmem:[%s2114_s7 + $0x30] ss:$20 sps:$4 sm:$0xff]  }
  0x56   : > { %v1833_v26 = vld [vmem:[%s2112_s6 + $0xf0] sm:$0xff]   ;;  %v1839_v30 = vld [vmem:[%s2112_s6 + $0xf8] sm:$0xff]   ;;  %v435_v48 = vld [vmem:[%s2114_s7 + $0xf8] sm:$0xff] }
  0x57   : > { %1714 = vmatpush3.bf16.msra.mxu1 %v1791_v49  ;;  %1536 = vmatpush3.bf16.msra.mxu0 %v1791_v49  ;;  %v1836_v27 = vld [vmem:[%s2112_s6 + $0xb0] sm:$0xff]   ;;  %v1840_v31 = vld [vmem:[%s2112_s6 + $0xb8] sm:$0xff]   ;;  %v1481_v51 = vcombine.high %v435_v48, %v435_v48  ;;  %v1868_v53 = vld [vmem:[%s2114_s7 + $0x100] ss:$0 sps:$4 sm:$0xff]  }
  0x58   : > { %1707 = vmatprep.subr.bf16.mxu1 %v1792_v50  ;;  %1537 = vmatprep.subr.bf16.mxu0 %v1792_v50  ;;  %v1838_v29 = vld [vmem:[%s2112_s6 + $0x130] sm:$0xff]   ;;  %v1844_v32 = vld [vmem:[%s2112_s6 + $0x138] sm:$0xff]  }
  0x59   : > { %v1841_v33 = vld [vmem:[%s2114_s7 + $0x8] ss:$20 sps:$4 sm:$0xff]   ;;  %v1849_v37 = vld [vmem:[%s2114_s7 + $0x38] ss:$20 sps:$4 sm:$0xff]   ;;  %v1853_v40 = vld [vmem:[%s2114_s7 + $0x60] ss:$20 sps:$4 sm:$0xff]  }
  0x5a   : > { %v1846_v35 = vld [vmem:[%s2114_s7 + $0x34] ss:$20 sps:$4 sm:$0xff]   ;;  %v1852_v39 = vld [vmem:[%s2114_s7 + $0x58] ss:$20 sps:$4 sm:$0xff]   ;;  %v1861_v46 = vld [vmem:[%s2114_s7 + $0xb0] ss:$20 sps:$4 sm:$0xff]  }
  0x5b   : > { %1715 = vmatpush3.bf16.msra.mxu1 %v1793_v52  ;;  %1538 = vmatpush3.bf16.msra.mxu0 %v1793_v52  ;;  %v1854_v41 = vld [vmem:[%s2114_s7 + $0x84] ss:$20 sps:$4 sm:$0xff]   ;;  %v1856_v42 = vld [vmem:[%s2114_s7 + $0x80] ss:$20 sps:$4 sm:$0xff]   ;;  %v1857_v43 = vld [vmem:[%s2114_s7 + $0x88] ss:$20 sps:$4 sm:$0xff]   ;;  %v1480_v52 = vcombine.low %v435_v48, %v435_v48 }
  0x5c   : > { %1708 = vmatprep.subr.bf16.mxu1 %v1794_v54  ;;  %1539 = vmatprep.subr.bf16.mxu0 %v1794_v54  ;;  %v1858_v44 = vld [vmem:[%s2114_s7 + $0xac] ss:$20 sps:$4 sm:$0xff]   ;;  %v1860_v45 = vld [vmem:[%s2114_s7 + $0xa8] ss:$20 sps:$4 sm:$0xff]   ;;  %v1864_v49 = vld [vmem:[%s2114_s7 + $0xd0] ss:$20 sps:$4 sm:$0xff]  }
  0x5d   : > { %v1862_v47 = vld [vmem:[%s2114_s7 + $0xd4] ss:$20 sps:$4 sm:$0xff]   ;;  %v1865_v50 = vld [vmem:[%s2114_s7 + $0xd8] ss:$20 sps:$4 sm:$0xff]  }
  0x5f   : > { %1716 = vmatpush3.bf16.msra.mxu1 %v1795_v55  ;;  %1540 = vmatpush3.bf16.msra.mxu0 %v1795_v55 }
  0x60   : > { %1709 = vmatprep.subr.bf16.mxu1 %v1796_v56  ;;  %1541 = vmatprep.subr.bf16.mxu0 %v1796_v56 }
  0x63   : > { %1717 = vmatpush3.bf16.msra.mxu1 %v1797_v57  ;;  %1542 = vmatpush3.bf16.msra.mxu0 %v1797_v57 }
  0x64   : > { %1585 = vmatprep.subr.bf16.mxu1 %v1801_v58  ;;  %1658 = vmatprep.subr.bf16.mxu0 %v1926_v0 }
  0x66   : > { %996 = vmatmul.mubr.bf16.vlgmr.msra.gmra.mrb[0].mxu1 %v1798_v59  ;;  %964 = vmatmul.mubr.bf16.vlgmr.msra.gmra.mrb[0].mxu0 %v1802_v60 }
  0x67   : > { %1586 = vmatpush3.bf16.msra.mxu1 %v1805_v61  ;;  %1659 = vmatpush3.bf16.msra.mxu0 %v1806_v62 }
  0x68   : > { %1587 = vmatprep.subr.bf16.mxu1 %v1807_v63  ;;  %1660 = vmatprep.subr.bf16.mxu0 %v1926_v0 }
  0x69   : > { %971 = vmatprep.mubr.bf16.mxu0 %v1811_v1  ;;  %1003 = vmatprep.mubr.bf16.mxu1 %v1816_v2 }
  0x6b   : > { %1588 = vmatpush3.bf16.msra.mxu1 %v1808_v3  ;;  %1661 = vmatpush3.bf16.msra.mxu0 %v1809_v4 }
  0x6c   : > { %1589 = vmatprep.subr.bf16.mxu1 %v1810_v5  ;;  %1662 = vmatprep.subr.bf16.mxu0 %v1926_v0 }
  0x6e   : > { %972 = vmatmul.mubr.bf16.gmra.mrb[4].mxu0 %v1814_v7  ;;  %1004 = vmatmul.mubr.bf16.gmra.mrb[4].mxu1 %v1819_v8 }
  0x6f   : > { %1590 = vmatpush3.bf16.msra.mxu1 %v1813_v6  ;;  %1663 = vmatpush3.bf16.msra.mxu0 %v1815_v10 }
  0x70   : > { %1591 = vmatprep.subr.bf16.mxu1 %v1818_v11  ;;  %1664 = vmatprep.subr.bf16.mxu0 %v1926_v0 }
  0x71   : > { %979 = vmatprep.mubr.bf16.mxu0 %v1823_v12  ;;  %1011 = vmatprep.mubr.bf16.mxu1 %v1479_v13 }
  0x73   : > { %1592 = vmatpush3.bf16.msra.mxu1 %v1820_v14  ;;  %1665 = vmatpush3.bf16.msra.mxu0 %v1821_v15 }
  0x74   : > { %1593 = vmatprep.subr.bf16.mxu1 %v1822_v16  ;;  %1666 = vmatprep.subr.bf16.mxu0 %v1926_v0 }
  0x76   : > { %980 = vmatmul.mubr.bf16.gmra.mrb[8].mxu0 %v1826_v18  ;;  %1012 = vmatmul.mubr.bf16.gmra.mrb[8].mxu1 %v1478_v19 }
  0x77   : > { %1594 = vmatpush3.bf16.msra.mxu1 %v1825_v17  ;;  %1667 = vmatpush3.bf16.msra.mxu0 %v1827_v20 }
  0x78   : > { %1595 = vmatprep.subr.bf16.mxu1 %v1829_v21  ;;  %1668 = vmatprep.subr.bf16.mxu0 %v1926_v0 }
  0x79   : > { %987 = vmatprep.mubr.bf16.mxu0 %v1834_v22  ;;  %1051 = vmatprep.mubr.bf16.mxu1 %v1843_v23 }
  0x7b   : > { %1596 = vmatpush3.bf16.msra.mxu1 %v1831_v24  ;;  %1669 = vmatpush3.bf16.msra.mxu0 %v1832_v25 }
  0x7c   : > { %1597 = vmatprep.subr.bf16.mxu1 %v1833_v26  ;;  %1670 = vmatprep.subr.bf16.mxu0 %v1926_v0 }
  0x7e   : > { %988 = vmatmul.mubr.bf16.gmra.mrb[12].mxu0 %v1837_v28 }
  0x7f   : > { %1598 = vmatpush3.bf16.msra.mxu1 %v1836_v27  ;;  %1671 = vmatpush3.bf16.msra.mxu0 %v1838_v29 }
  0x80   : > { %1599 = vmatprep.subr.bf16.mxu1 %v1839_v30  ;;  %1672 = vmatprep.subr.bf16.mxu0 %v1926_v0 }
  0x81   : > { %1674 = vmatprep.mubr.msk.bf16.mxu0 %vm1927_vm0, %v1926_v0 }
  0x83   : > { %1600 = vmatpush3.bf16.msra.mxu1 %v1840_v31  ;;  %1673 = vmatpush3.bf16.msra.mxu0 %v1844_v32 }
  0x86   : > { %1052 = vmatmul.mubr.bf16.vlgmr.msra.gmra.mrb[12].mxu1 %v1841_v33  ;;  %1675 = vmatmul.mubr.bf16.vlgmr.msra.gmra.mrb[16].mxu0 %v1845_v34 }
  0x87   : > { %1059 = vmatprep.mubr.bf16.mxu1 %v1846_v35  ;;  %1678 = vmatprep.mubr.msk.bf16.mxu0 %vm1927_vm0, %v1926_v0 }
  0x8e   : > { %1060 = vmatmul.mubr.bf16.gmra.mrb[16].mxu1 %v1848_v36  ;;  %1679 = vmatmul.mubr.bf16.gmra.mrb[20].mxu0 %v1849_v37 }
  0x8f   : > { %1067 = vmatprep.mubr.bf16.mxu1 %v1850_v38  ;;  %1682 = vmatprep.mubr.msk.bf16.mxu0 %vm1927_vm0, %v1926_v0 }
  0x96   : > { %1068 = vmatmul.mubr.bf16.gmra.mrb[20].mxu1 %v1852_v39  ;;  %1683 = vmatmul.mubr.bf16.gmra.mrb[24].mxu0 %v1853_v40 }
  0x97   : > { %1075 = vmatprep.mubr.bf16.mxu1 %v1854_v41  ;;  %1686 = vmatprep.mubr.msk.bf16.mxu0 %vm1927_vm0, %v1926_v0 }
  0x9e   : > { %1076 = vmatmul.mubr.bf16.gmra.mrb[24].mxu1 %v1856_v42  ;;  %1687 = vmatmul.mubr.bf16.gmra.mrb[28].mxu0 %v1857_v43  ;;  %v385_v42 = vld [vmem:[#allocation2] sm:$0xff] }
  0x9f   : > { %1083 = vmatprep.mubr.bf16.mxu1 %v1858_v44  ;;  %1690 = vmatprep.mubr.msk.bf16.mxu0 %vm1927_vm0, %v1926_v0 }
  0xa6   : > { %1084 = vmatmul.mubr.bf16.gmra.mrb[28].mxu1 %v1860_v45  ;;  %1691 = vmatmul.mubr.bf16.gmra.mrb[32].mxu0 %v1861_v46  ;;  %v386_v45 = vld [vmem:[#allocation2 + $0x8] sm:$0xff] }
  0xa7   : > { %1091 = vmatprep.mubr.bf16.mxu1 %v1862_v47  ;;  %1694 = vmatprep.mubr.msk.bf16.mxu0 %vm1927_vm0, %v1926_v0 }
  0xae   : > { %1092 = vmatmul.mubr.bf16.gmra.mrb[32].mxu1 %v1864_v49  ;;  %1695 = vmatmul.mubr.bf16.gmra.mrb[36].mxu0 %v1865_v50 }
  0xaf   : > { %1099 = vmatprep.mubr.bf16.mxu1 %v1481_v51  ;;  %1698 = vmatprep.mubr.msk.bf16.mxu0 %vm1927_vm0, %v1926_v0 }
  0xb6   : > { %1100 = vmatmul.mubr.bf16.gmra.mrb[36].mxu1 %v1480_v52  ;;  %1699 = vmatmul.mubr.bf16.gmra.mrb[40].mxu0 %v1868_v53 }
 0x139   : > { %v1567_v54 = vpop.f32.mrb[0].mxu1  ;;  %v1543_v55 = vpop.f32.mrb[0].mxu0 }
 0x13a   : > { %v1568_v56 = vpop.f32.mrb[1].mxu1  ;;  %v1544_v57 = vpop.f32.mrb[1].mxu0 }
 0x13b   : > { %v2212_v58 = vadd.f32 %v1568_v56, %v1567_v54  ;;  %v1570_v59 = vpop.f32.mrb[2].mxu1  ;;  %v1545_v60 = vadd.f32 %v1544_v57, %v1543_v55  ;;  %v1546_v61 = vpop.f32.mrb[2].mxu0 }
 0x13c   : > { %v1571_v62 = vpop.f32.mrb[3].mxu1  ;;  %v1547_v63 = vpop.f32.mrb[3].mxu0 }
 0x13d   : > { %v2214_v1 = vadd.f32 %v1571_v62, %v1570_v59  ;;  %v1548_v2 = vadd.f32 %v1547_v63, %v1546_v61  ;;  %v387_v61 = vld [vmem:[#allocation2 + $0x10] sm:$0xff] }
 0x141   : > { %v1549_v3 = vpop.f32.mrb[4].mxu0  ;;  %v1573_v0 = vpop.f32.mrb[4].mxu1 }
 0x142   : > { %v1550_v4 = vpop.f32.mrb[5].mxu0  ;;  %v1574_v5 = vpop.f32.mrb[5].mxu1 }
 0x143   : > { %v1551_v6 = vadd.f32 %v1550_v4, %v1549_v3  ;;  %v1552_v7 = vpop.f32.mrb[6].mxu0  ;;  %v2216_v8 = vadd.f32 %v1574_v5, %v1573_v0  ;;  %v1576_v9 = vpop.f32.mrb[6].mxu1 }
 0x144   : > { %v1553_v10 = vpop.f32.mrb[7].mxu0  ;;  %v1577_v11 = vpop.f32.mrb[7].mxu1 }
 0x145   : > { %v1554_v12 = vadd.f32 %v1553_v10, %v1552_v7  ;;  %v2218_v13 = vadd.f32 %v1577_v11, %v1576_v9 }
 0x149   : > { %v1555_v14 = vpop.f32.mrb[8].mxu0  ;;  %v1579_v15 = vpop.f32.mrb[8].mxu1 }
 0x14a   : > { %v1556_v16 = vpop.f32.mrb[9].mxu0  ;;  %v1580_v17 = vpop.f32.mrb[9].mxu1 }
 0x14b   : > { %v1557_v18 = vadd.f32 %v1556_v16, %v1555_v14  ;;  %v1558_v19 = vpop.f32.mrb[10].mxu0  ;;  %v2220_v20 = vadd.f32 %v1580_v17, %v1579_v15  ;;  %v1582_v21 = vpop.f32.mrb[10].mxu1 }
 0x14c   : > { %v1559_v22 = vpop.f32.mrb[11].mxu0  ;;  %v1583_v23 = vpop.f32.mrb[11].mxu1  ;;  %v389_v21 = vld [vmem:[#allocation2 + $0x20] sm:$0xff] }
 0x14d   : > { %v1560_v24 = vadd.f32 %v1559_v22, %v1558_v19  ;;  %v390_v23 = vld [vmem:[#allocation2 + $0x28] sm:$0xff] }
 0x151   : > { %v1561_v25 = vpop.f32.mrb[12].mxu0 }
 0x152   : > { %v1562_v26 = vpop.f32.mrb[13].mxu0 }
 0x153   : > { %v2222_v27 = vadd.f32 %v1562_v26, %v1561_v25  ;;  %v1564_v28 = vpop.f32.mrb[14].mxu0 }
 0x154   : > { %v1565_v29 = vpop.f32.mrb[15].mxu0 }
 0x155   : > { %v2224_v30 = vadd.f32 %v1565_v29, %v1564_v28 }
 0x159   : > { %v1601_v31 = vpop.f32.mrb[12].mxu1  ;;  %v1141_v32 = vpop.f32.mrb[16].mxu0 }
 0x15a   : > { %v1602_v33 = vpop.f32.mrb[13].mxu1  ;;  %v1676_v34 = vpop.f32.mrb[17].mxu0 }
 0x15b   : > { %v1603_v35 = vadd.f32 %v1602_v33, %v1601_v31  ;;  %v1604_v36 = vpop.f32.mrb[14].mxu1  ;;  %v1144_v37 = vpop.f32.mrb[18].mxu0 }
 0x15c   : > { %v1605_v38 = vpop.f32.mrb[15].mxu1  ;;  %v1677_v39 = vpop.f32.mrb[19].mxu0 }
 0x15d   : > { %v1054_v40 = vadd.f32 %v1603_v35, %v1545_v60  ;;  %v1606_v41 = vadd.f32 %v1605_v38, %v1604_v36 }
 0x15f   : > { %v1142_v43 = vadd.f32 %v1141_v32, %v1054_v40  ;;  %v1057_v44 = vadd.f32 %v1606_v41, %v1548_v2  ;;  %v388_v2 = vld [vmem:[#allocation2 + $0x18] sm:$0xff]  ;;  %v391_v40 = vld [vmem:[#allocation2 + $0x30] sm:$0xff] }
 0x161   : > { %v1195_v46 = vadd.f32 %v1142_v43, %v385_v42  ;;  %v1145_v47 = vadd.f32 %v1144_v37, %v1057_v44  ;;  %v1607_v48 = vpop.f32.mrb[16].mxu1  ;;  %v1149_v49 = vpop.f32.mrb[20].mxu0  ;;  %v392_v42 = vld [vmem:[#allocation2 + $0x38] sm:$0xff] }
 0x162   : > { %v1608_v50 = vpop.f32.mrb[17].mxu1  ;;  %v1680_v51 = vpop.f32.mrb[21].mxu0 }
 0x163   : > { %1208 = vst [vmem:[#allocation2] sm:$0xff] %v1195_v46  ;;  %v1196_v52 = vadd.f32 %v1145_v47, %v386_v45  ;;  %v1609_v53 = vadd.f32 %v1608_v50, %v1607_v48  ;;  %v1610_v54 = vpop.f32.mrb[18].mxu1  ;;  %v1152_v55 = vpop.f32.mrb[22].mxu0 }
 0x164   : > { %v1611_v56 = vpop.f32.mrb[19].mxu1  ;;  %v1681_v57 = vpop.f32.mrb[23].mxu0 }
 0x165   : > { %1209 = vst [vmem:[#allocation2 + $0x8] sm:$0xff] %v1196_v52  ;;  %v1062_v59 = vadd.f32 %v1609_v53, %v1551_v6  ;;  %v1612_v60 = vadd.f32 %v1611_v56, %v1610_v54  ;;  %v393_v56 = vld [vmem:[#allocation2 + $0x40] sm:$0xff] }
 0x167   : > { %v1150_v62 = vadd.f32 %v1149_v49, %v1062_v59  ;;  %v1065_v63 = vadd.f32 %v1612_v60, %v1554_v12  ;;  %v394_v59 = vld [vmem:[#allocation2 + $0x48] sm:$0xff] }
 0x169   : > { %v1197_v3 = vadd.f32 %v1150_v62, %v387_v61  ;;  %v1153_v0 = vadd.f32 %v1152_v55, %v1065_v63  ;;  %v1613_v4 = vpop.f32.mrb[20].mxu1  ;;  %v1157_v5 = vpop.f32.mrb[24].mxu0 }
 0x16a   : > { %v1614_v7 = vpop.f32.mrb[21].mxu1  ;;  %v1684_v9 = vpop.f32.mrb[25].mxu0 }
 0x16b   : > { %1210 = vst [vmem:[#allocation2 + $0x10] sm:$0xff] %v1197_v3  ;;  %v1198_v10 = vadd.f32 %v1153_v0, %v388_v2  ;;  %v1615_v11 = vadd.f32 %v1614_v7, %v1613_v4  ;;  %v1616_v14 = vpop.f32.mrb[22].mxu1  ;;  %v1160_v15 = vpop.f32.mrb[26].mxu0 }
 0x16c   : > { %v1617_v16 = vpop.f32.mrb[23].mxu1  ;;  %v1685_v17 = vpop.f32.mrb[27].mxu0 }
 0x16d   : > { %1211 = vst [vmem:[#allocation2 + $0x18] sm:$0xff] %v1198_v10  ;;  %v1070_v6 = vadd.f32 %v1615_v11, %v1557_v18  ;;  %v1618_v19 = vadd.f32 %v1617_v16, %v1616_v14  ;;  %v395_v14 = vld [vmem:[#allocation2 + $0x50] sm:$0xff]  ;;  %v396_v16 = vld [vmem:[#allocation2 + $0x58] sm:$0xff] }
 0x16f   : > { %v1158_v22 = vadd.f32 %v1157_v5, %v1070_v6  ;;  %v1073_v12 = vadd.f32 %v1618_v19, %v1560_v24 }
 0x171   : > { %v1199_v25 = vadd.f32 %v1158_v22, %v389_v21  ;;  %v1161_v26 = vadd.f32 %v1160_v15, %v1073_v12  ;;  %v1619_v28 = vpop.f32.mrb[24].mxu1  ;;  %v1165_v29 = vpop.f32.mrb[28].mxu0 }
 0x172   : > { %v1620_v31 = vpop.f32.mrb[25].mxu1  ;;  %v1688_v32 = vpop.f32.mrb[29].mxu0 }
 0x173   : > { %1212 = vst [vmem:[#allocation2 + $0x20] sm:$0xff] %v1199_v25  ;;  %v1200_v33 = vadd.f32 %v1161_v26, %v390_v23  ;;  %v1621_v34 = vadd.f32 %v1620_v31, %v1619_v28  ;;  %v1622_v35 = vpop.f32.mrb[26].mxu1  ;;  %v1168_v36 = vpop.f32.mrb[30].mxu0  ;;  %v397_v32 = vld [vmem:[#allocation2 + $0x60] sm:$0xff] }
 0x174   : > { %v1623_v37 = vpop.f32.mrb[27].mxu1  ;;  %v1689_v38 = vpop.f32.mrb[31].mxu0 }
 0x175   : > { %1213 = vst [vmem:[#allocation2 + $0x28] sm:$0xff] %v1200_v33  ;;  %v1078_v18 = vadd.f32 %v1621_v34, %v2222_v27  ;;  %v1624_v39 = vadd.f32 %v1623_v37, %v1622_v35  ;;  %v1225_v34 = vld [vmem:[#allocation2] sm:$0xff] (!%p1523_p13) }
 0x176   : > { %v1524_v35 = vld [vmem:[%s356_s24] ss:$0 sm:$0xff] (!%p1523_p13) }
 0x177   : > { %v1166_v24 = vadd.f32 %v1165_v29, %v1078_v18  ;;  %v1081_v41 = vadd.f32 %v1624_v39, %v2224_v30  ;;  %v1245_v37 = vadd.f32 (!%p1523_p13), %v1524_v35, %v1225_v34  ;;  %v1227_v18 = vld [vmem:[#allocation2 + $0x10] sm:$0xff] (!%p1523_p13)  ;;  %v1228_v39 = vld [vmem:[#allocation2 + $0x18] sm:$0xff] (!%p1523_p13) }
 0x179   : > { %v1201_v43 = vadd.f32 %v1166_v24, %v391_v40  ;;  %v1169_v44 = vadd.f32 %v1168_v36, %v1081_v41  ;;  %v1625_v45 = vpop.f32.mrb[28].mxu1  ;;  %v1173_v46 = vpop.f32.mrb[32].mxu0  ;;  %v1226_v36 = vld [vmem:[#allocation2 + $0x8] sm:$0xff] (!%p1523_p13)  ;;  %v1247_v40 = vadd.f32 (!%p1523_p13), %v1524_v35, %v1227_v18  ;;  %v1248_v24 = vadd.f32 (!%p1523_p13), %v1524_v35, %v1228_v39 }
 0x17a   : > { %v1626_v47 = vpop.f32.mrb[29].mxu1  ;;  %v1692_v48 = vpop.f32.mrb[33].mxu0  ;;  %v1246_v38 = vadd.f32 (!%p1523_p13), %v1524_v35, %v1226_v36 }
 0x17b   : > { %1214 = vst [vmem:[#allocation2 + $0x30] sm:$0xff] %v1201_v43  ;;  %v1202_v49 = vadd.f32 %v1169_v44, %v392_v42  ;;  %v1627_v50 = vadd.f32 %v1626_v47, %v1625_v45  ;;  %v1628_v51 = vpop.f32.mrb[30].mxu1  ;;  %v1176_v52 = vpop.f32.mrb[34].mxu0  ;;  %v1258_v45 = vmax.f32 (!%p1523_p13), %v1245_v37, 0.0 }
 0x17c   : > { %v1629_v53 = vpop.f32.mrb[31].mxu1  ;;  %v1693_v54 = vpop.f32.mrb[35].mxu0  ;;  %v1230_v42 = vld [vmem:[#allocation2 + $0x28] sm:$0xff] (!%p1523_p13) }
 0x17d   : > { %1215 = vst [vmem:[#allocation2 + $0x38] sm:$0xff] %v1202_v49  ;;  %v1086_v27 = vadd.f32 %v1627_v50, %v2212_v58  ;;  %v1630_v55 = vadd.f32 %v1629_v53, %v1628_v51  ;;  %v1250_v47 = vadd.f32 (!%p1523_p13), %v1524_v35, %v1230_v42  ;;  %v1261_v53 = vmax.f32 (!%p1523_p13), %v1248_v24, 0.0  ;;  %1271 = vst [vmem:[%s2107_s30] sm:$0xff] (!%p1523_p13), %v1258_v45 }
 0x17f   : > { %v1174_v30 = vadd.f32 %v1173_v46, %v1086_v27  ;;  %v1089_v57 = vadd.f32 %v1630_v55, %v2214_v1  ;;  %v1259_v46 = vmax.f32 (!%p1523_p13), %v1246_v38, 0.0  ;;  %1274 = vst [vmem:[%s2107_s30 + $0x18] sm:$0xff] (!%p1523_p13), %v1261_v53 }
 0x181   : > { %v1203_v60 = vadd.f32 %v1174_v30, %v393_v56  ;;  %v1177_v61 = vadd.f32 %v1176_v52, %v1089_v57  ;;  %v1631_v62 = vpop.f32.mrb[32].mxu1  ;;  %v1181_v63 = vpop.f32.mrb[36].mxu0  ;;  %v1260_v52 = vmax.f32 (!%p1523_p13), %v1247_v40, 0.0  ;;  %1272 = vst [vmem:[%s2107_s30 + $0x8] sm:$0xff] (!%p1523_p13), %v1259_v46  ;;  %v1263_v30 = vmax.f32 (!%p1523_p13), %v1250_v47, 0.0 }
 0x182   : > { %v1632_v2 = vpop.f32.mrb[33].mxu1  ;;  %v1696_v3 = vpop.f32.mrb[37].mxu0  ;;  %v1231_v43 = vld [vmem:[#allocation2 + $0x30] sm:$0xff] (!%p1523_p13) }
 0x183   : > { %1216 = vst [vmem:[#allocation2 + $0x40] sm:$0xff] %v1203_v60  ;;  %v1204_v0 = vadd.f32 %v1177_v61, %v394_v59  ;;  %v1633_v4 = vadd.f32 %v1632_v2, %v1631_v62  ;;  %v1634_v5 = vpop.f32.mrb[34].mxu1  ;;  %v1184_v7 = vpop.f32.mrb[38].mxu0  ;;  %v1251_v48 = vadd.f32 (!%p1523_p13), %v1524_v35, %v1231_v43  ;;  %1273 = vst [vmem:[%s2107_s30 + $0x10] sm:$0xff] (!%p1523_p13), %v1260_v52 }
 0x184   : > { %v1635_v9 = vpop.f32.mrb[35].mxu1  ;;  %v1697_v10 = vpop.f32.mrb[39].mxu0  ;;  %v1232_v44 = vld [vmem:[#allocation2 + $0x38] sm:$0xff] (!%p1523_p13)  ;;  %1276 = vst [vmem:[%s2107_s30 + $0x28] sm:$0xff] (!%p1523_p13), %v1263_v30 }
 0x185   : > { %1217 = vst [vmem:[#allocation2 + $0x48] sm:$0xff] %v1204_v0  ;;  %v1094_v58 = vadd.f32 %v1633_v4, %v2216_v8  ;;  %v1636_v11 = vadd.f32 %v1635_v9, %v1634_v5  ;;  %v1252_v27 = vadd.f32 (!%p1523_p13), %v1524_v35, %v1232_v44  ;;  %v1264_v57 = vmax.f32 (!%p1523_p13), %v1251_v48, 0.0 }
 0x187   : > { %v1182_v1 = vadd.f32 %v1181_v63, %v1094_v58  ;;  %v1097_v15 = vadd.f32 %v1636_v11, %v2218_v13  ;;  %v1265_v61 = vmax.f32 (!%p1523_p13), %v1252_v27, 0.0  ;;  %1277 = vst [vmem:[%s2107_s30 + $0x30] sm:$0xff] (!%p1523_p13), %v1264_v57 }
 0x189   : > { %v1205_v17 = vadd.f32 %v1182_v1, %v395_v14  ;;  %v1185_v6 = vadd.f32 %v1184_v7, %v1097_v15  ;;  %v1637_v19 = vpop.f32.mrb[36].mxu1  ;;  %v1189_v21 = vpop.f32.mrb[40].mxu0  ;;  %1278 = vst [vmem:[%s2107_s30 + $0x38] sm:$0xff] (!%p1523_p13), %v1265_v61 }
 0x18a   : > { %v1638_v22 = vpop.f32.mrb[37].mxu1  ;;  %v1700_v12 = vpop.f32.mrb[41].mxu0  ;;  %v1233_v49 = vld [vmem:[#allocation2 + $0x40] sm:$0xff] (!%p1523_p13) }
 0x18b   : > { %1218 = vst [vmem:[#allocation2 + $0x50] sm:$0xff] %v1205_v17  ;;  %v1206_v23 = vadd.f32 %v1185_v6, %v396_v16  ;;  %v1639_v25 = vadd.f32 %v1638_v22, %v1637_v19  ;;  %v1640_v26 = vpop.f32.mrb[38].mxu1  ;;  %v1192_v28 = vpop.f32.mrb[42].mxu0  ;;  %v1253_v59 = vadd.f32 (!%p1523_p13), %v1524_v35, %v1233_v49 }
 0x18c   : > { %v1641_v29 = vpop.f32.mrb[39].mxu1  ;;  %v1701_v31 = vpop.f32.mrb[43].mxu0  ;;  %v1234_v50 = vld [vmem:[#allocation2 + $0x48] sm:$0xff] (!%p1523_p13) }
 0x18d   : > { %1219 = vst [vmem:[#allocation2 + $0x58] sm:$0xff] %v1206_v23  ;;  %v1102_v8 = vadd.f32 %v1639_v25, %v2220_v20  ;;  %1224 = sbr.rel (%p1523_p13) target bundleno = 416 (0x1a0), region = 66  ;;  %v1229_v20 = vld [vmem:[#allocation2 + $0x20] sm:$0xff] (!%p1523_p13)  ;;  %v1254_v60 = vadd.f32 (!%p1523_p13), %v1524_v35, %v1234_v50  ;;  %v1266_v3 = vmax.f32 (!%p1523_p13), %v1253_v59, 0.0 }
 0x18e   : > { %v1249_v41 = vadd.f32 (!%p1523_p13), %v1524_v35, %v1229_v20 }
 0x18f   : > { %v1190_v33 = vadd.f32 %v1189_v21, %v1102_v8  ;;  %v1267_v0 = vmax.f32 (!%p1523_p13), %v1254_v60, 0.0  ;;  %1279 = vst [vmem:[%s2107_s30 + $0x40] sm:$0xff] (!%p1523_p13), %v1266_v3 }
 0x190   : > { %v1262_v54 = vmax.f32 (!%p1523_p13), %v1249_v41, 0.0 }
 0x191   : > { %v1207_v13 = vadd.f32 %v1190_v33, %v397_v32  ;;  %1280 = vst [vmem:[%s2107_s30 + $0x48] sm:$0xff] (!%p1523_p13), %v1267_v0 }
 0x192   : > { %v1235_v51 = vld [vmem:[#allocation2 + $0x50] sm:$0xff] (!%p1523_p13)  ;;  %1275 = vst [vmem:[%s2107_s30 + $0x20] sm:$0xff] (!%p1523_p13), %v1262_v54 }
 0x193   : > { %1220 = vst [vmem:[#allocation2 + $0x60] sm:$0xff] %v1207_v13  ;;  %v1255_v62 = vadd.f32 (!%p1523_p13), %v1524_v35, %v1235_v51 }
 0x194   : > { %v1236_v55 = vld [vmem:[#allocation2 + $0x58] sm:$0xff] }
 0x195   : > { %v1256_v63 = vadd.f32 %v1524_v35, %v1236_v55  ;;  %v1268_v4 = vmax.f32 %v1255_v62, 0.0 }
 0x197   : > { %v1269_v5 = vmax.f32 %v1256_v63, 0.0  ;;  %1281 = vst [vmem:[%s2107_s30 + $0x50] sm:$0xff] %v1268_v4 }
 0x199   : > { %1282 = vst [vmem:[%s2107_s30 + $0x58] sm:$0xff] %v1269_v5 }
 0x19a   : > { %v1237_v56 = vld [vmem:[#allocation2 + $0x60] sm:$0xff] }
 0x19b   : > { %v1257_v2 = vadd.f32 %v1524_v35, %v1237_v56 }
 0x19d   : > { %v1270_v7 = vmax.f32 %v1257_v2, 0.0 }
 0x19f   : > { %1283 = vst [vmem:[%s2107_s30 + $0x60] sm:$0xff] %v1270_v7 }
 0x1a0 PF: > { %s13_s18 = sadd.s32 1, %s1923_s18   ;;  %s2277_s12 = smov %s1903_s13 }
 0x1a1   : > { %p10_p0 = scmp.ge.s32.totalorder %s13_s18, 6   ;;  %s2278_s13 = smov %s1999_s25 }
 0x1a2   : > { %s2279_s14 = smov %s1915_s16  ;;  %s2280_s15 = smov %s1919_s17 }
 0x1a3   : > { %s2281_s16 = smov %s2284_s19  ;;  %s2282_s17 = smov %s2288_s20 }
 0x1a4   :  { %12 = sbr.rel (!%p10_p0) target bundleno = 4 (0x4), region = 113 }

// kernel: _lambda_.12
= control target key start
LH: loop header
LB: loop body
LE: loop exit
PB: predicated region body
PF: predicated region fallthrough
CT: control target
= control target key end

     0   :  { %v60_v0 = vlaneseq  ;;  %v1322_v1 = vmov 0.0|0.0   ;;  %v1323_v40 = vmov 1.0|1.0   ;;  %s2154_s0 = inlined_call_operand.vmem [shape: f32[104,256], index: 0, kind: input, shape index: {}]   ;;  %s2155_s1 = inlined_call_operand.vmem [shape: f32[104,256], index: 1, kind: output, shape index: {}]  }
   0x1   :  { %1129 = vmatprep.subr.bf16.mxu0 %v1322_v1  ;;  %1181 = vmatprep.subr.bf16.mxu1 %v1322_v1  ;;  %v1342_v2 = vld [vmem:[%s2154_s0 + $0x8] sm:$0xff]  ;;  %v1347_v3 = vld [vmem:[%s2154_s0 + $0x78] sm:$0xff] }
   0x2   :  { %v1349_v4 = vshrl.u32 %v60_v0, 7  ;;  %v1351_v5 = vand.u32 127, %v60_v0  ;;  %v35_v6 = vmul.f32 %v1342_v2, %v1342_v2  ;;  %v49_v7 = vmul.f32 %v1347_v3, %v1347_v3 }
   0x4   :  { %v62_v8 = vadd.s32 8, %v1349_v4  ;;  %v96_v9 = vsub.s32 %v1349_v4, %v1351_v5  ;;  %v63_v10 = vadd.s32 16, %v1349_v4  ;;  %v64_v11 = vadd.s32 24, %v1349_v4  ;;  %608 = vmatprep.mubr.f32.mxu0 %v35_v6  ;;  %650 = vmatprep.mubr.f32.mxu1 %v49_v7 }
   0x5   :  { %v65_v12 = vadd.s32 32, %v1349_v4  ;;  %v66_v13 = vadd.s32 40, %v1349_v4  ;;  %v67_v14 = vadd.s32 48, %v1349_v4  ;;  %v68_v15 = vadd.s32 56, %v1349_v4 }
   0x6   :  { %v98_v16 = vsub.s32 %v62_v8, %v1351_v5  ;;  %v161_v17 = vsub.s32 0, %v96_v9  ;;  %v100_v18 = vsub.s32 %v63_v10, %v1351_v5  ;;  %v102_v19 = vsub.s32 %v64_v11, %v1351_v5 }
   0x7   :  { %v104_v20 = vsub.s32 %v65_v12, %v1351_v5  ;;  %v106_v21 = vsub.s32 %v66_v13, %v1351_v5  ;;  %v108_v22 = vsub.s32 %v67_v14, %v1351_v5  ;;  %v110_v23 = vsub.s32 %v68_v15, %v1351_v5 }
   0x8   :  { %v1029_v24 = vmin.u32 %v161_v17, %v96_v9  ;;  %v167_v25 = vsub.s32 0, %v98_v16  ;;  %v173_v26 = vsub.s32 0, %v100_v18  ;;  %v179_v27 = vsub.s32 0, %v102_v19 }
   0x9   :  { %v185_v28 = vsub.s32 0, %v104_v20  ;;  %v191_v29 = vsub.s32 0, %v106_v21  ;;  %v197_v30 = vsub.s32 0, %v108_v22  ;;  %v203_v31 = vsub.s32 0, %v110_v23 }
   0xa   :  { %v1030_v32 = vmin.u32 %v167_v25, %v98_v16  ;;  %vm352_vm0 = vcmp.le.s32.totalorder %v1029_v24, 2  ;;  %v1031_v33 = vmin.u32 %v173_v26, %v100_v18  ;;  %v1032_v34 = vmin.u32 %v179_v27, %v102_v19 }
   0xb   :  { %v1033_v35 = vmin.u32 %v185_v28, %v104_v20  ;;  %v1034_v36 = vmin.u32 %v191_v29, %v106_v21  ;;  %v69_v37 = vadd.s32 64, %v1349_v4  ;;  %v1035_v38 = vmin.u32 %v197_v30, %v108_v22 }
   0xc   :  { %vm354_vm1 = vcmp.le.s32.totalorder %v1030_v32, 2  ;;  %vm356_vm2 = vcmp.le.s32.totalorder %v1031_v33, 2  ;;  %vm358_vm3 = vcmp.le.s32.totalorder %v1032_v34, 2  ;;  %v1036_v39 = vmin.u32 %v203_v31, %v110_v23 }
   0xd   :  { %vm1130_vm4 = vmpackc.low %vm354_vm1, %vm352_vm0  ;;  %v70_v41 = vadd.s32 72, %v1349_v4  ;;  %v112_v42 = vsub.s32 %v69_v37, %v1351_v5  ;;  %v71_v43 = vadd.s32 80, %v1349_v4  ;;  %v72_v44 = vadd.s32 88, %v1349_v4 }
   0xe   :  { %1131 = vmatpush1.bf16.msk.msra.mxu0 %vm1130_vm4, %v1323_v40  ;;  %1197 = vmatpush1.bf16.msk.msra.mxu1 %vm1130_vm4, %v1323_v40  ;;  %vm1133_vm5 = vmpackc.low %vm358_vm3, %vm356_vm2  ;;  %vm360_vm6 = vcmp.le.s32.totalorder %v1033_v35, 2  ;;  %vm362_vm7 = vcmp.le.s32.totalorder %v1034_v36, 2  ;;  %v73_v45 = vadd.s32 96, %v1349_v4  ;;  %v74_v46 = vadd.s32 104, %v1349_v4 }
   0xf   :  { %1132 = vmatprep.subr.bf16.mxu0 %v1322_v1  ;;  %1182 = vmatprep.subr.bf16.mxu1 %v1322_v1  ;;  %v114_v47 = vsub.s32 %v70_v41, %v1351_v5  ;;  %v209_v48 = vsub.s32 0, %v112_v42  ;;  %v116_v49 = vsub.s32 %v71_v43, %v1351_v5  ;;  %v118_v50 = vsub.s32 %v72_v44, %v1351_v5  ;;  %vm1136_vm8 = vmpackc.low %vm362_vm7, %vm360_vm6 }
  0x10   :  { %v120_v51 = vsub.s32 %v73_v45, %v1351_v5  ;;  %v122_v54 = vsub.s32 %v74_v46, %v1351_v5  ;;  %v75_v55 = vadd.s32 112, %v1349_v4  ;;  %v76_v58 = vadd.s32 120, %v1349_v4 }
  0x11   :  { %v1037_v52 = vmin.u32 %v209_v48, %v112_v42  ;;  %v215_v53 = vsub.s32 0, %v114_v47  ;;  %v221_v56 = vsub.s32 0, %v116_v49  ;;  %v227_v57 = vsub.s32 0, %v118_v50 }
  0x12   :  { %1134 = vmatpush1.bf16.msk.msra.mxu0 %vm1133_vm5, %v1323_v40  ;;  %1198 = vmatpush1.bf16.msk.msra.mxu1 %vm1133_vm5, %v1323_v40  ;;  %vm364_vm9 = vcmp.le.s32.totalorder %v1035_v38, 2  ;;  %vm366_vm10 = vcmp.le.s32.totalorder %v1036_v39, 2  ;;  %v1399_v60 = vadd.s32 128, %v1351_v5  ;;  %v233_v61 = vsub.s32 0, %v120_v51 }
  0x13   :  { %1135 = vmatprep.subr.bf16.mxu0 %v1322_v1  ;;  %1183 = vmatprep.subr.bf16.mxu1 %v1322_v1  ;;  %v1038_v59 = vmin.u32 %v215_v53, %v114_v47  ;;  %vm368_vm11 = vcmp.le.s32.totalorder %v1037_v52, 2  ;;  %v239_v62 = vsub.s32 0, %v122_v54  ;;  %v124_v63 = vsub.s32 %v75_v55, %v1351_v5  ;;  %vm1139_vm12 = vmpackc.low %vm366_vm10, %vm364_vm9 }
  0x14   :  { %v1039_v0 = vmin.u32 %v221_v56, %v116_v49  ;;  %v1040_v6 = vmin.u32 %v227_v57, %v118_v50  ;;  %v126_v7 = vsub.s32 %v76_v58, %v1351_v5  ;;  %v1408_v8 = vadd.s32 128, %v1349_v4  ;;  %v1603_v49 = vld [vmem:[%s2154_s0 + $0x30] sm:$0xff] }
  0x15   :  { %vm370_vm13 = vcmp.le.s32.totalorder %v1038_v59, 2  ;;  %v78_v9 = vadd.s32 136, %v1349_v4  ;;  %v79_v10 = vadd.s32 144, %v1349_v4  ;;  %v80_v11 = vadd.s32 152, %v1349_v4 }
  0x16   :  { %1137 = vmatpush1.bf16.msk.msra.mxu0 %vm1136_vm8, %v1323_v40  ;;  %1199 = vmatpush1.bf16.msk.msra.mxu1 %vm1136_vm8, %v1323_v40  ;;  %v127_v12 = vsub.s32 %v76_v58, %v1399_v60  ;;  %v129_v13 = vsub.s32 %v1408_v8, %v1399_v60  ;;  %v1041_v14 = vmin.u32 %v233_v61, %v120_v51  ;;  %vm1142_vm14 = vmpackc.low %vm370_vm13, %vm368_vm11  ;;  %vm372_vm15 = vcmp.le.s32.totalorder %v1039_v0, 2 }
  0x17   :  { %1138 = vmatprep.subr.bf16.mxu0 %v1322_v1  ;;  %1184 = vmatprep.subr.bf16.mxu1 %v1322_v1  ;;  %v131_v15 = vsub.s32 %v78_v9, %v1399_v60  ;;  %v1042_v16 = vmin.u32 %v239_v62, %v122_v54  ;;  %v245_v17 = vsub.s32 0, %v124_v63  ;;  %v251_v18 = vsub.s32 0, %v126_v7 }
  0x18   :  { %vm374_vm0 = vcmp.le.s32.totalorder %v1040_v6, 2  ;;  %v133_v19 = vsub.s32 %v79_v10, %v1399_v60  ;;  %v135_v20 = vsub.s32 %v80_v11, %v1399_v60  ;;  %v81_v21 = vadd.s32 160, %v1349_v4 }
  0x19   :  { %v254_v22 = vsub.s32 0, %v127_v12  ;;  %v260_v23 = vsub.s32 0, %v129_v13  ;;  %v266_v24 = vsub.s32 0, %v131_v15  ;;  %v82_v25 = vadd.s32 168, %v1349_v4  ;;  %vm1145_vm2 = vmpackc.low %vm374_vm0, %vm372_vm15 }
  0x1a   :  { %1140 = vmatpush1.bf16.msk.msra.mxu0 %vm1139_vm12, %v1323_v40  ;;  %1200 = vmatpush1.bf16.msk.msra.mxu1 %vm1139_vm12, %v1323_v40  ;;  %vm376_vm1 = vcmp.le.s32.totalorder %v1041_v14, 2  ;;  %v1043_v26 = vmin.u32 %v245_v17, %v124_v63  ;;  %v1044_v27 = vmin.u32 %v251_v18, %v126_v7  ;;  %v83_v28 = vadd.s32 176, %v1349_v4 }
  0x1b   :  { %1141 = vmatprep.subr.bf16.mxu0 %v1322_v1  ;;  %1185 = vmatprep.subr.bf16.mxu1 %v1322_v1  ;;  %v84_v29 = vadd.s32 184, %v1349_v4  ;;  %vm378_vm3 = vcmp.le.s32.totalorder %v1042_v16, 2  ;;  %v272_v30 = vsub.s32 0, %v133_v19  ;;  %v278_v31 = vsub.s32 0, %v135_v20 }
  0x1c   :  { %v137_v32 = vsub.s32 %v81_v21, %v1399_v60  ;;  %vm383_vm4 = vcmp.le.s32.totalorder %v254_v22, 2  ;;  %v1045_v33 = vmin.u32 %v260_v23, %v129_v13  ;;  %v1046_v34 = vmin.u32 %v266_v24, %v131_v15  ;;  %vm1443_vm5 = vmpackc.low %vm378_vm3, %vm376_vm1 }
  0x1d   :  { %v139_v35 = vsub.s32 %v82_v25, %v1399_v60  ;;  %v1324_v36 = vmov 1.0   ;;  %v1325_v37 = vmov 0.0   ;;  %v128_v39 = vsub.s32 %v1408_v8, %v1351_v5 }
  0x1e   :  { %1143 = vmatpush1.bf16.msk.msra.mxu0 %vm1142_vm14, %v1323_v40  ;;  %1201 = vmatpush1.bf16.msk.msra.mxu1 %vm1142_vm14, %v1323_v40  ;;  %v1150_v38 = vpack.c.bf16 %v1324_v36, %v1325_v37  ;;  %vm380_vm6 = vcmp.le.s32.totalorder %v1043_v26, 2  ;;  %vm382_vm7 = vcmp.le.s32.totalorder %v1044_v27, 2  ;;  %v141_v42 = vsub.s32 %v83_v28, %v1399_v60  ;;  %v1515_v27 = vld [vmem:[%s2154_s0] sm:$0xff]  ;;  %v1520_v28 = vld [vmem:[%s2154_s0 + $0x70] sm:$0xff] }
  0x1f   :  { %1144 = vmatprep.subr.bf16.mxu0 %v1322_v1  ;;  %1186 = vmatprep.subr.bf16.mxu1 %v1322_v1  ;;  %v143_v43 = vsub.s32 %v84_v29, %v1399_v60  ;;  %vm1326_vm8 = vmmov 1   ;;  %v1047_v5 = vmin.u32 %v272_v30, %v133_v19  ;;  %v1048_v44 = vmin.u32 %v278_v31, %v135_v20  ;;  %vm1153_vm12 = vmpackc.low %vm382_vm7, %vm380_vm6  ;;  %v1527_v29 = vld [vmem:[%s2154_s0 + $0x18] sm:$0xff]  ;;  %v1532_v30 = vld [vmem:[%s2154_s0 + $0x88] sm:$0xff] }
  0x20   :  { %vm1151_vm9 = vmpackc.low %vm383_vm4, %vm1326_vm8  ;;  %v284_v45 = vsub.s32 0, %v137_v32  ;;  %v85_v46 = vadd.s32 192, %v1349_v4  ;;  %vm385_vm10 = vcmp.le.s32.totalorder %v1045_v33, 2  ;;  %vm387_vm11 = vcmp.le.s32.totalorder %v1046_v34, 2  ;;  %v1547_v34 = vld [vmem:[%s2154_s0 + $0x10] sm:$0xff] }
  0x21   :  { %v290_v47 = vsub.s32 0, %v139_v35  ;;  %v86_v48 = vadd.s32 200, %v1349_v4  ;;  %vm1461_vm13 = vcmp.le.s32.totalorder %v128_v39, 2  ;;  %v296_v50 = vsub.s32 0, %v141_v42  ;;  %vm1155_vm14 = vmpackc.low %vm387_vm11, %vm385_vm10 }
  0x22   :  { %1146 = vmatpush1.bf16.msk.msra.mxu0 %vm1145_vm2, %v1323_v40  ;;  %1202 = vmatpush1.bf16.msk.msra.mxu1 %vm1145_vm2, %v1323_v40  ;;  %v302_v51 = vsub.s32 0, %v143_v43  ;;  %vm389_vm15 = vcmp.le.s32.totalorder %v1047_v5, 2  ;;  %v145_v52 = vsub.s32 %v85_v46, %v1399_v60  ;;  %v87_v53 = vadd.s32 208, %v1349_v4  ;;  %vm1158_vm1 = vmpackc.low %vm1326_vm8, %vm1461_vm13  ;;  %v1585_v5 = vld [vmem:[%s2154_s0 + $0x38] sm:$0xff] }
  0x23   :  { %1147 = vmatprep.subr.bf16.mxu0 %v1322_v1  ;;  %1187 = vmatprep.subr.bf16.mxu1 %v1322_v1  ;;  %v88_v54 = vadd.s32 216, %v1349_v4  ;;  %vm391_vm0 = vcmp.le.s32.totalorder %v1048_v44, 2  ;;  %v1049_v55 = vmin.u32 %v284_v45, %v137_v32  ;;  %v1050_v56 = vmin.u32 %v290_v47, %v139_v35  ;;  %v1552_v35 = vld [vmem:[%s2154_s0 + $0x80] sm:$0xff]  ;;  %v1590_v44 = vld [vmem:[%s2154_s0 + $0xa8] sm:$0xff] }
  0x24   :  { %v147_v57 = vsub.s32 %v86_v48, %v1399_v60  ;;  %v1157_v58 = vpack.c.bf16 %v1325_v37, %v1324_v36  ;;  %v1051_v59 = vmin.u32 %v296_v50, %v141_v42  ;;  %v1052_v61 = vmin.u32 %v302_v51, %v143_v43  ;;  %vm1160_vm2 = vmpackc.low %vm391_vm0, %vm389_vm15  ;;  %v1562_v36 = vld [vmem:[%s2154_s0 + $0x98] sm:$0xff]  ;;  %v1575_v42 = vld [vmem:[%s2154_s0 + $0x20] sm:$0xff] }
  0x25   :  { %v308_v62 = vsub.s32 0, %v145_v52  ;;  %v149_v63 = vsub.s32 %v87_v53, %v1399_v60  ;;  %v151_v0 = vsub.s32 %v88_v54, %v1399_v60  ;;  %v89_v6 = vadd.s32 224, %v1349_v4  ;;  %v1580_v43 = vld [vmem:[%s2154_s0 + $0x90] sm:$0xff]  ;;  %v1608_v50 = vld [vmem:[%s2154_s0 + $0xa0] sm:$0xff]  ;;  %v1613_v51 = vld [vmem:[%s2154_s0 + $0x48] sm:$0xff] }
  0x26   :  { %1149 = vmatpush1.bf16.msk.msra.mxu0 %vm1443_vm5, %v1323_v40  ;;  %1203 = vmatpush1.bf16.msk.msra.mxu1 %vm1443_vm5, %v1323_v40  ;;  %vm393_vm3 = vcmp.le.s32.totalorder %v1049_v55, 2  ;;  %vm395_vm4 = vcmp.le.s32.totalorder %v1050_v56, 2  ;;  %v314_v7 = vsub.s32 0, %v147_v57  ;;  %v90_v8 = vadd.s32 232, %v1349_v4 }
  0x27   :  { %1152 = vmatprep.subr.msk.bf16.mxu0 %vm1151_vm9, %v1150_v38  ;;  %1188 = vmatprep.subr.msk.bf16.mxu1 %vm1151_vm9, %v1150_v38  ;;  %vm397_vm5 = vcmp.le.s32.totalorder %v1051_v59, 2  ;;  %vm399_vm6 = vcmp.le.s32.totalorder %v1052_v61, 2  ;;  %vm1163_vm7 = vmpackc.low %vm395_vm4, %vm393_vm3  ;;  %v1053_v9 = vmin.u32 %v308_v62, %v145_v52  ;;  %v320_v10 = vsub.s32 0, %v149_v63  ;;  %v1618_v52 = vld [vmem:[%s2154_s0 + $0xb8] sm:$0xff]  ;;  %v1646_v61 = vld [vmem:[%s2154_s0 + $0xc8] sm:$0xff] }
  0x28   :  { %v326_v11 = vsub.s32 0, %v151_v0  ;;  %v153_v12 = vsub.s32 %v89_v6, %v1399_v60  ;;  %v1054_v13 = vmin.u32 %v314_v7, %v147_v57  ;;  %v155_v14 = vsub.s32 %v90_v8, %v1399_v60  ;;  %vm1166_vm8 = vmpackc.low %vm399_vm6, %vm397_vm5  ;;  %v1631_v57 = vld [vmem:[%s2154_s0 + $0x40] sm:$0xff]  ;;  %v1641_v59 = vld [vmem:[%s2154_s0 + $0x58] sm:$0xff]  ;;  %2166 = vst [vmem:[#allocation3_spill] sm:$0xff] %v1646_v61 }
  0x29   :  { %v91_v15 = vadd.s32 240, %v1349_v4  ;;  %v92_v16 = vadd.s32 248, %v1349_v4  ;;  %vm401_vm9 = vcmp.le.s32.totalorder %v1053_v9, 2  ;;  %v1055_v17 = vmin.u32 %v320_v10, %v149_v63  ;;  %2165 = vst [vmem:[#allocation2_spill] sm:$0xff] %v1641_v59  ;;  %v1659_v7 = vld [vmem:[%s2154_s0 + $0x50] sm:$0xff]  ;;  %v1664_v8 = vld [vmem:[%s2154_s0 + $0xc0] sm:$0xff] }
  0x2a   :  { %1154 = vmatpush1.bf16.msk.msra.mxu0 %vm1153_vm12, %v1323_v40  ;;  %1204 = vmatpush1.bf16.msk.msra.mxu1 %vm1153_vm12, %v1323_v40  ;;  %v1056_v18 = vmin.u32 %v326_v11, %v151_v0  ;;  %v332_v19 = vsub.s32 0, %v153_v12  ;;  %vm403_vm10 = vcmp.le.s32.totalorder %v1054_v13, 2  ;;  %v338_v20 = vsub.s32 0, %v155_v14  ;;  %2167 = vst [vmem:[#allocation4_spill] sm:$0xff] %v1664_v8  ;;  %v1669_v9 = vld [vmem:[%s2154_s0 + $0x68] sm:$0xff]  ;;  %v1680_v13 = vld [vmem:[%s2154_s0 + $0x60] sm:$0xff] }
  0x2b   :  { %1156 = vmatprep.subr.msk.bf16.mxu0 %vm1155_vm14, %v1323_v40  ;;  %1189 = vmatprep.subr.msk.bf16.mxu1 %vm1155_vm14, %v1323_v40  ;;  %v157_v21 = vsub.s32 %v91_v15, %v1399_v60  ;;  %v159_v4 = vsub.s32 %v92_v16, %v1399_v60  ;;  %vm1169_vm11 = vmpackc.low %vm403_vm10, %vm401_vm9  ;;  %vm405_vm12 = vcmp.le.s32.totalorder %v1055_v17, 2  ;;  %v34_v31 = vmul.f32 %v1515_v27, %v1515_v27 }
  0x2c   :  { %vm407_vm13 = vcmp.le.s32.totalorder %v1056_v18, 2  ;;  %v1057_v22 = vmin.u32 %v332_v19, %v153_v12  ;;  %v1058_v23 = vmin.u32 %v338_v20, %v155_v14  ;;  %v48_v32 = vmul.f32 %v1520_v28, %v1520_v28  ;;  %2168 = vst [vmem:[#allocation5_spill] sm:$0xff] %v1669_v9  ;;  %2169 = vst [vmem:[#allocation6_spill] sm:$0xff] %v1680_v13 }
  0x2d   :  { %v344_v24 = vsub.s32 0, %v157_v21  ;;  %v350_v25 = vsub.s32 0, %v159_v4  ;;  %vm1172_vm14 = vmpackc.low %vm407_vm13, %vm405_vm12  ;;  %v51_v33 = vmul.f32 %v1532_v30, %v1532_v30  ;;  %v36_v37 = vmul.f32 %v1547_v34, %v1547_v34 }
  0x2e   :  { %1159 = vmatpush1.bf16.msk.msra.mxu0 %vm1158_vm1, %v1157_v58  ;;  %1205 = vmatpush1.bf16.msk.msra.mxu1 %vm1158_vm1, %v1157_v58  ;;  %vm409_vm15 = vcmp.le.s32.totalorder %v1057_v22, 2  ;;  %vm411_vm0 = vcmp.le.s32.totalorder %v1058_v23, 2  ;;  %v50_v38 = vmul.f32 %v1552_v35, %v1552_v35  ;;  %v53_v41 = vmul.f32 %v1562_v36, %v1562_v36  ;;  %v1636_v58 = vld [vmem:[%s2154_s0 + $0xb0] sm:$0xff] }
  0x2f   :  { %1161 = vmatprep.subr.msk.bf16.mxu0 %vm1160_vm2, %v1323_v40  ;;  %1190 = vmatprep.subr.msk.bf16.mxu1 %vm1160_vm2, %v1323_v40  ;;  %v1059_v60 = vmin.u32 %v344_v24, %v157_v21  ;;  %v1060_v26 = vmin.u32 %v350_v25, %v159_v4  ;;  %vm1175_vm1 = vmpackc.low %vm411_vm0, %vm409_vm15  ;;  %v38_v45 = vmul.f32 %v1575_v42, %v1575_v42 }
  0x30   :  { %v52_v46 = vmul.f32 %v1580_v43, %v1580_v43  ;;  %v41_v47 = vmul.f32 %v1585_v5, %v1585_v5  ;;  %v55_v48 = vmul.f32 %v1590_v44, %v1590_v44  ;;  %v40_v53 = vmul.f32 %v1603_v49, %v1603_v49 }
  0x31   :  { %vm413_vm2 = vcmp.le.s32.totalorder %v1059_v60, 2  ;;  %vm415_vm3 = vcmp.le.s32.totalorder %v1060_v26, 2  ;;  %v54_v54 = vmul.f32 %v1608_v50, %v1608_v50  ;;  %v43_v55 = vmul.f32 %v1613_v51, %v1613_v51 }
  0x32   :  { %1162 = vmatpush1.bf16.msra.mxu0 %v1322_v1  ;;  %1206 = vmatpush1.bf16.msra.mxu1 %v1322_v1  ;;  %vm1178_vm4 = vmpackc.low %vm415_vm3, %vm413_vm2  ;;  %v57_v56 = vmul.f32 %v1618_v52, %v1618_v52  ;;  %v42_v62 = vmul.f32 %v1631_v57, %v1631_v57  ;;  %v56_v63 = vmul.f32 %v1636_v58, %v1636_v58 }
  0x33   :  { %1164 = vmatprep.subr.msk.bf16.mxu0 %vm1163_vm7, %v1323_v40  ;;  %1191 = vmatprep.subr.msk.bf16.mxu1 %vm1163_vm7, %v1323_v40  ;;  %v45_v0 = vmul.f32 %v1641_v59, %v1641_v59  ;;  %v59_v6 = vmul.f32 %v1646_v61, %v1646_v61  ;;  %v44_v10 = vmul.f32 %v1659_v7, %v1659_v7 }
  0x34   :  { %v58_v11 = vmul.f32 %v1664_v8, %v1664_v8  ;;  %v47_v12 = vmul.f32 %v1669_v9, %v1669_v9  ;;  %v46_v14 = vmul.f32 %v1680_v13, %v1680_v13 }
  0x36   :  { %1165 = vmatpush1.bf16.msra.mxu0 %v1322_v1  ;;  %1207 = vmatpush1.bf16.msra.mxu1 %v1322_v1 }
  0x37   :  { %1167 = vmatprep.subr.msk.bf16.mxu0 %vm1166_vm8, %v1323_v40  ;;  %1192 = vmatprep.subr.msk.bf16.mxu1 %vm1166_vm8, %v1323_v40 }
  0x3a   :  { %1168 = vmatpush1.bf16.msra.mxu0 %v1322_v1  ;;  %1208 = vmatpush1.bf16.msra.mxu1 %v1322_v1 }
  0x3b   :  { %1170 = vmatprep.subr.msk.bf16.mxu0 %vm1169_vm11, %v1323_v40  ;;  %1193 = vmatprep.subr.msk.bf16.mxu1 %vm1169_vm11, %v1323_v40 }
  0x3e   :  { %1171 = vmatpush1.bf16.msra.mxu0 %v1322_v1  ;;  %1209 = vmatpush1.bf16.msra.mxu1 %v1322_v1 }
  0x3f   :  { %1173 = vmatprep.subr.msk.bf16.mxu0 %vm1172_vm14, %v1323_v40  ;;  %1194 = vmatprep.subr.msk.bf16.mxu1 %vm1172_vm14, %v1323_v40 }
  0x42   :  { %1174 = vmatpush1.bf16.msra.mxu0 %v1322_v1  ;;  %1210 = vmatpush1.bf16.msra.mxu1 %v1322_v1 }
  0x43   :  { %1176 = vmatprep.subr.msk.bf16.mxu0 %vm1175_vm1, %v1323_v40  ;;  %1195 = vmatprep.subr.msk.bf16.mxu1 %vm1175_vm1, %v1323_v40 }
  0x46   :  { %1177 = vmatpush1.bf16.msra.mxu0 %v1322_v1  ;;  %1211 = vmatpush1.bf16.msra.mxu1 %v1322_v1 }
  0x47   :  { %1179 = vmatprep.subr.msk.bf16.mxu0 %vm1178_vm4, %v1323_v40  ;;  %1196 = vmatprep.subr.msk.bf16.mxu1 %vm1178_vm4, %v1323_v40  ;;  %v37_v40 = vmul.f32 %v1527_v29, %v1527_v29 }
  0x4a   :  { %1180 = vmatpush1.bf16.msra.mxu0 %v1322_v1  ;;  %1212 = vmatpush1.bf16.msra.mxu1 %v1322_v1  ;;  %v1557_v1 = vld [vmem:[%s2154_s0 + $0x28] sm:$0xff] }
  0x4b   :  { %v39_v39 = vmul.f32 %v1557_v1, %v1557_v1 }
  0x4d   :  { %609 = vmatmul.mubr.f32.vlgmr.msra.gmra.mrb[0].mxu0 %v34_v31  ;;  %651 = vmatmul.mubr.f32.vlgmr.msra.gmra.mrb[0].mxu1 %v48_v32 }
  0x4e   :  { %614 = vmatprep.mubr.f32.mxu0 %v37_v40  ;;  %656 = vmatprep.mubr.f32.mxu1 %v51_v33 }
  0x51   :  { %615 = vmatmul.mubr.f32.gmra.mrb[2].mxu0 %v36_v37  ;;  %657 = vmatmul.mubr.f32.gmra.mrb[2].mxu1 %v50_v38 }
  0x52   :  { %620 = vmatprep.mubr.f32.mxu0 %v39_v39  ;;  %662 = vmatprep.mubr.f32.mxu1 %v53_v41 }
  0x55   :  { %621 = vmatmul.mubr.f32.gmra.mrb[4].mxu0 %v38_v45  ;;  %663 = vmatmul.mubr.f32.gmra.mrb[4].mxu1 %v52_v46 }
  0x56   :  { %626 = vmatprep.mubr.f32.mxu0 %v41_v47  ;;  %668 = vmatprep.mubr.f32.mxu1 %v55_v48 }
  0x59   :  { %627 = vmatmul.mubr.f32.gmra.mrb[6].mxu0 %v40_v53  ;;  %669 = vmatmul.mubr.f32.gmra.mrb[6].mxu1 %v54_v54 }
  0x5a   :  { %632 = vmatprep.mubr.f32.mxu0 %v43_v55  ;;  %674 = vmatprep.mubr.f32.mxu1 %v57_v56 }
  0x5d   :  { %633 = vmatmul.mubr.f32.gmra.mrb[8].mxu0 %v42_v62  ;;  %675 = vmatmul.mubr.f32.gmra.mrb[8].mxu1 %v56_v63 }
  0x5e   :  { %638 = vmatprep.mubr.f32.mxu0 %v45_v0  ;;  %680 = vmatprep.mubr.f32.mxu1 %v59_v6 }
  0x61   :  { %639 = vmatmul.mubr.f32.gmra.mrb[10].mxu0 %v44_v10  ;;  %681 = vmatmul.mubr.f32.gmra.mrb[10].mxu1 %v58_v11 }
  0x62   :  { %644 = vmatprep.mubr.f32.mxu0 %v47_v12 }
  0x65   :  { %645 = vmatmul.mubr.f32.gmra.mrb[12].mxu0 %v46_v14 }
 0x120   :  { %v610_v15 = vpop.f32.mrb[0].mxu0  ;;  %v652_v16 = vpop.f32.mrb[0].mxu1 }
 0x121   :  { %v687_v17 = vmul.f32 2e-05, %v610_v15  ;;  %v701_v18 = vmul.f32 2e-05, %v652_v16  ;;  %v612_v19 = vpop.f32.mrb[1].mxu0  ;;  %v654_v20 = vpop.f32.mrb[1].mxu1 }
 0x122   :  { %v688_v21 = vmul.f32 2e-05, %v612_v19  ;;  %v702_v4 = vmul.f32 2e-05, %v654_v20 }
 0x123   :  { %v713_v22 = vadd.f32 1.0, %v687_v17  ;;  %v727_v23 = vadd.f32 1.0, %v701_v18 }
 0x124   :  { %v714_v24 = vadd.f32 1.0, %v688_v21  ;;  %v728_v25 = vadd.f32 1.0, %v702_v4  ;;  %v616_v60 = vpop.f32.mrb[2].mxu0  ;;  %v658_v26 = vpop.f32.mrb[2].mxu1 }
 0x125   :  { %1218 = vrsqrt.f32 %v713_v22  ;;  %v689_v31 = vmul.f32 2e-05, %v616_v60  ;;  %v703_v32 = vmul.f32 2e-05, %v658_v26  ;;  %v618_v40 = vpop.f32.mrb[3].mxu0  ;;  %v660_v33 = vpop.f32.mrb[3].mxu1 }
 0x126   :  { %1220 = vrsqrt.f32 %v727_v23  ;;  %v690_v37 = vmul.f32 2e-05, %v618_v40  ;;  %v704_v38 = vmul.f32 2e-05, %v660_v33 }
 0x127   :  { %1222 = vrsqrt.f32 %v714_v24  ;;  %v715_v39 = vadd.f32 1.0, %v689_v31  ;;  %v729_v41 = vadd.f32 1.0, %v703_v32 }
 0x128   :  { %1224 = vrsqrt.f32 %v728_v25  ;;  %v716_v45 = vadd.f32 1.0, %v690_v37  ;;  %v730_v46 = vadd.f32 1.0, %v704_v38  ;;  %v622_v47 = vpop.f32.mrb[4].mxu0  ;;  %v664_v48 = vpop.f32.mrb[4].mxu1 }
 0x129   :  { %1226 = vrsqrt.f32 %v715_v39  ;;  %v691_v53 = vmul.f32 2e-05, %v622_v47  ;;  %v705_v54 = vmul.f32 2e-05, %v664_v48  ;;  %v624_v55 = vpop.f32.mrb[5].mxu0  ;;  %v666_v56 = vpop.f32.mrb[5].mxu1 }
 0x12a   :  { %1228 = vrsqrt.f32 %v729_v41  ;;  %v692_v62 = vmul.f32 2e-05, %v624_v55  ;;  %v706_v16 = vmul.f32 2e-05, %v666_v56 }
 0x12b   :  { %1230 = vrsqrt.f32 %v716_v45  ;;  %v717_v63 = vadd.f32 1.0, %v691_v53  ;;  %v731_v0 = vadd.f32 1.0, %v705_v54 }
 0x12c   :  { %1232 = vrsqrt.f32 %v730_v46  ;;  %v718_v6 = vadd.f32 1.0, %v692_v62  ;;  %v628_v10 = vpop.f32.mrb[6].mxu0  ;;  %v670_v11 = vpop.f32.mrb[6].mxu1  ;;  %v732_v60 = vadd.f32 1.0, %v706_v16 }
 0x12d   :  { %1234 = vrsqrt.f32 %v717_v63  ;;  %v630_v12 = vpop.f32.mrb[7].mxu0  ;;  %v672_v14 = vpop.f32.mrb[7].mxu1  ;;  %v693_v18 = vmul.f32 2e-05, %v628_v10  ;;  %v707_v19 = vmul.f32 2e-05, %v670_v11 }
 0x12e   :  { %1236 = vrsqrt.f32 %v731_v0  ;;  %v694_v26 = vmul.f32 2e-05, %v630_v12  ;;  %v708_v31 = vmul.f32 2e-05, %v672_v14 }
 0x12f   :  { %v1684_v15 = vpop.eup %1218  ;;  %1238 = vrsqrt.f32 %v718_v6  ;;  %v719_v40 = vadd.f32 1.0, %v693_v18  ;;  %v733_v33 = vadd.f32 1.0, %v707_v19 }
 0x130   :  { %v1686_v17 = vpop.eup %1220  ;;  %1240 = vrsqrt.f32 %v1684_v15  ;;  %v1689_v20 = vpop.f32.mrb[8].mxu0  ;;  %vm767_vm5 = vcmp.eq.f32.partialorder %v1684_v15, inf  ;;  %vm769_vm6 = vcmp.eq.f32.partialorder %v1684_v15, 0.0  ;;  %v770_v41 = vand.u32 2147483648, %v1684_v15 }
 0x131   :  { %v1691_v21 = vpop.f32.mrb[8].mxu1  ;;  %v1693_v4 = vpop.eup %1222  ;;  %1242 = vrsqrt.f32 %v1686_v17  ;;  %vm865_vm7 = vcmp.eq.f32.partialorder %v1686_v17, inf  ;;  %vm867_vm8 = vcmp.eq.f32.partialorder %v1686_v17, 0.0  ;;  %v868_v48 = vand.u32 2147483648, %v1686_v17 }
 0x132   :  { %v1696_v22 = vpop.f32.mrb[9].mxu0  ;;  %v1698_v23 = vpop.f32.mrb[9].mxu1  ;;  %1244 = vrsqrt.f32 %v1693_v4  ;;  %vm774_vm9 = vcmp.eq.f32.partialorder %v1693_v4, inf  ;;  %vm776_vm10 = vcmp.eq.f32.partialorder %v1693_v4, 0.0  ;;  %v777_v54 = vand.u32 2147483648, %v1693_v4 }
 0x133   :  { %v1700_v24 = vpop.eup %1224  ;;  %v720_v9 = vadd.f32 1.0, %v694_v26 }
 0x134   :  { %v1703_v25 = vpop.eup %1226  ;;  %1246 = vrsqrt.f32 %v1700_v24  ;;  %v1710_v37 = vpop.f32.mrb[10].mxu0  ;;  %vm872_vm11 = vcmp.eq.f32.partialorder %v1700_v24, inf  ;;  %vm874_vm12 = vcmp.eq.f32.partialorder %v1700_v24, 0.0  ;;  %v875_v56 = vand.u32 2147483648, %v1700_v24 }
 0x135   :  { %v1706_v32 = vpop.eup %1228  ;;  %1248 = vrsqrt.f32 %v1703_v25  ;;  %v1712_v38 = vpop.f32.mrb[10].mxu1  ;;  %vm781_vm13 = vcmp.eq.f32.partialorder %v1703_v25, inf  ;;  %vm783_vm14 = vcmp.eq.f32.partialorder %v1703_v25, 0.0  ;;  %v784_v0 = vand.u32 2147483648, %v1703_v25 }
 0x136   :  { %v1714_v39 = vpop.eup %1230  ;;  %1250 = vrsqrt.f32 %v1706_v32  ;;  %v1720_v45 = vpop.f32.mrb[11].mxu0  ;;  %vm879_vm15 = vcmp.eq.f32.partialorder %v1706_v32, inf  ;;  %vm881_vm0 = vcmp.eq.f32.partialorder %v1706_v32, 0.0  ;;  %v882_v11 = vand.u32 2147483648, %v1706_v32 }
 0x137   :  { %v1722_v46 = vpop.f32.mrb[11].mxu1  ;;  %v1724_v47 = vpop.eup %1232  ;;  %1252 = vrsqrt.f32 %v1714_v39  ;;  %vm788_vm1 = vcmp.eq.f32.partialorder %v1714_v39, inf }
 0x138   :  { %v1730_v53 = vpop.eup %1234  ;;  %1254 = vrsqrt.f32 %v1724_v47  ;;  %v1742_v62 = vpop.f32.mrb[12].mxu0 }
 0x139   :  { %v1736_v55 = vpop.eup %1236  ;;  %1256 = vrsqrt.f32 %v1730_v53  ;;  %v1750_v6 = vpop.f32.mrb[13].mxu0  ;;  %v798_v19 = vand.u32 2147483648, %v1730_v53  ;;  %vm795_vm4 = vcmp.eq.f32.partialorder %v1730_v53, inf  ;;  %vm797_vm2 = vcmp.eq.f32.partialorder %v1730_v53, 0.0 }
 0x13a   :  { %v1744_v63 = vpop.eup %1238  ;;  %1258 = vrsqrt.f32 %v1736_v55  ;;  %v896_v59 = vand.u32 2147483648, %v1736_v55  ;;  %vm893_vm3 = vcmp.eq.f32.partialorder %v1736_v55, inf }
 0x13b   :  { %v1241_v10 = vpop.eup %1240  ;;  %1260 = vrsqrt.f32 %v1744_v63  ;;  %v805_v12 = vand.u32 2147483648, %v1744_v63 }
 0x13c   :  { %v1243_v16 = vpop.eup %1242  ;;  %v766_v18 = vmul.f32 %v1241_v10, %v1684_v15  ;;  %1262 = vrsqrt.f32 %v732_v60  ;;  %v1770_v60 = vadd.f32 1.0, %v708_v31 }
 0x13d   :  { %v1245_v13 = vpop.eup %1244  ;;  %v864_v61 = vmul.f32 %v1243_v16, %v1686_v17  ;;  %1264 = vrsqrt.f32 %v719_v40 }
 0x13e   :  { %v1247_v14 = vpop.eup %1246  ;;  %v768_v8 = vsel %vm767_vm5, %v1684_v15, %v766_v18  ;;  %v773_v10 = vmul.f32 %v1245_v13, %v1693_v4  ;;  %1266 = vrsqrt.f32 %v733_v33  ;;  %vm888_vm5 = vcmp.eq.f32.partialorder %v1724_v47, 0.0 }
 0x13f   :  { %v1249_v26 = vpop.eup %1248  ;;  %v771_v40 = vsel %vm769_vm6, %v770_v41, %v768_v8  ;;  %v866_v16 = vsel %vm865_vm7, %v1686_v17, %v864_v61  ;;  %v871_v18 = vmul.f32 %v1247_v14, %v1700_v24  ;;  %1268 = vrsqrt.f32 %v720_v9 }
 0x140   :  { %v1251_v13 = vpop.eup %1250  ;;  %v947_v31 = vmul.f32 %v1684_v15, %v771_v40  ;;  %v869_v33 = vsel %vm867_vm8, %v868_v48, %v866_v16  ;;  %v775_v8 = vsel %vm774_vm9, %v1693_v4, %v773_v10  ;;  %v780_v61 = vmul.f32 %v1249_v26, %v1703_v25 }
 0x141   :  { %vm895_vm6 = vcmp.eq.f32.partialorder %v1736_v55, 0.0  ;;  %vm802_vm7 = vcmp.eq.f32.partialorder %v1744_v63, inf  ;;  %v1253_v41 = vpop.eup %1252  ;;  %v961_v14 = vmul.f32 %v1686_v17, %v869_v33  ;;  %v778_v9 = vsel %vm776_vm10, %v777_v54, %v775_v8 }
 0x142   :  { %v873_v15 = vsel %vm872_vm11, %v1700_v24, %v871_v18  ;;  %v878_v48 = vmul.f32 %v1251_v13, %v1706_v32  ;;  %vm804_vm8 = vcmp.eq.f32.partialorder %v1744_v63, 0.0  ;;  %v1255_v10 = vpop.eup %1254  ;;  %v973_v26 = vmul.f32 %v947_v31, %v1515_v27 }
 0x143   :  { %v948_v40 = vmul.f32 %v1693_v4, %v778_v9  ;;  %v876_v16 = vsel %vm874_vm12, %v875_v56, %v873_v15  ;;  %v782_v17 = vsel %vm781_vm13, %v1703_v25, %v780_v61  ;;  %v1257_v54 = vpop.eup %1256  ;;  %v987_v33 = vmul.f32 %v961_v14, %v1520_v28 }
 0x144   :  { %v962_v18 = vmul.f32 %v1700_v24, %v876_v16  ;;  %v785_v13 = vsel %vm783_vm14, %v784_v0, %v782_v17  ;;  %v880_v27 = vsel %vm879_vm15, %v1706_v32, %v878_v48  ;;  %v1259_v4 = vpop.eup %1258  ;;  %999 = vst [vmem:[%s2155_s1] sm:$0xff] %v973_v26  ;;  %v787_v24 = vmul.f32 %v1253_v41, %v1714_v39 }
 0x145   :  { %v974_v56 = vmul.f32 %v948_v40, %v1342_v2  ;;  %v949_v31 = vmul.f32 %v1703_v25, %v785_v13  ;;  %v883_v28 = vsel %vm881_vm0, %v882_v11, %v880_v27  ;;  %v1261_v8 = vpop.eup %1260  ;;  %1013 = vst [vmem:[%s2155_s1 + $0x70] sm:$0xff] %v987_v33  ;;  %v885_v14 = vmul.f32 %v1255_v10, %v1724_v47 }
 0x146   :  { %v988_v0 = vmul.f32 %v962_v18, %v1347_v3  ;;  %v963_v61 = vmul.f32 %v1706_v32, %v883_v28  ;;  %v794_v2 = vmul.f32 %v1257_v54, %v1730_v53  ;;  %v1827_v9 = vpop.eup %1262  ;;  %v789_v11 = vsel %vm788_vm1, %v1714_v39, %v787_v24 }
 0x147   :  { %1000 = vst [vmem:[%s2155_s1 + $0x8] sm:$0xff] %v974_v56  ;;  %v975_v25 = vmul.f32 %v949_v31, %v1547_v34  ;;  %v892_v3 = vmul.f32 %v1259_v4, %v1736_v55  ;;  %v801_v32 = vmul.f32 %v1261_v8, %v1744_v63  ;;  %v1838_v41 = vpop.eup %1264  ;;  %v2170_v48 = vand.u32 2147483648, %v1714_v39 }
 0x148   :  { %1014 = vst [vmem:[%s2155_s1 + $0x78] sm:$0xff] %v988_v0  ;;  %v989_v15 = vmul.f32 %v963_v61, %v1552_v35  ;;  %vm2171_vm9 = vcmp.eq.f32.partialorder %v1714_v39, 0.0  ;;  %vm2172_vm10 = vcmp.eq.f32.partialorder %v1724_v47, inf  ;;  %v796_v26 = vsel %vm795_vm4, %v1730_v53, %v794_v2  ;;  %v1854_v40 = vpop.eup %1266 }
 0x149   :  { %v792_v34 = vsel %vm2171_vm9, %v2170_v48, %v789_v11  ;;  %v887_v10 = vsel %vm2172_vm10, %v1724_v47, %v885_v14  ;;  %1001 = vst [vmem:[%s2155_s1 + $0x10] sm:$0xff] %v975_v25  ;;  %v2173_v16 = vand.u32 2147483648, %v1724_v47  ;;  %v799_v54 = vsel %vm797_vm2, %v798_v19, %v796_v26  ;;  %v1871_v18 = vpop.eup %1268 }
 0x14a   :  { %v950_v35 = vmul.f32 %v1714_v39, %v792_v34  ;;  %v894_v33 = vsel %vm893_vm3, %v1736_v55, %v892_v3  ;;  %1015 = vst [vmem:[%s2155_s1 + $0x80] sm:$0xff] %v989_v15  ;;  %v951_v13 = vmul.f32 %v1730_v53, %v799_v54  ;;  %v803_v19 = vsel %vm802_vm7, %v1744_v63, %v801_v32 }
 0x14b   :  { %v890_v17 = vsel %vm888_vm5, %v2173_v16, %v887_v10  ;;  %v897_v27 = vsel %vm895_vm6, %v896_v59, %v894_v33  ;;  %1270 = vrsqrt.f32 %v1827_v9  ;;  %v695_v28 = vmul.f32 2e-05, %v1689_v20 }
 0x14c   :  { %v964_v39 = vmul.f32 %v1724_v47, %v890_v17  ;;  %v976_v4 = vmul.f32 %v950_v35, %v1527_v29  ;;  %v965_v56 = vmul.f32 %v1736_v55, %v897_v27  ;;  %v806_v47 = vsel %vm804_vm8, %v805_v12, %v803_v19 }
 0x14d   :  { %v977_v31 = vmul.f32 %v951_v13, %v1575_v42  ;;  %v952_v59 = vmul.f32 %v1744_v63, %v806_v47  ;;  %1272 = vrsqrt.f32 %v1838_v41  ;;  %v709_v55 = vmul.f32 2e-05, %v1691_v21 }
 0x14e   :  { %v990_v53 = vmul.f32 %v964_v39, %v1532_v30  ;;  %1002 = vst [vmem:[%s2155_s1 + $0x18] sm:$0xff] %v976_v4  ;;  %v991_v29 = vmul.f32 %v965_v56, %v1580_v43  ;;  %v696_v12 = vmul.f32 2e-05, %v1696_v22  ;;  %1274 = vrsqrt.f32 %v1854_v40 }
 0x14f   :  { %1003 = vst [vmem:[%s2155_s1 + $0x20] sm:$0xff] %v977_v31  ;;  %v978_v30 = vmul.f32 %v952_v59, %v1557_v1  ;;  %vm900_vm11 = vcmp.eq.f32.partialorder %v1827_v9, inf  ;;  %vm902_vm12 = vcmp.eq.f32.partialorder %v1827_v9, 0.0  ;;  %1276 = vrsqrt.f32 %v1871_v18 }
 0x150   :  { %1016 = vst [vmem:[%s2155_s1 + $0x88] sm:$0xff] %v990_v53  ;;  %1017 = vst [vmem:[%s2155_s1 + $0x90] sm:$0xff] %v991_v29  ;;  %1278 = vrsqrt.f32 %v1770_v60  ;;  %v721_v42 = vadd.f32 1.0, %v695_v28  ;;  %v735_v1 = vadd.f32 1.0, %v709_v55  ;;  %v722_v43 = vadd.f32 1.0, %v696_v12 }
 0x151   :  { %1004 = vst [vmem:[%s2155_s1 + $0x28] sm:$0xff] %v978_v30  ;;  %v710_v20 = vmul.f32 2e-05, %v1698_v23  ;;  %v697_v21 = vmul.f32 2e-05, %v1710_v37  ;;  %v903_v2 = vand.u32 2147483648, %v1827_v9 }
 0x152   :  { %v711_v22 = vmul.f32 2e-05, %v1712_v38  ;;  %1280 = vrsqrt.f32 %v721_v42  ;;  %v698_v63 = vmul.f32 2e-05, %v1720_v45  ;;  %v712_v24 = vmul.f32 2e-05, %v1722_v46 }
 0x153   :  { %v699_v8 = vmul.f32 2e-05, %v1742_v62  ;;  %1282 = vrsqrt.f32 %v735_v1  ;;  %v736_v0 = vadd.f32 1.0, %v710_v20  ;;  %v723_v61 = vadd.f32 1.0, %v697_v21 }
 0x154   :  { %v737_v60 = vadd.f32 1.0, %v711_v22  ;;  %vm809_vm13 = vcmp.eq.f32.partialorder %v1838_v41, inf  ;;  %1284 = vrsqrt.f32 %v722_v43  ;;  %v724_v23 = vadd.f32 1.0, %v698_v63 }
 0x155   :  { %v1271_v14 = vpop.eup %1270  ;;  %vm811_vm14 = vcmp.eq.f32.partialorder %v1838_v41, 0.0  ;;  %1286 = vrsqrt.f32 %v736_v0  ;;  %v738_v38 = vadd.f32 1.0, %v712_v24  ;;  %v812_v46 = vand.u32 2147483648, %v1838_v41 }
 0x156   :  { %v899_v37 = vmul.f32 %v1271_v14, %v1827_v9  ;;  %vm907_vm15 = vcmp.eq.f32.partialorder %v1854_v40, inf  ;;  %1288 = vrsqrt.f32 %v723_v61  ;;  %v725_v62 = vadd.f32 1.0, %v699_v8 }
 0x157   :  { %v1273_v45 = vpop.eup %1272  ;;  %vm909_vm0 = vcmp.eq.f32.partialorder %v1854_v40, 0.0  ;;  %1290 = vrsqrt.f32 %v737_v60  ;;  %v910_v15 = vand.u32 2147483648, %v1854_v40  ;;  %vm816_vm1 = vcmp.eq.f32.partialorder %v1871_v18, inf }
 0x158   :  { %v901_v25 = vsel %vm900_vm11, %v1827_v9, %v899_v37  ;;  %v808_v11 = vmul.f32 %v1273_v45, %v1838_v41  ;;  %v1275_v3 = vpop.eup %1274  ;;  %1292 = vrsqrt.f32 %v724_v23  ;;  %v819_v54 = vand.u32 2147483648, %v1871_v18 }
 0x159   :  { %v904_v32 = vsel %vm902_vm12, %v903_v2, %v901_v25  ;;  %v1277_v48 = vpop.eup %1276  ;;  %v906_v26 = vmul.f32 %v1275_v3, %v1854_v40  ;;  %1294 = vrsqrt.f32 %v738_v38  ;;  %vm818_vm2 = vcmp.eq.f32.partialorder %v1871_v18, 0.0 }
 0x15a   :  { %v966_v34 = vmul.f32 %v1827_v9, %v904_v32  ;;  %v810_v10 = vsel %vm809_vm13, %v1838_v41, %v808_v11  ;;  %v1947_v35 = vpop.eup %1278  ;;  %v815_v17 = vmul.f32 %v1277_v48, %v1871_v18  ;;  %1296 = vrsqrt.f32 %v725_v62 }
 0x15b   :  { %v813_v16 = vsel %vm811_vm14, %v812_v46, %v810_v10  ;;  %v908_v39 = vsel %vm907_vm15, %v1854_v40, %v906_v26  ;;  %1298 = vrsqrt.f32 %v1947_v35  ;;  %v700_v31 = vmul.f32 2e-05, %v1750_v6 }
 0x15c   :  { %v992_v33 = vmul.f32 %v966_v34, %v1562_v36  ;;  %v953_v9 = vmul.f32 %v1838_v41, %v813_v16  ;;  %v1959_v13 = vpop.eup %1280  ;;  %v911_v27 = vsel %vm909_vm0, %v910_v15, %v908_v39  ;;  %v817_v19 = vsel %vm816_vm1, %v1871_v18, %v815_v17 }
 0x15d   :  { %v1967_v36 = vpop.eup %1282  ;;  %v967_v4 = vmul.f32 %v1854_v40, %v911_v27  ;;  %v820_v56 = vsel %vm818_vm2, %v819_v54, %v817_v19  ;;  %1300 = vrsqrt.f32 %v1959_v13  ;;  %vm914_vm3 = vcmp.eq.f32.partialorder %v1947_v35, inf }
 0x15e   :  { %1018 = vst [vmem:[%s2155_s1 + $0x98] sm:$0xff] %v992_v33  ;;  %v979_v41 = vmul.f32 %v953_v9, %v1603_v49  ;;  %v1974_v47 = vpop.eup %1284  ;;  %v954_v53 = vmul.f32 %v1871_v18, %v820_v56  ;;  %1302 = vrsqrt.f32 %v1967_v36  ;;  %vm916_vm4 = vcmp.eq.f32.partialorder %v1947_v35, 0.0 }
 0x15f   :  { %v1979_v59 = vpop.eup %1286  ;;  %v993_v28 = vmul.f32 %v967_v4, %v1608_v50  ;;  %1304 = vrsqrt.f32 %v1974_v47  ;;  %v917_v29 = vand.u32 2147483648, %v1947_v35  ;;  %vm823_vm5 = vcmp.eq.f32.partialorder %v1959_v13, inf }
 0x160   :  { %1005 = vst [vmem:[%s2155_s1 + $0x30] sm:$0xff] %v979_v41  ;;  %v1986_v49 = vpop.eup %1288  ;;  %v980_v40 = vmul.f32 %v954_v53, %v1585_v5  ;;  %1306 = vrsqrt.f32 %v1979_v59  ;;  %v726_v5 = vadd.f32 1.0, %v700_v31  ;;  %vm825_vm6 = vcmp.eq.f32.partialorder %v1959_v13, 0.0 }
 0x161   :  { %v1990_v18 = vpop.eup %1290  ;;  %1019 = vst [vmem:[%s2155_s1 + $0xa0] sm:$0xff] %v993_v28  ;;  %1308 = vrsqrt.f32 %v1986_v49  ;;  %v826_v12 = vand.u32 2147483648, %v1959_v13  ;;  %vm921_vm7 = vcmp.eq.f32.partialorder %v1967_v36, inf  ;;  %vm923_vm8 = vcmp.eq.f32.partialorder %v1967_v36, 0.0 }
 0x162   :  { %v1996_v6 = vpop.eup %1292  ;;  %1006 = vst [vmem:[%s2155_s1 + $0x38] sm:$0xff] %v980_v40  ;;  %1310 = vrsqrt.f32 %v1990_v18  ;;  %v924_v42 = vand.u32 2147483648, %v1967_v36  ;;  %vm830_vm9 = vcmp.eq.f32.partialorder %v1974_v47, inf  ;;  %vm832_vm10 = vcmp.eq.f32.partialorder %v1974_v47, 0.0 }
 0x163   :  { %v2004_v50 = vpop.eup %1294  ;;  %1312 = vrsqrt.f32 %v1996_v6  ;;  %v833_v43 = vand.u32 2147483648, %v1974_v47  ;;  %vm928_vm11 = vcmp.eq.f32.partialorder %v1979_v59, inf  ;;  %vm930_vm12 = vcmp.eq.f32.partialorder %v1979_v59, 0.0 }
 0x164   :  { %v2010_v55 = vpop.eup %1296  ;;  %1314 = vrsqrt.f32 %v2004_v50  ;;  %v931_v20 = vand.u32 2147483648, %v1979_v59  ;;  %vm837_vm13 = vcmp.eq.f32.partialorder %v1986_v49, inf  ;;  %vm839_vm14 = vcmp.eq.f32.partialorder %v1986_v49, 0.0 }
 0x165   :  { %v1299_v30 = vpop.eup %1298  ;;  %1316 = vrsqrt.f32 %v2010_v55  ;;  %v840_v63 = vand.u32 2147483648, %v1986_v49  ;;  %vm935_vm15 = vcmp.eq.f32.partialorder %v1990_v18, inf  ;;  %vm937_vm0 = vcmp.eq.f32.partialorder %v1990_v18, 0.0 }
 0x166   :  { %v913_v1 = vmul.f32 %v1299_v30, %v1947_v35  ;;  %1318 = vrsqrt.f32 %v726_v5  ;;  %v938_v61 = vand.u32 2147483648, %v1990_v18  ;;  %vm844_vm1 = vcmp.eq.f32.partialorder %v1996_v6, inf }
 0x167   :  { %v1301_v21 = vpop.eup %1300  ;;  %v847_v23 = vand.u32 2147483648, %v1996_v6  ;;  %vm846_vm2 = vcmp.eq.f32.partialorder %v1996_v6, 0.0  ;;  %v945_v46 = vand.u32 2147483648, %v2004_v50 }
 0x168   :  { %v915_v22 = vsel %vm914_vm3, %v1947_v35, %v913_v1  ;;  %v1303_v24 = vpop.eup %1302  ;;  %v822_v0 = vmul.f32 %v1301_v21, %v1959_v13  ;;  %vm853_vm3 = vcmp.eq.f32.partialorder %v2010_v55, 0.0 }
 0x169   :  { %v918_v8 = vsel %vm916_vm4, %v917_v29, %v915_v22  ;;  %v1305_v60 = vpop.eup %1304  ;;  %v920_v2 = vmul.f32 %v1303_v24, %v1967_v36  ;;  %vm851_vm4 = vcmp.eq.f32.partialorder %v2010_v55, inf  ;;  %v854_v29 = vand.u32 2147483648, %v2010_v55  ;;  %v2176_v22 = vld [vmem:[#allocation2_spill] sm:$0xff]  ;;  %v2177_v24 = vld [vmem:[#allocation3_spill] sm:$0xff] }
 0x16a   :  { %v968_v14 = vmul.f32 %v1947_v35, %v918_v8  ;;  %v1307_v37 = vpop.eup %1306  ;;  %v824_v38 = vsel %vm823_vm5, %v1959_v13, %v822_v0  ;;  %v829_v45 = vmul.f32 %v1305_v60, %v1974_v47  ;;  %vm944_vm5 = vcmp.eq.f32.partialorder %v2004_v50, 0.0  ;;  %v2178_v0 = vld [vmem:[#allocation6_spill] sm:$0xff] }
 0x16b   :  { %v1309_v62 = vpop.eup %1308  ;;  %v827_v11 = vsel %vm825_vm6, %v826_v12, %v824_v38  ;;  %v922_v3 = vsel %vm921_vm7, %v1967_v36, %v920_v2  ;;  %v927_v32 = vmul.f32 %v1307_v37, %v1979_v59  ;;  %vm2175_vm6 = vcmp.eq.f32.partialorder %v2004_v50, inf }
 0x16c   :  { %v994_v25 = vmul.f32 %v968_v14, %v1590_v44  ;;  %v1311_v15 = vpop.eup %1310  ;;  %v955_v48 = vmul.f32 %v1959_v13, %v827_v11  ;;  %v925_v34 = vsel %vm923_vm8, %v924_v42, %v922_v3  ;;  %v831_v44 = vsel %vm830_vm9, %v1974_v47, %v829_v45 }
 0x16d   :  { %v836_v10 = vmul.f32 %v1309_v62, %v1986_v49  ;;  %v1313_v26 = vpop.eup %1312  ;;  %v969_v35 = vmul.f32 %v1967_v36, %v925_v34  ;;  %v834_v16 = vsel %vm832_vm10, %v833_v43, %v831_v44  ;;  %v929_v17 = vsel %vm928_vm11, %v1979_v59, %v927_v32 }
 0x16e   :  { %1020 = vst [vmem:[%s2155_s1 + $0xa8] sm:$0xff] %v994_v25  ;;  %v934_v54 = vmul.f32 %v1311_v15, %v1990_v18  ;;  %v1315_v33 = vpop.eup %1314  ;;  %v981_v9 = vmul.f32 %v955_v48, %v1631_v57  ;;  %v956_v39 = vmul.f32 %v1974_v47, %v834_v16  ;;  %v932_v13 = vsel %vm930_vm12, %v931_v20, %v929_v17 }
 0x16f   :  { %v838_v27 = vsel %vm837_vm13, %v1986_v49, %v836_v10  ;;  %v995_v19 = vmul.f32 %v969_v35, %v1636_v58  ;;  %v970_v36 = vmul.f32 %v1979_v59, %v932_v13  ;;  %v1317_v4 = vpop.eup %1316  ;;  %v843_v53 = vmul.f32 %v1313_v26, %v1996_v6 }
 0x170   :  { %v841_v41 = vsel %vm839_vm14, %v840_v63, %v838_v27  ;;  %v936_v57 = vsel %vm935_vm15, %v1990_v18, %v934_v54  ;;  %1007 = vst [vmem:[%s2155_s1 + $0x40] sm:$0xff] %v981_v9  ;;  %v982_v56 = vmul.f32 %v956_v39, %v1613_v51  ;;  %v1319_v31 = vpop.eup %1318  ;;  %v941_v40 = vmul.f32 %v1315_v33, %v2004_v50 }
 0x171   :  { %v957_v47 = vmul.f32 %v1986_v49, %v841_v41  ;;  %v939_v58 = vsel %vm937_vm0, %v938_v61, %v936_v57  ;;  %1021 = vst [vmem:[%s2155_s1 + $0xb0] sm:$0xff] %v995_v19  ;;  %v996_v59 = vmul.f32 %v970_v36, %v1618_v52  ;;  %v850_v51 = vmul.f32 %v1317_v4, %v2010_v55  ;;  %v2174_v52 = vld [vmem:[#allocation4_spill] sm:$0xff] }
 0x172   :  { %v971_v28 = vmul.f32 %v1990_v18, %v939_v58  ;;  %1008 = vst [vmem:[%s2155_s1 + $0x48] sm:$0xff] %v982_v56  ;;  %v845_v5 = vsel %vm844_vm1, %v1996_v6, %v843_v53  ;;  %1320 = vrsqrt.f32 %v1319_v31  ;;  %vm858_vm7 = vcmp.eq.f32.partialorder %v1319_v31, inf }
 0x173   :  { %v983_v49 = vmul.f32 %v957_v47, %v1659_v7  ;;  %1022 = vst [vmem:[%s2155_s1 + $0xb8] sm:$0xff] %v996_v59  ;;  %v848_v12 = vsel %vm846_vm2, %v847_v23, %v845_v5  ;;  %v943_v7 = vsel %vm2175_vm6, %v2004_v50, %v941_v40  ;;  %v852_v30 = vsel %vm851_vm4, %v2010_v55, %v850_v51  ;;  %v2179_v23 = vld [vmem:[#allocation5_spill] sm:$0xff] }
 0x174   :  { %v997_v18 = vmul.f32 %v971_v28, %v2174_v52  ;;  %v958_v42 = vmul.f32 %v1996_v6, %v848_v12  ;;  %v946_v1 = vsel %vm944_vm5, %v945_v46, %v943_v7  ;;  %v855_v43 = vsel %vm853_vm3, %v854_v29, %v852_v30 }
 0x175   :  { %1009 = vst [vmem:[%s2155_s1 + $0x50] sm:$0xff] %v983_v49  ;;  %v972_v20 = vmul.f32 %v2004_v50, %v946_v1  ;;  %v959_v21 = vmul.f32 %v2010_v55, %v855_v43  ;;  %v861_v61 = vand.u32 2147483648, %v1319_v31  ;;  %vm860_vm8 = vcmp.eq.f32.partialorder %v1319_v31, 0.0 }
 0x176   :  { %1023 = vst [vmem:[%s2155_s1 + $0xc0] sm:$0xff] %v997_v18  ;;  %v984_v63 = vmul.f32 %v958_v42, %v2176_v22 }
 0x177   :  { %v998_v8 = vmul.f32 %v972_v20, %v2177_v24  ;;  %v985_v6 = vmul.f32 %v959_v21, %v2178_v0 }
 0x178   :  { %1010 = vst [vmem:[%s2155_s1 + $0x58] sm:$0xff] %v984_v63 }
 0x179   :  { %1024 = vst [vmem:[%s2155_s1 + $0xc8] sm:$0xff] %v998_v8  ;;  %1011 = vst [vmem:[%s2155_s1 + $0x60] sm:$0xff] %v985_v6 }
 0x17c   :  { %v1321_v50 = vpop.eup %1320 }
 0x17d   :  { %v857_v55 = vmul.f32 %v1321_v50, %v1319_v31 }
 0x17f   :  { %v859_v60 = vsel %vm858_vm7, %v1319_v31, %v857_v55 }
 0x180   :  { %v862_v14 = vsel %vm860_vm8, %v861_v61, %v859_v60 }
 0x181   :  { %v960_v2 = vmul.f32 %v1319_v31, %v862_v14 }
 0x183   :  { %v986_v37 = vmul.f32 %v960_v2, %v2179_v23 }
 0x185   :  { %1012 = vst [vmem:[%s2155_s1 + $0x68] sm:$0xff] %v986_v37 }

// kernel: _lambda_.13
= control target key start
LH: loop header
LB: loop body
LE: loop exit
PB: predicated region body
PF: predicated region fallthrough
CT: control target
= control target key end

     0   :  { %s423_s6 = smov 0   ;;  %s504_s0 = inlined_call_operand.vmem [shape: f32[2,7,7,256], index: 0, kind: input, shape index: {}]   ;;  %s505_s1 = inlined_call_operand.vmem [shape: f32[2,3,3,256], index: 1, kind: output, shape index: {}]  }
   0x1 LB: > { %s368_s7 = sadd.s32 4294967295, %s411_s6   ;;  %p372_p0 = scmp.ge.s32.totalorder %s411_s6, 1  ;;  %s411_s6 = sphi %s423_s6, %s11_s6  }
   0x2   : > { %p87_p1 = scmp.lt.s32.totalorder %s411_s6, 3 }
   0x4   : > { %p88_p2 = pnand %p372_p0, %p87_p1 }
   0x5   : > { %p107_p3 = scmp.lt.s32.totalorder (!%p88_p2), %s368_s7, 1  ;;  %vm129_vm0 = vcmask (!%p88_p2), 1042432   ;;  %vm144_vm1 = vcmask (!%p88_p2), 1044482   ;;  %vm159_vm2 = vcmask (!%p88_p2), 1046532   ;;  %vm174_vm3 = vcmask (!%p88_p2), 1040384  }
   0x6   : > { %91 = sbr.rel (%p88_p2) target bundleno = 69 (0x45), region = 24  ;;  %vm177_vm4 = vcmask (!%p88_p2), 1041408  }
   0xd   : > { %s507_s7 = smov (!%p107_p3, %s368_s7), 1 }
   0xe   : > { %s395_s8 = smul.u32 112, %s507_s7 }
   0xf   : > { %s396_s12 = smul.u32 24, %s507_s7 }
  0x10   : > { %s437_s11 = scalar_lea.vmem %s504_s0, %s395_s8 }
  0x11   : > { %v117_v0 = vld [vmem:[%s437_s11] sm:$0x7f]  ;;  %v118_v1 = vld [vmem:[%s437_s11 + $0x8] sm:$0x7f]  ;;  %v375_v2 = vld [vmem:[%s437_s11 + $0x10] sm:$0x7f]  ;;  %s475_s15 = scalar_lea.vmem %s505_s1, %s396_s12 }
  0x12   : > { %v376_v3 = vld [vmem:[%s437_s11 + $0x18] sm:$0x7f]  ;;  %v122_v4 = vmax.f32 %v117_v0, %v375_v2  ;;  %v377_v5 = vld [vmem:[%s437_s11 + $0x20] sm:$0x7f]  ;;  %v378_v6 = vld [vmem:[%s437_s11 + $0x28] sm:$0x7f] }
  0x13   : > { %v123_v7 = vmax.f32 %v118_v1, %v376_v3  ;;  %v379_v8 = vld [vmem:[%s437_s11 + $0x20] sm:$0x7f]  ;;  %v380_v9 = vld [vmem:[%s437_s11 + $0x28] sm:$0x7f]  ;;  %v381_v10 = vld [vmem:[%s437_s11 + $0x30] sm:$0x7f] }
  0x14   : > { %v127_v11 = vmax.f32 %v122_v4, %v377_v5  ;;  %v382_v12 = vld [vmem:[%s437_s11 + $0x38] sm:$0x7f]  ;;  %v190_v13 = vmax.f32 %v379_v8, %v381_v10  ;;  %v383_v14 = vld [vmem:[%s437_s11 + $0x40] sm:$0x7f]  ;;  %v384_v20 = vld [vmem:[%s437_s11 + $0x48] sm:$0x7f] }
  0x15   : > { %v128_v15 = vmax.f32 %v123_v7, %v378_v6  ;;  %v191_v16 = vmax.f32 %v380_v9, %v382_v12  ;;  %v386_v9 = vld [vmem:[%s437_s11 + $0x40] sm:$0x7f]  ;;  %v387_v10 = vld [vmem:[%s437_s11 + $0x48] sm:$0x7f] }
  0x16   : > { %v130_v17 = vsel %vm129_vm0, %v127_v11, -inf  ;;  %v145_v18 = vsel %vm144_vm1, %v127_v11, -inf  ;;  %v160_v19 = vsel %vm159_vm2, %v127_v11, -inf  ;;  %v454_v21 = vmax.f32 %v190_v13, %v383_v14 }
  0x17   : > { %v131_v22 = vrot.slane %v130_v17, 4  ;;  %v137_v23 = vsel %vm129_vm0, %v128_v15, -inf  ;;  %v146_v24 = vrot.slane %v145_v18, 4  ;;  %v152_v25 = vsel %vm144_vm1, %v128_v15, -inf }
  0x18   : > { %v138_v26 = vrot.slane %v137_v23, 4  ;;  %v153_v27 = vrot.slane %v152_v25, 4  ;;  %v161_v28 = vrot.slane %v160_v19, 4  ;;  %v167_v29 = vsel %vm159_vm2, %v128_v15, -inf  ;;  %v388_v15 = vld [vmem:[%s437_s11 + $0x50] sm:$0x7f] }
  0x19   : > { %v132_v30 = vmax.f32 %v130_v17, %v131_v22  ;;  %v147_v31 = vmax.f32 %v145_v18, %v146_v24  ;;  %v168_v32 = vrot.slane %v167_v29, 4  ;;  %v196_v33 = vmax.f32 %v191_v16, %v384_v20  ;;  %v389_v16 = vld [vmem:[%s437_s11 + $0x58] sm:$0x7f] }
  0x1a   : > { %v139_v34 = vmax.f32 %v137_v23, %v138_v26  ;;  %v154_v35 = vmax.f32 %v152_v25, %v153_v27  ;;  %v162_v36 = vmax.f32 %v160_v19, %v161_v28  ;;  %v197_v37 = vsel %vm129_vm0, %v454_v21, -inf  ;;  %v390_v26 = vld [vmem:[%s437_s11 + $0x60] sm:$0x7f]  ;;  %v391_v27 = vld [vmem:[%s437_s11 + $0x68] sm:$0x7f] }
  0x1b   : > { %v133_v38 = vrot.slane %v132_v30, 2  ;;  %v148_v39 = vrot.slane %v147_v31, 2  ;;  %v169_v40 = vmax.f32 %v167_v29, %v168_v32  ;;  %v198_v41 = vrot.slane %v197_v37, 4 }
  0x1c   : > { %v140_v42 = vrot.slane %v139_v34, 2  ;;  %v155_v43 = vrot.slane %v154_v35, 2  ;;  %v163_v44 = vrot.slane %v162_v36, 2  ;;  %v204_v45 = vsel %vm129_vm0, %v196_v33, -inf }
  0x1d   : > { %v134_v46 = vmax.f32 %v132_v30, %v133_v38  ;;  %v149_v47 = vmax.f32 %v147_v31, %v148_v39  ;;  %v170_v48 = vrot.slane %v169_v40, 2  ;;  %v199_v49 = vmax.f32 %v197_v37, %v198_v41 }
  0x1e   : > { %v141_v50 = vmax.f32 %v139_v34, %v140_v42  ;;  %v156_v51 = vmax.f32 %v154_v35, %v155_v43  ;;  %v164_v52 = vmax.f32 %v162_v36, %v163_v44  ;;  %v205_v53 = vrot.slane %v204_v45, 4 }
  0x1f   : > { %v135_v54 = vrot.slane %v134_v46, 1  ;;  %v150_v55 = vrot.slane %v149_v47, 1  ;;  %v171_v56 = vmax.f32 %v169_v40, %v170_v48  ;;  %v200_v57 = vrot.slane %v199_v49, 2 }
  0x20   : > { %v142_v58 = vrot.slane %v141_v50, 1  ;;  %v157_v59 = vrot.slane %v156_v51, 1  ;;  %v165_v60 = vrot.slane %v164_v52, 1  ;;  %v206_v61 = vmax.f32 %v204_v45, %v205_v53 }
  0x21   : > { %v136_v62 = vmax.f32 %v134_v46, %v135_v54  ;;  %v151_v63 = vmax.f32 %v149_v47, %v150_v55  ;;  %v172_v0 = vrot.slane %v171_v56, 1  ;;  %v201_v1 = vmax.f32 %v199_v49, %v200_v57 }
  0x22   : > { %v143_v2 = vmax.f32 %v141_v50, %v142_v58  ;;  %v158_v3 = vmax.f32 %v156_v51, %v157_v59  ;;  %v166_v4 = vmax.f32 %v164_v52, %v165_v60  ;;  %v207_v5 = vrot.slane %v206_v61, 2 }
  0x23   : > { %v173_v6 = vmax.f32 %v171_v56, %v172_v0  ;;  %v175_v7 = vsel %vm174_vm3, %v136_v62, %v151_v63  ;;  %v211_v8 = vsel %vm144_vm1, %v454_v21, -inf  ;;  %v202_v18 = vrot.slane %v201_v1, 1 }
  0x24   : > { %v176_v11 = vsel %vm174_vm3, %v143_v2, %v158_v3  ;;  %v178_v12 = vsel %vm177_vm4, %v175_v7, %v166_v4  ;;  %v208_v13 = vmax.f32 %v206_v61, %v207_v5  ;;  %v212_v14 = vrot.slane %v211_v8, 4 }
  0x25   : > { %v179_v17 = vsel %vm177_vm4, %v176_v11, %v173_v6  ;;  %v218_v19 = vsel %vm144_vm1, %v196_v33, -inf  ;;  %v225_v20 = vsel %vm159_vm2, %v454_v21, -inf  ;;  %v232_v29 = vsel %vm159_vm2, %v196_v33, -inf }
  0x26   : > { %v182_v22 = vcombine.low %v178_v12, %v179_v17  ;;  %v209_v23 = vrot.slane %v208_v13, 1  ;;  %v213_v24 = vmax.f32 %v211_v8, %v212_v14  ;;  %v219_v25 = vrot.slane %v218_v19, 4 }
  0x27   : > { %v226_v28 = vrot.slane %v225_v20, 4  ;;  %v254_v30 = vmax.f32 %v386_v9, %v388_v15  ;;  %v255_v31 = vmax.f32 %v387_v10, %v389_v16  ;;  %v233_v35 = vrot.slane %v232_v29, 4 }
  0x28   : > { %184 = vst [vmem:[%s475_s15] sm:$0x77] %v182_v22  ;;  %v214_v32 = vrot.slane %v213_v24, 2  ;;  %v220_v34 = vmax.f32 %v218_v19, %v219_v25  ;;  %v203_v36 = vmax.f32 %v201_v1, %v202_v18  ;;  %v210_v21 = vmax.f32 %v208_v13, %v209_v23 }
  0x29   : > { %v227_v37 = vmax.f32 %v225_v20, %v226_v28  ;;  %v259_v38 = vmax.f32 %v254_v30, %v390_v26  ;;  %v260_v39 = vmax.f32 %v255_v31, %v391_v27  ;;  %v234_v42 = vmax.f32 %v232_v29, %v233_v35 }
  0x2a   : > { %v215_v40 = vmax.f32 %v213_v24, %v214_v32  ;;  %v221_v41 = vrot.slane %v220_v34, 2 }
  0x2b   : > { %v228_v43 = vrot.slane %v227_v37, 2  ;;  %v261_v44 = vsel %vm129_vm0, %v259_v38, -inf  ;;  %v268_v45 = vsel %vm129_vm0, %v260_v39, -inf  ;;  %v275_v33 = vsel %vm144_vm1, %v259_v38, -inf }
  0x2c   : > { %v216_v46 = vrot.slane %v215_v40, 1  ;;  %v222_v47 = vmax.f32 %v220_v34, %v221_v41  ;;  %v235_v48 = vrot.slane %v234_v42, 2  ;;  %v262_v49 = vrot.slane %v261_v44, 4 }
  0x2d   : > { %v229_v50 = vmax.f32 %v227_v37, %v228_v43  ;;  %v269_v51 = vrot.slane %v268_v45, 4  ;;  %v276_v52 = vrot.slane %v275_v33, 4  ;;  %v282_v53 = vsel %vm144_vm1, %v260_v39, -inf }
  0x2e   : > { %v217_v54 = vmax.f32 %v215_v40, %v216_v46  ;;  %v223_v55 = vrot.slane %v222_v47, 1  ;;  %v236_v56 = vmax.f32 %v234_v42, %v235_v48  ;;  %v263_v57 = vmax.f32 %v261_v44, %v262_v49 }
  0x2f   : > { %v230_v58 = vrot.slane %v229_v50, 1  ;;  %v270_v59 = vmax.f32 %v268_v45, %v269_v51  ;;  %v277_v60 = vmax.f32 %v275_v33, %v276_v52  ;;  %v283_v61 = vrot.slane %v282_v53, 4 }
  0x30   : > { %v224_v62 = vmax.f32 %v222_v47, %v223_v55  ;;  %v237_v63 = vrot.slane %v236_v56, 1  ;;  %v239_v0 = vsel %vm174_vm3, %v203_v36, %v217_v54  ;;  %v264_v1 = vrot.slane %v263_v57, 2 }
  0x31   : > { %v231_v2 = vmax.f32 %v229_v50, %v230_v58  ;;  %v271_v3 = vrot.slane %v270_v59, 2  ;;  %v278_v4 = vrot.slane %v277_v60, 2  ;;  %v284_v5 = vmax.f32 %v282_v53, %v283_v61 }
  0x32   : > { %v238_v6 = vmax.f32 %v236_v56, %v237_v63  ;;  %v240_v7 = vsel %vm174_vm3, %v210_v21, %v224_v62  ;;  %v265_v8 = vmax.f32 %v263_v57, %v264_v1  ;;  %v289_v9 = vsel %vm159_vm2, %v259_v38, -inf }
  0x33   : > { %v241_v10 = vsel %vm177_vm4, %v239_v0, %v231_v2  ;;  %v272_v11 = vmax.f32 %v270_v59, %v271_v3  ;;  %v279_v12 = vmax.f32 %v277_v60, %v278_v4  ;;  %v285_v13 = vrot.slane %v284_v5, 2 }
  0x34   : > { %v242_v14 = vsel %vm177_vm4, %v240_v7, %v238_v6  ;;  %v290_v15 = vrot.slane %v289_v9, 4  ;;  %v296_v16 = vsel %vm159_vm2, %v260_v39, -inf  ;;  %v266_v18 = vrot.slane %v265_v8, 1 }
  0x35   : > { %v245_v17 = vcombine.low %v241_v10, %v242_v14  ;;  %v280_v19 = vrot.slane %v279_v12, 1  ;;  %v286_v20 = vmax.f32 %v284_v5, %v285_v13  ;;  %v297_v23 = vrot.slane %v296_v16, 4 }
  0x36   : > { %v291_v22 = vmax.f32 %v289_v9, %v290_v15  ;;  %v273_v24 = vrot.slane %v272_v11, 1  ;;  %v267_v28 = vmax.f32 %v265_v8, %v266_v18 }
  0x37   : > { %385 = vst [vmem:[%s475_s15 + $0x8] sm:$0x77] %v245_v17  ;;  %v287_v25 = vrot.slane %v286_v20, 1  ;;  %v298_v27 = vmax.f32 %v296_v16, %v297_v23  ;;  %v281_v29 = vmax.f32 %v279_v12, %v280_v19 }
  0x38   : > { %v292_v26 = vrot.slane %v291_v22, 2  ;;  %v274_v32 = vmax.f32 %v272_v11, %v273_v24 }
  0x39   : > { %v299_v31 = vrot.slane %v298_v27, 2  ;;  %v288_v34 = vmax.f32 %v286_v20, %v287_v25  ;;  %v303_v37 = vsel %vm174_vm3, %v267_v28, %v281_v29 }
  0x3a   : > { %v293_v30 = vmax.f32 %v291_v22, %v292_v26 }
  0x3b   : > { %v300_v36 = vmax.f32 %v298_v27, %v299_v31  ;;  %v304_v21 = vsel %vm174_vm3, %v274_v32, %v288_v34 }
  0x3c   : > { %v294_v35 = vrot.slane %v293_v30, 1 }
  0x3d   : > { %v301_v39 = vrot.slane %v300_v36, 1 }
  0x3e   : > { %v295_v38 = vmax.f32 %v293_v30, %v294_v35 }
  0x3f   : > { %v302_v40 = vmax.f32 %v300_v36, %v301_v39 }
  0x40   : > { %v305_v41 = vsel %vm177_vm4, %v303_v37, %v295_v38 }
  0x41   : > { %v306_v42 = vsel %vm177_vm4, %v304_v21, %v302_v40 }
  0x42   : > { %v309_v43 = vcombine.low %v305_v41, %v306_v42 }
  0x44   : > { %392 = vst [vmem:[%s475_s15 + $0x10] sm:$0x77] %v309_v43 }
  0x45 PF: > { %s11_s6 = sadd.s32 1, %s411_s6  }
  0x46   : > { %p8_p4 = scmp.ge.s32.totalorder %s11_s6, 4  }
  0x48   :  { %10 = sbr.rel (!%p8_p4) target bundleno = 1 (0x1), region = 62 }

// kernel: _lambda_.14
= control target key start
LH: loop header
LB: loop body
LE: loop exit
PB: predicated region body
PF: predicated region fallthrough
CT: control target
= control target key end

     0   :  { %s2445_s12 = smov 0   ;;  %s2447_s13 = smov 0   ;;  %s2735_s0 = inlined_call_operand.vmem [shape: bf16[1,24,2304], index: 0, kind: input, shape index: {}]   ;;  %s2736_s1 = inlined_call_operand.vmem [shape: bf16[1,2304,384], index: 1, kind: input, shape index: {}]   ;;  %s2737_s2 = inlined_call_operand.vmem [shape: f32[1,1,384], index: 2, kind: input, shape index: {}]   ;;  %s2738_s3 = inlined_call_operand.vmem [shape: f32[1,24,384], index: 3, kind: output, shape index: {}]  }
   0x1   :  { %s2449_s14 = smov 0   ;;  %s2451_s15 = smov 0  }
   0x2   :  { %s2453_s16 = smov 0  }
   0x3 LB: > { %s25_s17 = sadd.s32 1, %s2418_s15  ;;  %p50_p1 = scmp.ne.s32.totalorder %s2410_s13, %s2406_s12  ;;  %s2422_s16 = sphi %s2453_s16, %s13_s16   ;;  %s2418_s15 = sphi %s2451_s15, %s2742_s15   ;;  %s2414_s14 = sphi %s2449_s14, %s2741_s14   ;;  %s2410_s13 = sphi %s2447_s13, %s2740_s13   ;;  %s2406_s12 = sphi %s2445_s12, %s2739_s12  }
   0x4   : > { %p26_p0 = scmp.ge.s32.totalorder %s25_s17, 3  ;;  %p51_p2 = scmp.eq.s32.totalorder %s2422_s16, 0 }
   0x5   : > { %s43_s19 = sadd.s32 1, %s2410_s13  ;;  %p1858_p5 = scmp.ge.s32.totalorder %s2422_s16, 3 }
   0x6   : > { %s2744_s17 = smov (%p26_p0, %s25_s17), 0  ;;  %p52_p3 = por %p51_p2, %p50_p1 }
   0x7   : > { %s39_s18 = ssub.s32 %s2418_s15, %s2744_s17  ;;  %165 = sbr.rel (%p1858_p5) target bundleno = 24 (0x18), region = 20 }
   0x8   : > { %p41_p4 = scmp.eq.s32.totalorder %s39_s18, 0 }
   0xa   : > { %s2480_s20 = scalar_select %p41_p4, %s2410_s13, %s43_s19  }
   0xe   : > { %168 = sbr.rel (!%p52_p3) target bundleno = 24 (0x18), region = 24  ;;  %s170_s21 = sand.u32 (%p52_p3), 1, %s2410_s13  }
   0xf   : > { %s2024_s22 = smul.u32 (%p52_p3), 24, %s2418_s15 }
  0x10   : > { %s2133_s23 = smul.u32 (%p52_p3), 72, %s170_s21 }
  0x11   : > { %s180_s26 = scalar_lea.vmem (%p52_p3), %s2735_s0, %s2024_s22 }
  0x12   : > { %v193_v0 = vld [vmem:[%s180_s26] sm:$0xff] (%p52_p3)  ;;  %v195_v1 = vld [vmem:[%s180_s26 + $0x8] sm:$0xff] (%p52_p3)  ;;  %v197_v2 = vld [vmem:[%s180_s26 + $0x10] sm:$0xff] (%p52_p3)  ;;  %s172_s27 = scalar_lea.vmem (%p52_p3), [#allocation3], %s2133_s23 }
  0x13   : > { %194 = vst [vmem:[%s172_s27] sm:$0xff] (%p52_p3), %v193_v0  ;;  %196 = vst [vmem:[%s172_s27 + $0x8] sm:$0xff] (%p52_p3), %v195_v1  ;;  %v199_v3 = vld [vmem:[%s180_s26 + $0x48] sm:$0xff] (%p52_p3)  ;;  %v201_v4 = vld [vmem:[%s180_s26 + $0x50] sm:$0xff] (%p52_p3) }
  0x14   : > { %198 = vst [vmem:[%s172_s27 + $0x10] sm:$0xff] (%p52_p3), %v197_v2  ;;  %v203_v5 = vld [vmem:[%s180_s26 + $0x58] sm:$0xff] (%p52_p3)  ;;  %200 = vst [vmem:[%s172_s27 + $0x18] sm:$0xff] (%p52_p3), %v199_v3  ;;  %v205_v6 = vld [vmem:[%s180_s26 + $0x90] sm:$0xff] (%p52_p3) }
  0x15   : > { %202 = vst [vmem:[%s172_s27 + $0x20] sm:$0xff] %v201_v4  ;;  %204 = vst [vmem:[%s172_s27 + $0x28] sm:$0xff] %v203_v5  ;;  %v207_v7 = vld [vmem:[%s180_s26 + $0x98] sm:$0xff]  ;;  %v209_v8 = vld [vmem:[%s180_s26 + $0xa0] sm:$0xff] }
  0x16   : > { %206 = vst [vmem:[%s172_s27 + $0x30] sm:$0xff] %v205_v6  ;;  %208 = vst [vmem:[%s172_s27 + $0x38] sm:$0xff] %v207_v7 }
  0x17   : > { %210 = vst [vmem:[%s172_s27 + $0x40] sm:$0xff] %v209_v8 }
  0x18 PF: > { %p1860_p6 = scmp.ge.s32.totalorder %s2422_s16, 1  ;;  %p229_p7 = scmp.lt.s32.totalorder %s2422_s16, 4 }
  0x1a   : > { %p230_p8 = pnand %p1860_p6, %p229_p7 }
  0x1b   : > { %s236_s28 = sand.u32 (!%p230_p8), 1, %s2406_s12   ;;  %s280_s29 = smul.u32 (!%p230_p8), 96, %s2414_s14 }
  0x1c   : > { %233 = sbr.rel (%p230_p8) target bundleno = 438 (0x1b6), region = 51  ;;  %p1862_p10 = scmp.ne.s32.totalorder (!%p230_p8), %s2414_s14, 0 }
  0x1d   : > { %s2134_s30 = smul.u32 (!%p230_p8), 72, %s236_s28  ;;  %p283_p9 = scmp.lt.s32.totalorder (!%p230_p8), %s280_s29, 287 }
  0x1f   : > { %s2497_s8 = scalar_lea.vmem (!%p230_p8), [#allocation3], %s2134_s30 }
  0x23   : > { %s2746_s29 = smov (!%p283_p9, %s280_s29), 287  ;;  %310 = sbr.rel (%p1862_p10) target bundleno = 42 (0x2a), region = 59 }
  0x24   : > { %s2135_s4 = smul.u32 12, %s2746_s29  ;;  %v2424_v9 = vmov (!%p1862_p10), 0.0  }
  0x25   : > { %311 = vst [vmem:[#allocation2] sm:$0xff] (!%p1862_p10), %v2424_v9  ;;  %312 = vst [vmem:[#allocation2 + $0x8] sm:$0xff] (!%p1862_p10), %v2424_v9 }
  0x26   : > { %s2495_s7 = scalar_lea.vmem %s2736_s1, %s2135_s4  ;;  %313 = vst [vmem:[#allocation2 + $0x10] sm:$0xff] (!%p1862_p10), %v2424_v9  ;;  %314 = vst [vmem:[#allocation2 + $0x18] sm:$0xff] (!%p1862_p10), %v2424_v9 }
  0x27   : > { %315 = vst [vmem:[#allocation2 + $0x20] sm:$0xff] (!%p1862_p10), %v2424_v9  ;;  %316 = vst [vmem:[#allocation2 + $0x28] sm:$0xff] (!%p1862_p10), %v2424_v9 }
  0x28   : > { %317 = vst [vmem:[#allocation2 + $0x30] sm:$0xff] (!%p1862_p10), %v2424_v9  ;;  %318 = vst [vmem:[#allocation2 + $0x38] sm:$0xff] (!%p1862_p10), %v2424_v9 }
  0x29   : > { %319 = vst [vmem:[#allocation2 + $0x40] sm:$0xff] (!%p1862_p10), %v2424_v9 }
  0x2a PF: > { %v2177_v10 = vld [vmem:[%s2495_s7 + $0x4] ss:$12 sps:$4 sm:$0xff]   ;;  %v2181_v12 = vld [vmem:[%s2495_s7] ss:$12 sps:$4 sm:$0xff]   ;;  %v2183_v14 = vld [vmem:[%s2495_s7 + $0x1c] ss:$12 sps:$4 sm:$0xff]  }
  0x2b   : > { %v2179_v11 = vld [vmem:[%s2495_s7 + $0x184] ss:$12 sps:$4 sm:$0xff]   ;;  %1349 = vmatprep.subr.bf16.mxu1 %v2177_v10  ;;  %v2182_v13 = vld [vmem:[%s2495_s7 + $0x180] ss:$12 sps:$4 sm:$0xff]   ;;  %v2185_v15 = vld [vmem:[%s2495_s7 + $0x19c] ss:$12 sps:$4 sm:$0xff]  }
  0x2c   : > { %1400 = vmatprep.subr.bf16.mxu0 %v2179_v11  ;;  %1350 = vmatpush1.bf16.msra.mxu1 %v2181_v12  ;;  %v2187_v16 = vld [vmem:[%s2495_s7 + $0x18] ss:$12 sps:$4 sm:$0xff]   ;;  %v2189_v18 = vld [vmem:[%s2495_s7 + $0x34] ss:$12 sps:$4 sm:$0xff]   ;;  %v2193_v20 = vld [vmem:[%s2495_s7 + $0x30] ss:$12 sps:$4 sm:$0xff]  }
  0x2d   : > { %1401 = vmatpush1.bf16.msra.mxu0 %v2182_v13  ;;  %1351 = vmatprep.subr.bf16.mxu1 %v2183_v14  ;;  %v2188_v17 = vld [vmem:[%s2495_s7 + $0x198] ss:$12 sps:$4 sm:$0xff]   ;;  %v2191_v19 = vld [vmem:[%s2495_s7 + $0x1b4] ss:$12 sps:$4 sm:$0xff]   ;;  %v2194_v21 = vld [vmem:[%s2495_s7 + $0x1b0] ss:$12 sps:$4 sm:$0xff]  }
  0x2e   : > { %1402 = vmatprep.subr.bf16.mxu0 %v2185_v15  ;;  %v2195_v22 = vld [vmem:[%s2495_s7 + $0x4c] ss:$12 sps:$4 sm:$0xff]   ;;  %v2199_v24 = vld [vmem:[%s2495_s7 + $0x48] ss:$12 sps:$4 sm:$0xff]   ;;  %v2201_v26 = vld [vmem:[%s2495_s7 + $0x64] ss:$12 sps:$4 sm:$0xff]  }
  0x2f   : > { %v2197_v23 = vld [vmem:[%s2495_s7 + $0x1cc] ss:$12 sps:$4 sm:$0xff]   ;;  %v2200_v25 = vld [vmem:[%s2495_s7 + $0x1c8] ss:$12 sps:$4 sm:$0xff]   ;;  %v2203_v27 = vld [vmem:[%s2495_s7 + $0x1e4] ss:$12 sps:$4 sm:$0xff]  }
  0x30   : > { %1352 = vmatpush1.bf16.msra.mxu1 %v2187_v16  ;;  %v2205_v28 = vld [vmem:[%s2495_s7 + $0x60] ss:$12 sps:$4 sm:$0xff]   ;;  %v2207_v30 = vld [vmem:[%s2495_s7 + $0x7c] ss:$12 sps:$4 sm:$0xff]   ;;  %v2211_v32 = vld [vmem:[%s2495_s7 + $0x78] ss:$12 sps:$4 sm:$0xff]  }
  0x31   : > { %1403 = vmatpush1.bf16.msra.mxu0 %v2188_v17  ;;  %1353 = vmatprep.subr.bf16.mxu1 %v2189_v18  ;;  %v2206_v29 = vld [vmem:[%s2495_s7 + $0x1e0] ss:$12 sps:$4 sm:$0xff]   ;;  %v2209_v31 = vld [vmem:[%s2495_s7 + $0x1fc] ss:$12 sps:$4 sm:$0xff]   ;;  %v2212_v33 = vld [vmem:[%s2495_s7 + $0x1f8] ss:$12 sps:$4 sm:$0xff]  }
  0x32   : > { %1404 = vmatprep.subr.bf16.mxu0 %v2191_v19  ;;  %v2213_v34 = vld [vmem:[%s2495_s7 + $0x94] ss:$12 sps:$4 sm:$0xff]   ;;  %v2217_v36 = vld [vmem:[%s2495_s7 + $0x90] ss:$12 sps:$4 sm:$0xff]   ;;  %v2219_v38 = vld [vmem:[%s2495_s7 + $0xac] ss:$12 sps:$4 sm:$0xff]  }
  0x33   : > { %v2215_v35 = vld [vmem:[%s2495_s7 + $0x214] ss:$12 sps:$4 sm:$0xff]   ;;  %v2218_v37 = vld [vmem:[%s2495_s7 + $0x210] ss:$12 sps:$4 sm:$0xff]   ;;  %v2221_v39 = vld [vmem:[%s2495_s7 + $0x22c] ss:$12 sps:$4 sm:$0xff]  }
  0x34   : > { %1354 = vmatpush1.bf16.msra.mxu1 %v2193_v20  ;;  %v2223_v40 = vld [vmem:[%s2495_s7 + $0xa8] ss:$12 sps:$4 sm:$0xff]   ;;  %v2225_v42 = vld [vmem:[%s2495_s7 + $0xc4] ss:$12 sps:$4 sm:$0xff]   ;;  %v2229_v44 = vld [vmem:[%s2495_s7 + $0xc0] ss:$12 sps:$4 sm:$0xff]  }
  0x35   : > { %1405 = vmatpush1.bf16.msra.mxu0 %v2194_v21  ;;  %1355 = vmatprep.subr.bf16.mxu1 %v2195_v22  ;;  %v2224_v41 = vld [vmem:[%s2495_s7 + $0x228] ss:$12 sps:$4 sm:$0xff]   ;;  %v2227_v43 = vld [vmem:[%s2495_s7 + $0x244] ss:$12 sps:$4 sm:$0xff]   ;;  %v2230_v45 = vld [vmem:[%s2495_s7 + $0x240] ss:$12 sps:$4 sm:$0xff]  }
  0x36   : > { %1406 = vmatprep.subr.bf16.mxu0 %v2197_v23  ;;  %v2231_v46 = vld [vmem:[%s2495_s7 + $0xdc] ss:$12 sps:$4 sm:$0xff]   ;;  %v2235_v48 = vld [vmem:[%s2495_s7 + $0xd8] ss:$12 sps:$4 sm:$0xff]   ;;  %v2237_v50 = vld [vmem:[%s2495_s7 + $0xf4] ss:$12 sps:$4 sm:$0xff]  }
  0x37   : > { %v2233_v47 = vld [vmem:[%s2495_s7 + $0x25c] ss:$12 sps:$4 sm:$0xff]   ;;  %v2236_v49 = vld [vmem:[%s2495_s7 + $0x258] ss:$12 sps:$4 sm:$0xff]   ;;  %v2239_v51 = vld [vmem:[%s2495_s7 + $0x274] ss:$12 sps:$4 sm:$0xff]  }
  0x38   : > { %1356 = vmatpush1.bf16.msra.mxu1 %v2199_v24  ;;  %v2241_v52 = vld [vmem:[%s2495_s7 + $0xf0] ss:$12 sps:$4 sm:$0xff]   ;;  %v2243_v54 = vld [vmem:[%s2495_s7 + $0x10c] ss:$12 sps:$4 sm:$0xff]   ;;  %v2247_v56 = vld [vmem:[%s2495_s7 + $0x108] ss:$12 sps:$4 sm:$0xff]  }
  0x39   : > { %1407 = vmatpush1.bf16.msra.mxu0 %v2200_v25  ;;  %1357 = vmatprep.subr.bf16.mxu1 %v2201_v26  ;;  %v2242_v53 = vld [vmem:[%s2495_s7 + $0x270] ss:$12 sps:$4 sm:$0xff]   ;;  %v2245_v55 = vld [vmem:[%s2495_s7 + $0x28c] ss:$12 sps:$4 sm:$0xff]   ;;  %v2248_v57 = vld [vmem:[%s2495_s7 + $0x288] ss:$12 sps:$4 sm:$0xff]  }
  0x3a   : > { %1408 = vmatprep.subr.bf16.mxu0 %v2203_v27  ;;  %v2249_v58 = vld [vmem:[%s2495_s7 + $0x124] ss:$12 sps:$4 sm:$0xff]   ;;  %v2554_v61 = vld [vmem:[%s2497_s8 + $0xc] ss:$24 sps:$4 sm:$0xff]   ;;  %p2019_p11 = scmp.ne.s32.totalorder %s2414_s14, 2 }
  0x3b   : > { %v2550_v59 = vld [vmem:[%s2497_s8 + $0x4] ss:$24 sps:$4 sm:$0xff]   ;;  %1432 = vmatprep.mubr.bf16.mxu0 %v2554_v61  ;;  %v2255_v0 = vld [vmem:[%s2495_s7 + $0x13c] ss:$12 sps:$4 sm:$0xff]  }
  0x3c   : > { %1358 = vmatpush1.bf16.msra.mxu1 %v2205_v28  ;;  %v2251_v60 = vld [vmem:[%s2495_s7 + $0x2a4] ss:$12 sps:$4 sm:$0xff]   ;;  %1381 = vmatprep.mubr.bf16.mxu1 %v2550_v59  ;;  %v2253_v62 = vld [vmem:[%s2495_s7 + $0x120] ss:$12 sps:$4 sm:$0xff]   ;;  %v2257_v1 = vld [vmem:[%s2495_s7 + $0x2bc] ss:$12 sps:$4 sm:$0xff]  }
  0x3d   : > { %1409 = vmatpush1.bf16.msra.mxu0 %v2206_v29  ;;  %1359 = vmatprep.subr.bf16.mxu1 %v2207_v30  ;;  %v2254_v63 = vld [vmem:[%s2495_s7 + $0x2a0] ss:$12 sps:$4 sm:$0xff]   ;;  %v2259_v2 = vld [vmem:[%s2495_s7 + $0x138] ss:$12 sps:$4 sm:$0xff]   ;;  %v2265_v6 = vld [vmem:[%s2495_s7 + $0x150] ss:$12 sps:$4 sm:$0xff]  }
  0x3e   : > { %1410 = vmatprep.subr.bf16.mxu0 %v2209_v31  ;;  %v2260_v3 = vld [vmem:[%s2495_s7 + $0x2b8] ss:$12 sps:$4 sm:$0xff]   ;;  %v2261_v4 = vld [vmem:[%s2495_s7 + $0x154] ss:$12 sps:$4 sm:$0xff]   ;;  %v2266_v7 = vld [vmem:[%s2495_s7 + $0x2d0] ss:$12 sps:$4 sm:$0xff]  }
  0x3f   : > { %v2263_v5 = vld [vmem:[%s2495_s7 + $0x2d4] ss:$12 sps:$4 sm:$0xff]   ;;  %v2267_v8 = vld [vmem:[%s2495_s7 + $0x16c] ss:$12 sps:$4 sm:$0xff]   ;;  %v2281_v12 = vld [vmem:[%s2495_s7 + $0x304] ss:$12 sps:$4 sm:$0xff]  }
  0x40   : > { %1360 = vmatpush1.bf16.msra.mxu1 %v2211_v32  ;;  %v2269_v9 = vld [vmem:[%s2495_s7 + $0x2ec] ss:$12 sps:$4 sm:$0xff]   ;;  %v2271_v10 = vld [vmem:[%s2495_s7 + $0x168] ss:$12 sps:$4 sm:$0xff]   ;;  %v2289_v28 = vld [vmem:[%s2495_s7 + $0x330] ss:$12 sps:$4 sm:$0xff]  }
  0x41   : > { %1411 = vmatpush1.bf16.msra.mxu0 %v2212_v33  ;;  %1361 = vmatprep.subr.bf16.mxu1 %v2213_v34  ;;  %v2272_v11 = vld [vmem:[%s2495_s7 + $0x2e8] ss:$12 sps:$4 sm:$0xff]   ;;  %v2279_v16 = vld [vmem:[%s2495_s7 + $0x300] ss:$12 sps:$4 sm:$0xff]   ;;  %v2284_v21 = vld [vmem:[%s2495_s7 + $0x318] ss:$12 sps:$4 sm:$0xff]  }
  0x42   : > { %1412 = vmatprep.subr.bf16.mxu0 %v2215_v35  ;;  %v2574_v13 = vld [vmem:[%s2497_s8] ss:$24 sps:$4 sm:$0xff]   ;;  %v335_v20 = vld [vmem:[%s2497_s8 + $0x30] sm:$0xff] }
  0x43   : > { %v2577_v14 = vld [vmem:[%s2497_s8 + $0x8] ss:$24 sps:$4 sm:$0xff]   ;;  %v2287_v19 = vld [vmem:[%s2495_s7 + $0xe0] ss:$12 sps:$4 sm:$0xff]   ;;  %v2587_v23 = vcombine.high %v335_v20, %v335_v20  ;;  %v2598_v29 = vcombine.low %v335_v20, %v335_v20 }
  0x44   : > { %1362 = vmatpush1.bf16.msra.mxu1 %v2217_v36  ;;  %v2282_v15 = vld [vmem:[%s2495_s7 + $0xc8] ss:$12 sps:$4 sm:$0xff]   ;;  %v2288_v22 = vld [vmem:[%s2495_s7 + $0x20] ss:$12 sps:$4 sm:$0xff]   ;;  %v2292_v26 = vld [vmem:[%s2495_s7 + $0xf8] ss:$12 sps:$4 sm:$0xff]  }
  0x45   : > { %1413 = vmatpush1.bf16.msra.mxu0 %v2218_v37  ;;  %1363 = vmatprep.subr.bf16.mxu1 %v2219_v38  ;;  %v2283_v17 = vld [vmem:[%s2495_s7 + $0x8] ss:$12 sps:$4 sm:$0xff]   ;;  %v2293_v31 = vld [vmem:[%s2495_s7 + $0x38] ss:$12 sps:$4 sm:$0xff]   ;;  %v2297_v33 = vld [vmem:[%s2495_s7 + $0x110] ss:$12 sps:$4 sm:$0xff]  }
  0x46   : > { %1414 = vmatprep.subr.bf16.mxu0 %v2221_v39  ;;  %v2286_v18 = vld [vmem:[%s2495_s7 + $0x31c] ss:$12 sps:$4 sm:$0xff]   ;;  %v2291_v24 = vld [vmem:[%s2495_s7 + $0x334] ss:$12 sps:$4 sm:$0xff]   ;;  %v2296_v32 = vld [vmem:[%s2495_s7 + $0x34c] ss:$12 sps:$4 sm:$0xff]  }
  0x47   : > { %v336_v25 = vld [vmem:[%s2497_s8 + $0x38] sm:$0xff]  ;;  %v2298_v35 = vld [vmem:[%s2495_s7 + $0x50] ss:$12 sps:$4 sm:$0xff]  }
  0x48   : > { %1364 = vmatpush1.bf16.msra.mxu1 %v2223_v40  ;;  %v2594_v27 = vcombine.high %v336_v25, %v336_v25  ;;  %v2601_v30 = vcombine.low %v336_v25, %v336_v25  ;;  %v2294_v34 = vld [vmem:[%s2495_s7 + $0x348] ss:$12 sps:$4 sm:$0xff]   ;;  %v2301_v36 = vld [vmem:[%s2495_s7 + $0x364] ss:$12 sps:$4 sm:$0xff]   ;;  %v2299_v38 = vld [vmem:[%s2495_s7 + $0x360] ss:$12 sps:$4 sm:$0xff]  }
  0x49   : > { %1415 = vmatpush1.bf16.msra.mxu0 %v2224_v41  ;;  %1365 = vmatprep.subr.bf16.mxu1 %v2225_v42  ;;  %v2302_v37 = vld [vmem:[%s2495_s7 + $0x128] ss:$12 sps:$4 sm:$0xff]   ;;  %v2307_v41 = vld [vmem:[%s2495_s7 + $0x140] ss:$12 sps:$4 sm:$0xff]   ;;  %v2304_v42 = vld [vmem:[%s2495_s7 + $0x378] ss:$12 sps:$4 sm:$0xff]  }
  0x4a   : > { %1416 = vmatprep.subr.bf16.mxu0 %v2227_v43  ;;  %v2303_v39 = vld [vmem:[%s2495_s7 + $0x68] ss:$12 sps:$4 sm:$0xff]   ;;  %v2308_v43 = vld [vmem:[%s2495_s7 + $0x80] ss:$12 sps:$4 sm:$0xff]  }
  0x4b   : > { %v2306_v40 = vld [vmem:[%s2495_s7 + $0x37c] ss:$12 sps:$4 sm:$0xff]  }
  0x4c   : > { %1366 = vmatpush1.bf16.msra.mxu1 %v2229_v44  ;;  %v2313_v44 = vld [vmem:[%s2495_s7 + $0x394] ss:$12 sps:$4 sm:$0xff]  }
  0x4d   : > { %1417 = vmatpush1.bf16.msra.mxu0 %v2230_v45  ;;  %1367 = vmatprep.subr.bf16.mxu1 %v2231_v46  ;;  %v2314_v45 = vld [vmem:[%s2495_s7 + $0x158] ss:$12 sps:$4 sm:$0xff]   ;;  %v2311_v46 = vld [vmem:[%s2495_s7 + $0x390] ss:$12 sps:$4 sm:$0xff]   ;;  %v2358_v20 = vld [vmem:[%s2495_s7 + $0x468] ss:$12 sps:$4 sm:$0xff]  }
  0x4e   : > { %1418 = vmatprep.subr.bf16.mxu0 %v2233_v47  ;;  %v2316_v47 = vld [vmem:[%s2495_s7 + $0x98] ss:$12 sps:$4 sm:$0xff]   ;;  %v2367_v25 = vld [vmem:[%s2495_s7 + $0x308] ss:$12 sps:$4 sm:$0xff]  }
  0x50   : > { %1368 = vmatpush1.bf16.msra.mxu1 %v2235_v48  ;;  %v2320_v48 = vld [vmem:[%s2495_s7 + $0x3ac] ss:$12 sps:$4 sm:$0xff]  }
  0x51   : > { %1419 = vmatpush1.bf16.msra.mxu0 %v2236_v49  ;;  %1369 = vmatprep.subr.bf16.mxu1 %v2237_v50  ;;  %v2321_v49 = vld [vmem:[%s2495_s7 + $0x170] ss:$12 sps:$4 sm:$0xff]   ;;  %v2318_v50 = vld [vmem:[%s2495_s7 + $0x3a8] ss:$12 sps:$4 sm:$0xff]  }
  0x52   : > { %1420 = vmatprep.subr.bf16.mxu0 %v2239_v51  ;;  %v2322_v51 = vld [vmem:[%s2495_s7 + $0xb0] ss:$12 sps:$4 sm:$0xff]  }
  0x54   : > { %1370 = vmatpush1.bf16.msra.mxu1 %v2241_v52  ;;  %v2325_v52 = vld [vmem:[%s2495_s7 + $0x3c4] ss:$12 sps:$4 sm:$0xff]  }
  0x55   : > { %1421 = vmatpush1.bf16.msra.mxu0 %v2242_v53  ;;  %1371 = vmatprep.subr.bf16.mxu1 %v2243_v54  ;;  %v2326_v53 = vld [vmem:[%s2495_s7 + $0x248] ss:$12 sps:$4 sm:$0xff]   ;;  %v2323_v54 = vld [vmem:[%s2495_s7 + $0x3c0] ss:$12 sps:$4 sm:$0xff]  }
  0x56   : > { %1422 = vmatprep.subr.bf16.mxu0 %v2245_v55  ;;  %v2327_v55 = vld [vmem:[%s2495_s7 + $0x188] ss:$12 sps:$4 sm:$0xff]  }
  0x58   : > { %1372 = vmatpush1.bf16.msra.mxu1 %v2247_v56  ;;  %v2330_v56 = vld [vmem:[%s2495_s7 + $0x3dc] ss:$12 sps:$4 sm:$0xff]  }
  0x59   : > { %1423 = vmatpush1.bf16.msra.mxu0 %v2248_v57  ;;  %1373 = vmatprep.subr.bf16.mxu1 %v2249_v58  ;;  %v2331_v57 = vld [vmem:[%s2495_s7 + $0x260] ss:$12 sps:$4 sm:$0xff]   ;;  %v2328_v58 = vld [vmem:[%s2495_s7 + $0x3d8] ss:$12 sps:$4 sm:$0xff]  }
  0x5a   : > { %1424 = vmatprep.subr.bf16.mxu0 %v2251_v60  ;;  %v2335_v60 = vld [vmem:[%s2495_s7 + $0x3f4] ss:$12 sps:$4 sm:$0xff]  }
  0x5c   : > { %1374 = vmatpush1.bf16.msra.mxu1 %v2253_v62  ;;  %v2638_v62 = vld [vmem:[%s2497_s8 + $0x14] ss:$24 sps:$4 sm:$0xff]  }
  0x5d   : > { %1425 = vmatpush1.bf16.msra.mxu0 %v2254_v63  ;;  %1375 = vmatprep.subr.bf16.mxu1 %v2255_v0  ;;  %v2336_v63 = vld [vmem:[%s2495_s7 + $0x278] ss:$12 sps:$4 sm:$0xff]   ;;  %v2333_v0 = vld [vmem:[%s2495_s7 + $0x3f0] ss:$12 sps:$4 sm:$0xff]  }
  0x5e   : > { %1426 = vmatprep.subr.bf16.mxu0 %v2257_v1  ;;  %v2337_v1 = vld [vmem:[%s2495_s7 + $0x1b8] ss:$12 sps:$4 sm:$0xff]  }
  0x60   : > { %1376 = vmatpush1.bf16.msra.mxu1 %v2259_v2  ;;  %v2340_v2 = vld [vmem:[%s2495_s7 + $0x40c] ss:$12 sps:$4 sm:$0xff]  }
  0x61   : > { %1427 = vmatpush1.bf16.msra.mxu0 %v2260_v3  ;;  %1377 = vmatprep.subr.bf16.mxu1 %v2261_v4  ;;  %v2341_v3 = vld [vmem:[%s2495_s7 + $0x290] ss:$12 sps:$4 sm:$0xff]   ;;  %v2338_v4 = vld [vmem:[%s2495_s7 + $0x408] ss:$12 sps:$4 sm:$0xff]  }
  0x62   : > { %1428 = vmatprep.subr.bf16.mxu0 %v2263_v5  ;;  %v2342_v5 = vld [vmem:[%s2495_s7 + $0x1d0] ss:$12 sps:$4 sm:$0xff]  }
  0x64   : > { %1378 = vmatpush1.bf16.msra.mxu1 %v2265_v6  ;;  %v2345_v6 = vld [vmem:[%s2495_s7 + $0x424] ss:$12 sps:$4 sm:$0xff]  }
  0x65   : > { %1429 = vmatpush1.bf16.msra.mxu0 %v2266_v7  ;;  %1379 = vmatprep.subr.bf16.mxu1 %v2267_v8  ;;  %v2346_v7 = vld [vmem:[%s2495_s7 + $0x2a8] ss:$12 sps:$4 sm:$0xff]   ;;  %v2343_v8 = vld [vmem:[%s2495_s7 + $0x420] ss:$12 sps:$4 sm:$0xff]  }
  0x66   : > { %1430 = vmatprep.subr.bf16.mxu0 %v2269_v9  ;;  %v2347_v9 = vld [vmem:[%s2495_s7 + $0x1e8] ss:$12 sps:$4 sm:$0xff]  }
  0x68   : > { %1380 = vmatpush1.bf16.msra.mxu1 %v2271_v10  ;;  %v2350_v10 = vld [vmem:[%s2495_s7 + $0x43c] ss:$12 sps:$4 sm:$0xff]  }
  0x69   : > { %1431 = vmatpush1.bf16.msra.mxu0 %v2272_v11  ;;  %2025 = vmatprep.subr.bf16.mxu1 %v2282_v15  ;;  %v2351_v11 = vld [vmem:[%s2495_s7 + $0x2c0] ss:$12 sps:$4 sm:$0xff]   ;;  %v2356_v15 = vld [vmem:[%s2495_s7 + $0x2d8] ss:$12 sps:$4 sm:$0xff]  }
  0x6a   : > { %1451 = vmatprep.subr.bf16.mxu0 %v2281_v12  ;;  %v2348_v12 = vld [vmem:[%s2495_s7 + $0x438] ss:$12 sps:$4 sm:$0xff]  }
  0x6b   : > { %1382 = vmatmul.mubr.bf16.vlgmr.msra.gmra.mrb[0].mxu1 %v2574_v13 }
  0x6c   : > { %1433 = vmatmul.mubr.bf16.vlgmr.msra.gmra.mrb[0].mxu0 %v2577_v14  ;;  %2026 = vmatpush3.bf16.msra.mxu1 %v2283_v17  ;;  %v2357_v17 = vld [vmem:[%s2495_s7 + $0x218] ss:$12 sps:$4 sm:$0xff]  }
  0x6d   : > { %1452 = vmatpush1.bf16.msra.mxu0 %v2279_v16  ;;  %2027 = vmatprep.subr.bf16.mxu1 %v2287_v19  ;;  %v2353_v16 = vld [vmem:[%s2495_s7 + $0x450] ss:$12 sps:$4 sm:$0xff]  }
  0x6e   : > { %1453 = vmatprep.subr.bf16.mxu0 %v2286_v18  ;;  %1391 = vmatprep.mubr.bf16.mxu1 %v2587_v23  ;;  %v2360_v18 = vld [vmem:[%s2495_s7 + $0x46c] ss:$12 sps:$4 sm:$0xff]   ;;  %v2361_v19 = vld [vmem:[%s2495_s7 + $0x2f0] ss:$12 sps:$4 sm:$0xff]  }
  0x6f   : > { %1442 = vmatprep.mubr.bf16.mxu0 %v2594_v27 }
  0x70   : > { %2028 = vmatpush3.bf16.msra.mxu1 %v2288_v22  ;;  %v2366_v22 = vld [vmem:[%s2495_s7 + $0x3c8] ss:$12 sps:$4 sm:$0xff]  }
  0x71   : > { %1454 = vmatpush1.bf16.msra.mxu0 %v2284_v21  ;;  %2029 = vmatprep.subr.bf16.mxu1 %v2292_v26  ;;  %v2362_v21 = vld [vmem:[%s2495_s7 + $0x230] ss:$12 sps:$4 sm:$0xff]   ;;  %v2368_v26 = vld [vmem:[%s2495_s7 + $0x3e0] ss:$12 sps:$4 sm:$0xff]  }
  0x72   : > { %1455 = vmatprep.subr.bf16.mxu0 %v2291_v24  ;;  %v337_v24 = vld [vmem:[%s2497_s8 + $0x40] sm:$0xff] }
  0x73   : > { %1392 = vmatmul.mubr.bf16.gmra.mrb[4].mxu1 %v2598_v29 }
  0x74   : > { %1443 = vmatmul.mubr.bf16.gmra.mrb[4].mxu0 %v2601_v30  ;;  %2030 = vmatpush3.bf16.msra.mxu1 %v2293_v31  ;;  %v2372_v31 = vld [vmem:[%s2495_s7 + $0x3f8] ss:$12 sps:$4 sm:$0xff]  }
  0x75   : > { %1456 = vmatpush1.bf16.msra.mxu0 %v2289_v28  ;;  %2031 = vmatprep.subr.bf16.mxu1 %v2297_v33  ;;  %v1874_v28 = vcombine.high %v337_v24, %v337_v24  ;;  %v2373_v33 = vld [vmem:[%s2495_s7 + $0x338] ss:$12 sps:$4 sm:$0xff]  }
  0x76   : > { %1457 = vmatprep.subr.bf16.mxu0 %v2296_v32  ;;  %1534 = vmatprep.mubr.bf16.mxu1 %v2550_v59  ;;  %v2332_v59 = vld [vmem:[%s2495_s7 + $0x1a0] ss:$12 sps:$4 sm:$0xff]   ;;  %v1873_v32 = vcombine.low %v337_v24, %v337_v24 }
  0x77   : > { %1483 = vmatprep.mubr.bf16.mxu0 %v2638_v62 }
  0x78   : > { %2032 = vmatpush3.bf16.msra.mxu1 %v2298_v35  ;;  %v2377_v35 = vld [vmem:[%s2495_s7 + $0x368] ss:$12 sps:$4 sm:$0xff]  }
  0x79   : > { %1458 = vmatpush1.bf16.msra.mxu0 %v2294_v34  ;;  %2033 = vmatprep.subr.bf16.mxu1 %v2302_v37  ;;  %v2374_v34 = vld [vmem:[%s2495_s7 + $0x410] ss:$12 sps:$4 sm:$0xff]   ;;  %v2380_v37 = vld [vmem:[%s2495_s7 + $0x458] ss:$12 sps:$4 sm:$0xff]  }
  0x7a   : > { %1459 = vmatprep.subr.bf16.mxu0 %v2301_v36  ;;  %v2379_v36 = vld [vmem:[%s2495_s7 + $0x380] ss:$12 sps:$4 sm:$0xff]  }
  0x7c   : > { %2034 = vmatpush3.bf16.msra.mxu1 %v2303_v39  ;;  %v2382_v39 = vld [vmem:[%s2495_s7 + $0x470] ss:$12 sps:$4 sm:$0xff]  }
  0x7d   : > { %1460 = vmatpush1.bf16.msra.mxu0 %v2299_v38  ;;  %2035 = vmatprep.subr.bf16.mxu1 %v2307_v41  ;;  %v2381_v38 = vld [vmem:[%s2495_s7 + $0x398] ss:$12 sps:$4 sm:$0xff]  }
  0x7e   : > { %1461 = vmatprep.subr.bf16.mxu0 %v2306_v40  ;;  %v2383_v40 = vld [vmem:[%s2495_s7 + $0x3b0] ss:$12 sps:$4 sm:$0xff]  }
  0x80   : > { %2036 = vmatpush3.bf16.msra.mxu1 %v2308_v43 }
  0x81   : > { %1462 = vmatpush1.bf16.msra.mxu0 %v2304_v42  ;;  %2037 = vmatprep.subr.bf16.mxu1 %v2314_v45 }
  0x82   : > { %1463 = vmatprep.subr.bf16.mxu0 %v2313_v44 }
  0x84   : > { %2038 = vmatpush3.bf16.msra.mxu1 %v2316_v47 }
  0x85   : > { %1464 = vmatpush1.bf16.msra.mxu0 %v2311_v46  ;;  %2039 = vmatprep.subr.bf16.mxu1 %v2321_v49 }
  0x86   : > { %1465 = vmatprep.subr.bf16.mxu0 %v2320_v48 }
  0x88   : > { %2040 = vmatpush3.bf16.msra.mxu1 %v2322_v51 }
  0x89   : > { %1466 = vmatpush1.bf16.msra.mxu0 %v2318_v50  ;;  %2053 = vmatprep.subr.bf16.mxu1 %v2326_v53 }
  0x8a   : > { %1467 = vmatprep.subr.bf16.mxu0 %v2325_v52 }
  0x8b   : > { %1535 = vmatmul.mubr.bf16.vlgmr.msra.gmra.mrb[8].mxu1 %v2574_v13  ;;  %v2352_v13 = vld [vmem:[%s2495_s7 + $0x200] ss:$12 sps:$4 sm:$0xff]  }
  0x8c   : > { %2054 = vmatpush3.bf16.msra.mxu1 %v2327_v55  ;;  %1542 = vmatprep.mubr.bf16.mxu1 %v2587_v23  ;;  %v2363_v23 = vld [vmem:[%s2497_s8 + $0x10] ss:$24 sps:$4 sm:$0xff]  }
  0x8d   : > { %1468 = vmatpush1.bf16.msra.mxu0 %v2323_v54  ;;  %2055 = vmatprep.subr.bf16.mxu1 %v2331_v57 }
  0x8e   : > { %1469 = vmatprep.subr.bf16.mxu0 %v2330_v56 }
  0x90   : > { %2056 = vmatpush3.bf16.msra.mxu1 %v2332_v59 }
  0x91   : > { %1470 = vmatpush1.bf16.msra.mxu0 %v2328_v58  ;;  %2057 = vmatprep.subr.bf16.mxu1 %v2336_v63 }
  0x92   : > { %1471 = vmatprep.subr.bf16.mxu0 %v2335_v60 }
  0x93   : > { %1543 = vmatmul.mubr.bf16.gmra.mrb[12].mxu1 %v2598_v29  ;;  %v2369_v29 = vld [vmem:[%s2495_s7 + $0x320] ss:$12 sps:$4 sm:$0xff]  }
  0x94   : > { %2058 = vmatpush3.bf16.msra.mxu1 %v2337_v1  ;;  %1582 = vmatprep.mubr.bf16.mxu1 %v2554_v61  ;;  %v2355_v61 = vld [vmem:[%s2495_s7 + $0x454] ss:$12 sps:$4 sm:$0xff]  }
  0x95   : > { %1472 = vmatpush1.bf16.msra.mxu0 %v2333_v0  ;;  %2059 = vmatprep.subr.bf16.mxu1 %v2341_v3  ;;  %v320_v3 = vld [vmem:[#allocation2] sm:$0xff] }
  0x96   : > { %1473 = vmatprep.subr.bf16.mxu0 %v2340_v2 }
  0x98   : > { %2060 = vmatpush3.bf16.msra.mxu1 %v2342_v5 }
  0x99   : > { %1474 = vmatpush1.bf16.msra.mxu0 %v2338_v4  ;;  %2061 = vmatprep.subr.bf16.mxu1 %v2346_v7  ;;  %v321_v7 = vld [vmem:[#allocation2 + $0x8] sm:$0xff] }
  0x9a   : > { %1475 = vmatprep.subr.bf16.mxu0 %v2345_v6 }
  0x9c   : > { %2062 = vmatpush3.bf16.msra.mxu1 %v2347_v9 }
  0x9d   : > { %1476 = vmatpush1.bf16.msra.mxu0 %v2343_v8  ;;  %2063 = vmatprep.subr.bf16.mxu1 %v2351_v11 }
  0x9e   : > { %1477 = vmatprep.subr.bf16.mxu0 %v2350_v10 }
  0xa0   : > { %2064 = vmatpush3.bf16.msra.mxu1 %v2352_v13 }
  0xa1   : > { %1478 = vmatpush1.bf16.msra.mxu0 %v2348_v12  ;;  %2065 = vmatprep.subr.bf16.mxu1 %v2356_v15  ;;  %v323_v12 = vld [vmem:[#allocation2 + $0x18] sm:$0xff] }
  0xa2   : > { %1479 = vmatprep.subr.bf16.mxu0 %v2355_v61 }
  0xa4   : > { %2066 = vmatpush3.bf16.msra.mxu1 %v2357_v17  ;;  %v324_v17 = vld [vmem:[#allocation2 + $0x20] sm:$0xff] }
  0xa5   : > { %1480 = vmatpush1.bf16.msra.mxu0 %v2353_v16  ;;  %2067 = vmatprep.subr.bf16.mxu1 %v2361_v19 }
  0xa6   : > { %1481 = vmatprep.subr.bf16.mxu0 %v2360_v18 }
  0xa8   : > { %2068 = vmatpush3.bf16.msra.mxu1 %v2362_v21 }
  0xa9   : > { %1482 = vmatpush1.bf16.msra.mxu0 %v2358_v20  ;;  %2109 = vmatprep.subr.bf16.mxu1 %v2366_v22 }
  0xaa   : > { %2081 = vmatprep.subr.bf16.mxu0 %v2366_v22 }
  0xab   : > { %1583 = vmatmul.mubr.bf16.vlgmr.msra.gmra.mrb[16].mxu1 %v2577_v14  ;;  %v2375_v14 = vld [vmem:[%s2495_s7 + $0x350] ss:$12 sps:$4 sm:$0xff]  }
  0xac   : > { %1484 = vmatmul.mubr.bf16.vlgmr.msra.gmra.mrb[0].mxu0 %v2363_v23  ;;  %2117 = vmatpush3.bf16.msra.mxu1 %v2367_v25 }
  0xad   : > { %2082 = vmatpush3.bf16.msra.mxu0 %v2367_v25  ;;  %2110 = vmatprep.subr.bf16.mxu1 %v2368_v26 }
  0xae   : > { %2083 = vmatprep.subr.bf16.mxu0 %v2368_v26  ;;  %1493 = vmatprep.mubr.bf16.mxu0 %v1874_v28 }
  0xaf   : > { %1590 = vmatprep.mubr.bf16.mxu1 %v2594_v27  ;;  %v2376_v27 = vld [vmem:[%s2495_s7 + $0x428] ss:$12 sps:$4 sm:$0xff]  }
  0xb0   : > { %2118 = vmatpush3.bf16.msra.mxu1 %v2369_v29 }
  0xb1   : > { %2084 = vmatpush3.bf16.msra.mxu0 %v2369_v29  ;;  %2111 = vmatprep.subr.bf16.mxu1 %v2372_v31 }
  0xb2   : > { %2085 = vmatprep.subr.bf16.mxu0 %v2372_v31 }
  0xb3   : > { %1591 = vmatmul.mubr.bf16.gmra.mrb[20].mxu1 %v2601_v30  ;;  %v2378_v30 = vld [vmem:[%s2495_s7 + $0x440] ss:$12 sps:$4 sm:$0xff]  }
  0xb4   : > { %1494 = vmatmul.mubr.bf16.gmra.mrb[8].mxu0 %v1873_v32  ;;  %2119 = vmatpush3.bf16.msra.mxu1 %v2373_v33 }
  0xb5   : > { %2086 = vmatpush3.bf16.msra.mxu0 %v2373_v33  ;;  %2112 = vmatprep.subr.bf16.mxu1 %v2374_v34  ;;  %v327_v33 = vld [vmem:[#allocation2 + $0x38] sm:$0xff] }
  0xb6   : > { %2087 = vmatprep.subr.bf16.mxu0 %v2374_v34  ;;  %1630 = vmatprep.mubr.bf16.mxu0 %v2638_v62 }
  0xb7   : > { %1638 = vmatprep.mubr.bf16.mxu1 %v1874_v28  ;;  %v326_v28 = vld [vmem:[#allocation2 + $0x30] sm:$0xff] }
  0xb8   : > { %2120 = vmatpush3.bf16.msra.mxu1 %v2375_v14 }
  0xb9   : > { %2088 = vmatpush3.bf16.msra.mxu0 %v2375_v14  ;;  %2113 = vmatprep.subr.bf16.mxu1 %v2376_v27 }
  0xba   : > { %2089 = vmatprep.subr.bf16.mxu0 %v2376_v27 }
  0xbc   : > { %2121 = vmatpush3.bf16.msra.mxu1 %v2377_v35 }
  0xbd   : > { %2090 = vmatpush3.bf16.msra.mxu0 %v2377_v35  ;;  %2114 = vmatprep.subr.bf16.mxu1 %v2378_v30 }
  0xbe   : > { %2091 = vmatprep.subr.bf16.mxu0 %v2378_v30 }
  0xc0   : > { %2122 = vmatpush3.bf16.msra.mxu1 %v2379_v36 }
  0xc1   : > { %2092 = vmatpush3.bf16.msra.mxu0 %v2379_v36  ;;  %2115 = vmatprep.subr.bf16.mxu1 %v2380_v37 }
  0xc2   : > { %2093 = vmatprep.subr.bf16.mxu0 %v2380_v37 }
  0xc4   : > { %2123 = vmatpush3.bf16.msra.mxu1 %v2381_v38 }
  0xc5   : > { %2094 = vmatpush3.bf16.msra.mxu0 %v2381_v38  ;;  %2116 = vmatprep.subr.bf16.mxu1 %v2382_v39 }
  0xc6   : > { %2095 = vmatprep.subr.bf16.mxu0 %v2382_v39 }
  0xc8   : > { %2124 = vmatpush3.bf16.msra.mxu1 %v2383_v40 }
  0xc9   : > { %2096 = vmatpush3.bf16.msra.mxu0 %v2383_v40 }
  0xcb   : > { %1639 = vmatmul.mubr.bf16.vlgmr.msra.gmra.mrb[24].mxu1 %v1873_v32 }
  0xcc   : > { %1631 = vmatmul.mubr.bf16.vlgmr.msra.gmra.mrb[12].mxu0 %v2363_v23 }
 0x13e   : > { %v1383_v41 = vpop.f32.mrb[0].mxu1 }
 0x13f   : > { %v1385_v42 = vpop.f32.mrb[1].mxu1 }
 0x140   : > { %v1387_v43 = vpop.f32.mrb[2].mxu1 }
 0x141   : > { %v1389_v44 = vpop.f32.mrb[3].mxu1 }
 0x146   : > { %v1393_v45 = vpop.f32.mrb[4].mxu1 }
 0x147   : > { %v1444_v46 = vpop.f32.mrb[4].mxu0  ;;  %v1395_v47 = vpop.f32.mrb[5].mxu1 }
 0x148   : > { %v1445_v48 = vadd.f32 %v1444_v46, %v1393_v45  ;;  %v1446_v49 = vpop.f32.mrb[5].mxu0  ;;  %v1397_v50 = vpop.f32.mrb[6].mxu1 }
 0x149   : > { %v1447_v51 = vadd.f32 %v1446_v49, %v1395_v47  ;;  %v1448_v52 = vpop.f32.mrb[6].mxu0  ;;  %v1398_v53 = vpop.f32.mrb[7].mxu1  ;;  %v322_v50 = vld [vmem:[#allocation2 + $0x10] sm:$0xff] }
 0x14a   : > { %v1449_v54 = vpop.f32.mrb[7].mxu0 }
 0x15e   : > { %v2041_v55 = vpop.f32.mrb[8].mxu1 }
 0x15f   : > { %v2042_v56 = vpop.f32.mrb[9].mxu1 }
 0x160   : > { %v2043_v57 = vadd.f32 %v2042_v56, %v2041_v55  ;;  %v2044_v58 = vpop.f32.mrb[10].mxu1 }
 0x161   : > { %v2045_v59 = vpop.f32.mrb[11].mxu1 }
 0x162   : > { %v2046_v60 = vadd.f32 %v2045_v59, %v2044_v58 }
 0x166   : > { %v2047_v62 = vpop.f32.mrb[12].mxu1 }
 0x167   : > { %v2048_v63 = vpop.f32.mrb[13].mxu1 }
 0x168   : > { %v2049_v0 = vadd.f32 %v2048_v63, %v2047_v62  ;;  %v2050_v1 = vpop.f32.mrb[14].mxu1  ;;  %v1679_v63 = vlaneseq (!%p2019_p11) }
 0x169   : > { %v2051_v2 = vpop.f32.mrb[15].mxu1  ;;  %v1677_v1 = vld [vmem:[%s2737_s2] sm:$0x7] (!%p2019_p11) }
 0x17e   : > { %v2069_v5 = vpop.f32.mrb[16].mxu1 }
 0x17f   : > { %v1485_v4 = vpop.f32.mrb[0].mxu0  ;;  %v2070_v9 = vpop.f32.mrb[17].mxu1 }
 0x180   : > { %v2125_v6 = vadd.f32 %v1485_v4, %v1383_v41  ;;  %v1487_v8 = vpop.f32.mrb[1].mxu0  ;;  %v2071_v11 = vadd.f32 %v2070_v9, %v2069_v5  ;;  %v2072_v61 = vpop.f32.mrb[18].mxu1 }
 0x181   : > { %v2126_v10 = vadd.f32 %v1487_v8, %v1385_v42  ;;  %v1489_v13 = vpop.f32.mrb[2].mxu0  ;;  %v2073_v19 = vpop.f32.mrb[19].mxu1 }
 0x182   : > { %v1646_v15 = vadd.f32 %v2125_v6, %v320_v3  ;;  %v2127_v16 = vadd.f32 %v1489_v13, %v1387_v43  ;;  %v1491_v18 = vpop.f32.mrb[3].mxu0  ;;  %v1585_v21 = vadd.f32 %v2071_v11, %v2043_v57  ;;  %v2074_v23 = vadd.f32 %v2073_v19, %v2072_v61  ;;  %v325_v57 = vld [vmem:[#allocation2 + $0x28] sm:$0xff] }
 0x183   : > { %v1647_v20 = vadd.f32 %v2126_v10, %v321_v7  ;;  %v2128_v22 = vadd.f32 %v1491_v18, %v1389_v44 }
 0x184   : > { %1655 = vst [vmem:[#allocation2] sm:$0xff] %v1646_v15  ;;  %v1649_v24 = vadd.f32 %v2127_v16, %v323_v12  ;;  %v1588_v26 = vadd.f32 %v2074_v23, %v2046_v60 }
 0x185   : > { %1656 = vst [vmem:[#allocation2 + $0x8] sm:$0xff] %v1647_v20  ;;  %v1650_v25 = vadd.f32 %v2128_v22, %v324_v17 }
 0x186   : > { %1658 = vst [vmem:[#allocation2 + $0x18] sm:$0xff] %v1649_v24  ;;  %v2075_v31 = vpop.f32.mrb[20].mxu1 }
 0x187   : > { %1659 = vst [vmem:[#allocation2 + $0x20] sm:$0xff] %v1650_v25  ;;  %v1495_v29 = vpop.f32.mrb[8].mxu0  ;;  %v2076_v14 = vpop.f32.mrb[21].mxu1 }
 0x188   : > { %v1496_v32 = vadd.f32 %v1495_v29, %v1445_v48  ;;  %v1497_v34 = vpop.f32.mrb[9].mxu0  ;;  %v2077_v35 = vadd.f32 %v2076_v14, %v2075_v31  ;;  %v2078_v36 = vpop.f32.mrb[22].mxu1 }
 0x189   : > { %v1498_v27 = vadd.f32 %v1497_v34, %v1447_v51  ;;  %v1499_v30 = vpop.f32.mrb[10].mxu0  ;;  %v2079_v39 = vpop.f32.mrb[23].mxu1  ;;  %v328_v51 = vld [vmem:[#allocation2 + $0x40] sm:$0xff] }
 0x18a   : > { %v1652_v37 = vadd.f32 %v1496_v32, %v326_v28  ;;  %v1500_v38 = vpop.f32.mrb[11].mxu0  ;;  %v1593_v41 = vadd.f32 %v2077_v35, %v2049_v0  ;;  %v1680_v0 = vshrl.u32 (!%p2019_p11), %v1679_v63, 7 }
 0x18b   : > { %v1653_v40 = vadd.f32 %v1498_v27, %v327_v33  ;;  %v1668_v2 = vld [vmem:[#allocation2] sm:$0xff] (!%p2019_p11) }
 0x18c   : > { %1661 = vst [vmem:[#allocation2 + $0x30] sm:$0xff] %v1652_v37  ;;  %v1681_v3 = vsub.s32 (!%p2019_p11), 0, %v1680_v0  ;;  %v1669_v4 = vld [vmem:[#allocation2 + $0x8] sm:$0xff] (!%p2019_p11)  ;;  %v1685_v5 = vsub.s32 (!%p2019_p11), 1, %v1680_v0  ;;  %v1689_v6 = vsub.s32 (!%p2019_p11), 2, %v1680_v0 }
 0x18d   : > { %1662 = vst [vmem:[#allocation2 + $0x38] sm:$0xff] %v1653_v40  ;;  %v1671_v8 = vld [vmem:[#allocation2 + $0x18] sm:$0xff] (!%p2019_p11) }
 0x18e   : > { %v1672_v9 = vld [vmem:[#allocation2 + $0x20] sm:$0xff] (!%p2019_p11)  ;;  %v1682_v10 = vrot.slane (!%p2019_p11), %v1677_v1, %v1681_v3  ;;  %v1686_v11 = vrot.slane (!%p2019_p11), %v1677_v1, %v1685_v5  ;;  %v1690_v12 = vrot.slane (!%p2019_p11), %v1677_v1, %v1689_v6 }
 0x190   : > { %v1694_v16 = vadd.f32 (!%p2019_p11), %v1682_v10, %v1668_v2  ;;  %v1695_v17 = vadd.f32 (!%p2019_p11), %v1686_v11, %v1669_v4  ;;  %v1697_v19 = vadd.f32 (!%p2019_p11), %v1682_v10, %v1671_v8  ;;  %v1698_v20 = vadd.f32 (!%p2019_p11), %v1686_v11, %v1672_v9 }
 0x192   : > { %v1703_v25 = vmax.f32 (!%p2019_p11), %v1694_v16, 0.0  ;;  %v1706_v29 = vmax.f32 (!%p2019_p11), %v1697_v19, 0.0  ;;  %v1707_v31 = vmax.f32 (!%p2019_p11), %v1698_v20, 0.0 }
 0x193   : > { %v1674_v61 = vld [vmem:[#allocation2 + $0x30] sm:$0xff] (!%p2019_p11) }
 0x194   : > { %v1675_v15 = vld [vmem:[#allocation2 + $0x38] sm:$0xff] (!%p2019_p11)  ;;  %v1700_v22 = vadd.f32 (!%p2019_p11), %v1682_v10, %v1674_v61  ;;  %1712 = vst [vmem:[%s2738_s3] sm:$0xff] (!%p2019_p11), %v1703_v25  ;;  %1715 = vst [vmem:[%s2738_s3 + $0x18] sm:$0xff] (!%p2019_p11), %v1706_v29 }
 0x195   : > { %v1701_v23 = vadd.f32 (!%p2019_p11), %v1686_v11, %v1675_v15  ;;  %1716 = vst [vmem:[%s2738_s3 + $0x20] sm:$0xff] (!%p2019_p11), %v1707_v31 }
 0x196   : > { %v1709_v33 = vmax.f32 (!%p2019_p11), %v1700_v22, 0.0 }
 0x197   : > { %v1710_v34 = vmax.f32 (!%p2019_p11), %v1701_v23, 0.0 }
 0x198   : > { %1718 = vst [vmem:[%s2738_s3 + $0x30] sm:$0xff] (!%p2019_p11), %v1709_v33 }
 0x199   : > { %1719 = vst [vmem:[%s2738_s3 + $0x38] sm:$0xff] (!%p2019_p11), %v1710_v34 }
 0x19e   : > { %v2103_v43 = vpop.f32.mrb[24].mxu1 }
 0x19f   : > { %v2097_v42 = vpop.f32.mrb[12].mxu0  ;;  %v2104_v45 = vpop.f32.mrb[25].mxu1 }
 0x1a0   : > { %v2098_v44 = vpop.f32.mrb[13].mxu0  ;;  %v2105_v47 = vadd.f32 %v2104_v45, %v2103_v43  ;;  %v2106_v49 = vpop.f32.mrb[26].mxu1 }
 0x1a1   : > { %v2099_v46 = vadd.f32 %v2098_v44, %v2097_v42  ;;  %v2100_v48 = vpop.f32.mrb[14].mxu0  ;;  %v2107_v53 = vpop.f32.mrb[27].mxu1 }
 0x1a2   : > { %v2101_v52 = vpop.f32.mrb[15].mxu0  ;;  %v1641_v55 = vadd.f32 %v2105_v47, %v1593_v41 }
 0x1a3   : > { %v1633_v54 = vadd.f32 %v2099_v46, %v1585_v21  ;;  %v2102_v56 = vadd.f32 %v2101_v52, %v2100_v48  ;;  %1667 = sbr.rel (%p2019_p11) target bundleno = 438 (0x1b6), region = 63 }
 0x1a4   : > { %v1654_v59 = vadd.f32 %v1641_v55, %v328_v51 }
 0x1a5   : > { %v1648_v58 = vadd.f32 %v1633_v54, %v322_v50  ;;  %v1636_v60 = vadd.f32 %v2102_v56, %v1588_v26  ;;  %v1704_v26 = vmax.f32 (!%p2019_p11), %v1695_v17, 0.0 }
 0x1a6   : > { %1663 = vst [vmem:[#allocation2 + $0x40] sm:$0xff] %v1654_v59 }
 0x1a7   : > { %1657 = vst [vmem:[#allocation2 + $0x10] sm:$0xff] %v1648_v58  ;;  %v1651_v62 = vadd.f32 %v1636_v60, %v325_v57  ;;  %1713 = vst [vmem:[%s2738_s3 + $0x8] sm:$0xff] (!%p2019_p11), %v1704_v26 }
 0x1a9   : > { %1660 = vst [vmem:[#allocation2 + $0x28] sm:$0xff] %v1651_v62 }
 0x1ad   : > { %v1676_v24 = vld [vmem:[#allocation2 + $0x40] sm:$0xff] }
 0x1ae   : > { %v1670_v7 = vld [vmem:[#allocation2 + $0x10] sm:$0xff]  ;;  %v1702_v14 = vadd.f32 %v1690_v12, %v1676_v24 }
 0x1af   : > { %v1696_v18 = vadd.f32 %v1690_v12, %v1670_v7 }
 0x1b0   : > { %v1673_v13 = vld [vmem:[#allocation2 + $0x28] sm:$0xff]  ;;  %v1711_v27 = vmax.f32 %v1702_v14, 0.0 }
 0x1b1   : > { %v1699_v21 = vadd.f32 %v1690_v12, %v1673_v13  ;;  %v1705_v28 = vmax.f32 %v1696_v18, 0.0 }
 0x1b2   : > { %1720 = vst [vmem:[%s2738_s3 + $0x40] sm:$0xff] %v1711_v27 }
 0x1b3   : > { %v1708_v32 = vmax.f32 %v1699_v21, 0.0  ;;  %1714 = vst [vmem:[%s2738_s3 + $0x10] sm:$0xff] %v1705_v28 }
 0x1b5   : > { %1717 = vst [vmem:[%s2738_s3 + $0x28] sm:$0xff] %v1708_v32 }
 0x1b6 PF: > { %s13_s16 = sadd.s32 1, %s2422_s16   ;;  %s2739_s12 = smov %s2410_s13 }
 0x1b7   : > { %p10_p12 = scmp.ge.s32.totalorder %s13_s16, 5   ;;  %s2740_s13 = smov %s2480_s20 }
 0x1b8   : > { %s2741_s14 = smov %s2418_s15  ;;  %s2742_s15 = smov %s2744_s17 }
 0x1b9   :  { %12 = sbr.rel (!%p10_p12) target bundleno = 3 (0x3), region = 104 }

// kernel: squeeze.11
= control target key start
LH: loop header
LB: loop body
LE: loop exit
PB: predicated region body
PF: predicated region fallthrough
CT: control target
= control target key end

     0   :  { %v403_v20 = vmov 0.0   ;;  %s483_s0 = inlined_call_operand.vmem [shape: bf16[1,18,384], index: 0, kind: input, shape index: {}]   ;;  %s484_s1 = inlined_call_operand.vmem [shape: bf16[2,3,3,384], index: 1, kind: output, shape index: {}]  }
   0x1   :  { %v358_v0 = vld [vmem:[%s483_s0 + $0x20] sm:$0xf]  ;;  %v399_v1 = vld [vmem:[%s483_s0 + $0x18] sm:$0xff]   ;;  %v400_v2 = vld [vmem:[%s483_s0 + $0x10] sm:$0xff]  }
   0x2   :  { %v17_v3 = vunpack.c.l.bf16 %v358_v0  ;;  %v385_v4 = vunpack.c.l.bf16 %v399_v1  ;;  %v386_v5 = vunpack.c.h.bf16 %v399_v1  ;;  %v389_v6 = vunpack.c.l.bf16 %v400_v2  ;;  %v401_v7 = vld [vmem:[%s483_s0 + $0x8] sm:$0xff]   ;;  %v396_v8 = vld [vmem:[%s483_s0] sm:$0xff]  }
   0x3   :  { %v390_v9 = vunpack.c.h.bf16 %v400_v2  ;;  %v393_v10 = vunpack.c.l.bf16 %v401_v7  ;;  %v394_v11 = vunpack.c.h.bf16 %v401_v7  ;;  %v397_v12 = vunpack.c.l.bf16 %v396_v8 }
   0x4   :  { %20 = vst [vmem:[#allocation1 + $0x40] sm:$0xff] %v17_v3  ;;  %36 = vst [vmem:[#allocation1 + $0x38] sm:$0xff] %v386_v5  ;;  %v398_v13 = vunpack.c.h.bf16 %v396_v8 }
   0x5   :  { %52 = vst [vmem:[#allocation1 + $0x30] sm:$0xff] %v385_v4  ;;  %180 = vst [vmem:[#allocation0 + $0x3a] ss:$22 sm:$0x3] %v389_v6  }
   0x6   :  { %182 = vst [vmem:[#allocation0 + $0x4f] ss:$25 sps:$4 sm:$0x7c] %v389_v6   ;;  %186 = vst [vmem:[#allocation0 + $0x79] sm:$0x80] %v389_v6  }
   0x7   :  { %146 = vst [vmem:[#allocation0] ss:$46 sps:$4 sm:$0xc7] %v397_v12   ;;  %148 = vst [vmem:[#allocation0 + $0x15] sm:$0x38] %v397_v12  }
   0x8   :  { %162 = vst [vmem:[#allocation0 + $0x10] ss:$46 sps:$4 sm:$0xc7] %v393_v10   ;;  %164 = vst [vmem:[#allocation0 + $0x25] sm:$0x38] %v393_v10  }
   0x9   :  { %170 = vst [vmem:[#allocation0 + $0x32] ss:$22 sm:$0x3] %v394_v11   ;;  %172 = vst [vmem:[#allocation0 + $0x47] ss:$25 sps:$4 sm:$0x7c] %v394_v11  }
   0xa   :  { %176 = vst [vmem:[#allocation0 + $0x71] sm:$0x80] %v394_v11   ;;  %190 = vst [vmem:[#allocation0 + $0x42] ss:$22 sm:$0x3] %v390_v9  }
   0xb   :  { %192 = vst [vmem:[#allocation0 + $0x57] ss:$25 sps:$4 sm:$0x7c] %v390_v9   ;;  %196 = vst [vmem:[#allocation0 + $0x81] sm:$0x80] %v390_v9  }
   0xc   :  { %154 = vst [vmem:[#allocation0 + $0x8] ss:$46 sps:$4 sm:$0xc7] %v398_v13   ;;  %156 = vst [vmem:[#allocation0 + $0x1d] sm:$0x38] %v398_v13  }
   0xd   :  { %v198_v14 = vld [vmem:[#allocation1 + $0x30] sm:$0x3]   ;;  %v202_v15 = vld [vmem:[#allocation1 + $0x38] sm:$0x3]   ;;  %v206_v16 = vld [vmem:[#allocation1 + $0x40] sm:$0x3]  }
   0xe   :  { %200 = vst [vmem:[#allocation0 + $0x79] sm:$0x3] %v198_v14   ;;  %204 = vst [vmem:[#allocation0 + $0x81] sm:$0x3] %v202_v15   ;;  %v213_v17 = vld [vmem:[#allocation0] sm:$0xf] }
   0xf   :  { %208 = vst [vmem:[#allocation0 + $0x89] sm:$0x3] %v206_v16   ;;  %v224_v18 = vld [vmem:[#allocation0 + $0x10] sm:$0xf]  ;;  %v231_v19 = vld [vmem:[#allocation0 + $0x18] sm:$0xf]  ;;  %v214_v21 = vpack.c.bf16 %v403_v20, %v213_v17 }
  0x10   :  { %v225_v23 = vpack.c.bf16 %v403_v20, %v224_v18  ;;  %v232_v24 = vpack.c.bf16 %v403_v20, %v231_v19  ;;  %v245_v26 = vld [vmem:[#allocation0 + $0x28] sm:$0xf]  ;;  %v252_v30 = vld [vmem:[#allocation0 + $0x30] sm:$0xf]  ;;  %v294_v42 = vld [vmem:[#allocation0 + $0x60] sm:$0xf] }
  0x11   :  { %v246_v29 = vpack.c.bf16 %v403_v20, %v245_v26  ;;  %v266_v32 = vld [vmem:[#allocation0 + $0x40] sm:$0xf]  ;;  %216 = vst [vmem:[%s484_s1] sm:$0x3] %v214_v21  ;;  %v253_v33 = vpack.c.bf16 %v403_v20, %v252_v30  ;;  %v273_v36 = vld [vmem:[#allocation0 + $0x48] sm:$0xf]  ;;  %v295_v45 = vpack.c.bf16 %v403_v20, %v294_v42 }
  0x12   :  { %367 = vst [vmem:[%s484_s1 + $0x4] sm:$0x3] %v225_v23  ;;  %368 = vst [vmem:[%s484_s1 + $0x6] sm:$0x3] %v232_v24  ;;  %v267_v35 = vpack.c.bf16 %v403_v20, %v266_v32  ;;  %v280_v37 = vld [vmem:[#allocation0 + $0x50] sm:$0xf]  ;;  %v274_v39 = vpack.c.bf16 %v403_v20, %v273_v36 }
  0x13   :  { %v218_v22 = vld [vmem:[#allocation0 + $0x8] sm:$0xf]  ;;  %v238_v25 = vld [vmem:[#allocation0 + $0x20] sm:$0xf]  ;;  %v259_v31 = vld [vmem:[#allocation0 + $0x38] sm:$0xf]  ;;  %v281_v40 = vpack.c.bf16 %v403_v20, %v280_v37 }
  0x14   :  { %v219_v27 = vpack.c.bf16 %v403_v20, %v218_v22  ;;  %v239_v28 = vpack.c.bf16 %v403_v20, %v238_v25  ;;  %v260_v34 = vpack.c.bf16 %v403_v20, %v259_v31  ;;  %v287_v38 = vld [vmem:[#allocation0 + $0x58] sm:$0xf]  ;;  %370 = vst [vmem:[%s484_s1 + $0xa] sm:$0x3] %v246_v29  ;;  %v301_v43 = vld [vmem:[#allocation0 + $0x68] sm:$0xf] }
  0x15   :  { %v288_v41 = vpack.c.bf16 %v403_v20, %v287_v38  ;;  %v308_v44 = vld [vmem:[#allocation0 + $0x70] sm:$0xf]  ;;  %371 = vst [vmem:[%s484_s1 + $0xc] sm:$0x3] %v253_v33  ;;  %373 = vst [vmem:[%s484_s1 + $0x10] sm:$0x3] %v267_v35  ;;  %v302_v46 = vpack.c.bf16 %v403_v20, %v301_v43 }
  0x16   :  { %366 = vst [vmem:[%s484_s1 + $0x2] sm:$0x3] %v219_v27  ;;  %369 = vst [vmem:[%s484_s1 + $0x8] sm:$0x3] %v239_v28  ;;  %v309_v47 = vpack.c.bf16 %v403_v20, %v308_v44  ;;  %v315_v48 = vld [vmem:[#allocation0 + $0x78] sm:$0xf] }
  0x17   :  { %372 = vst [vmem:[%s484_s1 + $0xe] sm:$0x3] %v260_v34  ;;  %374 = vst [vmem:[%s484_s1 + $0x12] sm:$0x3] %v274_v39  ;;  %v322_v49 = vld [vmem:[#allocation0 + $0x80] sm:$0xf]  ;;  %v316_v51 = vpack.c.bf16 %v403_v20, %v315_v48 }
  0x18   :  { %375 = vst [vmem:[%s484_s1 + $0x14] sm:$0x3] %v281_v40  ;;  %376 = vst [vmem:[%s484_s1 + $0x16] sm:$0x3] %v288_v41  ;;  %v329_v50 = vld [vmem:[#allocation0 + $0x88] sm:$0xf]  ;;  %v323_v52 = vpack.c.bf16 %v403_v20, %v322_v49 }
  0x19   :  { %377 = vst [vmem:[%s484_s1 + $0x18] sm:$0x3] %v295_v45  ;;  %378 = vst [vmem:[%s484_s1 + $0x1a] sm:$0x3] %v302_v46  ;;  %v330_v53 = vpack.c.bf16 %v403_v20, %v329_v50 }
  0x1a   :  { %379 = vst [vmem:[%s484_s1 + $0x1c] sm:$0x3] %v309_v47  ;;  %380 = vst [vmem:[%s484_s1 + $0x1e] sm:$0x3] %v316_v51 }
  0x1b   :  { %381 = vst [vmem:[%s484_s1 + $0x20] sm:$0x3] %v323_v52  ;;  %382 = vst [vmem:[%s484_s1 + $0x22] sm:$0x3] %v330_v53 }

// kernel: _lambda_.15
= control target key start
LH: loop header
LB: loop body
LE: loop exit
PB: predicated region body
PF: predicated region fallthrough
CT: control target
= control target key end

     0   :  { %s1964_s12 = smov 0   ;;  %s1966_s13 = smov 0   ;;  %s2200_s0 = inlined_call_operand.vmem [shape: bf16[2,24,1792], index: 0, kind: input, shape index: {}]   ;;  %s2201_s1 = inlined_call_operand.vmem [shape: bf16[2,1792,256], index: 1, kind: input, shape index: {}]   ;;  %s2202_s2 = inlined_call_operand.vmem [shape: f32[2,1,256], index: 2, kind: input, shape index: {}]   ;;  %s2203_s3 = inlined_call_operand.vmem [shape: f32[2,24,256], index: 3, kind: output, shape index: {}]  }
   0x1   :  { %s1968_s14 = smov 0   ;;  %s1970_s15 = smov 0  }
   0x2   :  { %s1972_s16 = smov 0   ;;  %s1974_s17 = smov 0  }
   0x3   :  { %s1976_s18 = smov 0  }
   0x4 LB: > { %s25_s19 = sadd.s32 1, %s1932_s16  ;;  %s32_s20 = sadd.s32 1, %s1936_s17  ;;  %s1940_s18 = sphi %s1976_s18, %s13_s18   ;;  %s1936_s17 = sphi %s1974_s17, %s2209_s17   ;;  %s1932_s16 = sphi %s1972_s16, %s2208_s16   ;;  %s1928_s15 = sphi %s1970_s15, %s2207_s15   ;;  %s1924_s14 = sphi %s1968_s14, %s2206_s14   ;;  %s1920_s13 = sphi %s1966_s13, %s2205_s13   ;;  %s1916_s12 = sphi %s1964_s12, %s2204_s12  }
   0x5   : > { %p26_p0 = scmp.ge.s32.totalorder %s25_s19, 2  ;;  %p50_p1 = scmp.ne.s32.totalorder %s1920_s13, %s1916_s12 }
   0x6   : > { %p51_p2 = scmp.eq.s32.totalorder %s1940_s18, 0  ;;  %s43_s24 = sadd.s32 1, %s1920_s13 }
   0x7   : > { %s2211_s19 = smov (%p26_p0, %s25_s19), 0  ;;  %s2213_s20 = smov (!%p26_p0, %s32_s20), %s1936_s17 }
   0x8   : > { %p52_p3 = por %p51_p2, %p50_p1  ;;  %p34_p4 = scmp.ge.s32.totalorder %s2213_s20, 2 }
   0x9   : > { %s39_s21 = ssub.s32 %s1932_s16, %s2211_s19  ;;  %p1483_p6 = scmp.ge.s32.totalorder %s1940_s18, 4 }
   0xa   : > { %s2215_s20 = smov (%p34_p4, %s2213_s20), 0 }
   0xb   : > { %s36_s22 = ssub.s32 %s1936_s17, %s2215_s20  ;;  %158 = sbr.rel (%p1483_p6) target bundleno = 33 (0x21), region = 16 }
   0xc   : > { %s40_s23 = sor.u32 %s39_s21, %s36_s22 }
   0xd   : > { %p41_p5 = scmp.eq.s32.totalorder %s40_s23, 0 }
   0xf   : > { %s2015_s25 = scalar_select %p41_p5, %s1920_s13, %s43_s24  }
  0x12   : > { %161 = sbr.rel (!%p52_p3) target bundleno = 33 (0x21), region = 20  ;;  %s163_s26 = sand.u32 (%p52_p3), 1, %s1920_s13  }
  0x13   : > { %s167_s27 = smul.u32 (%p52_p3), 7, %s1932_s16 }
  0x14   : > { %s1638_s28 = smul.u32 (%p52_p3), 84, %s163_s26 }
  0x15   : > { %s1639_s29 = smul.u32 (%p52_p3), 42, %s1936_s17 }
  0x16   : > { %s165_s8 = scalar_lea.vmem (%p52_p3), [#allocation3], %s1638_s28 }
  0x17   : > { %s171_s30 = sadd.s32 (%p52_p3), %s1639_s29, %s167_s27 }
  0x18   : > { %s1484_s4 = sshll.u32 (%p52_p3), %s171_s30, 2 }
  0x19   : > { %s173_s7 = scalar_lea.vmem %s2200_s0, %s1484_s4 }
  0x1a   : > { %v188_v0 = vld [vmem:[%s173_s7] sm:$0xff]  ;;  %v190_v1 = vld [vmem:[%s173_s7 + $0x8] sm:$0xff]  ;;  %v192_v2 = vld [vmem:[%s173_s7 + $0x10] sm:$0xff] }
  0x1b   : > { %189 = vst [vmem:[%s165_s8] sm:$0xff] %v188_v0  ;;  %191 = vst [vmem:[%s165_s8 + $0x8] sm:$0xff] %v190_v1  ;;  %v194_v3 = vld [vmem:[%s173_s7 + $0x38] sm:$0xff]  ;;  %v196_v4 = vld [vmem:[%s173_s7 + $0x40] sm:$0xff] }
  0x1c   : > { %193 = vst [vmem:[%s165_s8 + $0x10] sm:$0xff] %v192_v2  ;;  %v198_v5 = vld [vmem:[%s173_s7 + $0x48] sm:$0xff]  ;;  %195 = vst [vmem:[%s165_s8 + $0x1c] sm:$0xff] %v194_v3  ;;  %v200_v6 = vld [vmem:[%s173_s7 + $0x70] sm:$0xff] }
  0x1d   : > { %197 = vst [vmem:[%s165_s8 + $0x24] sm:$0xff] %v196_v4  ;;  %199 = vst [vmem:[%s165_s8 + $0x2c] sm:$0xff] %v198_v5  ;;  %v202_v7 = vld [vmem:[%s173_s7 + $0x78] sm:$0xff]  ;;  %v204_v8 = vld [vmem:[%s173_s7 + $0x80] sm:$0xff] }
  0x1e   : > { %201 = vst [vmem:[%s165_s8 + $0x38] sm:$0xff] %v200_v6  ;;  %203 = vst [vmem:[%s165_s8 + $0x40] sm:$0xff] %v202_v7  ;;  %v1485_v9 = vld [vmem:[%s173_s7 + $0x18] sm:$0xf]  ;;  %v1487_v10 = vld [vmem:[%s173_s7 + $0x50] sm:$0xf] }
  0x1f   : > { %205 = vst [vmem:[%s165_s8 + $0x48] sm:$0xff] %v204_v8  ;;  %v1489_v11 = vld [vmem:[%s173_s7 + $0x88] sm:$0xf]  ;;  %1486 = vst [vmem:[%s165_s8 + $0x18] sm:$0xf] %v1485_v9 }
  0x20   : > { %1488 = vst [vmem:[%s165_s8 + $0x34] sm:$0xf] %v1487_v10  ;;  %1490 = vst [vmem:[%s165_s8 + $0x50] sm:$0xf] %v1489_v11 }
  0x21 PF: > { %p1491_p7 = scmp.ge.s32.totalorder %s1940_s18, 1  ;;  %p244_p8 = scmp.lt.s32.totalorder %s1940_s18, 5 }
  0x23   : > { %p245_p9 = pnand %p1491_p7, %p244_p8 }
  0x24   : > { %s251_s9 = sand.u32 (!%p245_p9), 1, %s1916_s12   ;;  %s295_s10 = smul.u32 (!%p245_p9), 112, %s1924_s14 }
  0x25   : > { %248 = sbr.rel (%p245_p9) target bundleno = 426 (0x1aa), region = 54  ;;  %p296_p10 = scmp.lt.s32.totalorder (!%p245_p9), %s1928_s15, 1 }
  0x26   : > { %s1640_s11 = smul.u32 (!%p245_p9), 84, %s251_s9  ;;  %p298_p11 = scmp.lt.s32.totalorder (!%p245_p9), %s295_s10, 223 }
  0x27   : > { %p1496_p12 = scmp.ne.s32.totalorder (!%p245_p9), %s1924_s14, 0 }
  0x28   : > { %s2045_s9 = scalar_lea.vmem (!%p245_p9), [#allocation3], %s1640_s11 }
  0x2c   : > { %s2217_s15 = smov (!%p296_p10, %s1928_s15), 1  ;;  %s2219_s10 = smov (!%p298_p11, %s295_s10), 223 }
  0x2d   : > { %s1641_s21 = smul.u32 448, %s2217_s15  ;;  %s1494_s22 = sshll.u32 %s2217_s15, 1  ;;  %v1942_v12 = vmov (!%p1496_p12), 0.0  }
  0x2e   : > { %s1492_s23 = sshll.u32 %s2219_s10, 1  ;;  %s2033_s27 = scalar_lea.vmem %s2202_s2, %s1494_s22  ;;  %326 = vst [vmem:[#allocation2] sm:$0xff] (!%p1496_p12), %v1942_v12  ;;  %327 = vst [vmem:[#allocation2 + $0x8] sm:$0xff] (!%p1496_p12), %v1942_v12 }
  0x2f   : > { %s302_s28 = sadd.s32 %s1641_s21, %s1492_s23  ;;  %s1642_s29 = smul.u32 48, %s2217_s15  ;;  %328 = vst [vmem:[#allocation2 + $0x10] sm:$0xff] (!%p1496_p12), %v1942_v12  ;;  %329 = vst [vmem:[#allocation2 + $0x18] sm:$0xff] (!%p1496_p12), %v1942_v12 }
  0x30   : > { %s1493_s30 = sshll.u32 %s302_s28, 2  ;;  %325 = sbr.rel (%p1496_p12) target bundleno = 55 (0x37), region = 62  ;;  %330 = vst [vmem:[#allocation2 + $0x20] sm:$0xff] (!%p1496_p12), %v1942_v12  ;;  %331 = vst [vmem:[#allocation2 + $0x28] sm:$0xff] (!%p1496_p12), %v1942_v12 }
  0x31   : > { %s2038_s12 = scalar_lea.vmem %s2201_s1, %s1493_s30  ;;  %s2043_s8 = scalar_lea.vmem %s2203_s3, %s1642_s29 }
  0x37 PF: > { %v1701_v13 = vld [vmem:[%s2038_s12 + $0x4] ss:$8 sps:$4 sm:$0xff]   ;;  %v1703_v14 = vld [vmem:[%s2038_s12] ss:$8 sps:$4 sm:$0xff]   ;;  %v1707_v17 = vld [vmem:[%s2038_s12 + $0x14] ss:$8 sps:$4 sm:$0xff]  }
  0x38   : > { %1083 = vmatprep.subr.bf16.mxu1 %v1701_v13  ;;  %v1704_v15 = vld [vmem:[%s2038_s12 + $0x204] ss:$8 sps:$4 sm:$0xff]   ;;  %v1706_v16 = vld [vmem:[%s2038_s12 + $0x200] ss:$8 sps:$4 sm:$0xff]   ;;  %v1709_v18 = vld [vmem:[%s2038_s12 + $0x10] ss:$8 sps:$4 sm:$0xff]  }
  0x39   : > { %1084 = vmatpush1.bf16.msra.mxu1 %v1703_v14  ;;  %1185 = vmatprep.subr.bf16.mxu0 %v1704_v15  ;;  %v1710_v19 = vld [vmem:[%s2038_s12 + $0x214] ss:$8 sps:$4 sm:$0xff]   ;;  %v1712_v20 = vld [vmem:[%s2038_s12 + $0x210] ss:$8 sps:$4 sm:$0xff]   ;;  %v1713_v21 = vld [vmem:[%s2038_s12 + $0x24] ss:$8 sps:$4 sm:$0xff]  }
  0x3a   : > { %1186 = vmatpush1.bf16.msra.mxu0 %v1706_v16  ;;  %1085 = vmatprep.subr.bf16.mxu1 %v1707_v17  ;;  %v1715_v22 = vld [vmem:[%s2038_s12 + $0x20] ss:$8 sps:$4 sm:$0xff]   ;;  %v1716_v23 = vld [vmem:[%s2038_s12 + $0x224] ss:$8 sps:$4 sm:$0xff]   ;;  %v1719_v24 = vld [vmem:[%s2038_s12 + $0x34] ss:$8 sps:$4 sm:$0xff]  }
  0x3b   : > { %1187 = vmatprep.subr.bf16.mxu0 %v1710_v19  ;;  %v1718_v25 = vld [vmem:[%s2038_s12 + $0x220] ss:$8 sps:$4 sm:$0xff]   ;;  %v1722_v26 = vld [vmem:[%s2038_s12 + $0x234] ss:$8 sps:$4 sm:$0xff]   ;;  %v1721_v27 = vld [vmem:[%s2038_s12 + $0x30] ss:$8 sps:$4 sm:$0xff]  }
  0x3c   : > { %v1725_v28 = vld [vmem:[%s2038_s12 + $0x44] ss:$8 sps:$4 sm:$0xff]   ;;  %v1724_v29 = vld [vmem:[%s2038_s12 + $0x230] ss:$8 sps:$4 sm:$0xff]   ;;  %v1727_v31 = vld [vmem:[%s2038_s12 + $0x40] ss:$8 sps:$4 sm:$0xff]  }
  0x3d   : > { %1086 = vmatpush1.bf16.msra.mxu1 %v1709_v18  ;;  %v1728_v30 = vld [vmem:[%s2038_s12 + $0x244] ss:$8 sps:$4 sm:$0xff]   ;;  %v1731_v32 = vld [vmem:[%s2038_s12 + $0x54] ss:$8 sps:$4 sm:$0xff]   ;;  %v1730_v33 = vld [vmem:[%s2038_s12 + $0x240] ss:$8 sps:$4 sm:$0xff]  }
  0x3e   : > { %1087 = vmatprep.subr.bf16.mxu1 %v1713_v21  ;;  %1188 = vmatpush1.bf16.msra.mxu0 %v1712_v20  ;;  %v1734_v34 = vld [vmem:[%s2038_s12 + $0x254] ss:$8 sps:$4 sm:$0xff]   ;;  %v1733_v35 = vld [vmem:[%s2038_s12 + $0x50] ss:$8 sps:$4 sm:$0xff]   ;;  %v1737_v36 = vld [vmem:[%s2038_s12 + $0x64] ss:$8 sps:$4 sm:$0xff]  }
  0x3f   : > { %1189 = vmatprep.subr.bf16.mxu0 %v1716_v23  ;;  %v1736_v37 = vld [vmem:[%s2038_s12 + $0x250] ss:$8 sps:$4 sm:$0xff]   ;;  %v1740_v38 = vld [vmem:[%s2038_s12 + $0x264] ss:$8 sps:$4 sm:$0xff]   ;;  %v1739_v39 = vld [vmem:[%s2038_s12 + $0x60] ss:$8 sps:$4 sm:$0xff]  }
  0x40   : > { %v1743_v40 = vld [vmem:[%s2038_s12 + $0x74] ss:$8 sps:$4 sm:$0xff]   ;;  %v1742_v41 = vld [vmem:[%s2038_s12 + $0x260] ss:$8 sps:$4 sm:$0xff]   ;;  %v1745_v43 = vld [vmem:[%s2038_s12 + $0x70] ss:$8 sps:$4 sm:$0xff]  }
  0x41   : > { %1088 = vmatpush1.bf16.msra.mxu1 %v1715_v22  ;;  %v1746_v42 = vld [vmem:[%s2038_s12 + $0x274] ss:$8 sps:$4 sm:$0xff]   ;;  %v1749_v44 = vld [vmem:[%s2038_s12 + $0x84] ss:$8 sps:$4 sm:$0xff]   ;;  %v1748_v45 = vld [vmem:[%s2038_s12 + $0x270] ss:$8 sps:$4 sm:$0xff]  }
  0x42   : > { %1089 = vmatprep.subr.bf16.mxu1 %v1719_v24  ;;  %1190 = vmatpush1.bf16.msra.mxu0 %v1718_v25  ;;  %v1752_v46 = vld [vmem:[%s2038_s12 + $0x284] ss:$8 sps:$4 sm:$0xff]   ;;  %v1751_v47 = vld [vmem:[%s2038_s12 + $0x80] ss:$8 sps:$4 sm:$0xff]   ;;  %v1755_v48 = vld [vmem:[%s2038_s12 + $0x94] ss:$8 sps:$4 sm:$0xff]  }
  0x43   : > { %1191 = vmatprep.subr.bf16.mxu0 %v1722_v26  ;;  %v1754_v49 = vld [vmem:[%s2038_s12 + $0x280] ss:$8 sps:$4 sm:$0xff]   ;;  %v1758_v50 = vld [vmem:[%s2038_s12 + $0x294] ss:$8 sps:$4 sm:$0xff]   ;;  %v1757_v51 = vld [vmem:[%s2038_s12 + $0x90] ss:$8 sps:$4 sm:$0xff]  }
  0x44   : > { %v1761_v52 = vld [vmem:[%s2038_s12 + $0xa4] ss:$8 sps:$4 sm:$0xff]   ;;  %v1760_v53 = vld [vmem:[%s2038_s12 + $0x290] ss:$8 sps:$4 sm:$0xff]   ;;  %v1763_v55 = vld [vmem:[%s2038_s12 + $0xa0] ss:$8 sps:$4 sm:$0xff]  }
  0x45   : > { %1090 = vmatpush1.bf16.msra.mxu1 %v1721_v27  ;;  %v1764_v54 = vld [vmem:[%s2038_s12 + $0x2a4] ss:$8 sps:$4 sm:$0xff]   ;;  %v1767_v56 = vld [vmem:[%s2038_s12 + $0xb4] ss:$8 sps:$4 sm:$0xff]   ;;  %v1766_v57 = vld [vmem:[%s2038_s12 + $0x2a0] ss:$8 sps:$4 sm:$0xff]  }
  0x46   : > { %1091 = vmatprep.subr.bf16.mxu1 %v1725_v28  ;;  %1192 = vmatpush1.bf16.msra.mxu0 %v1724_v29  ;;  %v1770_v58 = vld [vmem:[%s2038_s12 + $0x2b4] ss:$8 sps:$4 sm:$0xff]   ;;  %v1769_v59 = vld [vmem:[%s2038_s12 + $0xb0] ss:$8 sps:$4 sm:$0xff]   ;;  %v1773_v61 = vld [vmem:[%s2038_s12 + $0xc4] ss:$8 sps:$4 sm:$0xff]  }
  0x47   : > { %1193 = vmatprep.subr.bf16.mxu0 %v1728_v30  ;;  %v1799_v60 = vld [vmem:[%s2045_s9 + $0x4] ss:$28 sps:$4 sm:$0xff]   ;;  %v1805_v0 = vld [vmem:[%s2045_s9 + $0x14] ss:$28 sps:$4 sm:$0xff]   ;;  %v348_v19 = vld [vmem:[%s2045_s9 + $0x48] sm:$0xff]  ;;  %p1623_p13 = scmp.ne.s32.totalorder %s1924_s14, 1 }
  0x48   : > { %v1772_v62 = vld [vmem:[%s2038_s12 + $0x2b0] ss:$8 sps:$4 sm:$0xff]   ;;  %1115 = vmatprep.mubr.bf16.mxu1 %v1799_v60  ;;  %v1776_v63 = vld [vmem:[%s2038_s12 + $0x2c4] ss:$8 sps:$4 sm:$0xff]   ;;  %v1775_v1 = vld [vmem:[%s2038_s12 + $0xc0] ss:$8 sps:$4 sm:$0xff]   ;;  %1217 = vmatprep.mubr.bf16.mxu0 %v1805_v0  ;;  %v1509_v23 = vcombine.high %v348_v19, %v348_v19 }
  0x49   : > { %1092 = vmatpush1.bf16.msra.mxu1 %v1727_v31  ;;  %v1779_v2 = vld [vmem:[%s2038_s12 + $0xd4] ss:$8 sps:$4 sm:$0xff]   ;;  %v1778_v3 = vld [vmem:[%s2038_s12 + $0x2c0] ss:$8 sps:$4 sm:$0xff]   ;;  %v1781_v5 = vld [vmem:[%s2038_s12 + $0xd0] ss:$8 sps:$4 sm:$0xff]   ;;  %v1508_v31 = vcombine.low %v348_v19, %v348_v19 }
  0x4a   : > { %1093 = vmatprep.subr.bf16.mxu1 %v1731_v32  ;;  %1194 = vmatpush1.bf16.msra.mxu0 %v1730_v33  ;;  %v1782_v4 = vld [vmem:[%s2038_s12 + $0x2d4] ss:$8 sps:$4 sm:$0xff]   ;;  %v1785_v6 = vld [vmem:[%s2038_s12 + $0xe4] ss:$8 sps:$4 sm:$0xff]   ;;  %v1784_v7 = vld [vmem:[%s2038_s12 + $0x2d0] ss:$8 sps:$4 sm:$0xff]  }
  0x4b   : > { %1195 = vmatprep.subr.bf16.mxu0 %v1734_v34  ;;  %v1788_v8 = vld [vmem:[%s2038_s12 + $0x2e4] ss:$8 sps:$4 sm:$0xff]   ;;  %v1787_v9 = vld [vmem:[%s2038_s12 + $0xe0] ss:$8 sps:$4 sm:$0xff]   ;;  %v1791_v10 = vld [vmem:[%s2038_s12 + $0xf4] ss:$8 sps:$4 sm:$0xff]  }
  0x4c   : > { %v1790_v11 = vld [vmem:[%s2038_s12 + $0x2e0] ss:$8 sps:$4 sm:$0xff]   ;;  %v1794_v12 = vld [vmem:[%s2038_s12 + $0x2f4] ss:$8 sps:$4 sm:$0xff]   ;;  %v1793_v13 = vld [vmem:[%s2038_s12 + $0xf0] ss:$8 sps:$4 sm:$0xff]  }
  0x4d   : > { %1094 = vmatpush1.bf16.msra.mxu1 %v1733_v35  ;;  %v1796_v14 = vld [vmem:[%s2038_s12 + $0x2f0] ss:$8 sps:$4 sm:$0xff]   ;;  %v1802_v15 = vld [vmem:[%s2038_s12 + $0x104] ss:$8 sps:$4 sm:$0xff]   ;;  %v1800_v17 = vld [vmem:[%s2038_s12 + $0x100] ss:$8 sps:$4 sm:$0xff]  }
  0x4e   : > { %1095 = vmatprep.subr.bf16.mxu1 %v1737_v36  ;;  %1196 = vmatpush1.bf16.msra.mxu0 %v1736_v37  ;;  %v1797_v16 = vld [vmem:[%s2045_s9] ss:$28 sps:$4 sm:$0xff]   ;;  %v1803_v20 = vld [vmem:[%s2045_s9 + $0x10] ss:$28 sps:$4 sm:$0xff]  }
  0x4f   : > { %1197 = vmatprep.subr.bf16.mxu0 %v1740_v38  ;;  %v1808_v18 = vld [vmem:[%s2038_s12 + $0x304] ss:$8 sps:$4 sm:$0xff]   ;;  %v1811_v21 = vld [vmem:[%s2038_s12 + $0x114] ss:$8 sps:$4 sm:$0xff]   ;;  %v1806_v22 = vld [vmem:[%s2038_s12 + $0x300] ss:$8 sps:$4 sm:$0xff]  }
  0x50   : > { %v1814_v24 = vld [vmem:[%s2038_s12 + $0x314] ss:$8 sps:$4 sm:$0xff]   ;;  %v1809_v25 = vld [vmem:[%s2038_s12 + $0x110] ss:$8 sps:$4 sm:$0xff]   ;;  %v1817_v26 = vld [vmem:[%s2038_s12 + $0x124] ss:$8 sps:$4 sm:$0xff]  }
  0x51   : > { %1096 = vmatpush1.bf16.msra.mxu1 %v1739_v39  ;;  %v1812_v27 = vld [vmem:[%s2038_s12 + $0x310] ss:$8 sps:$4 sm:$0xff]   ;;  %v1820_v28 = vld [vmem:[%s2038_s12 + $0x324] ss:$8 sps:$4 sm:$0xff]   ;;  %v1815_v29 = vld [vmem:[%s2038_s12 + $0x120] ss:$8 sps:$4 sm:$0xff]  }
  0x52   : > { %1097 = vmatprep.subr.bf16.mxu1 %v1743_v40  ;;  %1198 = vmatpush1.bf16.msra.mxu0 %v1742_v41  ;;  %v1823_v30 = vld [vmem:[%s2038_s12 + $0x134] ss:$8 sps:$4 sm:$0xff]   ;;  %v1818_v32 = vld [vmem:[%s2038_s12 + $0x320] ss:$8 sps:$4 sm:$0xff]   ;;  %v1821_v35 = vld [vmem:[%s2038_s12 + $0x130] ss:$8 sps:$4 sm:$0xff]  }
  0x53   : > { %1199 = vmatprep.subr.bf16.mxu0 %v1746_v42  ;;  %v1826_v33 = vld [vmem:[%s2038_s12 + $0x334] ss:$8 sps:$4 sm:$0xff]   ;;  %v1829_v37 = vld [vmem:[%s2038_s12 + $0x144] ss:$8 sps:$4 sm:$0xff]   ;;  %v1824_v39 = vld [vmem:[%s2038_s12 + $0x330] ss:$8 sps:$4 sm:$0xff]  }
  0x54   : > { %v346_v34 = vld [vmem:[%s2045_s9 + $0x38] sm:$0xff]  ;;  %v1943_v40 = vmov 0  }
  0x55   : > { %1098 = vmatpush1.bf16.msra.mxu1 %v1745_v43  ;;  %v1505_v36 = vcombine.high %v346_v34, %v346_v34  ;;  %v1504_v38 = vcombine.low %v346_v34, %v346_v34  ;;  %v1832_v41 = vld [vmem:[%s2038_s12 + $0x344] ss:$8 sps:$4 sm:$0xff]   ;;  %v1827_v42 = vld [vmem:[%s2038_s12 + $0x140] ss:$8 sps:$4 sm:$0xff]   ;;  %v1835_v43 = vld [vmem:[%s2038_s12 + $0x154] ss:$8 sps:$4 sm:$0xff]  }
  0x56   : > { %1099 = vmatprep.subr.bf16.mxu1 %v1749_v44  ;;  %1200 = vmatpush1.bf16.msra.mxu0 %v1748_v45  ;;  %v1882_v44 = vld [vmem:[%s2045_s9 + $0xc] ss:$28 sps:$4 sm:$0xff]   ;;  %v1830_v45 = vld [vmem:[%s2038_s12 + $0x340] ss:$8 sps:$4 sm:$0xff]  }
  0x57   : > { %1201 = vmatprep.subr.bf16.mxu0 %v1752_v46  ;;  %v1838_v46 = vld [vmem:[%s2038_s12 + $0x354] ss:$8 sps:$4 sm:$0xff]   ;;  %v333_v34 = vld [vmem:[#allocation2 + $0x8] sm:$0xff] }
  0x58   : > { %v1859_v60 = vld [vmem:[%s2038_s12 + $0x194] ss:$8 sps:$4 sm:$0xff]  }
  0x59   : > { %1100 = vmatpush1.bf16.msra.mxu1 %v1751_v47  ;;  %v1833_v47 = vld [vmem:[%s2038_s12 + $0x150] ss:$8 sps:$4 sm:$0xff]   ;;  %v1865_v0 = vld [vmem:[%s2038_s12 + $0x1b4] ss:$8 sps:$4 sm:$0xff]  }
  0x5a   : > { %1101 = vmatprep.subr.bf16.mxu1 %v1755_v48  ;;  %1202 = vmatpush1.bf16.msra.mxu0 %v1754_v49  ;;  %v1841_v48 = vld [vmem:[%s2038_s12 + $0x164] ss:$8 sps:$4 sm:$0xff]   ;;  %v1836_v49 = vld [vmem:[%s2038_s12 + $0x350] ss:$8 sps:$4 sm:$0xff]  }
  0x5b   : > { %1203 = vmatprep.subr.bf16.mxu0 %v1758_v50  ;;  %v1846_v50 = vld [vmem:[%s2038_s12 + $0x364] ss:$8 sps:$4 sm:$0xff]  }
  0x5d   : > { %1102 = vmatpush1.bf16.msra.mxu1 %v1757_v51  ;;  %v1839_v51 = vld [vmem:[%s2038_s12 + $0x160] ss:$8 sps:$4 sm:$0xff]  }
  0x5e   : > { %1103 = vmatprep.subr.bf16.mxu1 %v1761_v52  ;;  %1204 = vmatpush1.bf16.msra.mxu0 %v1760_v53  ;;  %v1849_v52 = vld [vmem:[%s2038_s12 + $0x174] ss:$8 sps:$4 sm:$0xff]   ;;  %v1844_v53 = vld [vmem:[%s2038_s12 + $0x360] ss:$8 sps:$4 sm:$0xff]  }
  0x5f   : > { %1205 = vmatprep.subr.bf16.mxu0 %v1764_v54  ;;  %v1852_v54 = vld [vmem:[%s2038_s12 + $0x374] ss:$8 sps:$4 sm:$0xff]  }
  0x61   : > { %1104 = vmatpush1.bf16.msra.mxu1 %v1763_v55  ;;  %v1847_v55 = vld [vmem:[%s2038_s12 + $0x170] ss:$8 sps:$4 sm:$0xff]  }
  0x62   : > { %1105 = vmatprep.subr.bf16.mxu1 %v1767_v56  ;;  %1206 = vmatpush1.bf16.msra.mxu0 %v1766_v57  ;;  %v1855_v56 = vld [vmem:[%s2038_s12 + $0x184] ss:$8 sps:$4 sm:$0xff]   ;;  %v1850_v57 = vld [vmem:[%s2038_s12 + $0x370] ss:$8 sps:$4 sm:$0xff]  }
  0x63   : > { %1207 = vmatprep.subr.bf16.mxu0 %v1770_v58  ;;  %v1853_v58 = vld [vmem:[%s2038_s12 + $0x180] ss:$8 sps:$4 sm:$0xff]  }
  0x65   : > { %1106 = vmatpush1.bf16.msra.mxu1 %v1769_v59  ;;  %v1856_v59 = vld [vmem:[%s2045_s9 + $0x18] ss:$28 sps:$4 sm:$0xff]  }
  0x66   : > { %1107 = vmatprep.subr.bf16.mxu1 %v1773_v61  ;;  %1208 = vmatpush1.bf16.msra.mxu0 %v1772_v62  ;;  %v1857_v61 = vld [vmem:[%s2038_s12 + $0x190] ss:$8 sps:$4 sm:$0xff]   ;;  %v1862_v62 = vld [vmem:[%s2038_s12 + $0x1a4] ss:$8 sps:$4 sm:$0xff]  }
  0x67   : > { %1209 = vmatprep.subr.bf16.mxu0 %v1776_v63  ;;  %v1860_v63 = vld [vmem:[%s2038_s12 + $0x1a0] ss:$8 sps:$4 sm:$0xff]  }
  0x69   : > { %1108 = vmatpush1.bf16.msra.mxu1 %v1775_v1  ;;  %v1885_v1 = vld [vmem:[%s2045_s9 + $0x50] ss:$0 sps:$4 sm:$0xff]  }
  0x6a   : > { %1109 = vmatprep.subr.bf16.mxu1 %v1779_v2  ;;  %1210 = vmatpush1.bf16.msra.mxu0 %v1778_v3  ;;  %v1863_v2 = vld [vmem:[%s2038_s12 + $0x1b0] ss:$8 sps:$4 sm:$0xff]   ;;  %v1868_v3 = vld [vmem:[%s2038_s12 + $0x1c4] ss:$8 sps:$4 sm:$0xff]  }
  0x6b   : > { %1211 = vmatprep.subr.bf16.mxu0 %v1782_v4  ;;  %v1866_v4 = vld [vmem:[%s2038_s12 + $0x1c0] ss:$8 sps:$4 sm:$0xff]  }
  0x6d   : > { %1110 = vmatpush1.bf16.msra.mxu1 %v1781_v5  ;;  %v1872_v5 = vld [vmem:[%s2038_s12 + $0x1d4] ss:$8 sps:$4 sm:$0xff]  }
  0x6e   : > { %1111 = vmatprep.subr.bf16.mxu1 %v1785_v6  ;;  %1212 = vmatpush1.bf16.msra.mxu0 %v1784_v7  ;;  %v1870_v6 = vld [vmem:[%s2038_s12 + $0x1d0] ss:$8 sps:$4 sm:$0xff]   ;;  %v1876_v7 = vld [vmem:[%s2038_s12 + $0x1e4] ss:$8 sps:$4 sm:$0xff]  }
  0x6f   : > { %1213 = vmatprep.subr.bf16.mxu0 %v1788_v8  ;;  %v1874_v8 = vld [vmem:[%s2038_s12 + $0x1e0] ss:$8 sps:$4 sm:$0xff]  }
  0x71   : > { %1112 = vmatpush1.bf16.msra.mxu1 %v1787_v9  ;;  %v1879_v9 = vld [vmem:[%s2038_s12 + $0x1f4] ss:$8 sps:$4 sm:$0xff]  }
  0x72   : > { %1113 = vmatprep.subr.bf16.mxu1 %v1791_v10  ;;  %1214 = vmatpush1.bf16.msra.mxu0 %v1790_v11  ;;  %v1877_v10 = vld [vmem:[%s2038_s12 + $0x1f0] ss:$8 sps:$4 sm:$0xff]  }
  0x73   : > { %1215 = vmatprep.subr.bf16.mxu0 %v1794_v12  ;;  %v347_v11 = vld [vmem:[%s2045_s9 + $0x40] sm:$0xff] }
  0x74   : > { %v1880_v12 = vld [vmem:[%s2045_s9 + $0x8] ss:$28 sps:$4 sm:$0xff]  }
  0x75   : > { %1114 = vmatpush1.bf16.msra.mxu1 %v1793_v13  ;;  %v1507_v13 = vcombine.high %v347_v11, %v347_v11 }
  0x76   : > { %1134 = vmatprep.subr.bf16.mxu1 %v1802_v15  ;;  %1216 = vmatpush1.bf16.msra.mxu0 %v1796_v14  ;;  %v1506_v14 = vcombine.low %v347_v11, %v347_v11 }
  0x77   : > { %1236 = vmatprep.subr.bf16.mxu0 %v1808_v18 }
  0x78   : > { %1116 = vmatmul.mubr.bf16.vlgmr.msra.gmra.mrb[0].mxu1 %v1797_v16 }
  0x79   : > { %1135 = vmatpush1.bf16.msra.mxu1 %v1800_v17  ;;  %1218 = vmatmul.mubr.bf16.vlgmr.msra.gmra.mrb[0].mxu0 %v1803_v20 }
  0x7a   : > { %1136 = vmatprep.subr.bf16.mxu1 %v1811_v21  ;;  %1237 = vmatpush1.bf16.msra.mxu0 %v1806_v22 }
  0x7b   : > { %1227 = vmatprep.mubr.bf16.mxu0 %v1509_v23  ;;  %1238 = vmatprep.subr.bf16.mxu0 %v1814_v24 }
  0x7c   : > { %1125 = vmatprep.mubr.bf16.mxu1 %v1505_v36 }
  0x7d   : > { %1137 = vmatpush1.bf16.msra.mxu1 %v1809_v25 }
  0x7e   : > { %1138 = vmatprep.subr.bf16.mxu1 %v1817_v26  ;;  %1239 = vmatpush1.bf16.msra.mxu0 %v1812_v27 }
  0x7f   : > { %1240 = vmatprep.subr.bf16.mxu0 %v1820_v28 }
  0x80   : > { %1126 = vmatmul.mubr.bf16.gmra.mrb[4].mxu1 %v1504_v38 }
  0x81   : > { %1139 = vmatpush1.bf16.msra.mxu1 %v1815_v29  ;;  %1228 = vmatmul.mubr.bf16.gmra.mrb[4].mxu0 %v1508_v31  ;;  %v332_v31 = vld [vmem:[#allocation2] sm:$0xff] }
  0x82   : > { %1140 = vmatprep.subr.bf16.mxu1 %v1823_v30  ;;  %1241 = vmatpush1.bf16.msra.mxu0 %v1818_v32 }
  0x83   : > { %1268 = vmatprep.mubr.bf16.mxu0 %v1943_v40  ;;  %1242 = vmatprep.subr.bf16.mxu0 %v1826_v33 }
  0x84   : > { %1166 = vmatprep.mubr.bf16.mxu1 %v1882_v44 }
  0x85   : > { %1141 = vmatpush1.bf16.msra.mxu1 %v1821_v35 }
  0x86   : > { %1142 = vmatprep.subr.bf16.mxu1 %v1829_v37  ;;  %1243 = vmatpush1.bf16.msra.mxu0 %v1824_v39  ;;  %v334_v37 = vld [vmem:[#allocation2 + $0x10] sm:$0xff] }
  0x87   : > { %1244 = vmatprep.subr.bf16.mxu0 %v1832_v41  ;;  %v335_v41 = vld [vmem:[#allocation2 + $0x18] sm:$0xff] }
  0x89   : > { %1143 = vmatpush1.bf16.msra.mxu1 %v1827_v42 }
  0x8a   : > { %1144 = vmatprep.subr.bf16.mxu1 %v1835_v43  ;;  %1245 = vmatpush1.bf16.msra.mxu0 %v1830_v45 }
  0x8b   : > { %1246 = vmatprep.subr.bf16.mxu0 %v1838_v46 }
  0x8d   : > { %1145 = vmatpush1.bf16.msra.mxu1 %v1833_v47 }
  0x8e   : > { %1146 = vmatprep.subr.bf16.mxu1 %v1841_v48  ;;  %1247 = vmatpush1.bf16.msra.mxu0 %v1836_v49 }
  0x8f   : > { %1248 = vmatprep.subr.bf16.mxu0 %v1846_v50 }
  0x91   : > { %1147 = vmatpush1.bf16.msra.mxu1 %v1839_v51 }
  0x92   : > { %1148 = vmatprep.subr.bf16.mxu1 %v1849_v52  ;;  %1249 = vmatpush1.bf16.msra.mxu0 %v1844_v53 }
  0x93   : > { %1250 = vmatprep.subr.bf16.mxu0 %v1852_v54  ;;  %v336_v54 = vld [vmem:[#allocation2 + $0x20] sm:$0xff] }
  0x95   : > { %1149 = vmatpush1.bf16.msra.mxu1 %v1847_v55 }
  0x96   : > { %1150 = vmatprep.subr.bf16.mxu1 %v1855_v56  ;;  %1251 = vmatpush1.bf16.msra.mxu0 %v1850_v57  ;;  %v337_v57 = vld [vmem:[#allocation2 + $0x28] sm:$0xff] }
  0x99   : > { %1151 = vmatpush1.bf16.msra.mxu1 %v1853_v58  ;;  %1269 = vmatmul.mubr.bf16.vlgmr.msra.gmra.mrb[0].mxu0 %v1856_v59 }
  0x9a   : > { %1152 = vmatprep.subr.bf16.mxu1 %v1859_v60  ;;  %1278 = vmatprep.mubr.bf16.mxu0 %v1943_v40 }
  0x9d   : > { %1153 = vmatpush1.bf16.msra.mxu1 %v1857_v61  ;;  %v1311_v61 = vlaneseq (!%p1623_p13) }
  0x9e   : > { %1154 = vmatprep.subr.bf16.mxu1 %v1862_v62 }
  0x9f   : > { %v1312_v62 = vshrl.u32 (!%p1623_p13), %v1311_v61, 7 }
  0xa1   : > { %1155 = vmatpush1.bf16.msra.mxu1 %v1860_v63  ;;  %1279 = vmatmul.mubr.bf16.gmra.mrb[8].mxu0 %v1885_v1  ;;  %v1309_v63 = vld [vmem:[%s2033_s27] sm:$0x3] (!%p1623_p13)  ;;  %v1313_v1 = vsub.s32 (!%p1623_p13), 0, %v1312_v62 }
  0xa2   : > { %1156 = vmatprep.subr.bf16.mxu1 %v1865_v0 }
  0xa5   : > { %1157 = vmatpush1.bf16.msra.mxu1 %v1863_v2  ;;  %v1317_v2 = vsub.s32 (!%p1623_p13), 1, %v1312_v62 }
  0xa6   : > { %1158 = vmatprep.subr.bf16.mxu1 %v1868_v3 }
  0xa9   : > { %1159 = vmatpush1.bf16.msra.mxu1 %v1866_v4 }
  0xaa   : > { %1160 = vmatprep.subr.bf16.mxu1 %v1872_v5 }
  0xad   : > { %1161 = vmatpush1.bf16.msra.mxu1 %v1870_v6  ;;  %v1314_v6 = vrot.slane (!%p1623_p13), %v1309_v63, %v1313_v1 }
  0xae   : > { %1162 = vmatprep.subr.bf16.mxu1 %v1876_v7  ;;  %v1318_v7 = vrot.slane (!%p1623_p13), %v1309_v63, %v1317_v2 }
  0xb1   : > { %1163 = vmatpush1.bf16.msra.mxu1 %v1874_v8 }
  0xb2   : > { %1164 = vmatprep.subr.bf16.mxu1 %v1879_v9 }
  0xb5   : > { %1165 = vmatpush1.bf16.msra.mxu1 %v1877_v10 }
  0xb8   : > { %1167 = vmatmul.mubr.bf16.vlgmr.msra.gmra.mrb[0].mxu1 %v1880_v12 }
  0xb9   : > { %1176 = vmatprep.mubr.bf16.mxu1 %v1507_v13 }
  0xc0   : > { %1177 = vmatmul.mubr.bf16.gmra.mrb[8].mxu1 %v1506_v14 }
 0x153   : > { %v1127_v19 = vpop.f32.mrb[4].mxu1 }
 0x154   : > { %v1229_v15 = vpop.f32.mrb[4].mxu0  ;;  %v1129_v20 = vpop.f32.mrb[5].mxu1 }
 0x155   : > { %v1231_v16 = vpop.f32.mrb[5].mxu0  ;;  %v1131_v21 = vpop.f32.mrb[6].mxu1 }
 0x156   : > { %v1233_v17 = vpop.f32.mrb[6].mxu0  ;;  %v1132_v22 = vpop.f32.mrb[7].mxu1 }
 0x157   : > { %v1234_v18 = vpop.f32.mrb[7].mxu0 }
 0x16c   : > { %v1270_v23 = vpop.f32.mrb[0].mxu0 }
 0x16d   : > { %v1272_v24 = vpop.f32.mrb[1].mxu0 }
 0x16e   : > { %v1274_v25 = vpop.f32.mrb[2].mxu0 }
 0x16f   : > { %v1276_v26 = vpop.f32.mrb[3].mxu0 }
 0x174   : > { %v1280_v27 = vpop.f32.mrb[8].mxu0 }
 0x175   : > { %v1282_v28 = vpop.f32.mrb[9].mxu0 }
 0x176   : > { %v1284_v29 = vpop.f32.mrb[10].mxu0 }
 0x177   : > { %v1285_v30 = vpop.f32.mrb[11].mxu0 }
 0x18b   : > { %v1168_v32 = vpop.f32.mrb[0].mxu1 }
 0x18c   : > { %v1626_v33 = vadd.f32 %v1270_v23, %v1168_v32  ;;  %v1170_v35 = vpop.f32.mrb[1].mxu1 }
 0x18d   : > { %v1627_v36 = vadd.f32 %v1272_v24, %v1170_v35  ;;  %v1172_v38 = vpop.f32.mrb[2].mxu1 }
 0x18e   : > { %v1287_v39 = vadd.f32 %v1626_v33, %v332_v31  ;;  %v1628_v40 = vadd.f32 %v1274_v25, %v1172_v38  ;;  %v1174_v42 = vpop.f32.mrb[3].mxu1 }
 0x18f   : > { %v1288_v43 = vadd.f32 %v1627_v36, %v333_v34  ;;  %v1629_v44 = vadd.f32 %v1276_v26, %v1174_v42 }
 0x190   : > { %1293 = vst [vmem:[#allocation2] sm:$0xff] %v1287_v39  ;;  %v1289_v45 = vadd.f32 %v1628_v40, %v334_v37 }
 0x191   : > { %1294 = vst [vmem:[#allocation2 + $0x8] sm:$0xff] %v1288_v43  ;;  %v1290_v46 = vadd.f32 %v1629_v44, %v335_v41 }
 0x192   : > { %1295 = vst [vmem:[#allocation2 + $0x10] sm:$0xff] %v1289_v45 }
 0x193   : > { %1296 = vst [vmem:[#allocation2 + $0x18] sm:$0xff] %v1290_v46  ;;  %v1178_v47 = vpop.f32.mrb[8].mxu1 }
 0x194   : > { %v1179_v48 = vadd.f32 %v1178_v47, %v1127_v19  ;;  %v1180_v49 = vpop.f32.mrb[9].mxu1 }
 0x195   : > { %v1181_v50 = vadd.f32 %v1180_v49, %v1129_v20  ;;  %v1182_v51 = vpop.f32.mrb[10].mxu1 }
 0x196   : > { %v1230_v52 = vadd.f32 %v1229_v15, %v1179_v48  ;;  %v1183_v53 = vpop.f32.mrb[11].mxu1 }
 0x197   : > { %v1232_v55 = vadd.f32 %v1231_v16, %v1181_v50  ;;  %1302 = sbr.rel (%p1623_p13) target bundleno = 426 (0x1aa), region = 66  ;;  %v1303_v0 = vld [vmem:[#allocation2] sm:$0xff] (!%p1623_p13) }
 0x198   : > { %v1281_v56 = vadd.f32 %v1280_v27, %v1230_v52  ;;  %v1304_v3 = vld [vmem:[#allocation2 + $0x8] sm:$0xff] (!%p1623_p13)  ;;  %v1321_v10 = vadd.f32 (!%p1623_p13), %v1314_v6, %v1303_v0 }
 0x199   : > { %v1283_v58 = vadd.f32 %v1282_v28, %v1232_v55  ;;  %v1305_v4 = vld [vmem:[#allocation2 + $0x10] sm:$0xff] (!%p1623_p13)  ;;  %v1322_v11 = vadd.f32 (!%p1623_p13), %v1318_v7, %v1304_v3 }
 0x19a   : > { %v1291_v59 = vadd.f32 %v1281_v56, %v336_v54  ;;  %v1306_v5 = vld [vmem:[#allocation2 + $0x18] sm:$0xff] (!%p1623_p13)  ;;  %v1323_v12 = vadd.f32 (!%p1623_p13), %v1314_v6, %v1305_v4  ;;  %v1327_v16 = vmax.f32 (!%p1623_p13), %v1321_v10, 0.0 }
 0x19b   : > { %v1292_v60 = vadd.f32 %v1283_v58, %v337_v57  ;;  %v1324_v13 = vadd.f32 (!%p1623_p13), %v1318_v7, %v1306_v5  ;;  %v1328_v17 = vmax.f32 (!%p1623_p13), %v1322_v11, 0.0 }
 0x19c   : > { %1297 = vst [vmem:[#allocation2 + $0x20] sm:$0xff] %v1291_v59  ;;  %v1329_v18 = vmax.f32 (!%p1623_p13), %v1323_v12, 0.0  ;;  %1333 = vst [vmem:[%s2043_s8] sm:$0xff] (!%p1623_p13), %v1327_v16 }
 0x19d   : > { %1298 = vst [vmem:[#allocation2 + $0x28] sm:$0xff] %v1292_v60  ;;  %v1330_v19 = vmax.f32 (!%p1623_p13), %v1324_v13, 0.0  ;;  %1334 = vst [vmem:[%s2043_s8 + $0x8] sm:$0xff] (!%p1623_p13), %v1328_v17 }
 0x19e   : > { %1335 = vst [vmem:[%s2043_s8 + $0x10] sm:$0xff] %v1329_v18 }
 0x19f   : > { %1336 = vst [vmem:[%s2043_s8 + $0x18] sm:$0xff] %v1330_v19 }
 0x1a3   : > { %v1307_v8 = vld [vmem:[#allocation2 + $0x20] sm:$0xff] }
 0x1a4   : > { %v1308_v9 = vld [vmem:[#allocation2 + $0x28] sm:$0xff]  ;;  %v1325_v14 = vadd.f32 %v1314_v6, %v1307_v8 }
 0x1a5   : > { %v1326_v15 = vadd.f32 %v1318_v7, %v1308_v9 }
 0x1a6   : > { %v1331_v20 = vmax.f32 %v1325_v14, 0.0 }
 0x1a7   : > { %v1332_v21 = vmax.f32 %v1326_v15, 0.0 }
 0x1a8   : > { %1337 = vst [vmem:[%s2043_s8 + $0x20] sm:$0xff] %v1331_v20 }
 0x1a9   : > { %1338 = vst [vmem:[%s2043_s8 + $0x28] sm:$0xff] %v1332_v21 }
 0x1aa PF: > { %s13_s18 = sadd.s32 1, %s1940_s18   ;;  %s2204_s12 = smov %s1920_s13 }
 0x1ab   : > { %p10_p0 = scmp.ge.s32.totalorder %s13_s18, 6   ;;  %s2205_s13 = smov %s2015_s25 }
 0x1ac   : > { %s2206_s14 = smov %s1932_s16  ;;  %s2207_s15 = smov %s1936_s17 }
 0x1ad   : > { %s2208_s16 = smov %s2211_s19  ;;  %s2209_s17 = smov %s2215_s20 }
 0x1ae   :  { %12 = sbr.rel (!%p10_p0) target bundleno = 4 (0x4), region = 113 }

// kernel: _lambda_.17
= control target key start
LH: loop header
LB: loop body
LE: loop exit
PB: predicated region body
PF: predicated region fallthrough
CT: control target
= control target key end

     0   :  { %6 = vsyncpa [#allocation3], 0  ;;  %s468_s0 = inlined_call_operand.vmem [shape: f32[2,3,3,256], index: 0, kind: input, shape index: {}]   ;;  %s469_s1 = inlined_call_operand.hbm [shape: f32[2,1,1,256], index: 1, kind: output, shape index: {}]  }
   0x1   :  { %8 = vsyncpa [#allocation3 + $0x1], 0  ;;  %s368_s6 = smov 0   ;;  %s370_s7 = smov 0  }
   0x2   :  { %s372_s8 = smov 0   ;;  %s374_s9 = smov 0  }
   0x3 LB: > { %s389_s10 = sadd.s32 4294967295, %s354_s9   ;;  %s237_s11 = sadd.s32 4294967294, %s354_s9   ;;  %s354_s9 = sphi %s374_s9, %s475_s9   ;;  %s350_s8 = sphi %s372_s8, %s474_s8   ;;  %s346_s7 = sphi %s370_s7, %s473_s7   ;;  %s342_s6 = sphi %s368_s6, %s472_s6  }
   0x4   : > { %s393_s12 = sadd.s32 1, %s354_s9   ;;  %s47_s13 = sadd.s32 1, %s350_s8 }
   0x5   : > { %s44_s14 = ssub.s32 %s354_s9, %s393_s12  ;;  %p57_p0 = scmp.ne.s32.totalorder %s350_s8, %s346_s7 }
   0x6   : > { %p45_p1 = scmp.eq.s32.totalorder %s44_s14, 0  ;;  %p58_p2 = scmp.eq.s32.totalorder %s389_s10, 1 }
   0x7   : > { %p63_p3 = scmp.ne.s32.totalorder %s346_s7, %s342_s6  ;;  %p64_p4 = scmp.eq.s32.totalorder %s237_s11, 1 }
   0x8   : > { %s404_s15 = scalar_select %p45_p1, %s350_s8, %s47_s13  }
   0x9   : > { %p406_p5 = por %p58_p2, %p57_p0  ;;  %p410_p6 = por %p64_p4, %p63_p3 }
   0xa   : > { %p240_p7 = scmp.ge.s32.totalorder %s354_s9, 1  ;;  %p90_p8 = scmp.lt.s32.totalorder %s354_s9, 3 }
   0xc   : > { %p91_p9 = pnand %p240_p7, %p90_p8 }
   0xd   : > { %p110_p10 = scmp.lt.s32.totalorder (!%p91_p9), %s389_s10, 1  ;;  %vm125_vm0 = vcmask (!%p91_p9), 1042432   ;;  %v356_v13 = vmov (!%p91_p9), 1966171168   ;;  %v146_v15 = vlaneseq (!%p91_p9)  ;;  %s107_s23 = sand.u32 (!%p91_p9), 1, %s346_s7  }
   0xe   : > { %94 = sbr.rel (%p91_p9) target bundleno = 66 (0x42), region = 24  ;;  %v144_v14 = vunpack.c.l.s4 (!%p91_p9), %v356_v13  ;;  %s241_s24 = sshll.u32 (!%p91_p9), %s107_s23, 1 }
   0xf   : > { %v147_v21 = vshrl.u32 (!%p91_p9), %v146_v15, 7  ;;  %s109_s25 = scalar_lea.vmem (!%p91_p9), [#allocation2], %s241_s24  ;;  %s250_s27 = sshll.u32 (!%p91_p9), %s389_s10, 5  ;;  %vm160_vm1 = vcmp.lt.s32.totalorder (!%p91_p9), %v146_v15, 256 }
  0x10   : > { %v145_v20 = vunpack.c.0.s8 (!%p91_p9), %v144_v14  ;;  %s178_s26 = sshll.u32 (!%p91_p9), %s109_s25, 4  ;;  %s428_s30 = scalar_lea.hbm (!%p91_p9), %s469_s1, %s250_s27  ;;  %s423_s26 = int_to_ptr.vmem [resolvable:$true] %s178_s26 }
  0x11   : > { %s164_s2 = scalar_lea.sflag (!%p91_p9), [#allocation3], %s107_s23  ;;  %s292_s3 = scalar_lea.vmem (!%p91_p9), %s423_s26, 32 }
  0x12   : > { %v148_v25 = vsub.s32 (!%p91_p9), %v145_v20, %v147_v21  ;;  %p293_p11 = scmp.ne.s32.totalorder (!%p91_p9), %s423_s26, %s292_s3  ;;  %s357_s4 = smov (!%p91_p9), [#allocation2]  }
  0x13   : > { %s296_s5 = sshll.u32 (!%p91_p9), %s357_s4, 4  ;;  %s297_s5 = int_to_ptr.vmem [resolvable:$false] %s296_s5 }
  0x14   : > { %p294_p12 = pnand (!%p91_p9), %p293_p11, %p406_p5  ;;  %p299_p0 = scmp.lt.s32.totalorder (!%p91_p9), %s423_s26, %s297_s5 }
  0x15   : > { %s111_s18 = scalar_select %p110_p10, %s389_s10, 1 }
  0x16   : > { %p295_p13 = pneg %p294_p12  ;;  %s298_s10 = scalar_lea.vmem %s297_s5, 64 }
  0x17   : > { %s251_s19 = smul.u32 24, %s111_s18  ;;  %p300_p1 = scmp.lt.s32.totalorder %s298_s10, %s292_s3 }
  0x19   : > { %s114_s22 = scalar_lea.vmem %s468_s0, %s251_s19  ;;  %p301_p2 = por %p300_p1, %p299_p0 }
  0x1a   : > { %v115_v0 = vld [vmem:[%s114_s22] sm:$0x77]  ;;  %v243_v1 = vld [vmem:[%s114_s22 + $0x8] sm:$0x77]  ;;  %v244_v2 = vld [vmem:[%s114_s22 + $0x10] sm:$0x77] }
  0x1b   : > { %v118_v3 = vmax.f32 %v115_v0, %v243_v1  ;;  %p302_p3 = pnand %p301_p2, %p295_p13 }
  0x1d   : > { %v121_v4 = vmax.f32 %v118_v3, %v244_v2 }
  0x1f   : > { %v123_v5 = vcombine.high %v121_v4, %v121_v4  ;;  %v126_v6 = vsel %vm125_vm0, %v121_v4, -inf }
  0x20   : > { %v127_v7 = vrot.slane %v126_v6, 4 }
  0x21   : > { %v133_v8 = vsel %vm125_vm0, %v123_v5, -inf }
  0x22   : > { %v128_v9 = vmax.f32 %v126_v6, %v127_v7  ;;  %v134_v10 = vrot.slane %v133_v8, 4 }
  0x24   : > { %v129_v11 = vrot.slane %v128_v9, 2  ;;  %v135_v12 = vmax.f32 %v133_v8, %v134_v10 }
  0x26   : > { %v130_v16 = vmax.f32 %v128_v9, %v129_v11  ;;  %v136_v17 = vrot.slane %v135_v12, 2 }
  0x28   : > { %v131_v18 = vrot.slane %v130_v16, 1  ;;  %v137_v19 = vmax.f32 %v135_v12, %v136_v17 }
  0x2a   : > { %v132_v22 = vmax.f32 %v130_v16, %v131_v18  ;;  %v138_v23 = vrot.slane %v137_v19, 1 }
  0x2c   : > { %v139_v24 = vmax.f32 %v137_v19, %v138_v23 }
  0x2e   : > { %v142_v26 = vcombine.low %v132_v22, %v139_v24 }
  0x30   : > { %v149_v27 = vrot.slane %v142_v26, %v148_v25 }
  0x32   : > { %v156_v28 = vrot.slane %v149_v27, %v148_v25 }
  0x34   : > { %162 = vst.msk [vmem:[%s109_s25] sm:$0x3] %vm160_vm1, %v156_v28 }
  0x35   : > { %305 = shalt.err (!%p302_p3)
}
  0x36   : > { %s306_s11 = scalar_lea.hbm %s428_s30, 32  ;;  %s310_s18 = scalar_lea.hbm %s469_s1, 64 }
  0x37   : > { %p307_p4 = scmp.ne.s32.totalorder %s428_s30, %s306_s11  ;;  %p311_p9 = scmp.lt.u32.totalorder %s428_s30, %s469_s1 }
  0x38   : > { %p312_p10 = scmp.lt.u32.totalorder %s310_s18, %s306_s11  ;;  %p314_p12 = scmp.lt.u32.totalorder %s306_s11, %s428_s30 }
  0x39   : > { %p308_p7 = pnand %p307_p4, %p406_p5 }
  0x3a   : > { %p313_p11 = por %p312_p10, %p311_p9 }
  0x3b   : > { %p309_p8 = pneg %p308_p7 }
  0x3c   : > { %p315_p13 = por %p314_p12, %p313_p11 }
  0x3e   : > { %p316_p0 = pnand %p315_p13, %p309_p8 }
  0x40   : > { %319 = shalt.err (!%p316_p0)
}
  0x41   : > { %252 = dma.vmem_to_hbm [thread:$0]  (%p406_p5), %s423_s26, 32, %s428_s30, %s164_s2  }
  0x42 PF: > { %p258_p1 = scmp.ge.s32.totalorder %s354_s9, 2  ;;  %s190_s21 = sand.u32 1, %s342_s6  }
  0x43   : > { %s191_s22 = scalar_lea.sflag [#allocation3], %s190_s21 }
  0x44   : > { %p255_p2 = pnand %p258_p1, %p410_p6 }
  0x46   : > { %337 = dma.done.wait (!%p255_p2), %s191_s22, 32  }
  0x47   : > { %339 = vsyncadd (!%p255_p2), %s191_s22, 4294967264  ;;  %p11_p3 = scmp.ge.s32.totalorder %s393_s12, 4   ;;  %s472_s6 = smov %s346_s7 }
  0x48   : > { %s473_s7 = smov %s350_s8  ;;  %s474_s8 = smov %s404_s15 }
  0x49   : > { %s475_s9 = smov %s393_s12  ;;  %13 = sbr.rel (!%p11_p3) target bundleno = 3 (0x3), region = 61 }
  0x50   :  { %196 = vsyncpa [#allocation3], 1 }
  0x51   :  { %198 = vsyncpa [#allocation3 + $0x1], 1 }

// kernel: _lambda_.16
= control target key start
LH: loop header
LB: loop body
LE: loop exit
PB: predicated region body
PF: predicated region fallthrough
CT: control target
= control target key end

     0   :  { %s1610_s12 = smov 0   ;;  %s1612_s13 = smov 0   ;;  %s1794_s0 = inlined_call_operand.vmem [shape: bf16[2,24,1792], index: 0, kind: input, shape index: {}]   ;;  %s1795_s1 = inlined_call_operand.vmem [shape: bf16[2,1792,128], index: 1, kind: input, shape index: {}]   ;;  %s1796_s2 = inlined_call_operand.vmem [shape: f32[2,1,128], index: 2, kind: input, shape index: {}]   ;;  %s1797_s3 = inlined_call_operand.vmem [shape: f32[2,24,128], index: 3, kind: output, shape index: {}]  }
   0x1   :  { %s1614_s14 = smov 0   ;;  %s1616_s15 = smov 0  }
   0x2   :  { %s1618_s16 = smov 0   ;;  %s1620_s17 = smov 0  }
   0x3   :  { %s1622_s18 = smov 0  }
   0x4 LB: > { %s25_s19 = sadd.s32 1, %s1579_s16  ;;  %s32_s20 = sadd.s32 1, %s1583_s17  ;;  %s1587_s18 = sphi %s1622_s18, %s13_s18   ;;  %s1583_s17 = sphi %s1620_s17, %s1803_s17   ;;  %s1579_s16 = sphi %s1618_s16, %s1802_s16   ;;  %s1575_s15 = sphi %s1616_s15, %s1801_s15   ;;  %s1571_s14 = sphi %s1614_s14, %s1800_s14   ;;  %s1567_s13 = sphi %s1612_s13, %s1799_s13   ;;  %s1563_s12 = sphi %s1610_s12, %s1798_s12  }
   0x5   : > { %p26_p0 = scmp.ge.s32.totalorder %s25_s19, 2  ;;  %p50_p1 = scmp.ne.s32.totalorder %s1567_s13, %s1563_s12 }
   0x6   : > { %p51_p2 = scmp.eq.s32.totalorder %s1587_s18, 0  ;;  %s43_s24 = sadd.s32 1, %s1567_s13 }
   0x7   : > { %s1805_s19 = smov (%p26_p0, %s25_s19), 0  ;;  %s1807_s20 = smov (!%p26_p0, %s32_s20), %s1583_s17 }
   0x8   : > { %p52_p3 = por %p51_p2, %p50_p1  ;;  %p34_p4 = scmp.ge.s32.totalorder %s1807_s20, 2 }
   0x9   : > { %s39_s21 = ssub.s32 %s1579_s16, %s1805_s19  ;;  %p1198_p6 = scmp.ge.s32.totalorder %s1587_s18, 4 }
   0xa   : > { %s1809_s20 = smov (%p34_p4, %s1807_s20), 0 }
   0xb   : > { %s36_s22 = ssub.s32 %s1583_s17, %s1809_s20  ;;  %158 = sbr.rel (%p1198_p6) target bundleno = 33 (0x21), region = 16 }
   0xc   : > { %s40_s23 = sor.u32 %s39_s21, %s36_s22 }
   0xd   : > { %p41_p5 = scmp.eq.s32.totalorder %s40_s23, 0 }
   0xf   : > { %s1661_s25 = scalar_select %p41_p5, %s1567_s13, %s43_s24  }
  0x12   : > { %161 = sbr.rel (!%p52_p3) target bundleno = 33 (0x21), region = 20  ;;  %s163_s26 = sand.u32 (%p52_p3), 1, %s1567_s13  }
  0x13   : > { %s167_s27 = smul.u32 (%p52_p3), 7, %s1579_s16 }
  0x14   : > { %s1398_s28 = smul.u32 (%p52_p3), 84, %s163_s26 }
  0x15   : > { %s1399_s29 = smul.u32 (%p52_p3), 42, %s1583_s17 }
  0x16   : > { %s165_s8 = scalar_lea.vmem (%p52_p3), [#allocation3], %s1398_s28 }
  0x17   : > { %s171_s30 = sadd.s32 (%p52_p3), %s1399_s29, %s167_s27 }
  0x18   : > { %s1199_s4 = sshll.u32 (%p52_p3), %s171_s30, 2 }
  0x19   : > { %s173_s7 = scalar_lea.vmem %s1794_s0, %s1199_s4 }
  0x1a   : > { %v188_v0 = vld [vmem:[%s173_s7] sm:$0xff]  ;;  %v190_v1 = vld [vmem:[%s173_s7 + $0x8] sm:$0xff]  ;;  %v192_v2 = vld [vmem:[%s173_s7 + $0x10] sm:$0xff] }
  0x1b   : > { %189 = vst [vmem:[%s165_s8] sm:$0xff] %v188_v0  ;;  %191 = vst [vmem:[%s165_s8 + $0x8] sm:$0xff] %v190_v1  ;;  %v194_v3 = vld [vmem:[%s173_s7 + $0x38] sm:$0xff]  ;;  %v196_v4 = vld [vmem:[%s173_s7 + $0x40] sm:$0xff] }
  0x1c   : > { %193 = vst [vmem:[%s165_s8 + $0x10] sm:$0xff] %v192_v2  ;;  %v198_v5 = vld [vmem:[%s173_s7 + $0x48] sm:$0xff]  ;;  %195 = vst [vmem:[%s165_s8 + $0x1c] sm:$0xff] %v194_v3  ;;  %v200_v6 = vld [vmem:[%s173_s7 + $0x70] sm:$0xff] }
  0x1d   : > { %197 = vst [vmem:[%s165_s8 + $0x24] sm:$0xff] %v196_v4  ;;  %199 = vst [vmem:[%s165_s8 + $0x2c] sm:$0xff] %v198_v5  ;;  %v202_v7 = vld [vmem:[%s173_s7 + $0x78] sm:$0xff]  ;;  %v204_v8 = vld [vmem:[%s173_s7 + $0x80] sm:$0xff] }
  0x1e   : > { %201 = vst [vmem:[%s165_s8 + $0x38] sm:$0xff] %v200_v6  ;;  %203 = vst [vmem:[%s165_s8 + $0x40] sm:$0xff] %v202_v7  ;;  %v1200_v9 = vld [vmem:[%s173_s7 + $0x18] sm:$0xf]  ;;  %v1202_v10 = vld [vmem:[%s173_s7 + $0x50] sm:$0xf] }
  0x1f   : > { %205 = vst [vmem:[%s165_s8 + $0x48] sm:$0xff] %v204_v8  ;;  %v1204_v11 = vld [vmem:[%s173_s7 + $0x88] sm:$0xf]  ;;  %1201 = vst [vmem:[%s165_s8 + $0x18] sm:$0xf] %v1200_v9 }
  0x20   : > { %1203 = vst [vmem:[%s165_s8 + $0x34] sm:$0xf] %v1202_v10  ;;  %1205 = vst [vmem:[%s165_s8 + $0x50] sm:$0xf] %v1204_v11 }
  0x21 PF: > { %p1206_p7 = scmp.ge.s32.totalorder %s1587_s18, 1  ;;  %p242_p8 = scmp.lt.s32.totalorder %s1587_s18, 5 }
  0x23   : > { %p243_p9 = pnand %p1206_p7, %p242_p8 }
  0x24   : > { %s249_s9 = sand.u32 (!%p243_p9), 1, %s1563_s12   ;;  %s290_s10 = smul.u32 (!%p243_p9), 112, %s1571_s14 }
  0x25   : > { %246 = sbr.rel (%p243_p9) target bundleno = 362 (0x16a), region = 54  ;;  %p291_p10 = scmp.lt.s32.totalorder (!%p243_p9), %s1575_s15, 1 }
  0x26   : > { %s1400_s11 = smul.u32 (!%p243_p9), 84, %s249_s9  ;;  %p293_p11 = scmp.lt.s32.totalorder (!%p243_p9), %s290_s10, 223 }
  0x27   : > { %p1209_p12 = scmp.ne.s32.totalorder (!%p243_p9), %s1571_s14, 0 }
  0x28   : > { %s1694_s7 = scalar_lea.vmem (!%p243_p9), [#allocation3], %s1400_s11 }
  0x2c   : > { %s1811_s15 = smov (!%p291_p10, %s1575_s15), 1  ;;  %s1813_s10 = smov (!%p293_p11, %s290_s10), 223 }
  0x2d   : > { %s1401_s21 = smul.u32 224, %s1811_s15  ;;  %s302_s24 = scalar_lea.vmem %s1796_s2, %s1811_s15  ;;  %v1589_v12 = vmov (!%p1209_p12), 0.0  }
  0x2e   : > { %s1402_s26 = smul.u32 24, %s1811_s15  ;;  %318 = vst [vmem:[#allocation2] sm:$0xff] (!%p1209_p12), %v1589_v12  ;;  %319 = vst [vmem:[#allocation2 + $0x8] sm:$0xff] (!%p1209_p12), %v1589_v12 }
  0x2f   : > { %s296_s27 = sadd.s32 %s1401_s21, %s1813_s10  ;;  %317 = sbr.rel (%p1209_p12) target bundleno = 54 (0x36), region = 62  ;;  %320 = vst [vmem:[#allocation2 + $0x10] sm:$0xff] (!%p1209_p12), %v1589_v12 }
  0x30   : > { %s1207_s28 = sshll.u32 %s296_s27, 2  ;;  %s1687_s30 = scalar_lea.vmem %s1797_s3, %s1402_s26 }
  0x31   : > { %s1692_s6 = scalar_lea.vmem %s1795_s1, %s1207_s28 }
  0x36 PF: > { %v1460_v13 = vld [vmem:[%s1692_s6 + $0x40] sm:$0xff]   ;;  %v1464_v17 = vld [vmem:[%s1692_s6 + $0x48] sm:$0xff]   ;;  %v1468_v21 = vld [vmem:[%s1692_s6 + $0x50] sm:$0xff]   ;;  %p1280_p13 = scmp.ne.s32.totalorder %s1571_s14, 1 }
  0x37   : > { %v1461_v14 = vld [vmem:[%s1692_s6 + $0xc0] sm:$0xff]   ;;  %1284 = vmatprep.subr.bf16.mxu0 %v1460_v13  ;;  %v1465_v18 = vld [vmem:[%s1692_s6 + $0xc8] sm:$0xff]   ;;  %v1469_v22 = vld [vmem:[%s1692_s6 + $0xd0] sm:$0xff]  }
  0x38   : > { %v1462_v15 = vld [vmem:[%s1692_s6] sm:$0xff]   ;;  %1312 = vmatprep.subr.bf16.mxu1 %v1461_v14  ;;  %v1466_v19 = vld [vmem:[%s1692_s6 + $0x8] sm:$0xff]   ;;  %v1470_v23 = vld [vmem:[%s1692_s6 + $0x10] sm:$0xff]  }
  0x39   : > { %v1463_v16 = vld [vmem:[%s1692_s6 + $0x80] sm:$0xff]   ;;  %1285 = vmatpush3.bf16.msra.mxu0 %v1462_v15  ;;  %v1467_v20 = vld [vmem:[%s1692_s6 + $0x88] sm:$0xff]   ;;  %v1471_v24 = vld [vmem:[%s1692_s6 + $0x90] sm:$0xff]  }
  0x3a   : > { %1313 = vmatpush3.bf16.msra.mxu1 %v1463_v16  ;;  %1286 = vmatprep.subr.bf16.mxu0 %v1464_v17  ;;  %v1472_v25 = vld [vmem:[%s1692_s6 + $0x58] sm:$0xff]   ;;  %v1476_v29 = vld [vmem:[%s1692_s6 + $0x60] sm:$0xff]   ;;  %v1480_v33 = vld [vmem:[%s1692_s6 + $0x68] sm:$0xff]  }
  0x3b   : > { %1314 = vmatprep.subr.bf16.mxu1 %v1465_v18  ;;  %v1473_v26 = vld [vmem:[%s1692_s6 + $0xd8] sm:$0xff]   ;;  %v1477_v30 = vld [vmem:[%s1692_s6 + $0xe0] sm:$0xff]   ;;  %v1481_v34 = vld [vmem:[%s1692_s6 + $0xe8] sm:$0xff]  }
  0x3c   : > { %v1474_v27 = vld [vmem:[%s1692_s6 + $0x18] sm:$0xff]   ;;  %v1478_v31 = vld [vmem:[%s1692_s6 + $0x20] sm:$0xff]   ;;  %v1482_v35 = vld [vmem:[%s1692_s6 + $0x28] sm:$0xff]  }
  0x3d   : > { %1287 = vmatpush3.bf16.msra.mxu0 %v1466_v19  ;;  %v1475_v28 = vld [vmem:[%s1692_s6 + $0x98] sm:$0xff]   ;;  %v1479_v32 = vld [vmem:[%s1692_s6 + $0xa0] sm:$0xff]   ;;  %v1483_v36 = vld [vmem:[%s1692_s6 + $0xa8] sm:$0xff]  }
  0x3e   : > { %1315 = vmatpush3.bf16.msra.mxu1 %v1467_v20  ;;  %1288 = vmatprep.subr.bf16.mxu0 %v1468_v21  ;;  %v1484_v37 = vld [vmem:[%s1692_s6 + $0x70] sm:$0xff]   ;;  %v1488_v41 = vld [vmem:[%s1692_s6 + $0x78] sm:$0xff]   ;;  %v1498_v49 = vld [vmem:[%s1692_s6 + $0x140] sm:$0xff]  }
  0x3f   : > { %1316 = vmatprep.subr.bf16.mxu1 %v1469_v22  ;;  %v1485_v38 = vld [vmem:[%s1692_s6 + $0xf0] sm:$0xff]   ;;  %v1489_v42 = vld [vmem:[%s1692_s6 + $0xf8] sm:$0xff]   ;;  %v1499_v50 = vld [vmem:[%s1692_s6 + $0x100] sm:$0xff]  }
  0x40   : > { %v1486_v39 = vld [vmem:[%s1692_s6 + $0x30] sm:$0xff]   ;;  %v1490_v43 = vld [vmem:[%s1692_s6 + $0x38] sm:$0xff]   ;;  %v1500_v51 = vld [vmem:[%s1692_s6 + $0x148] sm:$0xff]  }
  0x41   : > { %1289 = vmatpush3.bf16.msra.mxu0 %v1470_v23  ;;  %v1487_v40 = vld [vmem:[%s1692_s6 + $0xb0] sm:$0xff]   ;;  %v1491_v44 = vld [vmem:[%s1692_s6 + $0xb8] sm:$0xff]   ;;  %v1501_v52 = vld [vmem:[%s1692_s6 + $0x180] sm:$0xff]  }
  0x42   : > { %1317 = vmatpush3.bf16.msra.mxu1 %v1471_v24  ;;  %1290 = vmatprep.subr.bf16.mxu0 %v1472_v25  ;;  %v1492_v45 = vld [vmem:[%s1694_s7] ss:$28 sps:$4 sm:$0xff]   ;;  %v1495_v47 = vld [vmem:[%s1694_s7 + $0x8] ss:$28 sps:$4 sm:$0xff]   ;;  %v1527_v13 = vld [vmem:[%s1694_s7 + $0x14] ss:$28 sps:$4 sm:$0xff]  }
  0x43   : > { %1318 = vmatprep.subr.bf16.mxu1 %v1473_v26  ;;  %v1494_v46 = vld [vmem:[%s1694_s7 + $0x4] ss:$28 sps:$4 sm:$0xff]   ;;  %v1497_v48 = vld [vmem:[%s1694_s7 + $0xc] ss:$28 sps:$4 sm:$0xff]   ;;  %v332_v62 = vld [vmem:[%s1694_s7 + $0x38] sm:$0xff] }
  0x44   : > { %877 = vmatprep.mubr.bf16.mxu0 %v1494_v46  ;;  %925 = vmatprep.mubr.bf16.mxu1 %v1497_v48  ;;  %v1502_v53 = vld [vmem:[%s1692_s6 + $0x108] sm:$0xff]   ;;  %v1503_v54 = vld [vmem:[%s1692_s6 + $0x150] sm:$0xff]   ;;  %v1506_v57 = vld [vmem:[%s1692_s6 + $0x158] sm:$0xff]   ;;  %v1218_v0 = vcombine.high %v332_v62, %v332_v62  ;;  %v1217_v1 = vcombine.low %v332_v62, %v332_v62 }
  0x45   : > { %1291 = vmatpush3.bf16.msra.mxu0 %v1474_v27  ;;  %v1504_v55 = vld [vmem:[%s1692_s6 + $0x188] sm:$0xff]   ;;  %v1505_v56 = vld [vmem:[%s1692_s6 + $0x110] sm:$0xff]   ;;  %v1508_v59 = vld [vmem:[%s1692_s6 + $0x118] sm:$0xff]  }
  0x46   : > { %1319 = vmatpush3.bf16.msra.mxu1 %v1475_v28  ;;  %1292 = vmatprep.subr.bf16.mxu0 %v1476_v29  ;;  %v1507_v58 = vld [vmem:[%s1692_s6 + $0x190] sm:$0xff]   ;;  %v1509_v60 = vld [vmem:[%s1692_s6 + $0x160] sm:$0xff]   ;;  %v1510_v61 = vld [vmem:[%s1692_s6 + $0x198] sm:$0xff]  }
  0x47   : > { %1320 = vmatprep.subr.bf16.mxu1 %v1477_v30  ;;  %v1511_v63 = vld [vmem:[%s1692_s6 + $0x120] sm:$0xff]   ;;  %v1513_v3 = vld [vmem:[%s1692_s6 + $0x168] sm:$0xff]   ;;  %v1519_v9 = vld [vmem:[%s1692_s6 + $0x170] sm:$0xff]  }
  0x48   : > { %v1514_v2 = vld [vmem:[%s1692_s6 + $0x1a0] sm:$0xff]   ;;  %v333_v4 = vld [vmem:[%s1694_s7 + $0x40] sm:$0xff]  ;;  %v1530_v20 = vld [vmem:[%s1694_s7 + $0x50] ss:$0 sps:$4 sm:$0xff]  }
  0x49   : > { %1293 = vmatpush3.bf16.msra.mxu0 %v1478_v31  ;;  %v1516_v5 = vld [vmem:[%s1692_s6 + $0x128] sm:$0xff]   ;;  %v1220_v6 = vcombine.high %v333_v4, %v333_v4  ;;  %v1219_v7 = vcombine.low %v333_v4, %v333_v4  ;;  %v1521_v10 = vld [vmem:[%s1692_s6 + $0x130] sm:$0xff]   ;;  %v1522_v12 = vld [vmem:[%s1692_s6 + $0x178] sm:$0xff]  }
  0x4a   : > { %1321 = vmatpush3.bf16.msra.mxu1 %v1479_v32  ;;  %1294 = vmatprep.subr.bf16.mxu0 %v1480_v33  ;;  %v1520_v8 = vld [vmem:[%s1692_s6 + $0x1a8] sm:$0xff]   ;;  %v1523_v11 = vld [vmem:[%s1692_s6 + $0x1b0] sm:$0xff]   ;;  %v1524_v15 = vld [vmem:[%s1692_s6 + $0x138] sm:$0xff]  }
  0x4b   : > { %1322 = vmatprep.subr.bf16.mxu1 %v1481_v34  ;;  %v1529_v14 = vld [vmem:[%s1694_s7 + $0x18] ss:$28 sps:$4 sm:$0xff]   ;;  %v1528_v16 = vld [vmem:[%s1692_s6 + $0x1b8] sm:$0xff]  }
  0x4c   : > { %v334_v17 = vld [vmem:[%s1694_s7 + $0x48] sm:$0xff] }
  0x4d   : > { %1295 = vmatpush3.bf16.msra.mxu0 %v1482_v35  ;;  %v1525_v18 = vld [vmem:[%s1694_s7 + $0x10] ss:$28 sps:$4 sm:$0xff]   ;;  %v1222_v19 = vcombine.high %v334_v17, %v334_v17  ;;  %v1221_v21 = vcombine.low %v334_v17, %v334_v17 }
  0x4e   : > { %1323 = vmatpush3.bf16.msra.mxu1 %v1483_v36  ;;  %1296 = vmatprep.subr.bf16.mxu0 %v1484_v37 }
  0x4f   : > { %1324 = vmatprep.subr.bf16.mxu1 %v1485_v38 }
  0x51   : > { %1297 = vmatpush3.bf16.msra.mxu0 %v1486_v39 }
  0x52   : > { %1325 = vmatpush3.bf16.msra.mxu1 %v1487_v40  ;;  %1298 = vmatprep.subr.bf16.mxu0 %v1488_v41 }
  0x53   : > { %1326 = vmatprep.subr.bf16.mxu1 %v1489_v42 }
  0x55   : > { %1299 = vmatpush3.bf16.msra.mxu0 %v1490_v43 }
  0x56   : > { %1327 = vmatpush3.bf16.msra.mxu1 %v1491_v44  ;;  %1340 = vmatprep.subr.bf16.mxu0 %v1498_v49 }
  0x57   : > { %1378 = vmatprep.subr.bf16.mxu1 %v1501_v52 }
  0x58   : > { %878 = vmatmul.mubr.bf16.vlgmr.msra.gmra.mrb[0].mxu0 %v1492_v45 }
  0x59   : > { %926 = vmatmul.mubr.bf16.vlgmr.msra.gmra.mrb[0].mxu1 %v1495_v47  ;;  %1341 = vmatpush3.bf16.msra.mxu0 %v1499_v50 }
  0x5a   : > { %1342 = vmatprep.subr.bf16.mxu0 %v1500_v51  ;;  %1379 = vmatpush3.bf16.msra.mxu1 %v1501_v52 }
  0x5b   : > { %1380 = vmatprep.subr.bf16.mxu1 %v1504_v55  ;;  %885 = vmatprep.mubr.bf16.mxu0 %v1218_v0 }
  0x5c   : > { %933 = vmatprep.mubr.bf16.mxu1 %v1220_v6 }
  0x5d   : > { %1343 = vmatpush3.bf16.msra.mxu0 %v1502_v53 }
  0x5e   : > { %1344 = vmatprep.subr.bf16.mxu0 %v1503_v54  ;;  %1381 = vmatpush3.bf16.msra.mxu1 %v1504_v55 }
  0x5f   : > { %1382 = vmatprep.subr.bf16.mxu1 %v1507_v58 }
  0x60   : > { %886 = vmatmul.mubr.bf16.gmra.mrb[4].mxu0 %v1217_v1 }
  0x61   : > { %1345 = vmatpush3.bf16.msra.mxu0 %v1505_v56  ;;  %934 = vmatmul.mubr.bf16.gmra.mrb[4].mxu1 %v1219_v7  ;;  %v321_v56 = vld [vmem:[#allocation2] sm:$0xff]  ;;  %v323_v7 = vld [vmem:[#allocation2 + $0x10] sm:$0xff] }
  0x62   : > { %1346 = vmatprep.subr.bf16.mxu0 %v1506_v57  ;;  %1383 = vmatpush3.bf16.msra.mxu1 %v1507_v58 }
  0x63   : > { %1384 = vmatprep.subr.bf16.mxu1 %v1510_v61  ;;  %973 = vmatprep.mubr.bf16.mxu0 %v1527_v13 }
  0x64   : > { %1394 = vmatprep.mubr.bf16.mxu1 %v1529_v14 }
  0x65   : > { %1347 = vmatpush3.bf16.msra.mxu0 %v1508_v59 }
  0x66   : > { %1348 = vmatprep.subr.bf16.mxu0 %v1509_v60  ;;  %1385 = vmatpush3.bf16.msra.mxu1 %v1510_v61  ;;  %v322_v61 = vld [vmem:[#allocation2 + $0x8] sm:$0xff] }
  0x67   : > { %1386 = vmatprep.subr.bf16.mxu1 %v1514_v2 }
  0x69   : > { %1349 = vmatpush3.bf16.msra.mxu0 %v1511_v63 }
  0x6a   : > { %1350 = vmatprep.subr.bf16.mxu0 %v1513_v3  ;;  %1387 = vmatpush3.bf16.msra.mxu1 %v1514_v2 }
  0x6b   : > { %1388 = vmatprep.subr.bf16.mxu1 %v1520_v8 }
  0x6d   : > { %1351 = vmatpush3.bf16.msra.mxu0 %v1516_v5 }
  0x6e   : > { %1352 = vmatprep.subr.bf16.mxu0 %v1519_v9  ;;  %1389 = vmatpush3.bf16.msra.mxu1 %v1520_v8 }
  0x6f   : > { %1390 = vmatprep.subr.bf16.mxu1 %v1523_v11 }
  0x71   : > { %1353 = vmatpush3.bf16.msra.mxu0 %v1521_v10 }
  0x72   : > { %1354 = vmatprep.subr.bf16.mxu0 %v1522_v12  ;;  %1391 = vmatpush3.bf16.msra.mxu1 %v1523_v11  ;;  %v1281_v11 = vld [vmem:[%s302_s24] ss:$0 sm:$0xff] (!%p1280_p13) }
  0x73   : > { %1392 = vmatprep.subr.bf16.mxu1 %v1528_v16 }
  0x75   : > { %1355 = vmatpush3.bf16.msra.mxu0 %v1524_v15 }
  0x76   : > { %1393 = vmatpush3.bf16.msra.mxu1 %v1528_v16 }
  0x78   : > { %974 = vmatmul.mubr.bf16.vlgmr.msra.gmra.mrb[8].mxu0 %v1525_v18 }
  0x79   : > { %981 = vmatprep.mubr.bf16.mxu0 %v1222_v19  ;;  %1395 = vmatmul.mubr.bf16.vlgmr.msra.gmra.mrb[8].mxu1 %v1530_v20 }
  0x80   : > { %982 = vmatmul.mubr.bf16.gmra.mrb[12].mxu0 %v1221_v21 }
 0x12b   : > { %v1300_v22 = vpop.f32.mrb[0].mxu0 }
 0x12c   : > { %v1328_v23 = vpop.f32.mrb[0].mxu1  ;;  %v1301_v24 = vpop.f32.mrb[1].mxu0 }
 0x12d   : > { %v1302_v25 = vadd.f32 %v1301_v24, %v1300_v22  ;;  %v1329_v26 = vpop.f32.mrb[1].mxu1  ;;  %v1303_v27 = vpop.f32.mrb[2].mxu0 }
 0x12e   : > { %v1330_v28 = vadd.f32 %v1329_v26, %v1328_v23  ;;  %v1331_v29 = vpop.f32.mrb[2].mxu1  ;;  %v1304_v30 = vpop.f32.mrb[3].mxu0 }
 0x12f   : > { %v1305_v31 = vadd.f32 %v1304_v30, %v1303_v27  ;;  %v1332_v32 = vpop.f32.mrb[3].mxu1 }
 0x130   : > { %v928_v33 = vadd.f32 %v1330_v28, %v1302_v25  ;;  %v1333_v34 = vadd.f32 %v1332_v32, %v1331_v29 }
 0x132   : > { %v931_v35 = vadd.f32 %v1333_v34, %v1305_v31 }
 0x133   : > { %v1306_v36 = vpop.f32.mrb[4].mxu0 }
 0x134   : > { %v1307_v37 = vpop.f32.mrb[5].mxu0  ;;  %v1334_v41 = vpop.f32.mrb[4].mxu1 }
 0x135   : > { %v1308_v38 = vadd.f32 %v1307_v37, %v1306_v36  ;;  %v1309_v39 = vpop.f32.mrb[6].mxu0  ;;  %v1335_v42 = vpop.f32.mrb[5].mxu1 }
 0x136   : > { %v1310_v40 = vpop.f32.mrb[7].mxu0  ;;  %v1336_v43 = vadd.f32 %v1335_v42, %v1334_v41  ;;  %v1337_v44 = vpop.f32.mrb[6].mxu1 }
 0x137   : > { %v1338_v45 = vpop.f32.mrb[7].mxu1 }
 0x138   : > { %v936_v46 = vadd.f32 %v1336_v43, %v1308_v38 }
 0x14b   : > { %v1356_v47 = vpop.f32.mrb[8].mxu0 }
 0x14c   : > { %v1357_v48 = vpop.f32.mrb[9].mxu0  ;;  %v1396_v52 = vpop.f32.mrb[8].mxu1 }
 0x14d   : > { %v1358_v49 = vadd.f32 %v1357_v48, %v1356_v47  ;;  %v1359_v50 = vpop.f32.mrb[10].mxu0  ;;  %v1023_v55 = vpop.f32.mrb[9].mxu1 }
 0x14e   : > { %v1360_v51 = vpop.f32.mrb[11].mxu0  ;;  %v1397_v57 = vpop.f32.mrb[10].mxu1 }
 0x14f   : > { %v1361_v53 = vadd.f32 %v1360_v51, %v1359_v50  ;;  %v976_v54 = vadd.f32 %v1358_v49, %v928_v33  ;;  %v1026_v60 = vpop.f32.mrb[11].mxu1 }
 0x151   : > { %v1024_v58 = vadd.f32 %v1023_v55, %v976_v54  ;;  %v979_v59 = vadd.f32 %v1361_v53, %v931_v35 }
 0x153   : > { %v1037_v62 = vadd.f32 %v1024_v58, %v321_v56  ;;  %v1027_v63 = vadd.f32 %v1026_v60, %v979_v59  ;;  %v1362_v0 = vpop.f32.mrb[12].mxu0 }
 0x154   : > { %v1363_v1 = vpop.f32.mrb[13].mxu0 }
 0x155   : > { %1040 = vst [vmem:[#allocation2] sm:$0xff] %v1037_v62  ;;  %v1038_v2 = vadd.f32 %v1027_v63, %v322_v61  ;;  %v1364_v3 = vadd.f32 %v1363_v1, %v1362_v0  ;;  %v1365_v4 = vpop.f32.mrb[14].mxu0 }
 0x156   : > { %v1366_v5 = vpop.f32.mrb[15].mxu0 }
 0x157   : > { %1041 = vst [vmem:[#allocation2 + $0x8] sm:$0xff] %v1038_v2  ;;  %v984_v6 = vadd.f32 %v1364_v3, %v936_v46  ;;  %1046 = sbr.rel (%p1280_p13) target bundleno = 362 (0x16a), region = 66 }
 0x159   : > { %v1032_v8 = vadd.f32 %v1396_v52, %v984_v6 }
 0x15b   : > { %v1039_v9 = vadd.f32 %v1032_v8, %v323_v7 }
 0x15c   : > { %v1047_v10 = vld [vmem:[#allocation2] sm:$0xff] (!%p1280_p13) }
 0x15d   : > { %1042 = vst [vmem:[#allocation2 + $0x10] sm:$0xff] %v1039_v9  ;;  %v1057_v13 = vadd.f32 (!%p1280_p13), %v1281_v11, %v1047_v10 }
 0x15e   : > { %v1048_v12 = vld [vmem:[#allocation2 + $0x8] sm:$0xff] }
 0x15f   : > { %v1058_v14 = vadd.f32 %v1281_v11, %v1048_v12  ;;  %v1060_v17 = vmax.f32 %v1057_v13, 0.0 }
 0x161   : > { %v1061_v18 = vmax.f32 %v1058_v14, 0.0  ;;  %1063 = vst [vmem:[%s1687_s30] sm:$0xff] %v1060_v17 }
 0x163   : > { %1064 = vst [vmem:[%s1687_s30 + $0x8] sm:$0xff] %v1061_v18 }
 0x164   : > { %v1049_v15 = vld [vmem:[#allocation2 + $0x10] sm:$0xff] }
 0x165   : > { %v1059_v16 = vadd.f32 %v1281_v11, %v1049_v15 }
 0x167   : > { %v1062_v19 = vmax.f32 %v1059_v16, 0.0 }
 0x169   : > { %1065 = vst [vmem:[%s1687_s30 + $0x10] sm:$0xff] %v1062_v19 }
 0x16a PF: > { %s13_s18 = sadd.s32 1, %s1587_s18   ;;  %s1798_s12 = smov %s1567_s13 }
 0x16b   : > { %p10_p0 = scmp.ge.s32.totalorder %s13_s18, 6   ;;  %s1799_s13 = smov %s1661_s25 }
 0x16c   : > { %s1800_s14 = smov %s1579_s16  ;;  %s1801_s15 = smov %s1583_s17 }
 0x16d   : > { %s1802_s16 = smov %s1805_s19  ;;  %s1803_s17 = smov %s1809_s20 }
 0x16e   :  { %12 = sbr.rel (!%p10_p0) target bundleno = 4 (0x4), region = 113 }

</bundles_post_ra>
